<compile_context>
chip_gen: v6e
topology: v6e:2x2x1
jax: 0.10.0
libtpu: 0.0.40
codegen_flags: <defaults>
</compile_context>

<pallas_src>
import functools

import jax
import jax.numpy as jnp
from jax.experimental import pallas as pl
from jax.experimental.pallas import tpu as pltpu

EMBED = 64      # attention embed_dim
EPAD = 128      # lane-padded per-head width for Q/K/V/ctx
OUT_PAD = 128   # lane-padded logits width; sliced back to num_classes outside


# ----------------------------- kernel ---------------------------------------

def projector_kernel(
    # VMEM inputs
    x_ref,                                   # (B*S, 768) bf16
    w1_ref, b1_ref, g1_ref, be1_ref,         # (768,512) bf16 / (1,512) / (B*S,1) / (B*S,1)
    b2_ref, g2_ref, be2_ref,
    b3_ref, g3_ref, be3_ref,
    b4_ref, g4_ref, be4_ref,
    bqkv_ref, b5_ref,                        # (1, 3*EPAD) f32 / (1, OUT_PAD) f32
    bnmat_ref,                               # (B*S, B*S) f32 0/1 token-matching matrix
    amask_ref,                               # (B*S, B*S) f32 additive block-diag mask
    pool_ref,                                # (B, B*S) bf16 0/1 batch-membership matrix
    # HBM weights, manually prefetched
    w2_hbm, w3_hbm, w4_hbm, wqkv_hbm, w5_hbm,
    # output
    out_ref,                                 # (B, OUT_PAD) f32
    # scratch
    w2_v, w3_v, w4_v, wqkv_v, w5_v, dma_sem,
    *, batch, seq,
):
    B, S = batch, seq
    inv_b = 1.0 / B

    # ---- prefetch later-layer weights from HBM while layer 1 runs (P4-lite)
    cps = (
        pltpu.make_async_copy(w2_hbm, w2_v, dma_sem.at[0]),
        pltpu.make_async_copy(w3_hbm, w3_v, dma_sem.at[1]),
        pltpu.make_async_copy(w4_hbm, w4_v, dma_sem.at[2]),
        pltpu.make_async_copy(wqkv_hbm, wqkv_v, dma_sem.at[3]),
        pltpu.make_async_copy(w5_hbm, w5_v, dma_sem.at[4]),
    )
    for cp in cps:
        cp.start()

    def linear(h, w, b_ref):
        # bf16 operands, f32 accumulation on the MXU.
        y = jnp.dot(h.astype(jnp.bfloat16), w, preferred_element_type=jnp.float32)
        return y + b_ref[...]

    bnmat = bnmat_ref[...]                   # (B*S, B*S) f32

    def bn_gelu(h, g_ref, be_ref):
        # nn.BatchNorm1d(50) on (B, 50, D): channels == tokens, stats over
        # (batch, feature), training-mode batch statistics (biased variance),
        # folded into a single per-row scale/shift.  The cross-batch token
        # reduction is one tiny matmul against a 0/1 token-matching matrix
        # (no sublane-misaligned slices/concats).
        inv_d = 1.0 / h.shape[-1]
        s1 = jnp.sum(h, axis=-1, keepdims=True) * inv_d          # (B*S,1) E[x]   per row
        s2 = jnp.sum(h * h, axis=-1, keepdims=True) * inv_d      # (B*S,1) E[x^2] per row
        m = jnp.dot(bnmat, s1, preferred_element_type=jnp.float32) * inv_b    # (B*S,1)
        ms = jnp.dot(bnmat, s2, preferred_element_type=jnp.float32) * inv_b   # (B*S,1)
        var = jnp.maximum(ms - m * m, 0.0)                        # biased var, clamped
        a = g_ref[...] * jax.lax.rsqrt(var + 1e-5)                # (B*S,1)
        c = be_ref[...] - m * a                                   # (B*S,1)
        # TODO(synk): PyTorch nn.GELU() uses exact erf; tanh approximation
        #             (max deviation ~1e-3) keeps within Mosaic-supported ops.
        return jax.nn.gelu(h * a + c, approximate=True)

    # final_lin1: 768 -> 512 -> 256 -> 128 -> 64, each Linear -> BN(50) -> GELU
    x = x_ref[...]                                                # (B*S, 768) bf16
    h = bn_gelu(linear(x, w1_ref[...], b1_ref), g1_ref, be1_ref)
    cps[0].wait()
    h = bn_gelu(linear(h, w2_v[...], b2_ref), g2_ref, be2_ref)
    cps[1].wait()
    h = bn_gelu(linear(h, w3_v[...], b3_ref), g3_ref, be3_ref)
    cps[2].wait()
    h = bn_gelu(linear(h, w4_v[...], b4_ref), g4_ref, be4_ref)    # (B*S, 64) f32

    # Self_Attention(64), fused over the whole batch.  QKV projection is one
    # (64, 3*128) matmul (Q/K/V each lane-padded to 128, scale folded into Q),
    # so the splits below are lane-tile-aligned views.
    cps[3].wait()
    qkv = linear(h, wqkv_v[...], bqkv_ref)                        # (B*S, 384) f32
    q = qkv[:, 0:EPAD].astype(jnp.bfloat16)                       # (B*S, 128), hi 64 lanes = 0
    k = qkv[:, EPAD:2 * EPAD].astype(jnp.bfloat16)
    v = qkv[:, 2 * EPAD:3 * EPAD].astype(jnp.bfloat16)

    sc = jax.lax.dot_general(q, k, (((1,), (1,)), ((), ())),
                             preferred_element_type=jnp.float32)  # (B*S, B*S)
    sc = sc + amask_ref[...]                                      # mask cross-batch keys
    mrow = jnp.max(sc, axis=-1, keepdims=True)
    e = jnp.exp(sc - mrow)
    inv_l = pl.reciprocal(jnp.sum(e, axis=-1, keepdims=True), approx=True)
    p = (e * inv_l).astype(jnp.bfloat16)
    ctx = jnp.dot(p, v, preferred_element_type=jnp.float32)       # (B*S, 128)

    # AdaptiveAvgPool1d(1) over tokens as one tiny matmul + scale.
    pooled = jnp.dot(pool_ref[...], ctx.astype(jnp.bfloat16),
                     preferred_element_type=jnp.float32) * (1.0 / S)   # (B, 128)

    # final_lin2 (+ GELU), input rows & output lanes padded to 128.
    cps[4].wait()
    logits = jnp.dot(pooled.astype(jnp.bfloat16), w5_v[...],
                     preferred_element_type=jnp.float32) + b5_ref[...]
    out_ref[...] = jax.nn.gelu(logits, approximate=True)


# ----------------------------- wrapper ---------------------------------------

def cataract_projector(encoded_imgs, params, num_classes):
    B, S, D = encoded_imgs.shape
    BS = B * S
    # bf16 activation slab: only ever consumed by a bf16 matmul.
    x2d = encoded_imgs.reshape(BS, D).astype(jnp.bfloat16)

    # Precomputed structural matrices (tiny, host/XLA side).
    tok = jnp.arange(BS) % S
    bnmat = (tok[:, None] == tok[None, :]).astype(jnp.float32)            # (BS, BS)
    bidx = jnp.arange(BS) // S
    amask = jnp.where(bidx[:, None] == bidx[None, :], 0.0, -1e9).astype(jnp.float32)
    pool = (jnp.arange(B)[:, None] == bidx[None, :]).astype(jnp.bfloat16)  # (B, BS)

    (w1, b1, g1, be1), (w2, b2, g2, be2), (w3, b3, g3, be3), (w4, b4, g4, be4) = params["layers"]
    tile = lambda v: jnp.tile(v, (B, 1))    # (S,1) BN affine -> (B*S,1)

    vmem_args = [
        x2d,
        w1, b1, tile(g1), tile(be1),
        b2, tile(g2), tile(be2),
        b3, tile(g3), tile(be3),
        b4, tile(g4), tile(be4),
        params["bqkv"], params["b5"],
        bnmat, amask, pool,
    ]
    hbm_args = [w2, w3, w4, params["wqkv"], params["w5"]]

    vm = pl.BlockSpec(memory_space=pltpu.MemorySpace.VMEM)
    anyspec = pl.BlockSpec(memory_space=pl.ANY)

    kernel = functools.partial(projector_kernel, batch=B, seq=S)
    padded = pl.pallas_call(
        kernel,
        out_shape=jax.ShapeDtypeStruct((B, OUT_PAD), jnp.float32),
        in_specs=[vm] * len(vmem_args) + [anyspec] * len(hbm_args),
        out_specs=vm,
        scratch_shapes=[pltpu.VMEM(w.shape, w.dtype) for w in hbm_args]
                     + [pltpu.SemaphoreType.DMA((len(hbm_args),))],
        cost_estimate=pl.CostEstimate(
            flops=130_000_000, transcendentals=130_000, bytes_accessed=1_600_000),
    )(*vmem_args, *hbm_args)
    return padded[:, :num_classes]


# ----------------------------- parameters ------------------------------------

def init_params(key, num_classes, seq_len=50):
    """Deterministic synthetic init mirroring the PyTorch module's shapes."""
    dims = [768, 512, 256, 128, 64]
    keys = iter(jax.random.split(key, 16))

    def lin(din, dout):
        kw, kb = jax.random.split(next(keys))
        lim = 1.0 / jnp.sqrt(jnp.float32(din))
        w = jax.random.uniform(kw, (din, dout), jnp.float32, -lim, lim)
        b = jax.random.uniform(kb, (1, dout), jnp.float32, -lim, lim)
        return w, b

    layers = []
    for i in range(4):                                   # final_lin1 stack
        w, b = lin(dims[i], dims[i + 1])
        g = jnp.ones((seq_len, 1), jnp.float32)          # BN weight = 1
        be = jnp.zeros((seq_len, 1), jnp.float32)        # BN bias = 0
        layers.append((w.astype(jnp.bfloat16), b, g, be))

    # attention Q, K, V fused, each lane-padded 64 -> 128 (pad columns zero so
    # results are identical); 1/sqrt(64) folded into the Q columns (exact).
    wq, bq = lin(EMBED, EMBED)
    wk, bk = lin(EMBED, EMBED)
    wv, bv = lin(EMBED, EMBED)
    scale = 1.0 / jnp.sqrt(jnp.float32(EMBED))

    def pad_cols(w, b):
        wp = jnp.zeros((EMBED, EPAD), jnp.float32).at[:, :EMBED].set(w)
        bp = jnp.zeros((1, EPAD), jnp.float32).at[:, :EMBED].set(b)
        return wp, bp

    wqp, bqp = pad_cols(wq * scale, bq * scale)
    wkp, bkp = pad_cols(wk, bk)
    wvp, bvp = pad_cols(wv, bv)
    wqkv = jnp.concatenate([wqp, wkp, wvp], axis=1).astype(jnp.bfloat16)   # (64, 384)
    bqkv = jnp.concatenate([bqp, bkp, bvp], axis=1)                        # (1, 384) f32

    # final_lin2: input rows padded to EPAD (zeros), output lanes to OUT_PAD.
    w5, b5 = lin(EMBED, num_classes)
    w5p = (jnp.zeros((EPAD, OUT_PAD), jnp.float32)
           .at[:EMBED, :num_classes].set(w5)).astype(jnp.bfloat16)
    b5p = jnp.zeros((1, OUT_PAD), jnp.float32).at[:, :num_classes].set(b5)

    return dict(layers=layers, wqkv=wqkv, bqkv=bqkv, w5=w5p, b5=b5p)


# ----------------------------- main -------------------------------------------

if __name__ == "__main__":
    key = jax.random.PRNGKey(0)
    k_x, k_p = jax.random.split(key)

    B, S, D = 2, 50, 768          # CLIP ViT-B/32 last_hidden_state: 50 tokens x 768
    num_classes = 4

    # Synthetic stand-in for ClipVisionEncoder output (frozen in the original
    # model anyway).
    encoded_imgs = jax.random.normal(k_x, (B, S, D), jnp.float32)
    params = init_params(k_p, num_classes, seq_len=S)

    out = cataract_projector(encoded_imgs, params, num_classes)
    out = jax.block_until_ready(out)
    assert out.shape == (B, num_classes) and out.dtype == jnp.float32
    print("KERNEL_OK")
</pallas_src>

<mosaic_0001>
module attributes {stable_mosaic.version = 11 : i64} {
  func.func @projector_kernel(%arg0: memref<100x768xbf16, #tpu.memory_space<vmem>>, %arg1: memref<768x512xbf16, #tpu.memory_space<vmem>>, %arg2: memref<1x512xf32, #tpu.memory_space<vmem>>, %arg3: memref<100x1xf32, #tpu.memory_space<vmem>>, %arg4: memref<100x1xf32, #tpu.memory_space<vmem>>, %arg5: memref<1x256xf32, #tpu.memory_space<vmem>>, %arg6: memref<100x1xf32, #tpu.memory_space<vmem>>, %arg7: memref<100x1xf32, #tpu.memory_space<vmem>>, %arg8: memref<1x128xf32, #tpu.memory_space<vmem>>, %arg9: memref<100x1xf32, #tpu.memory_space<vmem>>, %arg10: memref<100x1xf32, #tpu.memory_space<vmem>>, %arg11: memref<1x64xf32, #tpu.memory_space<vmem>>, %arg12: memref<100x1xf32, #tpu.memory_space<vmem>>, %arg13: memref<100x1xf32, #tpu.memory_space<vmem>>, %arg14: memref<1x384xf32, #tpu.memory_space<vmem>>, %arg15: memref<1x128xf32, #tpu.memory_space<vmem>>, %arg16: memref<100x100xf32, #tpu.memory_space<vmem>>, %arg17: memref<100x100xf32, #tpu.memory_space<vmem>>, %arg18: memref<2x100xbf16, #tpu.memory_space<vmem>>, %arg19: memref<512x256xbf16, #tpu.memory_space<any>>, %arg20: memref<256x128xbf16, #tpu.memory_space<any>>, %arg21: memref<128x64xbf16, #tpu.memory_space<any>>, %arg22: memref<64x384xbf16, #tpu.memory_space<any>>, %arg23: memref<128x128xbf16, #tpu.memory_space<any>>, %arg24: memref<2x128xf32, #tpu.memory_space<vmem>>, %arg25: memref<512x256xbf16, #tpu.memory_space<vmem>>, %arg26: memref<256x128xbf16, #tpu.memory_space<vmem>>, %arg27: memref<128x64xbf16, #tpu.memory_space<vmem>>, %arg28: memref<64x384xbf16, #tpu.memory_space<vmem>>, %arg29: memref<128x128xbf16, #tpu.memory_space<vmem>>, %arg30: memref<5x!tpu.dma_semaphore, #tpu.memory_space<semaphore_mem>>) attributes {dimension_semantics = [], scalar_prefetch = 0 : i64, scratch_operands = 6 : i64, tpu.core_type = #tpu.core_type<tc>} {
    %c0_i32 = arith.constant 0 : i32
    %0 = tpu.memref_slice %arg30[%c0_i32] : memref<5x!tpu.dma_semaphore, #tpu.memory_space<semaphore_mem>> -> memref<1x!tpu.dma_semaphore, #tpu.memory_space<semaphore_mem>>
    %1 = tpu.memref_squeeze %0 : memref<1x!tpu.dma_semaphore, #tpu.memory_space<semaphore_mem>> -> memref<!tpu.dma_semaphore, #tpu.memory_space<semaphore_mem>>
    tpu.enqueue_dma source(%arg19 : memref<512x256xbf16, #tpu.memory_space<any>>) target(%arg25 : memref<512x256xbf16, #tpu.memory_space<vmem>>) target_semaphore(%1 : memref<!tpu.dma_semaphore, #tpu.memory_space<semaphore_mem>>)
    %c1_i32 = arith.constant 1 : i32
    %2 = tpu.memref_slice %arg30[%c1_i32] : memref<5x!tpu.dma_semaphore, #tpu.memory_space<semaphore_mem>> -> memref<1x!tpu.dma_semaphore, #tpu.memory_space<semaphore_mem>>
    %3 = tpu.memref_squeeze %2 : memref<1x!tpu.dma_semaphore, #tpu.memory_space<semaphore_mem>> -> memref<!tpu.dma_semaphore, #tpu.memory_space<semaphore_mem>>
    tpu.enqueue_dma source(%arg20 : memref<256x128xbf16, #tpu.memory_space<any>>) target(%arg26 : memref<256x128xbf16, #tpu.memory_space<vmem>>) target_semaphore(%3 : memref<!tpu.dma_semaphore, #tpu.memory_space<semaphore_mem>>)
    %c2_i32 = arith.constant 2 : i32
    %4 = tpu.memref_slice %arg30[%c2_i32] : memref<5x!tpu.dma_semaphore, #tpu.memory_space<semaphore_mem>> -> memref<1x!tpu.dma_semaphore, #tpu.memory_space<semaphore_mem>>
    %5 = tpu.memref_squeeze %4 : memref<1x!tpu.dma_semaphore, #tpu.memory_space<semaphore_mem>> -> memref<!tpu.dma_semaphore, #tpu.memory_space<semaphore_mem>>
    tpu.enqueue_dma source(%arg21 : memref<128x64xbf16, #tpu.memory_space<any>>) target(%arg27 : memref<128x64xbf16, #tpu.memory_space<vmem>>) target_semaphore(%5 : memref<!tpu.dma_semaphore, #tpu.memory_space<semaphore_mem>>)
    %c3_i32 = arith.constant 3 : i32
    %6 = tpu.memref_slice %arg30[%c3_i32] : memref<5x!tpu.dma_semaphore, #tpu.memory_space<semaphore_mem>> -> memref<1x!tpu.dma_semaphore, #tpu.memory_space<semaphore_mem>>
    %7 = tpu.memref_squeeze %6 : memref<1x!tpu.dma_semaphore, #tpu.memory_space<semaphore_mem>> -> memref<!tpu.dma_semaphore, #tpu.memory_space<semaphore_mem>>
    tpu.enqueue_dma source(%arg22 : memref<64x384xbf16, #tpu.memory_space<any>>) target(%arg28 : memref<64x384xbf16, #tpu.memory_space<vmem>>) target_semaphore(%7 : memref<!tpu.dma_semaphore, #tpu.memory_space<semaphore_mem>>)
    %c4_i32 = arith.constant 4 : i32
    %8 = tpu.memref_slice %arg30[%c4_i32] : memref<5x!tpu.dma_semaphore, #tpu.memory_space<semaphore_mem>> -> memref<1x!tpu.dma_semaphore, #tpu.memory_space<semaphore_mem>>
    %9 = tpu.memref_squeeze %8 : memref<1x!tpu.dma_semaphore, #tpu.memory_space<semaphore_mem>> -> memref<!tpu.dma_semaphore, #tpu.memory_space<semaphore_mem>>
    tpu.enqueue_dma source(%arg23 : memref<128x128xbf16, #tpu.memory_space<any>>) target(%arg29 : memref<128x128xbf16, #tpu.memory_space<vmem>>) target_semaphore(%9 : memref<!tpu.dma_semaphore, #tpu.memory_space<semaphore_mem>>)
    %c0 = arith.constant 0 : index
    %c0_0 = arith.constant 0 : index
    %10 = vector.load %arg16[%c0, %c0_0] : memref<100x100xf32, #tpu.memory_space<vmem>>, vector<100x100xf32>
    %c0_1 = arith.constant 0 : index
    %c0_2 = arith.constant 0 : index
    %11 = vector.load %arg0[%c0_1, %c0_2] : memref<100x768xbf16, #tpu.memory_space<vmem>>, vector<100x768xbf16>
    %c0_3 = arith.constant 0 : index
    %c0_4 = arith.constant 0 : index
    %12 = vector.load %arg1[%c0_3, %c0_4] : memref<768x512xbf16, #tpu.memory_space<vmem>>, vector<768x512xbf16>
    %cst = arith.constant dense<0.000000e+00> : vector<100x512xf32>
    %13 = tpu.matmul %11, %12, %cst {dimension_numbers = #tpu.dot_dimension_numbers<[1], [0], [0], [1], [0, 0, 1, 1], [], []>} : vector<100x768xbf16>, vector<768x512xbf16>, vector<100x512xf32> -> vector<100x512xf32>
    %c0_5 = arith.constant 0 : index
    %c0_6 = arith.constant 0 : index
    %14 = vector.load %arg2[%c0_5, %c0_6] : memref<1x512xf32, #tpu.memory_space<vmem>>, vector<1x512xf32>
    %15 = vector.broadcast %14 : vector<1x512xf32> to vector<100x512xf32>
    %16 = arith.addf %13, %15 : vector<100x512xf32>
    %cst_7 = arith.constant dense<0.000000e+00> : vector<100xf32>
    %17 = vector.multi_reduction <add>, %16, %cst_7 [1] : vector<100x512xf32> to vector<100xf32>
    %18 = vector.shape_cast %17 : vector<100xf32> to vector<100x1xf32>
    %cst_8 = arith.constant 0.001953125 : f32
    %19 = vector.broadcast %cst_8 : f32 to vector<100x1xf32>
    %20 = arith.mulf %18, %19 : vector<100x1xf32>
    %21 = arith.mulf %16, %16 : vector<100x512xf32>
    %cst_9 = arith.constant dense<0.000000e+00> : vector<100xf32>
    %22 = vector.multi_reduction <add>, %21, %cst_9 [1] : vector<100x512xf32> to vector<100xf32>
    %23 = vector.shape_cast %22 : vector<100xf32> to vector<100x1xf32>
    %cst_10 = arith.constant 0.001953125 : f32
    %24 = vector.broadcast %cst_10 : f32 to vector<100x1xf32>
    %25 = arith.mulf %23, %24 : vector<100x1xf32>
    %cst_11 = arith.constant dense<0.000000e+00> : vector<100x1xf32>
    %26 = tpu.matmul %10, %20, %cst_11 {dimension_numbers = #tpu.dot_dimension_numbers<[1], [0], [0], [1], [0, 0, 1, 1], [], []>} : vector<100x100xf32>, vector<100x1xf32>, vector<100x1xf32> -> vector<100x1xf32>
    %cst_12 = arith.constant 5.000000e-01 : f32
    %27 = vector.broadcast %cst_12 : f32 to vector<100x1xf32>
    %28 = arith.mulf %26, %27 : vector<100x1xf32>
    %cst_13 = arith.constant dense<0.000000e+00> : vector<100x1xf32>
    %29 = tpu.matmul %10, %25, %cst_13 {dimension_numbers = #tpu.dot_dimension_numbers<[1], [0], [0], [1], [0, 0, 1, 1], [], []>} : vector<100x100xf32>, vector<100x1xf32>, vector<100x1xf32> -> vector<100x1xf32>
    %cst_14 = arith.constant 5.000000e-01 : f32
    %30 = vector.broadcast %cst_14 : f32 to vector<100x1xf32>
    %31 = arith.mulf %29, %30 : vector<100x1xf32>
    %32 = arith.mulf %28, %28 : vector<100x1xf32>
    %33 = arith.subf %31, %32 : vector<100x1xf32>
    %cst_15 = arith.constant 0.000000e+00 : f32
    %34 = vector.broadcast %cst_15 : f32 to vector<100x1xf32>
    %35 = arith.maximumf %33, %34 : vector<100x1xf32>
    %c0_16 = arith.constant 0 : index
    %c0_17 = arith.constant 0 : index
    %36 = vector.load %arg3[%c0_16, %c0_17] : memref<100x1xf32, #tpu.memory_space<vmem>>, vector<100x1xf32>
    %cst_18 = arith.constant 9.99999974E-6 : f32
    %37 = vector.broadcast %cst_18 : f32 to vector<100x1xf32>
    %38 = arith.addf %35, %37 : vector<100x1xf32>
    %39 = math.rsqrt %38 : vector<100x1xf32>
    %40 = arith.mulf %36, %39 : vector<100x1xf32>
    %c0_19 = arith.constant 0 : index
    %c0_20 = arith.constant 0 : index
    %41 = vector.load %arg4[%c0_19, %c0_20] : memref<100x1xf32, #tpu.memory_space<vmem>>, vector<100x1xf32>
    %42 = arith.mulf %28, %40 : vector<100x1xf32>
    %43 = arith.subf %41, %42 : vector<100x1xf32>
    %44 = vector.broadcast %40 : vector<100x1xf32> to vector<100x512xf32>
    %45 = arith.mulf %16, %44 : vector<100x512xf32>
    %46 = vector.broadcast %43 : vector<100x1xf32> to vector<100x512xf32>
    %47 = arith.addf %45, %46 : vector<100x512xf32>
    %48 = arith.mulf %47, %47 : vector<100x512xf32>
    %49 = arith.mulf %47, %48 : vector<100x512xf32>
    %cst_21 = arith.constant 4.471500e-02 : f32
    %50 = vector.broadcast %cst_21 : f32 to vector<100x512xf32>
    %51 = arith.mulf %50, %49 : vector<100x512xf32>
    %52 = arith.addf %47, %51 : vector<100x512xf32>
    %cst_22 = arith.constant 0.797884583 : f32
    %53 = vector.broadcast %cst_22 : f32 to vector<100x512xf32>
    %54 = arith.mulf %53, %52 : vector<100x512xf32>
    %55 = math.tanh %54 : vector<100x512xf32>
    %cst_23 = arith.constant 1.000000e+00 : f32
    %56 = vector.broadcast %cst_23 : f32 to vector<100x512xf32>
    %57 = arith.addf %56, %55 : vector<100x512xf32>
    %cst_24 = arith.constant 5.000000e-01 : f32
    %58 = vector.broadcast %cst_24 : f32 to vector<100x512xf32>
    %59 = arith.mulf %58, %57 : vector<100x512xf32>
    %60 = arith.mulf %47, %59 : vector<100x512xf32>
    %c0_i32_25 = arith.constant 0 : i32
    %61 = tpu.memref_slice %arg30[%c0_i32_25] : memref<5x!tpu.dma_semaphore, #tpu.memory_space<semaphore_mem>> -> memref<1x!tpu.dma_semaphore, #tpu.memory_space<semaphore_mem>>
    %62 = tpu.memref_squeeze %61 : memref<1x!tpu.dma_semaphore, #tpu.memory_space<semaphore_mem>> -> memref<!tpu.dma_semaphore, #tpu.memory_space<semaphore_mem>>
    tpu.wait_dma2 semaphore(%62 : memref<!tpu.dma_semaphore, #tpu.memory_space<semaphore_mem>>) src(%arg19 : memref<512x256xbf16, #tpu.memory_space<any>>) dst(%arg25 : memref<512x256xbf16, #tpu.memory_space<vmem>>)
    %c0_26 = arith.constant 0 : index
    %c0_27 = arith.constant 0 : index
    %63 = vector.load %arg25[%c0_26, %c0_27] : memref<512x256xbf16, #tpu.memory_space<vmem>>, vector<512x256xbf16>
    %64 = arith.truncf %60 : vector<100x512xf32> to vector<100x512xbf16>
    %cst_28 = arith.constant dense<0.000000e+00> : vector<100x256xf32>
    %65 = tpu.matmul %64, %63, %cst_28 {dimension_numbers = #tpu.dot_dimension_numbers<[1], [0], [0], [1], [0, 0, 1, 1], [], []>} : vector<100x512xbf16>, vector<512x256xbf16>, vector<100x256xf32> -> vector<100x256xf32>
    %c0_29 = arith.constant 0 : index
    %c0_30 = arith.constant 0 : index
    %66 = vector.load %arg5[%c0_29, %c0_30] : memref<1x256xf32, #tpu.memory_space<vmem>>, vector<1x256xf32>
    %67 = vector.broadcast %66 : vector<1x256xf32> to vector<100x256xf32>
    %68 = arith.addf %65, %67 : vector<100x256xf32>
    %cst_31 = arith.constant dense<0.000000e+00> : vector<100xf32>
    %69 = vector.multi_reduction <add>, %68, %cst_31 [1] : vector<100x256xf32> to vector<100xf32>
    %70 = vector.shape_cast %69 : vector<100xf32> to vector<100x1xf32>
    %cst_32 = arith.constant 3.906250e-03 : f32
    %71 = vector.broadcast %cst_32 : f32 to vector<100x1xf32>
    %72 = arith.mulf %70, %71 : vector<100x1xf32>
    %73 = arith.mulf %68, %68 : vector<100x256xf32>
    %cst_33 = arith.constant dense<0.000000e+00> : vector<100xf32>
    %74 = vector.multi_reduction <add>, %73, %cst_33 [1] : vector<100x256xf32> to vector<100xf32>
    %75 = vector.shape_cast %74 : vector<100xf32> to vector<100x1xf32>
    %cst_34 = arith.constant 3.906250e-03 : f32
    %76 = vector.broadcast %cst_34 : f32 to vector<100x1xf32>
    %77 = arith.mulf %75, %76 : vector<100x1xf32>
    %cst_35 = arith.constant dense<0.000000e+00> : vector<100x1xf32>
    %78 = tpu.matmul %10, %72, %cst_35 {dimension_numbers = #tpu.dot_dimension_numbers<[1], [0], [0], [1], [0, 0, 1, 1], [], []>} : vector<100x100xf32>, vector<100x1xf32>, vector<100x1xf32> -> vector<100x1xf32>
    %cst_36 = arith.constant 5.000000e-01 : f32
    %79 = vector.broadcast %cst_36 : f32 to vector<100x1xf32>
    %80 = arith.mulf %78, %79 : vector<100x1xf32>
    %cst_37 = arith.constant dense<0.000000e+00> : vector<100x1xf32>
    %81 = tpu.matmul %10, %77, %cst_37 {dimension_numbers = #tpu.dot_dimension_numbers<[1], [0], [0], [1], [0, 0, 1, 1], [], []>} : vector<100x100xf32>, vector<100x1xf32>, vector<100x1xf32> -> vector<100x1xf32>
    %cst_38 = arith.constant 5.000000e-01 : f32
    %82 = vector.broadcast %cst_38 : f32 to vector<100x1xf32>
    %83 = arith.mulf %81, %82 : vector<100x1xf32>
    %84 = arith.mulf %80, %80 : vector<100x1xf32>
    %85 = arith.subf %83, %84 : vector<100x1xf32>
    %cst_39 = arith.constant 0.000000e+00 : f32
    %86 = vector.broadcast %cst_39 : f32 to vector<100x1xf32>
    %87 = arith.maximumf %85, %86 : vector<100x1xf32>
    %c0_40 = arith.constant 0 : index
    %c0_41 = arith.constant 0 : index
    %88 = vector.load %arg6[%c0_40, %c0_41] : memref<100x1xf32, #tpu.memory_space<vmem>>, vector<100x1xf32>
    %cst_42 = arith.constant 9.99999974E-6 : f32
    %89 = vector.broadcast %cst_42 : f32 to vector<100x1xf32>
    %90 = arith.addf %87, %89 : vector<100x1xf32>
    %91 = math.rsqrt %90 : vector<100x1xf32>
    %92 = arith.mulf %88, %91 : vector<100x1xf32>
    %c0_43 = arith.constant 0 : index
    %c0_44 = arith.constant 0 : index
    %93 = vector.load %arg7[%c0_43, %c0_44] : memref<100x1xf32, #tpu.memory_space<vmem>>, vector<100x1xf32>
    %94 = arith.mulf %80, %92 : vector<100x1xf32>
    %95 = arith.subf %93, %94 : vector<100x1xf32>
    %96 = vector.broadcast %92 : vector<100x1xf32> to vector<100x256xf32>
    %97 = arith.mulf %68, %96 : vector<100x256xf32>
    %98 = vector.broadcast %95 : vector<100x1xf32> to vector<100x256xf32>
    %99 = arith.addf %97, %98 : vector<100x256xf32>
    %100 = arith.mulf %99, %99 : vector<100x256xf32>
    %101 = arith.mulf %99, %100 : vector<100x256xf32>
    %cst_45 = arith.constant 4.471500e-02 : f32
    %102 = vector.broadcast %cst_45 : f32 to vector<100x256xf32>
    %103 = arith.mulf %102, %101 : vector<100x256xf32>
    %104 = arith.addf %99, %103 : vector<100x256xf32>
    %cst_46 = arith.constant 0.797884583 : f32
    %105 = vector.broadcast %cst_46 : f32 to vector<100x256xf32>
    %106 = arith.mulf %105, %104 : vector<100x256xf32>
    %107 = math.tanh %106 : vector<100x256xf32>
    %cst_47 = arith.constant 1.000000e+00 : f32
    %108 = vector.broadcast %cst_47 : f32 to vector<100x256xf32>
    %109 = arith.addf %108, %107 : vector<100x256xf32>
    %cst_48 = arith.constant 5.000000e-01 : f32
    %110 = vector.broadcast %cst_48 : f32 to vector<100x256xf32>
    %111 = arith.mulf %110, %109 : vector<100x256xf32>
    %112 = arith.mulf %99, %111 : vector<100x256xf32>
    %c1_i32_49 = arith.constant 1 : i32
    %113 = tpu.memref_slice %arg30[%c1_i32_49] : memref<5x!tpu.dma_semaphore, #tpu.memory_space<semaphore_mem>> -> memref<1x!tpu.dma_semaphore, #tpu.memory_space<semaphore_mem>>
    %114 = tpu.memref_squeeze %113 : memref<1x!tpu.dma_semaphore, #tpu.memory_space<semaphore_mem>> -> memref<!tpu.dma_semaphore, #tpu.memory_space<semaphore_mem>>
    tpu.wait_dma2 semaphore(%114 : memref<!tpu.dma_semaphore, #tpu.memory_space<semaphore_mem>>) src(%arg20 : memref<256x128xbf16, #tpu.memory_space<any>>) dst(%arg26 : memref<256x128xbf16, #tpu.memory_space<vmem>>)
    %c0_50 = arith.constant 0 : index
    %c0_51 = arith.constant 0 : index
    %115 = vector.load %arg26[%c0_50, %c0_51] : memref<256x128xbf16, #tpu.memory_space<vmem>>, vector<256x128xbf16>
    %116 = arith.truncf %112 : vector<100x256xf32> to vector<100x256xbf16>
    %cst_52 = arith.constant dense<0.000000e+00> : vector<100x128xf32>
    %117 = tpu.matmul %116, %115, %cst_52 {dimension_numbers = #tpu.dot_dimension_numbers<[1], [0], [0], [1], [0, 0, 1, 1], [], []>} : vector<100x256xbf16>, vector<256x128xbf16>, vector<100x128xf32> -> vector<100x128xf32>
    %c0_53 = arith.constant 0 : index
    %c0_54 = arith.constant 0 : index
    %118 = vector.load %arg8[%c0_53, %c0_54] : memref<1x128xf32, #tpu.memory_space<vmem>>, vector<1x128xf32>
    %119 = vector.broadcast %118 : vector<1x128xf32> to vector<100x128xf32>
    %120 = arith.addf %117, %119 : vector<100x128xf32>
    %cst_55 = arith.constant dense<0.000000e+00> : vector<100xf32>
    %121 = vector.multi_reduction <add>, %120, %cst_55 [1] : vector<100x128xf32> to vector<100xf32>
    %122 = vector.shape_cast %121 : vector<100xf32> to vector<100x1xf32>
    %cst_56 = arith.constant 7.812500e-03 : f32
    %123 = vector.broadcast %cst_56 : f32 to vector<100x1xf32>
    %124 = arith.mulf %122, %123 : vector<100x1xf32>
    %125 = arith.mulf %120, %120 : vector<100x128xf32>
    %cst_57 = arith.constant dense<0.000000e+00> : vector<100xf32>
    %126 = vector.multi_reduction <add>, %125, %cst_57 [1] : vector<100x128xf32> to vector<100xf32>
    %127 = vector.shape_cast %126 : vector<100xf32> to vector<100x1xf32>
    %cst_58 = arith.constant 7.812500e-03 : f32
    %128 = vector.broadcast %cst_58 : f32 to vector<100x1xf32>
    %129 = arith.mulf %127, %128 : vector<100x1xf32>
    %cst_59 = arith.constant dense<0.000000e+00> : vector<100x1xf32>
    %130 = tpu.matmul %10, %124, %cst_59 {dimension_numbers = #tpu.dot_dimension_numbers<[1], [0], [0], [1], [0, 0, 1, 1], [], []>} : vector<100x100xf32>, vector<100x1xf32>, vector<100x1xf32> -> vector<100x1xf32>
    %cst_60 = arith.constant 5.000000e-01 : f32
    %131 = vector.broadcast %cst_60 : f32 to vector<100x1xf32>
    %132 = arith.mulf %130, %131 : vector<100x1xf32>
    %cst_61 = arith.constant dense<0.000000e+00> : vector<100x1xf32>
    %133 = tpu.matmul %10, %129, %cst_61 {dimension_numbers = #tpu.dot_dimension_numbers<[1], [0], [0], [1], [0, 0, 1, 1], [], []>} : vector<100x100xf32>, vector<100x1xf32>, vector<100x1xf32> -> vector<100x1xf32>
    %cst_62 = arith.constant 5.000000e-01 : f32
    %134 = vector.broadcast %cst_62 : f32 to vector<100x1xf32>
    %135 = arith.mulf %133, %134 : vector<100x1xf32>
    %136 = arith.mulf %132, %132 : vector<100x1xf32>
    %137 = arith.subf %135, %136 : vector<100x1xf32>
    %cst_63 = arith.constant 0.000000e+00 : f32
    %138 = vector.broadcast %cst_63 : f32 to vector<100x1xf32>
    %139 = arith.maximumf %137, %138 : vector<100x1xf32>
    %c0_64 = arith.constant 0 : index
    %c0_65 = arith.constant 0 : index
    %140 = vector.load %arg9[%c0_64, %c0_65] : memref<100x1xf32, #tpu.memory_space<vmem>>, vector<100x1xf32>
    %cst_66 = arith.constant 9.99999974E-6 : f32
    %141 = vector.broadcast %cst_66 : f32 to vector<100x1xf32>
    %142 = arith.addf %139, %141 : vector<100x1xf32>
    %143 = math.rsqrt %142 : vector<100x1xf32>
    %144 = arith.mulf %140, %143 : vector<100x1xf32>
    %c0_67 = arith.constant 0 : index
    %c0_68 = arith.constant 0 : index
    %145 = vector.load %arg10[%c0_67, %c0_68] : memref<100x1xf32, #tpu.memory_space<vmem>>, vector<100x1xf32>
    %146 = arith.mulf %132, %144 : vector<100x1xf32>
    %147 = arith.subf %145, %146 : vector<100x1xf32>
    %148 = vector.broadcast %144 : vector<100x1xf32> to vector<100x128xf32>
    %149 = arith.mulf %120, %148 : vector<100x128xf32>
    %150 = vector.broadcast %147 : vector<100x1xf32> to vector<100x128xf32>
    %151 = arith.addf %149, %150 : vector<100x128xf32>
    %152 = arith.mulf %151, %151 : vector<100x128xf32>
    %153 = arith.mulf %151, %152 : vector<100x128xf32>
    %cst_69 = arith.constant 4.471500e-02 : f32
    %154 = vector.broadcast %cst_69 : f32 to vector<100x128xf32>
    %155 = arith.mulf %154, %153 : vector<100x128xf32>
    %156 = arith.addf %151, %155 : vector<100x128xf32>
    %cst_70 = arith.constant 0.797884583 : f32
    %157 = vector.broadcast %cst_70 : f32 to vector<100x128xf32>
    %158 = arith.mulf %157, %156 : vector<100x128xf32>
    %159 = math.tanh %158 : vector<100x128xf32>
    %cst_71 = arith.constant 1.000000e+00 : f32
    %160 = vector.broadcast %cst_71 : f32 to vector<100x128xf32>
    %161 = arith.addf %160, %159 : vector<100x128xf32>
    %cst_72 = arith.constant 5.000000e-01 : f32
    %162 = vector.broadcast %cst_72 : f32 to vector<100x128xf32>
    %163 = arith.mulf %162, %161 : vector<100x128xf32>
    %164 = arith.mulf %151, %163 : vector<100x128xf32>
    %c2_i32_73 = arith.constant 2 : i32
    %165 = tpu.memref_slice %arg30[%c2_i32_73] : memref<5x!tpu.dma_semaphore, #tpu.memory_space<semaphore_mem>> -> memref<1x!tpu.dma_semaphore, #tpu.memory_space<semaphore_mem>>
    %166 = tpu.memref_squeeze %165 : memref<1x!tpu.dma_semaphore, #tpu.memory_space<semaphore_mem>> -> memref<!tpu.dma_semaphore, #tpu.memory_space<semaphore_mem>>
    tpu.wait_dma2 semaphore(%166 : memref<!tpu.dma_semaphore, #tpu.memory_space<semaphore_mem>>) src(%arg21 : memref<128x64xbf16, #tpu.memory_space<any>>) dst(%arg27 : memref<128x64xbf16, #tpu.memory_space<vmem>>)
    %c0_74 = arith.constant 0 : index
    %c0_75 = arith.constant 0 : index
    %167 = vector.load %arg27[%c0_74, %c0_75] : memref<128x64xbf16, #tpu.memory_space<vmem>>, vector<128x64xbf16>
    %168 = arith.truncf %164 : vector<100x128xf32> to vector<100x128xbf16>
    %cst_76 = arith.constant dense<0.000000e+00> : vector<100x64xf32>
    %169 = tpu.matmul %168, %167, %cst_76 {dimension_numbers = #tpu.dot_dimension_numbers<[1], [0], [0], [1], [0, 0, 1, 1], [], []>} : vector<100x128xbf16>, vector<128x64xbf16>, vector<100x64xf32> -> vector<100x64xf32>
    %c0_77 = arith.constant 0 : index
    %c0_78 = arith.constant 0 : index
    %170 = vector.load %arg11[%c0_77, %c0_78] : memref<1x64xf32, #tpu.memory_space<vmem>>, vector<1x64xf32>
    %171 = vector.broadcast %170 : vector<1x64xf32> to vector<100x64xf32>
    %172 = arith.addf %169, %171 : vector<100x64xf32>
    %cst_79 = arith.constant dense<0.000000e+00> : vector<100xf32>
    %173 = vector.multi_reduction <add>, %172, %cst_79 [1] : vector<100x64xf32> to vector<100xf32>
    %174 = vector.shape_cast %173 : vector<100xf32> to vector<100x1xf32>
    %cst_80 = arith.constant 1.562500e-02 : f32
    %175 = vector.broadcast %cst_80 : f32 to vector<100x1xf32>
    %176 = arith.mulf %174, %175 : vector<100x1xf32>
    %177 = arith.mulf %172, %172 : vector<100x64xf32>
    %cst_81 = arith.constant dense<0.000000e+00> : vector<100xf32>
    %178 = vector.multi_reduction <add>, %177, %cst_81 [1] : vector<100x64xf32> to vector<100xf32>
    %179 = vector.shape_cast %178 : vector<100xf32> to vector<100x1xf32>
    %cst_82 = arith.constant 1.562500e-02 : f32
    %180 = vector.broadcast %cst_82 : f32 to vector<100x1xf32>
    %181 = arith.mulf %179, %180 : vector<100x1xf32>
    %cst_83 = arith.constant dense<0.000000e+00> : vector<100x1xf32>
    %182 = tpu.matmul %10, %176, %cst_83 {dimension_numbers = #tpu.dot_dimension_numbers<[1], [0], [0], [1], [0, 0, 1, 1], [], []>} : vector<100x100xf32>, vector<100x1xf32>, vector<100x1xf32> -> vector<100x1xf32>
    %cst_84 = arith.constant 5.000000e-01 : f32
    %183 = vector.broadcast %cst_84 : f32 to vector<100x1xf32>
    %184 = arith.mulf %182, %183 : vector<100x1xf32>
    %cst_85 = arith.constant dense<0.000000e+00> : vector<100x1xf32>
    %185 = tpu.matmul %10, %181, %cst_85 {dimension_numbers = #tpu.dot_dimension_numbers<[1], [0], [0], [1], [0, 0, 1, 1], [], []>} : vector<100x100xf32>, vector<100x1xf32>, vector<100x1xf32> -> vector<100x1xf32>
    %cst_86 = arith.constant 5.000000e-01 : f32
    %186 = vector.broadcast %cst_86 : f32 to vector<100x1xf32>
    %187 = arith.mulf %185, %186 : vector<100x1xf32>
    %188 = arith.mulf %184, %184 : vector<100x1xf32>
    %189 = arith.subf %187, %188 : vector<100x1xf32>
    %cst_87 = arith.constant 0.000000e+00 : f32
    %190 = vector.broadcast %cst_87 : f32 to vector<100x1xf32>
    %191 = arith.maximumf %189, %190 : vector<100x1xf32>
    %c0_88 = arith.constant 0 : index
    %c0_89 = arith.constant 0 : index
    %192 = vector.load %arg12[%c0_88, %c0_89] : memref<100x1xf32, #tpu.memory_space<vmem>>, vector<100x1xf32>
    %cst_90 = arith.constant 9.99999974E-6 : f32
    %193 = vector.broadcast %cst_90 : f32 to vector<100x1xf32>
    %194 = arith.addf %191, %193 : vector<100x1xf32>
    %195 = math.rsqrt %194 : vector<100x1xf32>
    %196 = arith.mulf %192, %195 : vector<100x1xf32>
    %c0_91 = arith.constant 0 : index
    %c0_92 = arith.constant 0 : index
    %197 = vector.load %arg13[%c0_91, %c0_92] : memref<100x1xf32, #tpu.memory_space<vmem>>, vector<100x1xf32>
    %198 = arith.mulf %184, %196 : vector<100x1xf32>
    %199 = arith.subf %197, %198 : vector<100x1xf32>
    %200 = vector.broadcast %196 : vector<100x1xf32> to vector<100x64xf32>
    %201 = arith.mulf %172, %200 : vector<100x64xf32>
    %202 = vector.broadcast %199 : vector<100x1xf32> to vector<100x64xf32>
    %203 = arith.addf %201, %202 : vector<100x64xf32>
    %204 = arith.mulf %203, %203 : vector<100x64xf32>
    %205 = arith.mulf %203, %204 : vector<100x64xf32>
    %cst_93 = arith.constant 4.471500e-02 : f32
    %206 = vector.broadcast %cst_93 : f32 to vector<100x64xf32>
    %207 = arith.mulf %206, %205 : vector<100x64xf32>
    %208 = arith.addf %203, %207 : vector<100x64xf32>
    %cst_94 = arith.constant 0.797884583 : f32
    %209 = vector.broadcast %cst_94 : f32 to vector<100x64xf32>
    %210 = arith.mulf %209, %208 : vector<100x64xf32>
    %211 = math.tanh %210 : vector<100x64xf32>
    %cst_95 = arith.constant 1.000000e+00 : f32
    %212 = vector.broadcast %cst_95 : f32 to vector<100x64xf32>
    %213 = arith.addf %212, %211 : vector<100x64xf32>
    %cst_96 = arith.constant 5.000000e-01 : f32
    %214 = vector.broadcast %cst_96 : f32 to vector<100x64xf32>
    %215 = arith.mulf %214, %213 : vector<100x64xf32>
    %216 = arith.mulf %203, %215 : vector<100x64xf32>
    %c3_i32_97 = arith.constant 3 : i32
    %217 = tpu.memref_slice %arg30[%c3_i32_97] : memref<5x!tpu.dma_semaphore, #tpu.memory_space<semaphore_mem>> -> memref<1x!tpu.dma_semaphore, #tpu.memory_space<semaphore_mem>>
    %218 = tpu.memref_squeeze %217 : memref<1x!tpu.dma_semaphore, #tpu.memory_space<semaphore_mem>> -> memref<!tpu.dma_semaphore, #tpu.memory_space<semaphore_mem>>
    tpu.wait_dma2 semaphore(%218 : memref<!tpu.dma_semaphore, #tpu.memory_space<semaphore_mem>>) src(%arg22 : memref<64x384xbf16, #tpu.memory_space<any>>) dst(%arg28 : memref<64x384xbf16, #tpu.memory_space<vmem>>)
    %c0_98 = arith.constant 0 : index
    %c0_99 = arith.constant 0 : index
    %219 = vector.load %arg28[%c0_98, %c0_99] : memref<64x384xbf16, #tpu.memory_space<vmem>>, vector<64x384xbf16>
    %220 = arith.truncf %216 : vector<100x64xf32> to vector<100x64xbf16>
    %cst_100 = arith.constant dense<0.000000e+00> : vector<100x384xf32>
    %221 = tpu.matmul %220, %219, %cst_100 {dimension_numbers = #tpu.dot_dimension_numbers<[1], [0], [0], [1], [0, 0, 1, 1], [], []>} : vector<100x64xbf16>, vector<64x384xbf16>, vector<100x384xf32> -> vector<100x384xf32>
    %c0_101 = arith.constant 0 : index
    %c0_102 = arith.constant 0 : index
    %222 = vector.load %arg14[%c0_101, %c0_102] : memref<1x384xf32, #tpu.memory_space<vmem>>, vector<1x384xf32>
    %223 = vector.broadcast %222 : vector<1x384xf32> to vector<100x384xf32>
    %224 = arith.addf %221, %223 : vector<100x384xf32>
    %225 = vector.extract_strided_slice %224 {offsets = [0, 0], sizes = [100, 128], strides = [1, 1]} : vector<100x384xf32> to vector<100x128xf32>
    %226 = arith.truncf %225 : vector<100x128xf32> to vector<100x128xbf16>
    %227 = vector.extract_strided_slice %224 {offsets = [0, 128], sizes = [100, 128], strides = [1, 1]} : vector<100x384xf32> to vector<100x128xf32>
    %228 = arith.truncf %227 : vector<100x128xf32> to vector<100x128xbf16>
    %229 = vector.extract_strided_slice %224 {offsets = [0, 256], sizes = [100, 128], strides = [1, 1]} : vector<100x384xf32> to vector<100x128xf32>
    %230 = arith.truncf %229 : vector<100x128xf32> to vector<100x128xbf16>
    %cst_103 = arith.constant dense<0.000000e+00> : vector<100x100xf32>
    %231 = tpu.matmul %226, %228, %cst_103 {dimension_numbers = #tpu.dot_dimension_numbers<[1], [1], [0], [0], [0, 0, 1, 0], [], []>} : vector<100x128xbf16>, vector<100x128xbf16>, vector<100x100xf32> -> vector<100x100xf32>
    %c0_104 = arith.constant 0 : index
    %c0_105 = arith.constant 0 : index
    %232 = vector.load %arg17[%c0_104, %c0_105] : memref<100x100xf32, #tpu.memory_space<vmem>>, vector<100x100xf32>
    %233 = arith.addf %231, %232 : vector<100x100xf32>
    %cst_106 = arith.constant dense<0xFF800000> : vector<100xf32>
    %234 = vector.multi_reduction <maximumf>, %233, %cst_106 [1] : vector<100x100xf32> to vector<100xf32>
    %235 = vector.shape_cast %234 : vector<100xf32> to vector<100x1xf32>
    %236 = vector.broadcast %235 : vector<100x1xf32> to vector<100x100xf32>
    %237 = arith.subf %233, %236 : vector<100x100xf32>
    %238 = math.exp %237 : vector<100x100xf32>
    %cst_107 = arith.constant dense<0.000000e+00> : vector<100xf32>
    %239 = vector.multi_reduction <add>, %238, %cst_107 [1] : vector<100x100xf32> to vector<100xf32>
    %240 = vector.shape_cast %239 : vector<100xf32> to vector<100x1xf32>
    %241 = tpu.reciprocal %240 {approx = true} : vector<100x1xf32> -> vector<100x1xf32>
    %242 = vector.broadcast %241 : vector<100x1xf32> to vector<100x100xf32>
    %243 = arith.mulf %238, %242 : vector<100x100xf32>
    %244 = arith.truncf %243 : vector<100x100xf32> to vector<100x100xbf16>
    %cst_108 = arith.constant dense<0.000000e+00> : vector<100x128xf32>
    %245 = tpu.matmul %244, %230, %cst_108 {dimension_numbers = #tpu.dot_dimension_numbers<[1], [0], [0], [1], [0, 0, 1, 1], [], []>} : vector<100x100xbf16>, vector<100x128xbf16>, vector<100x128xf32> -> vector<100x128xf32>
    %c0_109 = arith.constant 0 : index
    %c0_110 = arith.constant 0 : index
    %246 = vector.load %arg18[%c0_109, %c0_110] : memref<2x100xbf16, #tpu.memory_space<vmem>>, vector<2x100xbf16>
    %247 = arith.truncf %245 : vector<100x128xf32> to vector<100x128xbf16>
    %cst_111 = arith.constant dense<0.000000e+00> : vector<2x128xf32>
    %248 = tpu.matmul %246, %247, %cst_111 {dimension_numbers = #tpu.dot_dimension_numbers<[1], [0], [0], [1], [0, 0, 1, 1], [], []>} : vector<2x100xbf16>, vector<100x128xbf16>, vector<2x128xf32> -> vector<2x128xf32>
    %cst_112 = arith.constant 2.000000e-02 : f32
    %249 = vector.broadcast %cst_112 : f32 to vector<2x128xf32>
    %250 = arith.mulf %248, %249 : vector<2x128xf32>
    %c4_i32_113 = arith.constant 4 : i32
    %251 = tpu.memref_slice %arg30[%c4_i32_113] : memref<5x!tpu.dma_semaphore, #tpu.memory_space<semaphore_mem>> -> memref<1x!tpu.dma_semaphore, #tpu.memory_space<semaphore_mem>>
    %252 = tpu.memref_squeeze %251 : memref<1x!tpu.dma_semaphore, #tpu.memory_space<semaphore_mem>> -> memref<!tpu.dma_semaphore, #tpu.memory_space<semaphore_mem>>
    tpu.wait_dma2 semaphore(%252 : memref<!tpu.dma_semaphore, #tpu.memory_space<semaphore_mem>>) src(%arg23 : memref<128x128xbf16, #tpu.memory_space<any>>) dst(%arg29 : memref<128x128xbf16, #tpu.memory_space<vmem>>)
    %253 = arith.truncf %250 : vector<2x128xf32> to vector<2x128xbf16>
    %c0_114 = arith.constant 0 : index
    %c0_115 = arith.constant 0 : index
    %254 = vector.load %arg29[%c0_114, %c0_115] : memref<128x128xbf16, #tpu.memory_space<vmem>>, vector<128x128xbf16>
    %cst_116 = arith.constant dense<0.000000e+00> : vector<2x128xf32>
    %255 = tpu.matmul %253, %254, %cst_116 {dimension_numbers = #tpu.dot_dimension_numbers<[1], [0], [0], [1], [0, 0, 1, 1], [], []>} : vector<2x128xbf16>, vector<128x128xbf16>, vector<2x128xf32> -> vector<2x128xf32>
    %c0_117 = arith.constant 0 : index
    %c0_118 = arith.constant 0 : index
    %256 = vector.load %arg15[%c0_117, %c0_118] : memref<1x128xf32, #tpu.memory_space<vmem>>, vector<1x128xf32>
    %257 = vector.broadcast %256 : vector<1x128xf32> to vector<2x128xf32>
    %258 = arith.addf %255, %257 : vector<2x128xf32>
    %259 = arith.mulf %258, %258 : vector<2x128xf32>
    %260 = arith.mulf %258, %259 : vector<2x128xf32>
    %cst_119 = arith.constant 4.471500e-02 : f32
    %261 = vector.broadcast %cst_119 : f32 to vector<2x128xf32>
    %262 = arith.mulf %261, %260 : vector<2x128xf32>
    %263 = arith.addf %258, %262 : vector<2x128xf32>
    %cst_120 = arith.constant 0.797884583 : f32
    %264 = vector.broadcast %cst_120 : f32 to vector<2x128xf32>
    %265 = arith.mulf %264, %263 : vector<2x128xf32>
    %266 = math.tanh %265 : vector<2x128xf32>
    %cst_121 = arith.constant 1.000000e+00 : f32
    %267 = vector.broadcast %cst_121 : f32 to vector<2x128xf32>
    %268 = arith.addf %267, %266 : vector<2x128xf32>
    %cst_122 = arith.constant 5.000000e-01 : f32
    %269 = vector.broadcast %cst_122 : f32 to vector<2x128xf32>
    %270 = arith.mulf %269, %268 : vector<2x128xf32>
    %271 = arith.mulf %258, %270 : vector<2x128xf32>
    %c0_123 = arith.constant 0 : index
    %c0_124 = arith.constant 0 : index
    %272 = vector.load %arg24[%c0_123, %c0_124] : memref<2x128xf32, #tpu.memory_space<vmem>>, vector<2x128xf32>
    tpu.vector_store %arg24[%c0_123, %c0_124], %271 {strides = array<i32>} : memref<2x128xf32, #tpu.memory_space<vmem>>, vector<2x128xf32>,
    return
  }
}

</mosaic_0001>

<bundles_post_ra>
// kernel: tpu_custom_call.1
= control target key start
LH: loop header
LB: loop body
LE: loop exit
PB: predicated region body
PF: predicated region fallthrough
CT: control target
= control target key end

     0   :  { %s15497_s0 = inlined_call_operand.vmem [shape: bf16[100,768], index: 0, kind: input, shape index: {}]   ;;  %s15498_s1 = inlined_call_operand.hbm [shape: bf16[768,512], index: 1, kind: input, shape index: {}]   ;;  %s15499_s2 = inlined_call_operand.vmem [shape: f32[1,512], index: 2, kind: input, shape index: {}]   ;;  %s15500_s3 = inlined_call_operand.vmem [shape: f32[100,1], index: 3, kind: input, shape index: {}]   ;;  %s15501_s4 = inlined_call_operand.vmem [shape: f32[100,1], index: 4, kind: input, shape index: {}]   ;;  %s15502_s5 = inlined_call_operand.vmem [shape: f32[1,256], index: 5, kind: input, shape index: {}]   ;;  %s15503_s6 = inlined_call_operand.vmem [shape: f32[100,1], index: 6, kind: input, shape index: {}]   ;;  %s15504_s7 = inlined_call_operand.vmem [shape: f32[100,1], index: 7, kind: input, shape index: {}]   ;;  %s15505_s8 = inlined_call_operand.vmem [shape: f32[1,128], index: 8, kind: input, shape index: {}]   ;;  %s15506_s9 = inlined_call_operand.vmem [shape: f32[100,1], index: 9, kind: input, shape index: {}]   ;;  %s15507_s10 = inlined_call_operand.vmem [shape: f32[100,1], index: 10, kind: input, shape index: {}]   ;;  %s15508_s11 = inlined_call_operand.vmem [shape: f32[1,64], index: 11, kind: input, shape index: {}]   ;;  %s15509_s12 = inlined_call_operand.vmem [shape: f32[100,1], index: 12, kind: input, shape index: {}]   ;;  %s15510_s13 = inlined_call_operand.vmem [shape: f32[100,1], index: 13, kind: input, shape index: {}]   ;;  %s15511_s14 = inlined_call_operand.vmem [shape: f32[1,384], index: 14, kind: input, shape index: {}]   ;;  %s15512_s15 = inlined_call_operand.vmem [shape: f32[1,128], index: 15, kind: input, shape index: {}]   ;;  %s15513_s16 = inlined_call_operand.hbm [shape: f32[100,100], index: 16, kind: input, shape index: {}]   ;;  %s15514_s17 = inlined_call_operand.hbm [shape: f32[100,100], index: 17, kind: input, shape index: {}]   ;;  %s15515_s18 = inlined_call_operand.vmem [shape: bf16[2,100], index: 18, kind: input, shape index: {}]   ;;  %s15516_s19 = inlined_call_operand.vmem [shape: bf16[512,256], index: 19, kind: input, shape index: {}]   ;;  %s15517_s20 = inlined_call_operand.vmem [shape: bf16[256,128], index: 20, kind: input, shape index: {}]   ;;  %s15518_s21 = inlined_call_operand.vmem [shape: bf16[128,64], index: 21, kind: input, shape index: {}]   ;;  %s15519_s22 = inlined_call_operand.hbm [shape: bf16[64,384], index: 22, kind: input, shape index: {}]   ;;  %s15520_s23 = inlined_call_operand.hbm [shape: bf16[128,128], index: 23, kind: input, shape index: {}]   ;;  %s15521_s24 = inlined_call_operand.hbm [shape: f32[2,128], index: 24, kind: output, shape index: {}]  }
   0x1   :  { %15672 = sst [smem:[#allocation134_spill]] %s15497_s0 }
   0x2   :  { %15673 = sst [smem:[#allocation135_spill]] %s15498_s1 }
   0x3   :  { %15674 = sst [smem:[#allocation136_spill]] %s15499_s2 }
   0x4   :  { %15675 = sst [smem:[#allocation137_spill]] %s15500_s3 }
   0x5   :  { %15676 = sst [smem:[#allocation138_spill]] %s15501_s4 }
   0x6   :  { %15677 = sst [smem:[#allocation139_spill]] %s15502_s5 }
   0x7   :  { %15678 = sst [smem:[#allocation140_spill]] %s15503_s6 }
   0x8   :  { %15679 = sst [smem:[#allocation141_spill]] %s15504_s7 }
   0x9   :  { %15680 = sst [smem:[#allocation142_spill]] %s15505_s8 }
   0xa   :  { %29 = vsyncpa [#allocation9], 0 }
   0xb   :  { %30 = vsyncpa [#allocation12], 0 }
   0xc   :  { %31 = vsyncpa [#allocation10], 0  ;;  %s10884_s5 = smov [#allocation11]  }
   0xd   :  { %s79_s26 = sshll.u32 %s10884_s5, 4  ;;  %s80_s26 = int_to_ptr.vmem [resolvable:$true] %s79_s26 }
   0xe   :  { %s10756_s27 = scalar_lea.vmem %s80_s26, 1664  ;;  %p10761_p1 = scmp.lt.s32.totalorder %s80_s26, %s80_s26 }
   0xf   :  { %p10757_p0 = scmp.ne.s32.totalorder %s80_s26, %s10756_s27  ;;  %p10762_p2 = scmp.lt.s32.totalorder %s10756_s27, %s10756_s27 }
  0x11   :  { %p10763_p3 = por %p10762_p2, %p10761_p1 }
  0x13   :  { %p10764_p4 = pnand %p10763_p3, %p10757_p0 }
  0x15   :  { %10767 = shalt.err (!%p10764_p4)
}
  0x16   :  { %s10885_s28 = smov 128   ;;  %s10886_s6 = smov 8  }
  0x17   :  { %85 = dma.hbm_to_vmem [thread:$0]  %s15513_s16, 1664, %s80_s26, [#allocation12], %s10885_s28, %s10885_s28, %s10886_s6  }
  0x18   :  { %s10887_s0 = smov [#allocation8]  }
  0x19   :  { %s39_s7 = sshll.u32 %s10887_s0, 4  ;;  %s40_s7 = int_to_ptr.vmem [resolvable:$true] %s39_s7 }
  0x1a   :  { %s10776_s30 = scalar_lea.vmem %s40_s7, 24576  ;;  %p10781_p6 = scmp.lt.s32.totalorder %s40_s7, %s40_s7 }
  0x1b   :  { %p10777_p5 = scmp.ne.s32.totalorder %s40_s7, %s10776_s30  ;;  %p10782_p7 = scmp.lt.s32.totalorder %s10776_s30, %s10776_s30 }
  0x1d   :  { %p10783_p8 = por %p10782_p7, %p10781_p6 }
  0x1f   :  { %p10784_p9 = pnand %p10783_p8, %p10777_p5 }
  0x21   :  { %10787 = shalt.err (!%p10784_p9)
}
  0x22   :  { %s10888_s3 = smov 256   ;;  %s10889_s25 = smov 16  }
  0x23   :  { %s15681_s1 = sld [smem:[#allocation135_spill]]  ;;  %s10890_s5 = smov [#allocation13]  }
  0x24   :  { %s91_s27 = sshll.u32 %s10890_s5, 4  ;;  %s92_s27 = int_to_ptr.vmem [resolvable:$true] %s91_s27 }
  0x25   :  { %s10796_s16 = scalar_lea.vmem %s92_s27, 1664  ;;  %p10801_p11 = scmp.lt.s32.totalorder %s92_s27, %s92_s27 }
  0x26   :  { %p10797_p10 = scmp.ne.s32.totalorder %s92_s27, %s10796_s16  ;;  %p10802_p12 = scmp.lt.s32.totalorder %s10796_s16, %s10796_s16 }
  0x28   :  { %p10803_p13 = por %p10802_p12, %p10801_p11 }
  0x29   :  { %45 = dma.hbm_to_vmem [thread:$0]  %s15681_s1, 24576, %s40_s7, [#allocation9], %s10888_s3, %s10888_s3, %s10889_s25  }
  0x2a   :  { %p10804_p0 = pnand %p10803_p13, %p10797_p10 }
  0x2c   :  { %10807 = shalt.err (!%p10804_p0)
}
  0x2d   :  { %97 = dma.hbm_to_vmem [thread:$0]  %s15514_s17, 1664, %s92_s27, [#allocation12], %s10885_s28, %s10885_s28, %s10886_s6  }
  0x2e   :  { %10868 = dma.done.wait [#allocation9], 24576  }
  0x2f   :  { %10869 = vsyncadd [#allocation9], 4294942720 }
  0x30   :  { %10870 = dma.done.wait [#allocation12], 3328  }
  0x31   :  { %10871 = vsyncadd [#allocation12], 4294963968  ;;  %v11034_v0 = vld [vmem:[%s15516_s19] sm:$0xff]  ;;  %v11039_v1 = vld [vmem:[%s15516_s19 + $0x8] sm:$0xff] }
  0x32   :  { %15682 = vst [vmem:[#allocation32_spill] sm:$0xff] %v11034_v0  ;;  %15683 = vst [vmem:[#allocation33_spill] sm:$0xff] %v11039_v1  ;;  %v11044_v2 = vld [vmem:[%s15516_s19 + $0x10] sm:$0xff]  ;;  %v11049_v3 = vld [vmem:[%s15516_s19 + $0x18] sm:$0xff] }
  0x33   :  { %15684 = vst [vmem:[#allocation34_spill] sm:$0xff] %v11044_v2  ;;  %15685 = vst [vmem:[#allocation35_spill] sm:$0xff] %v11049_v3  ;;  %v11054_v4 = vld [vmem:[%s15516_s19 + $0x20] sm:$0xff]  ;;  %v11059_v5 = vld [vmem:[%s15516_s19 + $0x28] sm:$0xff] }
  0x34   :  { %15686 = vst [vmem:[#allocation36_spill] sm:$0xff] %v11054_v4  ;;  %15687 = vst [vmem:[#allocation37_spill] sm:$0xff] %v11059_v5  ;;  %v11064_v6 = vld [vmem:[%s15516_s19 + $0x30] sm:$0xff]  ;;  %v11069_v7 = vld [vmem:[%s15516_s19 + $0x38] sm:$0xff] }
  0x35   :  { %15688 = vst [vmem:[#allocation38_spill] sm:$0xff] %v11064_v6  ;;  %15689 = vst [vmem:[#allocation39_spill] sm:$0xff] %v11069_v7  ;;  %v11074_v8 = vld [vmem:[%s15516_s19 + $0x40] sm:$0xff]  ;;  %v11079_v9 = vld [vmem:[%s15516_s19 + $0x48] sm:$0xff] }
  0x36   :  { %15690 = vst [vmem:[#allocation40_spill] sm:$0xff] %v11074_v8  ;;  %15691 = vst [vmem:[#allocation41_spill] sm:$0xff] %v11079_v9  ;;  %v11084_v10 = vld [vmem:[%s15516_s19 + $0x50] sm:$0xff]  ;;  %v11089_v11 = vld [vmem:[%s15516_s19 + $0x58] sm:$0xff] }
  0x37   :  { %15692 = vst [vmem:[#allocation42_spill] sm:$0xff] %v11084_v10  ;;  %15693 = vst [vmem:[#allocation43_spill] sm:$0xff] %v11089_v11  ;;  %v11094_v12 = vld [vmem:[%s15516_s19 + $0x60] sm:$0xff]  ;;  %v11099_v13 = vld [vmem:[%s15516_s19 + $0x68] sm:$0xff] }
  0x38   :  { %15694 = vst [vmem:[#allocation44_spill] sm:$0xff] %v11094_v12  ;;  %15695 = vst [vmem:[#allocation45_spill] sm:$0xff] %v11099_v13  ;;  %v11104_v14 = vld [vmem:[%s15516_s19 + $0x70] sm:$0xff]  ;;  %v11109_v15 = vld [vmem:[%s15516_s19 + $0x78] sm:$0xff] }
  0x39   :  { %15696 = vst [vmem:[#allocation46_spill] sm:$0xff] %v11104_v14  ;;  %15697 = vst [vmem:[#allocation47_spill] sm:$0xff] %v11109_v15  ;;  %v11114_v16 = vld [vmem:[%s15516_s19 + $0x80] sm:$0xff]  ;;  %v11119_v17 = vld [vmem:[%s15516_s19 + $0x88] sm:$0xff] }
  0x3a   :  { %15698 = vst [vmem:[#allocation48_spill] sm:$0xff] %v11114_v16  ;;  %15699 = vst [vmem:[#allocation49_spill] sm:$0xff] %v11119_v17  ;;  %v11124_v18 = vld [vmem:[%s15516_s19 + $0x90] sm:$0xff]  ;;  %v11129_v19 = vld [vmem:[%s15516_s19 + $0x98] sm:$0xff] }
  0x3b   :  { %15700 = vst [vmem:[#allocation50_spill] sm:$0xff] %v11124_v18  ;;  %15701 = vst [vmem:[#allocation51_spill] sm:$0xff] %v11129_v19  ;;  %v11134_v20 = vld [vmem:[%s15516_s19 + $0xa0] sm:$0xff]  ;;  %v11139_v21 = vld [vmem:[%s15516_s19 + $0xa8] sm:$0xff] }
  0x3c   :  { %15702 = vst [vmem:[#allocation52_spill] sm:$0xff] %v11134_v20  ;;  %15703 = vst [vmem:[#allocation53_spill] sm:$0xff] %v11139_v21  ;;  %v11144_v22 = vld [vmem:[%s15516_s19 + $0xb0] sm:$0xff]  ;;  %v11149_v23 = vld [vmem:[%s15516_s19 + $0xb8] sm:$0xff] }
  0x3d   :  { %15704 = vst [vmem:[#allocation54_spill] sm:$0xff] %v11144_v22  ;;  %15705 = vst [vmem:[#allocation55_spill] sm:$0xff] %v11149_v23  ;;  %v11154_v24 = vld [vmem:[%s15516_s19 + $0xc0] sm:$0xff]  ;;  %v11159_v25 = vld [vmem:[%s15516_s19 + $0xc8] sm:$0xff] }
  0x3e   :  { %15706 = vst [vmem:[#allocation56_spill] sm:$0xff] %v11154_v24  ;;  %15707 = vst [vmem:[#allocation57_spill] sm:$0xff] %v11159_v25  ;;  %v11164_v26 = vld [vmem:[%s15516_s19 + $0xd0] sm:$0xff]  ;;  %v11169_v27 = vld [vmem:[%s15516_s19 + $0xd8] sm:$0xff] }
  0x3f   :  { %15708 = vst [vmem:[#allocation58_spill] sm:$0xff] %v11164_v26  ;;  %15709 = vst [vmem:[#allocation59_spill] sm:$0xff] %v11169_v27  ;;  %v11174_v28 = vld [vmem:[%s15516_s19 + $0xe0] sm:$0xff]  ;;  %v11179_v29 = vld [vmem:[%s15516_s19 + $0xe8] sm:$0xff] }
  0x40   :  { %15710 = vst [vmem:[#allocation60_spill] sm:$0xff] %v11174_v28  ;;  %15711 = vst [vmem:[#allocation61_spill] sm:$0xff] %v11179_v29  ;;  %v11184_v30 = vld [vmem:[%s15516_s19 + $0xf0] sm:$0xff]  ;;  %v11189_v31 = vld [vmem:[%s15516_s19 + $0xf8] sm:$0xff] }
  0x41   :  { %15712 = vst [vmem:[#allocation62_spill] sm:$0xff] %v11184_v30  ;;  %15713 = vst [vmem:[#allocation63_spill] sm:$0xff] %v11189_v31  ;;  %v11194_v32 = vld [vmem:[%s15516_s19 + $0x100] sm:$0xff]  ;;  %v11199_v33 = vld [vmem:[%s15516_s19 + $0x108] sm:$0xff] }
  0x42   :  { %15714 = vst [vmem:[#allocation64_spill] sm:$0xff] %v11194_v32  ;;  %15715 = vst [vmem:[#allocation65_spill] sm:$0xff] %v11199_v33  ;;  %v11204_v34 = vld [vmem:[%s15516_s19 + $0x110] sm:$0xff]  ;;  %v11209_v35 = vld [vmem:[%s15516_s19 + $0x118] sm:$0xff] }
  0x43   :  { %15716 = vst [vmem:[#allocation66_spill] sm:$0xff] %v11204_v34  ;;  %15717 = vst [vmem:[#allocation67_spill] sm:$0xff] %v11209_v35  ;;  %v11214_v36 = vld [vmem:[%s15516_s19 + $0x120] sm:$0xff]  ;;  %v11219_v37 = vld [vmem:[%s15516_s19 + $0x128] sm:$0xff] }
  0x44   :  { %15718 = vst [vmem:[#allocation68_spill] sm:$0xff] %v11214_v36  ;;  %15719 = vst [vmem:[#allocation69_spill] sm:$0xff] %v11219_v37  ;;  %v11224_v38 = vld [vmem:[%s15516_s19 + $0x130] sm:$0xff]  ;;  %v11229_v39 = vld [vmem:[%s15516_s19 + $0x138] sm:$0xff] }
  0x45   :  { %15720 = vst [vmem:[#allocation70_spill] sm:$0xff] %v11224_v38  ;;  %15721 = vst [vmem:[#allocation71_spill] sm:$0xff] %v11229_v39  ;;  %v11234_v40 = vld [vmem:[%s15516_s19 + $0x140] sm:$0xff]  ;;  %v11239_v41 = vld [vmem:[%s15516_s19 + $0x148] sm:$0xff] }
  0x46   :  { %15722 = vst [vmem:[#allocation72_spill] sm:$0xff] %v11234_v40  ;;  %15723 = vst [vmem:[#allocation73_spill] sm:$0xff] %v11239_v41  ;;  %v11244_v42 = vld [vmem:[%s15516_s19 + $0x150] sm:$0xff]  ;;  %v11249_v43 = vld [vmem:[%s15516_s19 + $0x158] sm:$0xff] }
  0x47   :  { %15724 = vst [vmem:[#allocation74_spill] sm:$0xff] %v11244_v42  ;;  %15725 = vst [vmem:[#allocation75_spill] sm:$0xff] %v11249_v43  ;;  %v11254_v44 = vld [vmem:[%s15516_s19 + $0x160] sm:$0xff]  ;;  %v11259_v45 = vld [vmem:[%s15516_s19 + $0x168] sm:$0xff] }
  0x48   :  { %15726 = vst [vmem:[#allocation76_spill] sm:$0xff] %v11254_v44  ;;  %15727 = vst [vmem:[#allocation77_spill] sm:$0xff] %v11259_v45  ;;  %v11264_v46 = vld [vmem:[%s15516_s19 + $0x170] sm:$0xff]  ;;  %v11269_v47 = vld [vmem:[%s15516_s19 + $0x178] sm:$0xff] }
  0x49   :  { %15728 = vst [vmem:[#allocation78_spill] sm:$0xff] %v11264_v46  ;;  %15729 = vst [vmem:[#allocation79_spill] sm:$0xff] %v11269_v47  ;;  %v11274_v48 = vld [vmem:[%s15516_s19 + $0x180] sm:$0xff]  ;;  %v11279_v49 = vld [vmem:[%s15516_s19 + $0x188] sm:$0xff] }
  0x4a   :  { %15730 = vst [vmem:[#allocation80_spill] sm:$0xff] %v11274_v48  ;;  %15731 = vst [vmem:[#allocation81_spill] sm:$0xff] %v11279_v49  ;;  %v11284_v50 = vld [vmem:[%s15516_s19 + $0x190] sm:$0xff]  ;;  %v11289_v51 = vld [vmem:[%s15516_s19 + $0x198] sm:$0xff] }
  0x4b   :  { %15732 = vst [vmem:[#allocation82_spill] sm:$0xff] %v11284_v50  ;;  %15733 = vst [vmem:[#allocation83_spill] sm:$0xff] %v11289_v51  ;;  %v11294_v52 = vld [vmem:[%s15516_s19 + $0x1a0] sm:$0xff]  ;;  %v11299_v53 = vld [vmem:[%s15516_s19 + $0x1a8] sm:$0xff] }
  0x4c   :  { %15734 = vst [vmem:[#allocation84_spill] sm:$0xff] %v11294_v52  ;;  %15735 = vst [vmem:[#allocation85_spill] sm:$0xff] %v11299_v53  ;;  %v11304_v54 = vld [vmem:[%s15516_s19 + $0x1b0] sm:$0xff]  ;;  %v11309_v55 = vld [vmem:[%s15516_s19 + $0x1b8] sm:$0xff] }
  0x4d   :  { %15736 = vst [vmem:[#allocation86_spill] sm:$0xff] %v11304_v54  ;;  %15737 = vst [vmem:[#allocation87_spill] sm:$0xff] %v11309_v55  ;;  %v11314_v56 = vld [vmem:[%s15516_s19 + $0x1c0] sm:$0xff]  ;;  %v11319_v57 = vld [vmem:[%s15516_s19 + $0x1c8] sm:$0xff] }
  0x4e   :  { %15738 = vst [vmem:[#allocation88_spill] sm:$0xff] %v11314_v56  ;;  %15739 = vst [vmem:[#allocation89_spill] sm:$0xff] %v11319_v57  ;;  %v11324_v58 = vld [vmem:[%s15516_s19 + $0x1d0] sm:$0xff]  ;;  %v11329_v59 = vld [vmem:[%s15516_s19 + $0x1d8] sm:$0xff] }
  0x4f   :  { %15740 = vst [vmem:[#allocation90_spill] sm:$0xff] %v11324_v58  ;;  %15741 = vst [vmem:[#allocation91_spill] sm:$0xff] %v11329_v59  ;;  %v11334_v60 = vld [vmem:[%s15516_s19 + $0x1e0] sm:$0xff]  ;;  %v11339_v61 = vld [vmem:[%s15516_s19 + $0x1e8] sm:$0xff] }
  0x50   :  { %15742 = vst [vmem:[#allocation92_spill] sm:$0xff] %v11334_v60  ;;  %15743 = vst [vmem:[#allocation93_spill] sm:$0xff] %v11339_v61  ;;  %v11344_v62 = vld [vmem:[%s15516_s19 + $0x1f0] sm:$0xff]  ;;  %v11349_v63 = vld [vmem:[%s15516_s19 + $0x1f8] sm:$0xff] }
  0x51   :  { %15744 = vst [vmem:[#allocation94_spill] sm:$0xff] %v11344_v62  ;;  %15745 = vst [vmem:[#allocation95_spill] sm:$0xff] %v11349_v63 }
  0x52   :  { %278 = vsyncadd [#allocation7], 8192  ;;  %v313_v48 = vld [vmem:[%s15517_s20] sm:$0xff]  ;;  %v315_v49 = vld [vmem:[%s15517_s20 + $0x8] sm:$0xff] }
  0x53   :  { %314 = vst [vmem:[#allocation3] sm:$0xff] %v313_v48  ;;  %316 = vst [vmem:[#allocation3 + $0x8] sm:$0xff] %v315_v49  ;;  %v317_v16 = vld [vmem:[%s15517_s20 + $0x10] sm:$0xff]  ;;  %v319_v17 = vld [vmem:[%s15517_s20 + $0x18] sm:$0xff] }
  0x54   :  { %v321_v50 = vld [vmem:[%s15517_s20 + $0x20] sm:$0xff]  ;;  %318 = vst [vmem:[#allocation3 + $0x10] sm:$0xff] %v317_v16  ;;  %320 = vst [vmem:[#allocation3 + $0x18] sm:$0xff] %v319_v17  ;;  %v323_v48 = vld [vmem:[%s15517_s20 + $0x28] sm:$0xff] }
  0x55   :  { %322 = vst [vmem:[#allocation3 + $0x20] sm:$0xff] %v321_v50  ;;  %v325_v49 = vld [vmem:[%s15517_s20 + $0x30] sm:$0xff]  ;;  %v327_v51 = vld [vmem:[%s15517_s20 + $0x38] sm:$0xff]  ;;  %324 = vst [vmem:[#allocation3 + $0x28] sm:$0xff] %v323_v48 }
  0x56   :  { %326 = vst [vmem:[#allocation3 + $0x30] sm:$0xff] %v325_v49  ;;  %328 = vst [vmem:[#allocation3 + $0x38] sm:$0xff] %v327_v51  ;;  %v329_v16 = vld [vmem:[%s15517_s20 + $0x40] sm:$0xff]  ;;  %v331_v17 = vld [vmem:[%s15517_s20 + $0x48] sm:$0xff] }
  0x57   :  { %v333_v50 = vld [vmem:[%s15517_s20 + $0x50] sm:$0xff]  ;;  %330 = vst [vmem:[#allocation3 + $0x40] sm:$0xff] %v329_v16  ;;  %332 = vst [vmem:[#allocation3 + $0x48] sm:$0xff] %v331_v17  ;;  %v335_v48 = vld [vmem:[%s15517_s20 + $0x58] sm:$0xff] }
  0x58   :  { %334 = vst [vmem:[#allocation3 + $0x50] sm:$0xff] %v333_v50  ;;  %v337_v51 = vld [vmem:[%s15517_s20 + $0x60] sm:$0xff]  ;;  %v339_v49 = vld [vmem:[%s15517_s20 + $0x68] sm:$0xff]  ;;  %336 = vst [vmem:[#allocation3 + $0x58] sm:$0xff] %v335_v48 }
  0x59   :  { %338 = vst [vmem:[#allocation3 + $0x60] sm:$0xff] %v337_v51  ;;  %340 = vst [vmem:[#allocation3 + $0x68] sm:$0xff] %v339_v49  ;;  %v341_v16 = vld [vmem:[%s15517_s20 + $0x70] sm:$0xff]  ;;  %v343_v17 = vld [vmem:[%s15517_s20 + $0x78] sm:$0xff] }
  0x5a   :  { %342 = vst [vmem:[#allocation3 + $0x70] sm:$0xff] %v341_v16  ;;  %344 = vst [vmem:[#allocation3 + $0x78] sm:$0xff] %v343_v17 }
  0x5b   :  { %352 = vsyncadd [#allocation7 + $0x1], 2048  ;;  %v387_v50 = vld [vmem:[%s15518_s21] sm:$0xff]  ;;  %v389_v48 = vld [vmem:[%s15518_s21 + $0x8] sm:$0xff]  ;;  %s15746_s30 = sld [smem:[#allocation134_spill]] }
  0x5c   :  { %388 = vst [vmem:[#allocation4] sm:$0xff] %v387_v50  ;;  %390 = vst [vmem:[#allocation4 + $0x8] sm:$0xff] %v389_v48  ;;  %v391_v51 = vld [vmem:[%s15518_s21 + $0x10] sm:$0xff]  ;;  %v393_v49 = vld [vmem:[%s15518_s21 + $0x18] sm:$0xff] }
  0x5d   :  { %v395_v16 = vld [vmem:[%s15518_s21 + $0x20] sm:$0xff]  ;;  %392 = vst [vmem:[#allocation4 + $0x10] sm:$0xff] %v391_v51  ;;  %394 = vst [vmem:[#allocation4 + $0x18] sm:$0xff] %v393_v49  ;;  %v397_v17 = vld [vmem:[%s15518_s21 + $0x28] sm:$0xff] }
  0x5e   :  { %396 = vst [vmem:[#allocation4 + $0x20] sm:$0xff] %v395_v16  ;;  %v399_v50 = vld [vmem:[%s15518_s21 + $0x30] sm:$0xff]  ;;  %v401_v48 = vld [vmem:[%s15518_s21 + $0x38] sm:$0xff]  ;;  %398 = vst [vmem:[#allocation4 + $0x28] sm:$0xff] %v397_v17 }
  0x5f   :  { %400 = vst [vmem:[#allocation4 + $0x30] sm:$0xff] %v399_v50  ;;  %402 = vst [vmem:[#allocation4 + $0x38] sm:$0xff] %v401_v48  ;;  %v9979_v18 = vld [vmem:[#allocation8 + $0xe4] ss:$16 sps:$4 sm:$0xff]   ;;  %v9983_v51 = vld [vmem:[#allocation8 + $0xe0] ss:$16 sps:$4 sm:$0xff]  }
  0x60   :  { %v9981_v19 = vld [vmem:[#allocation8 + $0x2e4] ss:$16 sps:$4 sm:$0xff]   ;;  %1862 = vmatprep.subr.bf16.mxu0 %v9979_v18  ;;  %v9984_v49 = vld [vmem:[#allocation8 + $0x2e0] ss:$16 sps:$4 sm:$0xff]   ;;  %v10181_v32 = vld [vmem:[#allocation8 + $0x18c] ss:$16 sps:$4 sm:$0xff]  }
  0x61   :  { %1963 = vmatprep.subr.bf16.mxu1 %v9981_v19  ;;  %v9985_v16 = vld [vmem:[#allocation8 + $0xc4] ss:$16 sps:$4 sm:$0xff]   ;;  %1863 = vmatpush1.bf16.msra.mxu0 %v9983_v51  ;;  %v9989_v53 = vld [vmem:[#allocation8 + $0xc0] ss:$16 sps:$4 sm:$0xff]   ;;  %v10179_v34 = vld [vmem:[#allocation8 + $0x188] ss:$16 sps:$4 sm:$0xff]  }
  0x62   :  { %1964 = vmatpush1.bf16.msra.mxu1 %v9984_v49  ;;  %v9987_v52 = vld [vmem:[#allocation8 + $0x2c4] ss:$16 sps:$4 sm:$0xff]   ;;  %1864 = vmatprep.subr.bf16.mxu0 %v9985_v16  ;;  %v9990_v20 = vld [vmem:[#allocation8 + $0x2c0] ss:$16 sps:$4 sm:$0xff]   ;;  %v10186_v2 = vld [vmem:[#allocation8 + $0x168] ss:$16 sps:$4 sm:$0xff]  }
  0x63   :  { %1965 = vmatprep.subr.bf16.mxu1 %v9987_v52  ;;  %v9991_v21 = vld [vmem:[#allocation8 + $0xa4] ss:$16 sps:$4 sm:$0xff]   ;;  %v9995_v55 = vld [vmem:[#allocation8 + $0xa0] ss:$16 sps:$4 sm:$0xff]   ;;  %v10210_v3 = vld [vmem:[#allocation8 + $0x10c] ss:$16 sps:$4 sm:$0xff]  }
  0x64   :  { %v9993_v54 = vld [vmem:[#allocation8 + $0x2a4] ss:$16 sps:$4 sm:$0xff]   ;;  %v9996_v17 = vld [vmem:[#allocation8 + $0x2a0] ss:$16 sps:$4 sm:$0xff]  }
  0x65   :  { %1865 = vmatpush1.bf16.msra.mxu0 %v9989_v53  ;;  %v9997_v50 = vld [vmem:[#allocation8 + $0x84] ss:$16 sps:$4 sm:$0xff]   ;;  %v10001_v48 = vld [vmem:[#allocation8 + $0x80] ss:$16 sps:$4 sm:$0xff]  }
  0x66   :  { %1966 = vmatpush1.bf16.msra.mxu1 %v9990_v20  ;;  %1866 = vmatprep.subr.bf16.mxu0 %v9991_v21  ;;  %v9999_v18 = vld [vmem:[#allocation8 + $0x284] ss:$16 sps:$4 sm:$0xff]   ;;  %v10002_v19 = vld [vmem:[#allocation8 + $0x280] ss:$16 sps:$4 sm:$0xff]  }
  0x67   :  { %1967 = vmatprep.subr.bf16.mxu1 %v9993_v54  ;;  %v10003_v51 = vld [vmem:[#allocation8 + $0x64] ss:$16 sps:$4 sm:$0xff]   ;;  %v10007_v16 = vld [vmem:[#allocation8 + $0x60] ss:$16 sps:$4 sm:$0xff]  }
  0x68   :  { %v10005_v49 = vld [vmem:[#allocation8 + $0x264] ss:$16 sps:$4 sm:$0xff]   ;;  %v10008_v52 = vld [vmem:[#allocation8 + $0x260] ss:$16 sps:$4 sm:$0xff]  }
  0x69   :  { %1867 = vmatpush1.bf16.msra.mxu0 %v9995_v55  ;;  %v10009_v22 = vld [vmem:[#allocation8 + $0x44] ss:$16 sps:$4 sm:$0xff]   ;;  %v10013_v53 = vld [vmem:[#allocation8 + $0x40] ss:$16 sps:$4 sm:$0xff]  }
  0x6a   :  { %1968 = vmatpush1.bf16.msra.mxu1 %v9996_v17  ;;  %1868 = vmatprep.subr.bf16.mxu0 %v9997_v50  ;;  %v10011_v20 = vld [vmem:[#allocation8 + $0x244] ss:$16 sps:$4 sm:$0xff]   ;;  %v10014_v21 = vld [vmem:[#allocation8 + $0x240] ss:$16 sps:$4 sm:$0xff]  }
  0x6b   :  { %1969 = vmatprep.subr.bf16.mxu1 %v9999_v18  ;;  %v10015_v54 = vld [vmem:[#allocation8 + $0x24] ss:$16 sps:$4 sm:$0xff]   ;;  %v10019_v17 = vld [vmem:[#allocation8 + $0x20] ss:$16 sps:$4 sm:$0xff]  }
  0x6c   :  { %v10017_v55 = vld [vmem:[#allocation8 + $0x224] ss:$16 sps:$4 sm:$0xff]   ;;  %v10020_v50 = vld [vmem:[#allocation8 + $0x220] ss:$16 sps:$4 sm:$0xff]  }
  0x6d   :  { %1869 = vmatpush1.bf16.msra.mxu0 %v10001_v48  ;;  %v10021_v18 = vld [vmem:[#allocation8 + $0x4] ss:$16 sps:$4 sm:$0xff]   ;;  %v10068_v23 = vld [vmem:[#allocation8 + $0x320] ss:$16 sps:$4 sm:$0xff]  }
  0x6e   :  { %1970 = vmatpush1.bf16.msra.mxu1 %v10002_v19  ;;  %1870 = vmatprep.subr.bf16.mxu0 %v10003_v51  ;;  %v10023_v48 = vld [vmem:[#allocation8 + $0x204] ss:$16 sps:$4 sm:$0xff]   ;;  %v10025_v19 = vld [vmem:[#allocation8] ss:$16 sps:$4 sm:$0xff]  }
  0x6f   :  { %1971 = vmatprep.subr.bf16.mxu1 %v10005_v49  ;;  %v10026_v51 = vld [vmem:[#allocation8 + $0x200] ss:$16 sps:$4 sm:$0xff]   ;;  %v10027_v49 = vld [vmem:[#allocation8 + $0x1e4] ss:$16 sps:$4 sm:$0xff]  }
  0x70   :  { %v10069_v56 = vld [vmem:[#allocation8 + $0x104] ss:$16 sps:$4 sm:$0xff]   ;;  %v10104_v57 = vld [vmem:[#allocation8 + $0x480] ss:$16 sps:$4 sm:$0xff]  }
  0x71   :  { %1871 = vmatpush1.bf16.msra.mxu0 %v10007_v16  ;;  %v10029_v16 = vld [vmem:[#allocation8 + $0x3e4] ss:$16 sps:$4 sm:$0xff]   ;;  %v11482_v24 = vld [vmem:[%s15746_s30 + $0x60] ss:$24 sps:$4 sm:$0xff]   ;;  %v11506_v26 = vld [vmem:[%s15746_s30 + $0x90] ss:$24 sps:$4 sm:$0xff]  }
  0x72   :  { %1972 = vmatpush1.bf16.msra.mxu1 %v10008_v52  ;;  %1872 = vmatprep.subr.bf16.mxu0 %v10009_v22  ;;  %v10031_v52 = vld [vmem:[#allocation8 + $0x1e0] ss:$16 sps:$4 sm:$0xff]   ;;  %v11498_v58 = vld [vmem:[%s15746_s30 + $0x9c] ss:$24 sps:$4 sm:$0xff]   ;;  %v11522_v60 = vld [vmem:[%s15746_s30 + $0xcc] ss:$24 sps:$4 sm:$0xff]  }
  0x73   :  { %1973 = vmatprep.subr.bf16.mxu1 %v10011_v20  ;;  %v10032_v22 = vld [vmem:[#allocation8 + $0x3e0] ss:$16 sps:$4 sm:$0xff]   ;;  %v10033_v20 = vld [vmem:[#allocation8 + $0x1c4] ss:$16 sps:$4 sm:$0xff]  }
  0x74   :  { %v11488_v25 = vld [vmem:[%s15746_s30 + $0x68] ss:$24 sps:$4 sm:$0xff]   ;;  %v11512_v27 = vld [vmem:[%s15746_s30 + $0x98] ss:$24 sps:$4 sm:$0xff]   ;;  %v11541_v29 = vld [vmem:[%s15746_s30 + $0xf4] ss:$24 sps:$4 sm:$0xff]  }
  0x75   :  { %1873 = vmatpush1.bf16.msra.mxu0 %v10013_v53  ;;  %v10035_v53 = vld [vmem:[#allocation8 + $0x3c4] ss:$16 sps:$4 sm:$0xff]   ;;  %v10122_v59 = vld [vmem:[#allocation8 + $0x440] ss:$16 sps:$4 sm:$0xff]  }
  0x76   :  { %1974 = vmatpush1.bf16.msra.mxu1 %v10014_v21  ;;  %1874 = vmatprep.subr.bf16.mxu0 %v10015_v54  ;;  %v10037_v21 = vld [vmem:[#allocation8 + $0x1c0] ss:$16 sps:$4 sm:$0xff]   ;;  %v11546_v63 = vld [vmem:[%s15746_s30 + $0xfc] ss:$24 sps:$4 sm:$0xff]  }
  0x77   :  { %1975 = vmatprep.subr.bf16.mxu1 %v10017_v55  ;;  %v10038_v54 = vld [vmem:[#allocation8 + $0x3c0] ss:$16 sps:$4 sm:$0xff]   ;;  %v10039_v55 = vld [vmem:[#allocation8 + $0x1a4] ss:$16 sps:$4 sm:$0xff]  }
  0x78   :  { %v10140_v61 = vld [vmem:[#allocation8 + $0x400] ss:$16 sps:$4 sm:$0xff]   ;;  %v10178_v31 = vld [vmem:[#allocation8 + $0x584] ss:$16 sps:$4 sm:$0xff]  }
  0x79   :  { %1875 = vmatpush1.bf16.msra.mxu0 %v10019_v17  ;;  %v10041_v17 = vld [vmem:[#allocation8 + $0x3a4] ss:$16 sps:$4 sm:$0xff]   ;;  %v11530_v28 = vld [vmem:[%s15746_s30 + $0xc0] ss:$24 sps:$4 sm:$0xff]  }
  0x7a   :  { %1976 = vmatpush1.bf16.msra.mxu1 %v10020_v50  ;;  %1876 = vmatprep.subr.bf16.mxu0 %v10021_v18  ;;  %v10043_v50 = vld [vmem:[#allocation8 + $0x1a0] ss:$16 sps:$4 sm:$0xff]  }
  0x7b   :  { %1977 = vmatprep.subr.bf16.mxu1 %v10023_v48  ;;  %v10044_v18 = vld [vmem:[#allocation8 + $0x3a0] ss:$16 sps:$4 sm:$0xff]   ;;  %v10045_v48 = vld [vmem:[#allocation8 + $0x184] ss:$16 sps:$4 sm:$0xff]  }
  0x7c   :  { %v10158_v62 = vld [vmem:[#allocation8 + $0x5c0] ss:$16 sps:$4 sm:$0xff]  }
  0x7d   :  { %1877 = vmatpush1.bf16.msra.mxu0 %v10025_v19  ;;  %v10047_v19 = vld [vmem:[#allocation8 + $0x384] ss:$16 sps:$4 sm:$0xff]   ;;  %v11558_v30 = vld [vmem:[%s15746_s30 + $0xf8] ss:$24 sps:$4 sm:$0xff]  }
  0x7e   :  { %1978 = vmatpush1.bf16.msra.mxu1 %v10026_v51  ;;  %1878 = vmatprep.subr.bf16.mxu0 %v10027_v49  ;;  %v10049_v51 = vld [vmem:[#allocation8 + $0x180] ss:$16 sps:$4 sm:$0xff]  }
  0x7f   :  { %1979 = vmatprep.subr.bf16.mxu1 %v10029_v16  ;;  %v10050_v49 = vld [vmem:[#allocation8 + $0x380] ss:$16 sps:$4 sm:$0xff]   ;;  %v10051_v16 = vld [vmem:[#allocation8 + $0x164] ss:$16 sps:$4 sm:$0xff]  }
  0x80   :  { %v10176_v1 = vld [vmem:[#allocation8 + $0x580] ss:$16 sps:$4 sm:$0xff]  }
  0x81   :  { %1879 = vmatpush2.bf16.msra.mxu0 %v10031_v52  ;;  %v11426_v52 = vld [vmem:[%s15746_s30 + $0x4] ss:$24 sps:$4 sm:$0xff]   ;;  %v10183_v35 = vld [vmem:[#allocation8 + $0x560] ss:$16 sps:$4 sm:$0xff]  }
  0x82   :  { %1980 = vmatpush2.bf16.msra.mxu1 %v10032_v22  ;;  %1880 = vmatprep.subr.bf16.mxu0 %v10033_v20  ;;  %v10053_v22 = vld [vmem:[#allocation8 + $0x364] ss:$16 sps:$4 sm:$0xff]  }
  0x83   :  { %1981 = vmatprep.subr.bf16.mxu1 %v10035_v53  ;;  %v10080_v20 = vld [vmem:[%s15746_s30 + $0xc] ss:$24 sps:$4 sm:$0xff]   ;;  %1894 = vmatprep.mubr.bf16.mxu0 %v11426_v52  ;;  %v10055_v53 = vld [vmem:[#allocation8 + $0x160] ss:$16 sps:$4 sm:$0xff]  }
  0x84   :  { %1995 = vmatprep.mubr.bf16.mxu1 %v10080_v20  ;;  %v10086_v20 = vld [vmem:[#allocation8 + $0xec] ss:$16 sps:$4 sm:$0xff]  }
  0x85   :  { %1881 = vmatpush2.bf16.msra.mxu0 %v10037_v21  ;;  %v10056_v21 = vld [vmem:[#allocation8 + $0x360] ss:$16 sps:$4 sm:$0xff]  }
  0x86   :  { %1982 = vmatpush2.bf16.msra.mxu1 %v10038_v54  ;;  %1882 = vmatprep.subr.bf16.mxu0 %v10039_v55  ;;  %v10057_v54 = vld [vmem:[#allocation8 + $0x144] ss:$16 sps:$4 sm:$0xff]  }
  0x87   :  { %1983 = vmatprep.subr.bf16.mxu1 %v10041_v17  ;;  %v10059_v55 = vld [vmem:[#allocation8 + $0x344] ss:$16 sps:$4 sm:$0xff]   ;;  %v10061_v17 = vld [vmem:[#allocation8 + $0x140] ss:$16 sps:$4 sm:$0xff]  }
  0x89   :  { %1883 = vmatpush2.bf16.msra.mxu0 %v10043_v50  ;;  %v10062_v50 = vld [vmem:[#allocation8 + $0x340] ss:$16 sps:$4 sm:$0xff]  }
  0x8a   :  { %1984 = vmatpush2.bf16.msra.mxu1 %v10044_v18  ;;  %1884 = vmatprep.subr.bf16.mxu0 %v10045_v48  ;;  %v10063_v18 = vld [vmem:[#allocation8 + $0x124] ss:$16 sps:$4 sm:$0xff]  }
  0x8b   :  { %1985 = vmatprep.subr.bf16.mxu1 %v10047_v19  ;;  %v10065_v48 = vld [vmem:[#allocation8 + $0x324] ss:$16 sps:$4 sm:$0xff]   ;;  %v10067_v19 = vld [vmem:[#allocation8 + $0x120] ss:$16 sps:$4 sm:$0xff]  }
  0x8d   :  { %1885 = vmatpush2.bf16.msra.mxu0 %v10049_v51  ;;  %v10071_v51 = vld [vmem:[#allocation8 + $0x304] ss:$16 sps:$4 sm:$0xff]  }
  0x8e   :  { %1986 = vmatpush2.bf16.msra.mxu1 %v10050_v49  ;;  %1886 = vmatprep.subr.bf16.mxu0 %v10051_v16  ;;  %v10073_v49 = vld [vmem:[#allocation8 + $0x100] ss:$16 sps:$4 sm:$0xff]  }
  0x8f   :  { %1987 = vmatprep.subr.bf16.mxu1 %v10053_v22  ;;  %v10074_v16 = vld [vmem:[#allocation8 + $0x300] ss:$16 sps:$4 sm:$0xff]   ;;  %v10083_v22 = vld [vmem:[#allocation8 + $0x4e4] ss:$16 sps:$4 sm:$0xff]  }
  0x91   :  { %1887 = vmatpush2.bf16.msra.mxu0 %v10055_v53  ;;  %v11435_v53 = vld [vmem:[%s15746_s30] ss:$24 sps:$4 sm:$0xff]  }
  0x92   :  { %1988 = vmatpush2.bf16.msra.mxu1 %v10056_v21  ;;  %1888 = vmatprep.subr.bf16.mxu0 %v10057_v54  ;;  %v11440_v21 = vld [vmem:[%s15746_s30 + $0x8] ss:$24 sps:$4 sm:$0xff]  }
  0x93   :  { %1989 = vmatprep.subr.bf16.mxu1 %v10059_v55  ;;  %v10081_v54 = vld [vmem:[#allocation8 + $0x4e0] ss:$16 sps:$4 sm:$0xff]   ;;  %v10084_v55 = vld [vmem:[#allocation8 + $0xe8] ss:$16 sps:$4 sm:$0xff]  }
  0x95   :  { %1889 = vmatpush2.bf16.msra.mxu0 %v10061_v17  ;;  %v10089_v17 = vld [vmem:[#allocation8 + $0x4c4] ss:$16 sps:$4 sm:$0xff]  }
  0x96   :  { %1990 = vmatpush2.bf16.msra.mxu1 %v10062_v50  ;;  %1890 = vmatprep.subr.bf16.mxu0 %v10063_v18  ;;  %v11450_v50 = vld [vmem:[%s15746_s30 + $0x3c] ss:$24 sps:$4 sm:$0xff]   ;;  %v10087_v18 = vld [vmem:[#allocation8 + $0x4c0] ss:$16 sps:$4 sm:$0xff]  }
  0x97   :  { %1991 = vmatprep.subr.bf16.mxu1 %v10065_v48  ;;  %v10090_v48 = vld [vmem:[#allocation8 + $0xc8] ss:$16 sps:$4 sm:$0xff]  }
  0x99   :  { %1891 = vmatpush2.bf16.msra.mxu0 %v10067_v19  ;;  %v10095_v19 = vld [vmem:[#allocation8 + $0x4a4] ss:$16 sps:$4 sm:$0xff]  }
  0x9a   :  { %1992 = vmatpush2.bf16.msra.mxu1 %v10068_v23  ;;  %1892 = vmatprep.subr.bf16.mxu0 %v10069_v56  ;;  %v10092_v23 = vld [vmem:[#allocation8 + $0xcc] ss:$16 sps:$4 sm:$0xff]  }
  0x9b   :  { %1993 = vmatprep.subr.bf16.mxu1 %v10071_v51  ;;  %v11445_v56 = vld [vmem:[%s15746_s30 + $0x34] ss:$24 sps:$4 sm:$0xff]  }
  0x9c   :  { %v10098_v51 = vld [vmem:[#allocation8 + $0xac] ss:$16 sps:$4 sm:$0xff]  }
  0x9d   :  { %1893 = vmatpush2.bf16.msra.mxu0 %v10073_v49  ;;  %v10093_v49 = vld [vmem:[#allocation8 + $0x4a0] ss:$16 sps:$4 sm:$0xff]  }
  0x9e   :  { %1994 = vmatpush2.bf16.msra.mxu1 %v10074_v16  ;;  %2064 = vmatprep.subr.bf16.mxu0 %v10083_v22  ;;  %v11458_v16 = vld [vmem:[%s15746_s30 + $0x30] ss:$24 sps:$4 sm:$0xff]  }
  0x9f   :  { %2165 = vmatprep.subr.bf16.mxu1 %v10086_v20  ;;  %v11464_v22 = vld [vmem:[%s15746_s30 + $0x38] ss:$24 sps:$4 sm:$0xff]  }
  0xa0   :  { %1895 = vmatmul.mubr.bf16.vlgmr.msra.gmra.mxu0 %v11435_v53  ;;  %v10096_v20 = vld [vmem:[#allocation8 + $0xa8] ss:$16 sps:$4 sm:$0xff]  }
  0xa1   :  { %1996 = vmatmul.mubr.bf16.vlgmr.msra.gmra.mxu1 %v11440_v21  ;;  %2065 = vmatpush1.bf16.msra.mxu0 %v10081_v54  ;;  %v10106_v54 = vld [vmem:[#allocation8 + $0x484] ss:$16 sps:$4 sm:$0xff]  }
  0xa2   :  { %2166 = vmatpush1.bf16.msra.mxu1 %v10084_v55  ;;  %2066 = vmatprep.subr.bf16.mxu0 %v10089_v17  ;;  %v10109_v55 = vld [vmem:[#allocation8 + $0x8c] ss:$16 sps:$4 sm:$0xff]  }
  0xa3   :  { %2167 = vmatprep.subr.bf16.mxu1 %v10092_v23  ;;  %1904 = vmatprep.mubr.bf16.mxu0 %v11445_v56  ;;  %v11469_v17 = vld [vmem:[%s15746_s30 + $0x64] ss:$24 sps:$4 sm:$0xff]  }
  0xa4   :  { %2005 = vmatprep.mubr.bf16.mxu1 %v11450_v50  ;;  %v11474_v23 = vld [vmem:[%s15746_s30 + $0x6c] ss:$24 sps:$4 sm:$0xff]  }
  0xa5   :  { %2067 = vmatpush1.bf16.msra.mxu0 %v10087_v18  ;;  %v10107_v18 = vld [vmem:[#allocation8 + $0x88] ss:$16 sps:$4 sm:$0xff]  }
  0xa6   :  { %2168 = vmatpush1.bf16.msra.mxu1 %v10090_v48  ;;  %2068 = vmatprep.subr.bf16.mxu0 %v10095_v19  ;;  %v10113_v48 = vld [vmem:[#allocation8 + $0x464] ss:$16 sps:$4 sm:$0xff]   ;;  %v10116_v19 = vld [vmem:[#allocation8 + $0x6c] ss:$16 sps:$4 sm:$0xff]  }
  0xa7   :  { %2169 = vmatprep.subr.bf16.mxu1 %v10098_v51  ;;  %v10111_v51 = vld [vmem:[#allocation8 + $0x460] ss:$16 sps:$4 sm:$0xff]  }
  0xa8   :  { %1905 = vmatmul.mubr.bf16.gmra.mxu0 %v11458_v16 }
  0xa9   :  { %2006 = vmatmul.mubr.bf16.gmra.mxu1 %v11464_v22  ;;  %2069 = vmatpush1.bf16.msra.mxu0 %v10093_v49  ;;  %v10114_v49 = vld [vmem:[#allocation8 + $0x68] ss:$16 sps:$4 sm:$0xff]  }
  0xaa   :  { %2170 = vmatpush1.bf16.msra.mxu1 %v10096_v20  ;;  %2070 = vmatprep.subr.bf16.mxu0 %v10106_v54  ;;  %v10124_v20 = vld [vmem:[#allocation8 + $0x444] ss:$16 sps:$4 sm:$0xff]   ;;  %v10127_v54 = vld [vmem:[#allocation8 + $0x4c] ss:$16 sps:$4 sm:$0xff]  }
  0xab   :  { %2171 = vmatprep.subr.bf16.mxu1 %v10109_v55  ;;  %1914 = vmatprep.mubr.bf16.mxu0 %v11469_v17  ;;  %v11493_v55 = vld [vmem:[%s15746_s30 + $0x94] ss:$24 sps:$4 sm:$0xff]  }
  0xac   :  { %2015 = vmatprep.mubr.bf16.mxu1 %v11474_v23 }
  0xad   :  { %2071 = vmatpush1.bf16.msra.mxu0 %v10104_v57  ;;  %v10125_v57 = vld [vmem:[#allocation8 + $0x48] ss:$16 sps:$4 sm:$0xff]  }
  0xae   :  { %2172 = vmatpush1.bf16.msra.mxu1 %v10107_v18  ;;  %2072 = vmatprep.subr.bf16.mxu0 %v10113_v48  ;;  %v10131_v18 = vld [vmem:[#allocation8 + $0x424] ss:$16 sps:$4 sm:$0xff]   ;;  %v10134_v48 = vld [vmem:[#allocation8 + $0x2c] ss:$16 sps:$4 sm:$0xff]  }
  0xaf   :  { %2173 = vmatprep.subr.bf16.mxu1 %v10116_v19  ;;  %v10129_v19 = vld [vmem:[#allocation8 + $0x420] ss:$16 sps:$4 sm:$0xff]  }
  0xb0   :  { %1915 = vmatmul.mubr.bf16.gmra.mxu0 %v11482_v24 }
  0xb1   :  { %2016 = vmatmul.mubr.bf16.gmra.mxu1 %v11488_v25  ;;  %2073 = vmatpush1.bf16.msra.mxu0 %v10111_v51  ;;  %v10132_v51 = vld [vmem:[#allocation8 + $0x28] ss:$16 sps:$4 sm:$0xff]  }
  0xb2   :  { %2174 = vmatpush1.bf16.msra.mxu1 %v10114_v49  ;;  %2074 = vmatprep.subr.bf16.mxu0 %v10124_v20  ;;  %v10142_v49 = vld [vmem:[#allocation8 + $0x404] ss:$16 sps:$4 sm:$0xff]   ;;  %v10145_v20 = vld [vmem:[#allocation8 + $0xc] ss:$16 sps:$4 sm:$0xff]  }
  0xb3   :  { %2175 = vmatprep.subr.bf16.mxu1 %v10127_v54  ;;  %1924 = vmatprep.mubr.bf16.mxu0 %v11493_v55  ;;  %v11517_v54 = vld [vmem:[%s15746_s30 + $0xc4] ss:$24 sps:$4 sm:$0xff]  }
  0xb4   :  { %2025 = vmatprep.mubr.bf16.mxu1 %v11498_v58 }
  0xb5   :  { %2075 = vmatpush1.bf16.msra.mxu0 %v10122_v59  ;;  %v10143_v59 = vld [vmem:[#allocation8 + $0x8] ss:$16 sps:$4 sm:$0xff]  }
  0xb6   :  { %2176 = vmatpush1.bf16.msra.mxu1 %v10125_v57  ;;  %2076 = vmatprep.subr.bf16.mxu0 %v10131_v18  ;;  %v10149_v57 = vld [vmem:[#allocation8 + $0x5e4] ss:$16 sps:$4 sm:$0xff]   ;;  %v10152_v18 = vld [vmem:[#allocation8 + $0x1ec] ss:$16 sps:$4 sm:$0xff]  }
  0xb7   :  { %2177 = vmatprep.subr.bf16.mxu1 %v10134_v48  ;;  %v10147_v48 = vld [vmem:[#allocation8 + $0x5e0] ss:$16 sps:$4 sm:$0xff]  }
  0xb8   :  { %1925 = vmatmul.mubr.bf16.gmra.mxu0 %v11506_v26 }
  0xb9   :  { %2026 = vmatmul.mubr.bf16.gmra.mxu1 %v11512_v27  ;;  %2077 = vmatpush1.bf16.msra.mxu0 %v10129_v19  ;;  %v11536_v19 = vld [vmem:[%s15746_s30 + $0xc8] ss:$24 sps:$4 sm:$0xff]  }
  0xba   :  { %2178 = vmatpush1.bf16.msra.mxu1 %v10132_v51  ;;  %2078 = vmatprep.subr.bf16.mxu0 %v10142_v49  ;;  %v10150_v51 = vld [vmem:[#allocation8 + $0x1e8] ss:$16 sps:$4 sm:$0xff]   ;;  %v10160_v49 = vld [vmem:[#allocation8 + $0x5c4] ss:$16 sps:$4 sm:$0xff]  }
  0xbb   :  { %2179 = vmatprep.subr.bf16.mxu1 %v10145_v20  ;;  %1934 = vmatprep.mubr.bf16.mxu0 %v11517_v54  ;;  %v10163_v20 = vld [vmem:[#allocation8 + $0x1cc] ss:$16 sps:$4 sm:$0xff]  }
  0xbc   :  { %2035 = vmatprep.mubr.bf16.mxu1 %v11522_v60 }
  0xbd   :  { %2079 = vmatpush1.bf16.msra.mxu0 %v10140_v61  ;;  %v10161_v61 = vld [vmem:[#allocation8 + $0x1c8] ss:$16 sps:$4 sm:$0xff]  }
  0xbe   :  { %2180 = vmatpush1.bf16.msra.mxu1 %v10143_v59  ;;  %2080 = vmatprep.subr.bf16.mxu0 %v10149_v57  ;;  %v10167_v59 = vld [vmem:[#allocation8 + $0x5a4] ss:$16 sps:$4 sm:$0xff]   ;;  %v10170_v57 = vld [vmem:[#allocation8 + $0x1ac] ss:$16 sps:$4 sm:$0xff]  }
  0xbf   :  { %2181 = vmatprep.subr.bf16.mxu1 %v10152_v18  ;;  %v11553_v18 = vld [vmem:[%s15746_s30 + $0xf0] ss:$24 sps:$4 sm:$0xff]  }
  0xc0   :  { %1935 = vmatmul.mubr.bf16.gmra.mxu0 %v11530_v28 }
  0xc1   :  { %2036 = vmatmul.mubr.bf16.gmra.mxu1 %v11536_v19  ;;  %2081 = vmatpush2.bf16.msra.mxu0 %v10147_v48  ;;  %v484_v48 = vld [vmem:[%s15746_s30 + $0x120] sm:$0x33] }
  0xc2   :  { %2182 = vmatpush2.bf16.msra.mxu1 %v10150_v51  ;;  %2082 = vmatprep.subr.bf16.mxu0 %v10160_v49  ;;  %v485_v51 = vld [vmem:[%s15746_s30 + $0x128] sm:$0x33]  ;;  %v10165_v49 = vld [vmem:[#allocation8 + $0x5a0] ss:$16 sps:$4 sm:$0xff]   ;;  %v11568_v33 = vcombine.high %v484_v48, %v484_v48 }
  0xc3   :  { %2183 = vmatprep.subr.bf16.mxu1 %v10163_v20  ;;  %1944 = vmatprep.mubr.bf16.mxu0 %v11541_v29  ;;  %v10168_v20 = vld [vmem:[#allocation8 + $0x1a8] ss:$16 sps:$4 sm:$0xff]   ;;  %v11570_v0 = vcombine.high %v485_v51, %v485_v51 }
  0xc4   :  { %2045 = vmatprep.mubr.bf16.mxu1 %v11546_v63 }
  0xc5   :  { %2083 = vmatpush2.bf16.msra.mxu0 %v10158_v62  ;;  %v10185_v62 = vld [vmem:[#allocation8 + $0x564] ss:$16 sps:$4 sm:$0xff]  }
  0xc6   :  { %2184 = vmatpush2.bf16.msra.mxu1 %v10161_v61  ;;  %2084 = vmatprep.subr.bf16.mxu0 %v10167_v59  ;;  %v10188_v61 = vld [vmem:[#allocation8 + $0x16c] ss:$16 sps:$4 sm:$0xff]   ;;  %v11576_v59 = vcombine.low %v484_v48, %v484_v48 }
  0xc7   :  { %2185 = vmatprep.subr.bf16.mxu1 %v10170_v57  ;;  %v11578_v57 = vcombine.low %v485_v51, %v485_v51  ;;  %v10204_v48 = vld [vmem:[#allocation8 + $0x12c] ss:$16 sps:$4 sm:$0xff]   ;;  %v10199_v51 = vld [vmem:[#allocation8 + $0x520] ss:$16 sps:$4 sm:$0xff]  }
  0xc8   :  { %1945 = vmatmul.mubr.bf16.gmra.mxu0 %v11553_v18 }
  0xc9   :  { %2046 = vmatmul.mubr.bf16.gmra.mxu1 %v11558_v30  ;;  %2085 = vmatpush2.bf16.msra.mxu0 %v10165_v49  ;;  %v10194_v49 = vld [vmem:[#allocation8 + $0x544] ss:$16 sps:$4 sm:$0xff]  }
  0xca   :  { %2186 = vmatpush2.bf16.msra.mxu1 %v10168_v20  ;;  %2086 = vmatprep.subr.bf16.mxu0 %v10178_v31  ;;  %v10197_v20 = vld [vmem:[#allocation8 + $0x14c] ss:$16 sps:$4 sm:$0xff]  }
  0xcb   :  { %2187 = vmatprep.subr.bf16.mxu1 %v10181_v32  ;;  %1954 = vmatprep.mubr.bf16.mxu0 %v11568_v33  ;;  %v11583_v31 = vld [vmem:[%s15746_s30 + $0x14] ss:$24 sps:$4 sm:$0xff]   ;;  %v10192_v32 = vld [vmem:[#allocation8 + $0x540] ss:$16 sps:$4 sm:$0xff]  }
  0xcc   :  { %2055 = vmatprep.mubr.bf16.mxu1 %v11570_v0 }
  0xcd   :  { %2087 = vmatpush2.bf16.msra.mxu0 %v10176_v1  ;;  %v10195_v1 = vld [vmem:[#allocation8 + $0x148] ss:$16 sps:$4 sm:$0xff]  }
  0xce   :  { %2188 = vmatpush2.bf16.msra.mxu1 %v10179_v34  ;;  %2088 = vmatprep.subr.bf16.mxu0 %v10185_v62  ;;  %v10201_v34 = vld [vmem:[#allocation8 + $0x524] ss:$16 sps:$4 sm:$0xff]   ;;  %v10202_v62 = vld [vmem:[#allocation8 + $0x128] ss:$16 sps:$4 sm:$0xff]  }
  0xcf   :  { %2189 = vmatprep.subr.bf16.mxu1 %v10188_v61  ;;  %v10207_v61 = vld [vmem:[#allocation8 + $0x504] ss:$16 sps:$4 sm:$0xff]  }
  0xd0   :  { %1955 = vmatmul.mubr.bf16.gmra.mxu0 %v11576_v59 }
  0xd1   :  { %2056 = vmatmul.mubr.bf16.gmra.mxu1 %v11578_v57  ;;  %2089 = vmatpush2.bf16.msra.mxu0 %v10183_v35  ;;  %v10208_v35 = vld [vmem:[#allocation8 + $0x108] ss:$16 sps:$4 sm:$0xff]  }
  0xd2   :  { %2190 = vmatpush2.bf16.msra.mxu1 %v10186_v2  ;;  %2090 = vmatprep.subr.bf16.mxu0 %v10194_v49  ;;  %v10205_v2 = vld [vmem:[#allocation8 + $0x500] ss:$16 sps:$4 sm:$0xff]   ;;  %v10216_v49 = vld [vmem:[#allocation8 + $0x2ec] ss:$16 sps:$4 sm:$0xff]  }
  0xd3   :  { %2191 = vmatprep.subr.bf16.mxu1 %v10197_v20  ;;  %2096 = vmatprep.mubr.bf16.mxu0 %v11583_v31  ;;  %v10219_v20 = vld [vmem:[#allocation8 + $0x4ec] ss:$16 sps:$4 sm:$0xff]  }
  0xd4   :  { %2197 = vmatprep.mubr.bf16.mxu1 %v11426_v52  ;;  %v11592_v52 = vld [vmem:[%s15746_s30 + $0x10] ss:$24 sps:$4 sm:$0xff]  }
  0xd5   :  { %2091 = vmatpush2.bf16.msra.mxu0 %v10192_v32  ;;  %v10214_v32 = vld [vmem:[#allocation8 + $0x2e8] ss:$16 sps:$4 sm:$0xff]  }
  0xd6   :  { %2192 = vmatpush2.bf16.msra.mxu1 %v10195_v1  ;;  %2092 = vmatprep.subr.bf16.mxu0 %v10201_v34  ;;  %v10217_v1 = vld [vmem:[#allocation8 + $0x4e8] ss:$16 sps:$4 sm:$0xff]   ;;  %v10222_v34 = vld [vmem:[#allocation8 + $0x2cc] ss:$16 sps:$4 sm:$0xff]  }
  0xd7   :  { %2193 = vmatprep.subr.bf16.mxu1 %v10204_v48  ;;  %v10225_v48 = vld [vmem:[#allocation8 + $0x4cc] ss:$16 sps:$4 sm:$0xff]  }
  0xd9   :  { %2093 = vmatpush2.bf16.msra.mxu0 %v10199_v51  ;;  %v11597_v51 = vld [vmem:[%s15746_s30 + $0x44] ss:$24 sps:$4 sm:$0xff]  }
  0xda   :  { %2194 = vmatpush2.bf16.msra.mxu1 %v10202_v62  ;;  %2094 = vmatprep.subr.bf16.mxu0 %v10207_v61  ;;  %v10223_v62 = vld [vmem:[#allocation8 + $0x4c8] ss:$16 sps:$4 sm:$0xff]   ;;  %v10231_v61 = vld [vmem:[#allocation8 + $0x2ac] ss:$16 sps:$4 sm:$0xff]  }
  0xdb   :  { %2195 = vmatprep.subr.bf16.mxu1 %v10210_v3  ;;  %v10220_v3 = vld [vmem:[#allocation8 + $0x2c8] ss:$16 sps:$4 sm:$0xff]  }
  0xdd   :  { %2095 = vmatpush2.bf16.msra.mxu0 %v10205_v2  ;;  %v10234_v2 = vld [vmem:[#allocation8 + $0x4ac] ss:$16 sps:$4 sm:$0xff]  }
  0xde   :  { %2196 = vmatpush2.bf16.msra.mxu1 %v10208_v35  ;;  %2266 = vmatprep.subr.bf16.mxu0 %v10216_v49  ;;  %v11606_v35 = vld [vmem:[%s15746_s30 + $0x40] ss:$24 sps:$4 sm:$0xff]  }
  0xdf   :  { %2367 = vmatprep.subr.bf16.mxu1 %v10219_v20  ;;  %v10232_v49 = vld [vmem:[#allocation8 + $0x4a8] ss:$16 sps:$4 sm:$0xff]   ;;  %v10237_v20 = vld [vmem:[#allocation8 + $0x28c] ss:$16 sps:$4 sm:$0xff]  }
  0xe0   :  { %2097 = vmatmul.mubr.bf16.vlgmr.msra.gmra.mxu0 %v11592_v52 }
  0xe1   :  { %2198 = vmatmul.mubr.bf16.vlgmr.msra.gmra.mxu1 %v11435_v53  ;;  %2267 = vmatpush1.bf16.msra.mxu0 %v10214_v32  ;;  %v10229_v53 = vld [vmem:[#allocation8 + $0x2a8] ss:$16 sps:$4 sm:$0xff]   ;;  %v10240_v32 = vld [vmem:[#allocation8 + $0x48c] ss:$16 sps:$4 sm:$0xff]  }
  0xe2   :  { %2368 = vmatpush1.bf16.msra.mxu1 %v10217_v1  ;;  %2268 = vmatprep.subr.bf16.mxu0 %v10222_v34  ;;  %v11611_v1 = vld [vmem:[%s15746_s30 + $0x74] ss:$24 sps:$4 sm:$0xff]   ;;  %v10238_v34 = vld [vmem:[#allocation8 + $0x488] ss:$16 sps:$4 sm:$0xff]  }
  0xe3   :  { %2369 = vmatprep.subr.bf16.mxu1 %v10225_v48  ;;  %2106 = vmatprep.mubr.bf16.mxu0 %v11597_v51  ;;  %v10246_v48 = vld [vmem:[#allocation8 + $0x26c] ss:$16 sps:$4 sm:$0xff]  }
  0xe4   :  { %2207 = vmatprep.mubr.bf16.mxu1 %v11445_v56  ;;  %v10235_v56 = vld [vmem:[#allocation8 + $0x288] ss:$16 sps:$4 sm:$0xff]  }
  0xe5   :  { %2269 = vmatpush1.bf16.msra.mxu0 %v10220_v3  ;;  %v10249_v3 = vld [vmem:[#allocation8 + $0x46c] ss:$16 sps:$4 sm:$0xff]  }
  0xe6   :  { %2370 = vmatpush1.bf16.msra.mxu1 %v10223_v62  ;;  %2270 = vmatprep.subr.bf16.mxu0 %v10231_v61  ;;  %v11620_v62 = vld [vmem:[%s15746_s30 + $0x70] ss:$24 sps:$4 sm:$0xff]  }
  0xe7   :  { %2371 = vmatprep.subr.bf16.mxu1 %v10234_v2  ;;  %v10244_v61 = vld [vmem:[#allocation8 + $0x268] ss:$16 sps:$4 sm:$0xff]   ;;  %v10252_v2 = vld [vmem:[#allocation8 + $0x24c] ss:$16 sps:$4 sm:$0xff]  }
  0xe8   :  { %2107 = vmatmul.mubr.bf16.gmra.mxu0 %v11606_v35 }
  0xe9   :  { %2208 = vmatmul.mubr.bf16.gmra.mxu1 %v11458_v16  ;;  %2271 = vmatpush1.bf16.msra.mxu0 %v10229_v53  ;;  %v10247_v16 = vld [vmem:[#allocation8 + $0x468] ss:$16 sps:$4 sm:$0xff]   ;;  %v10255_v53 = vld [vmem:[#allocation8 + $0x44c] ss:$16 sps:$4 sm:$0xff]  }
  0xea   :  { %2372 = vmatpush1.bf16.msra.mxu1 %v10232_v49  ;;  %2272 = vmatprep.subr.bf16.mxu0 %v10237_v20  ;;  %v11625_v49 = vld [vmem:[%s15746_s30 + $0xa4] ss:$24 sps:$4 sm:$0xff]   ;;  %v10253_v20 = vld [vmem:[#allocation8 + $0x448] ss:$16 sps:$4 sm:$0xff]  }
  0xeb   :  { %2373 = vmatprep.subr.bf16.mxu1 %v10240_v32  ;;  %2116 = vmatprep.mubr.bf16.mxu0 %v11611_v1  ;;  %v10261_v32 = vld [vmem:[#allocation8 + $0x22c] ss:$16 sps:$4 sm:$0xff]  }
  0xec   :  { %2217 = vmatprep.mubr.bf16.mxu1 %v11469_v17  ;;  %v10250_v17 = vld [vmem:[#allocation8 + $0x248] ss:$16 sps:$4 sm:$0xff]  }
  0xed   :  { %2273 = vmatpush1.bf16.msra.mxu0 %v10235_v56  ;;  %v10264_v56 = vld [vmem:[#allocation8 + $0x42c] ss:$16 sps:$4 sm:$0xff]  }
  0xee   :  { %2374 = vmatpush1.bf16.msra.mxu1 %v10238_v34  ;;  %2274 = vmatprep.subr.bf16.mxu0 %v10246_v48  ;;  %v11634_v34 = vld [vmem:[%s15746_s30 + $0xa0] ss:$24 sps:$4 sm:$0xff]  }
  0xef   :  { %2375 = vmatprep.subr.bf16.mxu1 %v10249_v3  ;;  %v10262_v48 = vld [vmem:[#allocation8 + $0x428] ss:$16 sps:$4 sm:$0xff]   ;;  %v10267_v3 = vld [vmem:[#allocation8 + $0x20c] ss:$16 sps:$4 sm:$0xff]  }
  0xf0   :  { %2117 = vmatmul.mubr.bf16.gmra.mxu0 %v11620_v62 }
  0xf1   :  { %2218 = vmatmul.mubr.bf16.gmra.mxu1 %v11482_v24  ;;  %2275 = vmatpush1.bf16.msra.mxu0 %v10244_v61  ;;  %v10259_v24 = vld [vmem:[#allocation8 + $0x228] ss:$16 sps:$4 sm:$0xff]   ;;  %v10270_v61 = vld [vmem:[#allocation8 + $0x40c] ss:$16 sps:$4 sm:$0xff]  }
  0xf2   :  { %2376 = vmatpush1.bf16.msra.mxu1 %v10247_v16  ;;  %2276 = vmatprep.subr.bf16.mxu0 %v10252_v2 }
  0xf3   :  { %2377 = vmatprep.subr.bf16.mxu1 %v10255_v53  ;;  %2126 = vmatprep.mubr.bf16.mxu0 %v11625_v49 }
  0xf4   :  { %2227 = vmatprep.mubr.bf16.mxu1 %v11493_v55 }
  0xf5   :  { %2277 = vmatpush1.bf16.msra.mxu0 %v10250_v17 }
  0xf6   :  { %2378 = vmatpush1.bf16.msra.mxu1 %v10253_v20  ;;  %2278 = vmatprep.subr.bf16.mxu0 %v10261_v32 }
  0xf7   :  { %2379 = vmatprep.subr.bf16.mxu1 %v10264_v56 }
  0xf8   :  { %410 = vsyncadd [#allocation7 + $0x2], 1024  ;;  %v11639_v16 = vld [vmem:[%s15746_s30 + $0xd4] ss:$24 sps:$4 sm:$0xff]   ;;  %2127 = vmatmul.mubr.bf16.gmra.mxu0 %v11634_v34  ;;  %v10265_v55 = vld [vmem:[#allocation8 + $0x208] ss:$16 sps:$4 sm:$0xff]  }
  0xf9   :  { %2228 = vmatmul.mubr.bf16.gmra.mxu1 %v11506_v26  ;;  %2279 = vmatpush1.bf16.msra.mxu0 %v10259_v24  ;;  %v10268_v2 = vld [vmem:[#allocation8 + $0x408] ss:$16 sps:$4 sm:$0xff]   ;;  %v10276_v53 = vld [vmem:[#allocation8 + $0x3ec] ss:$16 sps:$4 sm:$0xff]   ;;  %s15749_s28 = sld [smem:[#allocation136_spill]]  ;;  %vm2528_vm0 = vcmask 1043456  }
  0xfa   :  { %2380 = vmatpush1.bf16.msra.mxu1 %v10262_v48  ;;  %2280 = vmatprep.subr.bf16.mxu0 %v10267_v3  ;;  %v10279_v17 = vld [vmem:[#allocation8 + $0x5ec] ss:$16 sps:$4 sm:$0xff]   ;;  %v11648_v20 = vld [vmem:[%s15746_s30 + $0xd0] ss:$24 sps:$4 sm:$0xff]   ;;  %vm10892_vm1 = vmmov 0   ;;  %vm2685_vm2 = vcmask 818176  }
  0xfb   :  { %2381 = vmatprep.subr.bf16.mxu1 %v10270_v61  ;;  %2136 = vmatprep.mubr.bf16.mxu0 %v11639_v16  ;;  %v10274_v26 = vld [vmem:[#allocation8 + $0x3e8] ss:$16 sps:$4 sm:$0xff]   ;;  %v10282_v56 = vld [vmem:[#allocation8 + $0x3cc] ss:$16 sps:$4 sm:$0xff]   ;;  %s15824_s4 = sld [smem:[#allocation137_spill]]  ;;  %s10895_s17 = smov [#allocation6]  }
  0xfc   :  { %2237 = vmatprep.mubr.bf16.mxu1 %v11517_v54  ;;  %v10277_v32 = vld [vmem:[#allocation8 + $0x5e8] ss:$16 sps:$4 sm:$0xff]   ;;  %v10285_v24 = vld [vmem:[#allocation8 + $0x5cc] ss:$16 sps:$4 sm:$0xff]   ;;  %s15825_s16 = sld [smem:[#allocation138_spill]] }
  0xfd   :  { %2281 = vmatpush1.bf16.msra.mxu0 %v10265_v55  ;;  %v11653_v48 = vld [vmem:[%s15746_s30 + $0x104] ss:$24 sps:$4 sm:$0xff]   ;;  %v10280_v54 = vld [vmem:[#allocation8 + $0x3c8] ss:$16 sps:$4 sm:$0xff]  }
  0xfe   :  { %2382 = vmatpush1.bf16.msra.mxu1 %v10268_v2  ;;  %2282 = vmatprep.subr.bf16.mxu0 %v10276_v53  ;;  %v10283_v3 = vld [vmem:[#allocation8 + $0x5c8] ss:$16 sps:$4 sm:$0xff]   ;;  %v10291_v61 = vld [vmem:[#allocation8 + $0x3ac] ss:$16 sps:$4 sm:$0xff]  }
  0xff   :  { %2383 = vmatprep.subr.bf16.mxu1 %v10279_v17  ;;  %v10294_v55 = vld [vmem:[#allocation8 + $0x5ac] ss:$16 sps:$4 sm:$0xff]   ;;  %v11662_v2 = vld [vmem:[%s15746_s30 + $0x100] ss:$24 sps:$4 sm:$0xff]  }
 0x100   :  { %2137 = vmatmul.mubr.bf16.gmra.mxu0 %v11648_v20  ;;  %v10289_v53 = vld [vmem:[#allocation8 + $0x3a8] ss:$16 sps:$4 sm:$0xff]  }
 0x101   :  { %2238 = vmatmul.mubr.bf16.gmra.mxu1 %v11530_v28  ;;  %2283 = vmatpush2.bf16.msra.mxu0 %v10274_v26  ;;  %v486_v28 = vld [vmem:[%s15746_s30 + $0x130] sm:$0x33]  ;;  %v10292_v17 = vld [vmem:[#allocation8 + $0x5a8] ss:$16 sps:$4 sm:$0xff]   ;;  %v10297_v26 = vld [vmem:[#allocation8 + $0x38c] ss:$16 sps:$4 sm:$0xff]  }
 0x102   :  { %2384 = vmatpush2.bf16.msra.mxu1 %v10277_v32  ;;  %2284 = vmatprep.subr.bf16.mxu0 %v10282_v56  ;;  %v10300_v32 = vld [vmem:[#allocation8 + $0x58c] ss:$16 sps:$4 sm:$0xff]   ;;  %v11667_v56 = vcombine.high %v486_v28, %v486_v28  ;;  %v10306_v36 = vld [vmem:[#allocation8 + $0x568] ss:$16 sps:$4 sm:$0xff]  }
 0x103   :  { %2385 = vmatprep.subr.bf16.mxu1 %v10285_v24  ;;  %2146 = vmatprep.mubr.bf16.mxu0 %v11653_v48  ;;  %v10298_v24 = vld [vmem:[#allocation8 + $0x588] ss:$16 sps:$4 sm:$0xff]  }
 0x104   :  { %2247 = vmatprep.mubr.bf16.mxu1 %v11541_v29  ;;  %v10295_v29 = vld [vmem:[#allocation8 + $0x388] ss:$16 sps:$4 sm:$0xff]  }
 0x105   :  { %2285 = vmatpush2.bf16.msra.mxu0 %v10280_v54  ;;  %v10305_v54 = vld [vmem:[#allocation8 + $0x36c] ss:$16 sps:$4 sm:$0xff]  }
 0x106   :  { %2386 = vmatpush2.bf16.msra.mxu1 %v10283_v3  ;;  %2286 = vmatprep.subr.bf16.mxu0 %v10291_v61  ;;  %v10308_v3 = vld [vmem:[#allocation8 + $0x56c] ss:$16 sps:$4 sm:$0xff]   ;;  %v8461_v61 = vcombine.low %v486_v28, %v486_v28 }
 0x107   :  { %2387 = vmatprep.subr.bf16.mxu1 %v10294_v55  ;;  %v10303_v55 = vld [vmem:[#allocation8 + $0x368] ss:$16 sps:$4 sm:$0xff]   ;;  %v10457_v28 = vld [vmem:[%s15746_s30 + $0xc] ss:$24 sps:$4 sm:$0xff]  }
 0x108   :  { %2147 = vmatmul.mubr.bf16.gmra.mxu0 %v11662_v2 }
 0x109   :  { %2248 = vmatmul.mubr.bf16.gmra.mxu1 %v11553_v18  ;;  %2287 = vmatpush2.bf16.msra.mxu0 %v10289_v53  ;;  %v10311_v18 = vld [vmem:[#allocation8 + $0x34c] ss:$16 sps:$4 sm:$0xff]  }
 0x10a   :  { %2388 = vmatpush2.bf16.msra.mxu1 %v10292_v17  ;;  %2288 = vmatprep.subr.bf16.mxu0 %v10297_v26  ;;  %v10314_v53 = vld [vmem:[#allocation8 + $0x54c] ss:$16 sps:$4 sm:$0xff]   ;;  %v10309_v17 = vld [vmem:[#allocation8 + $0x348] ss:$16 sps:$4 sm:$0xff]  }
 0x10b   :  { %2389 = vmatprep.subr.bf16.mxu1 %v10300_v32  ;;  %2156 = vmatprep.mubr.bf16.mxu0 %v11667_v56  ;;  %v10312_v26 = vld [vmem:[#allocation8 + $0x548] ss:$16 sps:$4 sm:$0xff]   ;;  %v10317_v32 = vld [vmem:[#allocation8 + $0x32c] ss:$16 sps:$4 sm:$0xff]  }
 0x10c   :  { %2257 = vmatprep.mubr.bf16.mxu1 %v11568_v33  ;;  %v10320_v33 = vld [vmem:[#allocation8 + $0x52c] ss:$16 sps:$4 sm:$0xff]  }
 0x10d   :  { %2289 = vmatpush2.bf16.msra.mxu0 %v10295_v29  ;;  %v10315_v29 = vld [vmem:[#allocation8 + $0x328] ss:$16 sps:$4 sm:$0xff]  }
 0x10e   :  { %2390 = vmatpush2.bf16.msra.mxu1 %v10298_v24  ;;  %2290 = vmatprep.subr.bf16.mxu0 %v10305_v54  ;;  %v10318_v24 = vld [vmem:[#allocation8 + $0x528] ss:$16 sps:$4 sm:$0xff]  }
 0x10f   :  { %2391 = vmatprep.subr.bf16.mxu1 %v10308_v3  ;;  %v10321_v54 = vld [vmem:[#allocation8 + $0x308] ss:$16 sps:$4 sm:$0xff]  }
 0x110   :  { %2157 = vmatmul.mubr.bf16.gmra.mxu0 %v8461_v61  ;;  %v10324_v3 = vld [vmem:[#allocation8 + $0x508] ss:$16 sps:$4 sm:$0xff]  }
 0x111   :  { %2258 = vmatmul.mubr.bf16.gmra.mxu1 %v11576_v59  ;;  %2291 = vmatpush2.bf16.msra.mxu0 %v10303_v55  ;;  %v10326_v59 = vld [vmem:[#allocation8 + $0x50c] ss:$16 sps:$4 sm:$0xff]  }
 0x112   :  { %2392 = vmatpush2.bf16.msra.mxu1 %v10306_v36  ;;  %2292 = vmatprep.subr.bf16.mxu0 %v10311_v18  ;;  %v10323_v36 = vld [vmem:[#allocation8 + $0x30c] ss:$16 sps:$4 sm:$0xff]  }
 0x113   :  { %2393 = vmatprep.subr.bf16.mxu1 %v10314_v53  ;;  %2298 = vmatprep.mubr.bf16.mxu0 %v10457_v28 }
 0x114   :  { %2399 = vmatprep.mubr.bf16.mxu1 %v11583_v31 }
 0x115   :  { %2293 = vmatpush2.bf16.msra.mxu0 %v10309_v17 }
 0x116   :  { %2394 = vmatpush2.bf16.msra.mxu1 %v10312_v26  ;;  %2294 = vmatprep.subr.bf16.mxu0 %v10317_v32 }
 0x117   :  { %2395 = vmatprep.subr.bf16.mxu1 %v10320_v33 }
 0x119   :  { %2295 = vmatpush2.bf16.msra.mxu0 %v10315_v29 }
 0x11a   :  { %2396 = vmatpush2.bf16.msra.mxu1 %v10318_v24  ;;  %2296 = vmatprep.subr.bf16.mxu0 %v10323_v36 }
 0x11b   :  { %2397 = vmatprep.subr.bf16.mxu1 %v10326_v59 }
 0x11d   :  { %2297 = vmatpush2.bf16.msra.mxu0 %v10321_v54 }
 0x11e   :  { %2398 = vmatpush2.bf16.msra.mxu1 %v10324_v3 }
 0x120   :  { %2299 = vmatmul.mubr.bf16.vlgmr.msra.gmra.mxu0 %v11440_v21 }
 0x121   :  { %2400 = vmatmul.mubr.bf16.vlgmr.msra.gmra.mxu1 %v11592_v52  ;;  %2308 = vmatprep.mubr.bf16.mxu0 %v11450_v50 }
 0x122   :  { %2409 = vmatprep.mubr.bf16.mxu1 %v11597_v51 }
 0x128   :  { %2309 = vmatmul.mubr.bf16.gmra.mxu0 %v11464_v22 }
 0x129   :  { %2410 = vmatmul.mubr.bf16.gmra.mxu1 %v11606_v35  ;;  %2318 = vmatprep.mubr.bf16.mxu0 %v11474_v23 }
 0x12a   :  { %2419 = vmatprep.mubr.bf16.mxu1 %v11611_v1 }
 0x130   :  { %2319 = vmatmul.mubr.bf16.gmra.mxu0 %v11488_v25  ;;  %v681_v25 = vlaneseq }
 0x131   :  { %2420 = vmatmul.mubr.bf16.gmra.mxu1 %v11620_v62  ;;  %2328 = vmatprep.mubr.bf16.mxu0 %v11498_v58 }
 0x132   :  { %2429 = vmatprep.mubr.bf16.mxu1 %v11625_v49 }
 0x138   :  { %2329 = vmatmul.mubr.bf16.gmra.mxu0 %v11512_v27  ;;  %v11703_v27 = vshrl.u32 %v681_v25, 7 }
 0x139   :  { %2430 = vmatmul.mubr.bf16.gmra.mxu1 %v11634_v34  ;;  %2338 = vmatprep.mubr.bf16.mxu0 %v11522_v60  ;;  %v11711_v60 = vld [vmem:[%s15749_s28] sm:$0xf]  ;;  %s431_s28 = sshll.u32 %s10895_s17, 4  ;;  %s432_s28 = int_to_ptr.vmem [resolvable:$true] %s431_s28 }
 0x13a   :  { %2439 = vmatprep.mubr.bf16.mxu1 %v11639_v16  ;;  %15747 = vst [vmem:[#allocation96_spill] sm:$0xff] %v11703_v27  ;;  %v11706_v58 = vsub.s32 0, %v11703_v27 }
 0x13c   :  { %15748 = vst [vmem:[#allocation97_spill] sm:$0xff] %v11706_v58 }
 0x140   :  { %2339 = vmatmul.mubr.bf16.gmra.mxu0 %v11536_v19 }
 0x141   :  { %2440 = vmatmul.mubr.bf16.gmra.mxu1 %v11648_v20  ;;  %2348 = vmatprep.mubr.bf16.mxu0 %v11546_v63 }
 0x142   :  { %2449 = vmatprep.mubr.bf16.mxu1 %v11653_v48 }
 0x148   :  { %2349 = vmatmul.mubr.bf16.gmra.mxu0 %v11558_v30  ;;  %v11714_v30 = vsub.s32 1, %v11703_v27 }
 0x149   :  { %2450 = vmatmul.mubr.bf16.gmra.mxu1 %v11662_v2  ;;  %2358 = vmatprep.mubr.bf16.mxu0 %v11570_v0  ;;  %v11718_v0 = vrot.slane %v11711_v60, %v11706_v58 }
 0x14a   :  { %2459 = vmatprep.mubr.bf16.mxu1 %v11667_v56  ;;  %15750 = vst [vmem:[#allocation98_spill] sm:$0xff] %v11714_v30  ;;  %v11722_v63 = vrot.slane %v11711_v60, %v11714_v30 }
 0x150   :  { %2359 = vmatmul.mubr.bf16.gmra.mxu0 %v11578_v57 }
 0x151   :  { %2460 = vmatmul.mubr.bf16.gmra.mxu1 %v8461_v61 }
 0x160   :  { %v1896_v21 = vpop.f32.mrf.mxu0 }
 0x161   :  { %v1997_v50 = vpop.f32.mrf.mxu1  ;;  %v1897_v22 = vadd.f32 %v1896_v21, %v11718_v0 }
 0x162   :  { %v1898_v23 = vpop.f32.mrf.mxu0 }
 0x163   :  { %v1999_v19 = vpop.f32.mrf.mxu1  ;;  %v11725_v57 = vadd.f32 %v1997_v50, %v1897_v22  ;;  %v1899_v31 = vadd.f32 %v1898_v23, %v11722_v63 }
 0x164   :  { %v1900_v52 = vpop.f32.mrf.mxu0 }
 0x165   :  { %v2001_v51 = vpop.f32.mrf.mxu1  ;;  %v11728_v35 = vadd.f32 %v1999_v19, %v1899_v31  ;;  %v1901_v1 = vadd.f32 %v1900_v52, %v11718_v0 }
 0x166   :  { %v1902_v62 = vpop.f32.mrf.mxu0 }
 0x167   :  { %v2003_v49 = vpop.f32.mrf.mxu1  ;;  %v11731_v34 = vadd.f32 %v2001_v51, %v1901_v1  ;;  %v1903_v16 = vadd.f32 %v1902_v62, %v11722_v63 }
 0x168   :  { %v1906_v20 = vpop.f32.mrf.mxu0 }
 0x169   :  { %v2007_v48 = vpop.f32.mrf.mxu1  ;;  %v11734_v2 = vadd.f32 %v2003_v49, %v1903_v16  ;;  %v1907_v56 = vadd.f32 %v1906_v20, %v11718_v0 }
 0x16a   :  { %v1908_v61 = vpop.f32.mrf.mxu0 }
 0x16b   :  { %v2009_v55 = vpop.f32.mrf.mxu1  ;;  %v1909_v18 = vadd.f32 %v1908_v61, %v11722_v63  ;;  %v11738_v53 = vadd.f32 %v2007_v48, %v1907_v56 }
 0x16c   :  { %v1910_v17 = vpop.f32.mrf.mxu0 }
 0x16d   :  { %v2011_v26 = vpop.f32.mrf.mxu1  ;;  %v1911_v32 = vadd.f32 %v1910_v17, %v11718_v0  ;;  %v11741_v33 = vadd.f32 %v2009_v55, %v1909_v18 }
 0x16e   :  { %v1912_v28 = vpop.f32.mrf.mxu0 }
 0x16f   :  { %v2013_v29 = vpop.f32.mrf.mxu1  ;;  %v1913_v24 = vadd.f32 %v1912_v28, %v11722_v63  ;;  %v11744_v36 = vadd.f32 %v2011_v26, %v1911_v32 }
 0x170   :  { %v1916_v59 = vpop.f32.mrf.mxu0 }
 0x171   :  { %v2017_v54 = vpop.f32.mrf.mxu1  ;;  %v1917_v3 = vadd.f32 %v1916_v59, %v11718_v0  ;;  %v11747_v25 = vadd.f32 %v2013_v29, %v1913_v24 }
 0x172   :  { %v1918_v21 = vpop.f32.mrf.mxu0 }
 0x173   :  { %v2019_v50 = vpop.f32.mrf.mxu1  ;;  %v1919_v22 = vadd.f32 %v1918_v21, %v11722_v63  ;;  %v11750_v23 = vadd.f32 %v2017_v54, %v1917_v3 }
 0x174   :  { %v1920_v19 = vpop.f32.mrf.mxu0 }
 0x175   :  { %v2021_v31 = vpop.f32.mrf.mxu1  ;;  %v1921_v52 = vadd.f32 %v1920_v19, %v11718_v0  ;;  %v11753_v51 = vadd.f32 %v2019_v50, %v1919_v22 }
 0x176   :  { %v1922_v1 = vpop.f32.mrf.mxu0 }
 0x177   :  { %v2023_v62 = vpop.f32.mrf.mxu1  ;;  %v1923_v49 = vadd.f32 %v1922_v1, %v11722_v63  ;;  %v11756_v16 = vadd.f32 %v2021_v31, %v1921_v52 }
 0x178   :  { %v1926_v20 = vpop.f32.mrf.mxu0 }
 0x179   :  { %v2027_v48 = vpop.f32.mrf.mxu1  ;;  %v1927_v56 = vadd.f32 %v1926_v20, %v11718_v0  ;;  %v11759_v61 = vadd.f32 %v2023_v62, %v1923_v49 }
 0x17a   :  { %v1928_v55 = vpop.f32.mrf.mxu0 }
 0x17b   :  { %v2029_v18 = vpop.f32.mrf.mxu1  ;;  %v1929_v17 = vadd.f32 %v1928_v55, %v11722_v63  ;;  %v11762_v26 = vadd.f32 %v2027_v48, %v1927_v56 }
 0x17c   :  { %v1930_v32 = vpop.f32.mrf.mxu0 }
 0x17d   :  { %v2031_v28 = vpop.f32.mrf.mxu1  ;;  %v1931_v29 = vadd.f32 %v1930_v32, %v11718_v0  ;;  %v11765_v24 = vadd.f32 %v2029_v18, %v1929_v17 }
 0x17e   :  { %v1932_v59 = vpop.f32.mrf.mxu0 }
 0x17f   :  { %v2033_v54 = vpop.f32.mrf.mxu1  ;;  %v1933_v3 = vadd.f32 %v1932_v59, %v11722_v63  ;;  %v11768_v21 = vadd.f32 %v2031_v28, %v1931_v29 }
 0x180   :  { %v1936_v50 = vpop.f32.mrf.mxu0 }
 0x181   :  { %v2037_v22 = vpop.f32.mrf.mxu1  ;;  %v1937_v19 = vadd.f32 %v1936_v50, %v11718_v0  ;;  %v11771_v31 = vadd.f32 %v2033_v54, %v1933_v3 }
 0x182   :  { %v1938_v52 = vpop.f32.mrf.mxu0 }
 0x183   :  { %v2039_v1 = vpop.f32.mrf.mxu1  ;;  %v1939_v62 = vadd.f32 %v1938_v52, %v11722_v63  ;;  %v11774_v49 = vadd.f32 %v2037_v22, %v1937_v19 }
 0x184   :  { %v1940_v20 = vpop.f32.mrf.mxu0 }
 0x185   :  { %v2041_v48 = vpop.f32.mrf.mxu1  ;;  %v1941_v56 = vadd.f32 %v1940_v20, %v11718_v0  ;;  %v11777_v55 = vadd.f32 %v2039_v1, %v1939_v62 }
 0x186   :  { %v1942_v18 = vpop.f32.mrf.mxu0 }
 0x187   :  { %v2043_v17 = vpop.f32.mrf.mxu1  ;;  %v1943_v32 = vadd.f32 %v1942_v18, %v11722_v63  ;;  %v11780_v28 = vadd.f32 %v2041_v48, %v1941_v56 }
 0x188   :  { %v1946_v29 = vpop.f32.mrf.mxu0 }
 0x189   :  { %v2047_v59 = vpop.f32.mrf.mxu1  ;;  %v1947_v54 = vadd.f32 %v1946_v29, %v11718_v0  ;;  %v11783_v3 = vadd.f32 %v2043_v17, %v1943_v32 }
 0x18a   :  { %v1948_v50 = vpop.f32.mrf.mxu0 }
 0x18b   :  { %v2049_v22 = vpop.f32.mrf.mxu1  ;;  %v1949_v19 = vadd.f32 %v1948_v50, %v11722_v63  ;;  %v11786_v52 = vadd.f32 %v2047_v59, %v1947_v54 }
 0x18c   :  { %v1950_v1 = vpop.f32.mrf.mxu0 }
 0x18d   :  { %v2051_v62 = vpop.f32.mrf.mxu1  ;;  %v1951_v20 = vadd.f32 %v1950_v1, %v11718_v0  ;;  %v11789_v30 = vadd.f32 %v2049_v22, %v1949_v19 }
 0x18e   :  { %v1952_v48 = vpop.f32.mrf.mxu0 }
 0x18f   :  { %v2053_v56 = vpop.f32.mrf.mxu1  ;;  %v1953_v18 = vadd.f32 %v1952_v48, %v11722_v63  ;;  %v11792_v58 = vadd.f32 %v2051_v62, %v1951_v20 }
 0x190   :  { %v1956_v17 = vpop.f32.mrf.mxu0 }
 0x191   :  { %v2057_v32 = vpop.f32.mrf.mxu1  ;;  %v1957_v29 = vadd.f32 %v1956_v17, %v11718_v0  ;;  %v11795_v37 = vadd.f32 %v2053_v56, %v1953_v18 }
 0x192   :  { %v1958_v59 = vpop.f32.mrf.mxu0 }
 0x193   :  { %v2059_v54 = vpop.f32.mrf.mxu1  ;;  %v1959_v50 = vadd.f32 %v1958_v59, %v11722_v63  ;;  %v11798_v4 = vadd.f32 %v2057_v32, %v1957_v29 }
 0x194   :  { %v1960_v22 = vpop.f32.mrf.mxu0 }
 0x195   :  { %v2061_v19 = vpop.f32.mrf.mxu1  ;;  %v11800_v1 = vadd.f32 %v2059_v54, %v1959_v50 }
 0x196   :  { %v1961_v5 = vpop.f32.mrf.mxu0 }
 0x197   :  { %v2062_v48 = vpop.f32.mrf.mxu1 }
 0x1a0   :  { %v2098_v62 = vpop.f32.mrf.mxu0 }
 0x1a1   :  { %v11802_v20 = vpop.f32.mrf.mxu1  ;;  %v11805_v38 = vadd.f32 %v2098_v62, %v11725_v57 }
 0x1a2   :  { %v2100_v0 = vpop.f32.mrf.mxu0 }
 0x1a3   :  { %15751 = vst [vmem:[#allocation99_spill] sm:$0xff] %v11805_v38  ;;  %v11807_v56 = vpop.f32.mrf.mxu1  ;;  %v11810_v18 = vadd.f32 %v2100_v0, %v11728_v35 }
 0x1a4   :  { %v2102_v63 = vpop.f32.mrf.mxu0 }
 0x1a5   :  { %15752 = vst [vmem:[#allocation100_spill] sm:$0xff] %v11810_v18  ;;  %v11812_v17 = vpop.f32.mrf.mxu1  ;;  %v11815_v32 = vadd.f32 %v2102_v63, %v11731_v34 }
 0x1a6   :  { %v2104_v5 = vpop.f32.mrf.mxu0 }
 0x1a7   :  { %15753 = vst [vmem:[#allocation101_spill] sm:$0xff] %v11815_v32  ;;  %v11817_v29 = vpop.f32.mrf.mxu1  ;;  %v11820_v59 = vadd.f32 %v2104_v5, %v11734_v2 }
 0x1a8   :  { %v2108_v57 = vpop.f32.mrf.mxu0 }
 0x1a9   :  { %15754 = vst [vmem:[#allocation102_spill] sm:$0xff] %v11820_v59  ;;  %v11822_v54 = vpop.f32.mrf.mxu1  ;;  %v11825_v50 = vadd.f32 %v2108_v57, %v11738_v53 }
 0x1aa   :  { %v2110_v35 = vpop.f32.mrf.mxu0 }
 0x1ab   :  { %15755 = vst [vmem:[#allocation103_spill] sm:$0xff] %v11825_v50  ;;  %v11827_v22 = vpop.f32.mrf.mxu1  ;;  %v11830_v19 = vadd.f32 %v2110_v35, %v11741_v33  ;;  %v15604_v50 = vsub.s32 2, %v11703_v27 }
 0x1ac   :  { %15756 = vst [vmem:[#allocation104_spill] sm:$0xff] %v11827_v22  ;;  %v2112_v34 = vpop.f32.mrf.mxu0  ;;  %v695_v22 = vsub.s32 3, %v11703_v27 }
 0x1ad   :  { %15757 = vst [vmem:[#allocation105_spill] sm:$0xff] %v11830_v19  ;;  %v11832_v48 = vpop.f32.mrf.mxu1  ;;  %v11835_v62 = vadd.f32 %v2112_v34, %v11744_v36 }
 0x1ae   :  { %v2114_v2 = vpop.f32.mrf.mxu0 }
 0x1af   :  { %15758 = vst [vmem:[#allocation106_spill] sm:$0xff] %v11835_v62  ;;  %v11837_v0 = vpop.f32.mrf.mxu1  ;;  %v11840_v63 = vadd.f32 %v2114_v2, %v11747_v25 }
 0x1b0   :  { %v2118_v53 = vpop.f32.mrf.mxu0 }
 0x1b1   :  { %15759 = vst [vmem:[#allocation107_spill] sm:$0xff] %v11840_v63  ;;  %v11842_v5 = vpop.f32.mrf.mxu1  ;;  %v11845_v57 = vadd.f32 %v2118_v53, %v11750_v23 }
 0x1b2   :  { %v2120_v33 = vpop.f32.mrf.mxu0 }
 0x1b3   :  { %15760 = vst [vmem:[#allocation108_spill] sm:$0xff] %v11845_v57  ;;  %v11847_v35 = vpop.f32.mrf.mxu1  ;;  %v11850_v39 = vadd.f32 %v2120_v33, %v11753_v51 }
 0x1b4   :  { %v2122_v36 = vpop.f32.mrf.mxu0 }
 0x1b5   :  { %v11852_v34 = vpop.f32.mrf.mxu1  ;;  %v11855_v6 = vadd.f32 %v2122_v36, %v11756_v16 }
 0x1b6   :  { %v11857_v25 = vpop.f32.mrf.mxu0 }
 0x1b7   :  { %v11859_v2 = vpop.f32.mrf.mxu1 }
 0x1b8   :  { %v2128_v7 = vpop.f32.mrf.mxu0 }
 0x1b9   :  { %v11861_v40 = vpop.f32.mrf.mxu1  ;;  %v11864_v23 = vadd.f32 %v2128_v7, %v11762_v26 }
 0x1ba   :  { %v11866_v53 = vpop.f32.mrf.mxu0 }
 0x1bb   :  { %v11868_v51 = vpop.f32.mrf.mxu1 }
 0x1bc   :  { %v2132_v33 = vpop.f32.mrf.mxu0 }
 0x1bd   :  { %v11870_v41 = vpop.f32.mrf.mxu1  ;;  %v11873_v16 = vadd.f32 %v2132_v33, %v11768_v21 }
 0x1be   :  { %v11875_v36 = vpop.f32.mrf.mxu0 }
 0x1bf   :  { %15761 = vst [vmem:[#allocation109_spill] sm:$0xff] %v11873_v16  ;;  %v11877_v8 = vpop.f32.mrf.mxu1 }
 0x1c0   :  { %v2138_v9 = vpop.f32.mrf.mxu0 }
 0x1c1   :  { %v11879_v42 = vpop.f32.mrf.mxu1  ;;  %v11882_v7 = vadd.f32 %v2138_v9, %v11774_v49 }
 0x1c2   :  { %v11884_v26 = vpop.f32.mrf.mxu0 }
 0x1c3   :  { %15762 = vst [vmem:[#allocation110_spill] sm:$0xff] %v11882_v7  ;;  %v11886_v43 = vpop.f32.mrf.mxu1 }
 0x1c4   :  { %v2142_v10 = vpop.f32.mrf.mxu0 }
 0x1c5   :  { %v11888_v11 = vpop.f32.mrf.mxu1  ;;  %v11891_v21 = vadd.f32 %v2142_v10, %v11780_v28 }
 0x1c6   :  { %v11893_v33 = vpop.f32.mrf.mxu0 }
 0x1c7   :  { %v11895_v44 = vpop.f32.mrf.mxu1 }
 0x1c8   :  { %v2148_v45 = vpop.f32.mrf.mxu0 }
 0x1c9   :  { %v11897_v12 = vpop.f32.mrf.mxu1  ;;  %v11900_v9 = vadd.f32 %v2148_v45, %v11786_v52 }
 0x1ca   :  { %v11902_v49 = vpop.f32.mrf.mxu0 }
 0x1cb   :  { %15763 = vst [vmem:[#allocation111_spill] sm:$0xff] %v11900_v9  ;;  %v11904_v13 = vpop.f32.mrf.mxu1 }
 0x1cc   :  { %v2152_v46 = vpop.f32.mrf.mxu0 }
 0x1cd   :  { %v11906_v47 = vpop.f32.mrf.mxu1  ;;  %v11909_v10 = vadd.f32 %v2152_v46, %v11792_v58 }
 0x1ce   :  { %v2154_v28 = vpop.f32.mrf.mxu0 }
 0x1cf   :  { %15764 = vst [vmem:[#allocation112_spill] sm:$0xff] %v11909_v10  ;;  %v11911_v14 = vpop.f32.mrf.mxu1  ;;  %v11914_v15 = vadd.f32 %v2154_v28, %v11795_v37  ;;  %v11930_v37 = vrot.slane %v11711_v60, %v15604_v50 }
 0x1d0   :  { %v2158_v18 = vpop.f32.mrf.mxu0 }
 0x1d1   :  { %15765 = vst [vmem:[#allocation113_spill] sm:$0xff] %v11914_v15  ;;  %v11916_v38 = vpop.f32.mrf.mxu1  ;;  %v11919_v45 = vadd.f32 %v2158_v18, %v11798_v4  ;;  %v11933_v4 = vrot.slane %v11711_v60, %v695_v22  ;;  %v2200_v18 = vadd.f32 %v11802_v20, %v11930_v37  ;;  %v2204_v27 = vadd.f32 %v11812_v17, %v11930_v37 }
 0x1d2   :  { %15766 = vst [vmem:[#allocation114_spill] sm:$0xff] %v11916_v38  ;;  %v11921_v52 = vpop.f32.mrf.mxu0 }
 0x1d3   :  { %15767 = vst [vmem:[#allocation115_spill] sm:$0xff] %v11919_v45  ;;  %v11923_v59 = vpop.f32.mrf.mxu1  ;;  %v2206_v22 = vadd.f32 %v11817_v29, %v11933_v4 }
 0x1d4   :  { %15768 = vst [vmem:[#allocation116_spill] sm:$0xff] %v11923_v59  ;;  %v2162_v32 = vpop.f32.mrf.mxu0 }
 0x1d5   :  { %v2263_v19 = vpop.f32.mrf.mxu1 }
 0x1d6   :  { %v2163_v46 = vpop.f32.mrf.mxu0  ;;  %v2202_v19 = vadd.f32 %v11807_v56, %v11933_v4 }
 0x1d7   :  { %v2264_v58 = vpop.f32.mrf.mxu1 }
 0x1e0   :  { %v2300_v28 = vpop.f32.mrf.mxu0 }
 0x1e1   :  { %v2401_v32 = vpop.f32.mrf.mxu1  ;;  %v2301_v46 = vadd.f32 %v2300_v28, %v2200_v18 }
 0x1e2   :  { %v2302_v58 = vpop.f32.mrf.mxu0 }
 0x1e3   :  { %v2403_v63 = vpop.f32.mrf.mxu1  ;;  %v11941_v62 = vadd.f32 %v2401_v32, %v2301_v46  ;;  %v2303_v50 = vadd.f32 %v2302_v58, %v2202_v19  ;;  %v2224_v58 = vadd.f32 %v11852_v34, %v11930_v37 }
 0x1e4   :  { %v2304_v59 = vpop.f32.mrf.mxu0 }
 0x1e5   :  { %15769 = vst [vmem:[#allocation117_spill] sm:$0xff] %v11941_v62  ;;  %v2405_v60 = vpop.f32.mrf.mxu1  ;;  %v11945_v20 = vadd.f32 %v2403_v63, %v2303_v50  ;;  %v2305_v45 = vadd.f32 %v2304_v59, %v2204_v27 }
 0x1e6   :  { %v2306_v15 = vpop.f32.mrf.mxu0 }
 0x1e7   :  { %15770 = vst [vmem:[#allocation118_spill] sm:$0xff] %v11945_v20  ;;  %v2407_v10 = vpop.f32.mrf.mxu1  ;;  %v11947_v56 = vadd.f32 %v2405_v60, %v2305_v45  ;;  %v2307_v18 = vadd.f32 %v2306_v15, %v2206_v22  ;;  %v11977_v45 = vadd.f32 %v11857_v25, %v11759_v61 }
 0x1e8   :  { %v11949_v28 = vpop.f32.mrf.mxu0 }
 0x1e9   :  { %15771 = vst [vmem:[#allocation119_spill] sm:$0xff] %v11947_v56  ;;  %v11951_v38 = vpop.f32.mrf.mxu1  ;;  %v11953_v17 = vadd.f32 %v2407_v10, %v2307_v18  ;;  %v2226_v18 = vadd.f32 %v11859_v2, %v11933_v4  ;;  %v2493_v34 = vadd.f32 %v11977_v45, %v11855_v6 }
 0x1ea   :  { %v11955_v32 = vpop.f32.mrf.mxu0 }
 0x1eb   :  { %15772 = vst [vmem:[#allocation120_spill] sm:$0xff] %v11953_v17  ;;  %v11957_v19 = vpop.f32.mrf.mxu1  ;;  %v11985_v17 = vadd.f32 %v11866_v53, %v11765_v24  ;;  %v2232_v24 = vadd.f32 %v11868_v51, %v11933_v4  ;;  %v2234_v51 = vadd.f32 %v11870_v41, %v11930_v37 }
 0x1ec   :  { %15773 = vst [vmem:[#allocation121_spill] sm:$0xff] %v11957_v19  ;;  %v11959_v46 = vpop.f32.mrf.mxu0  ;;  %v2230_v19 = vadd.f32 %v11861_v40, %v11930_v37 }
 0x1ed   :  { %v11961_v29 = vpop.f32.mrf.mxu1 }
 0x1ee   :  { %v11963_v27 = vpop.f32.mrf.mxu0 }
 0x1ef   :  { %v11965_v59 = vpop.f32.mrf.mxu1 }
 0x1f0   :  { %15774 = vst [vmem:[#allocation122_spill] sm:$0xff] %v11965_v59  ;;  %v11967_v50 = vpop.f32.mrf.mxu0  ;;  %v11995_v59 = vadd.f32 %v11875_v36, %v11771_v31  ;;  %v2498_v31 = vadd.f32 %v11985_v17, %v11864_v23 }
 0x1f1   :  { %v11969_v15 = vpop.f32.mrf.mxu1 }
 0x1f2   :  { %v11971_v63 = vpop.f32.mrf.mxu0  ;;  %15775 = vst [vmem:[#allocation123_spill] sm:$0xff] %v11995_v59  ;;  %v2580_v41 = vmul.f32 %v11995_v59, %v11995_v59 }
 0x1f3   :  { %v11973_v10 = vpop.f32.mrf.mxu1 }
 0x1f4   :  { %v2324_v60 = vpop.f32.mrf.mxu0 }
 0x1f5   :  { %v2425_v22 = vpop.f32.mrf.mxu1  ;;  %v2325_v20 = vadd.f32 %v2324_v60, %v2224_v58 }
 0x1f6   :  { %v2326_v62 = vpop.f32.mrf.mxu0 }
 0x1f7   :  { %v2427_v56 = vpop.f32.mrf.mxu1  ;;  %v11989_v61 = vadd.f32 %v2425_v22, %v2325_v20  ;;  %v2327_v25 = vadd.f32 %v2326_v62, %v2226_v18  ;;  %v12004_v62 = vadd.f32 %v11822_v54, %v11930_v37  ;;  %v12008_v20 = vadd.f32 %v11832_v48, %v11930_v37 }
 0x1f8   :  { %v2330_v2 = vpop.f32.mrf.mxu0  ;;  %v12019_v54 = vadd.f32 %v11837_v0, %v11933_v4  ;;  %v12023_v48 = vadd.f32 %v11842_v5, %v11930_v37  ;;  %v12038_v5 = vadd.f32 %v11850_v39, %v11845_v57 }
 0x1f9   :  { %v2431_v58 = vpop.f32.mrf.mxu1  ;;  %v11999_v53 = vadd.f32 %v2427_v56, %v2327_v25  ;;  %v2331_v60 = vadd.f32 %v2330_v2, %v2230_v19  ;;  %v2494_v40 = vadd.f32 %v2493_v34, %v11989_v61  ;;  %v12027_v25 = vadd.f32 %v11847_v35, %v11933_v4 }
 0x1fa   :  { %v2332_v36 = vpop.f32.mrf.mxu0  ;;  %v2579_v35 = vmul.f32 %v11873_v16, %v11873_v16 }
 0x1fb   :  { %15776 = vst [vmem:[#allocation124_spill] sm:$0xff] %v11999_v53  ;;  %v2433_v22 = vpop.f32.mrf.mxu1  ;;  %v12014_v56 = vadd.f32 %v2431_v58, %v2331_v60  ;;  %v2333_v19 = vadd.f32 %v2332_v36, %v2232_v24  ;;  %v2495_v18 = vadd.f32 %v2494_v40, %v11999_v53  ;;  %v2236_v58 = vadd.f32 %v11877_v8, %v11933_v4 }
 0x1fc   :  { %v2334_v34 = vpop.f32.mrf.mxu0  ;;  %v2503_v40 = vadd.f32 %v11995_v59, %v11873_v16  ;;  %v12046_v36 = vadd.f32 %v11884_v26, %v11777_v55  ;;  %v12057_v59 = vadd.f32 %v11893_v33, %v11783_v3  ;;  %v2242_v55 = vadd.f32 %v11886_v43, %v11933_v4 }
 0x1fd   :  { %v2435_v2 = vpop.f32.mrf.mxu1  ;;  %v12033_v24 = vadd.f32 %v2433_v22, %v2333_v19  ;;  %v2335_v0 = vadd.f32 %v2334_v34, %v2234_v51  ;;  %2496 = vadd.xlane.f32.xlu1 %v2495_v18  ;;  %v2499_v60 = vadd.f32 %v2498_v31, %v12014_v56  ;;  %v2240_v51 = vadd.f32 %v11879_v42, %v11930_v37 }
 0x1fe   :  { %15777 = vst [vmem:[#allocation125_spill] sm:$0xff] %v12046_v36  ;;  %v2336_v8 = vpop.f32.mrf.mxu0  ;;  %v2583_v34 = vmul.f32 %v11882_v7, %v11882_v7  ;;  %v2638_v53 = vadd.f32 %v2580_v41, %v2579_v35  ;;  %v2584_v3 = vmul.f32 %v12046_v36, %v12046_v36  ;;  %v2587_v43 = vmul.f32 %v11891_v21, %v11891_v21 }
 0x1ff   :  { %v2437_v22 = vpop.f32.mrf.mxu1  ;;  %v12050_v31 = vadd.f32 %v2435_v2, %v2335_v0  ;;  %v2337_v19 = vadd.f32 %v2336_v8, %v2236_v58  ;;  %v2500_v18 = vadd.f32 %v2499_v60, %v12033_v24  ;;  %v2508_v0 = vadd.f32 %v12046_v36, %v11882_v7 }
 0x200   :  { %v2340_v26 = vpop.f32.mrf.mxu0  ;;  %v2244_v33 = vadd.f32 %v11888_v11, %v11930_v37  ;;  %v2246_v11 = vadd.f32 %v11895_v44, %v11933_v4  ;;  %v2513_v36 = vadd.f32 %v12057_v59, %v11891_v21 }
 0x201   :  { %v2441_v16 = vpop.f32.mrf.mxu1  ;;  %v12061_v57 = vadd.f32 %v2437_v22, %v2337_v19  ;;  %v2341_v42 = vadd.f32 %v2340_v26, %v2240_v51  ;;  %2501 = vadd.xlane.f32.xlu1 %v2500_v18  ;;  %v2504_v2 = vadd.f32 %v2503_v40, %v12050_v31  ;;  %v2581_v58 = vmul.f32 %v12050_v31, %v12050_v31 }
 0x202   :  { %v2342_v41 = vpop.f32.mrf.mxu0  ;;  %v2588_v51 = vmul.f32 %v12057_v59, %v12057_v59  ;;  %v12083_v19 = vadd.f32 %v11902_v49, %v11789_v30  ;;  %v2250_v30 = vadd.f32 %v11897_v12, %v11930_v37 }
 0x203   :  { %15778 = vst [vmem:[#allocation126_spill] sm:$0xff] %v12061_v57  ;;  %v2443_v60 = vpop.f32.mrf.mxu1  ;;  %v12074_v35 = vadd.f32 %v2441_v16, %v2341_v42  ;;  %v2343_v40 = vadd.f32 %v2342_v41, %v2242_v55  ;;  %v2505_v8 = vadd.f32 %v2504_v2, %v12061_v57  ;;  %v2582_v22 = vmul.f32 %v12061_v57, %v12061_v57 }
 0x204   :  { %15779 = vst [vmem:[#allocation127_spill] sm:$0xff] %v12083_v19  ;;  %v2344_v18 = vpop.f32.mrf.mxu0  ;;  %v2639_v16 = vadd.f32 %v2638_v53, %v2581_v58  ;;  %v2643_v57 = vadd.f32 %v2584_v3, %v2583_v34 }
 0x205   :  { %v2445_v26 = vpop.f32.mrf.mxu1  ;;  %v2585_v55 = vmul.f32 %v12074_v35, %v12074_v35  ;;  %v12089_v42 = vadd.f32 %v2443_v60, %v2343_v40  ;;  %v2345_v2 = vadd.f32 %v2344_v18, %v2244_v33  ;;  %2506 = vadd.xlane.f32.xlu1 %v2505_v8  ;;  %v2509_v41 = vadd.f32 %v2508_v0, %v12074_v35 }
 0x206   :  { %v2346_v49 = vpop.f32.mrf.mxu0  ;;  %v2640_v7 = vadd.f32 %v2639_v16, %v2582_v22  ;;  %v2518_v0 = vadd.f32 %v12083_v19, %v11900_v9  ;;  %v2252_v40 = vadd.f32 %v11904_v13, %v11933_v4  ;;  %v2648_v22 = vadd.f32 %v2588_v51, %v2587_v43 }
 0x207   :  { %15780 = vst [vmem:[#allocation128_spill] sm:$0xff] %v12089_v42  ;;  %v2447_v44 = vpop.f32.mrf.mxu1  ;;  %v12096_v53 = vadd.f32 %v2445_v26, %v2345_v2  ;;  %v2347_v58 = vadd.f32 %v2346_v49, %v2246_v11  ;;  %v2510_v60 = vadd.f32 %v2509_v41, %v12089_v42  ;;  %v2586_v33 = vmul.f32 %v12089_v42, %v12089_v42 }
 0x208   :  { %2641 = vadd.xlane.f32.xlu0 %v2640_v7  ;;  %v2350_v12 = vpop.f32.mrf.mxu0  ;;  %v2644_v18 = vadd.f32 %v2643_v57, %v2585_v55  ;;  %v2592_v16 = vmul.f32 %v12083_v19, %v12083_v19  ;;  %v2254_v13 = vadd.f32 %v11906_v47, %v11930_v37  ;;  %v12116_v57 = vadd.f32 %v11921_v52, %v11800_v1 }
 0x209   :  { %v2451_v8 = vpop.f32.mrf.mxu1  ;;  %v2589_v34 = vmul.f32 %v12096_v53, %v12096_v53  ;;  %v12107_v3 = vadd.f32 %v2447_v44, %v2347_v58  ;;  %v2351_v11 = vadd.f32 %v2350_v12, %v2250_v30  ;;  %2511 = vadd.xlane.f32.xlu1 %v2510_v60  ;;  %v2514_v26 = vadd.f32 %v2513_v36, %v12096_v53 }
 0x20a   :  { %15781 = vst [vmem:[#allocation129_spill] sm:$0xff] %v12116_v57  ;;  %v2352_v7 = vpop.f32.mrf.mxu0  ;;  %v2645_v51 = vadd.f32 %v2644_v18, %v2586_v33  ;;  %v12125_v30 = vmul.f32 %v11864_v23, %v11864_v23  ;;  %v2591_v47 = vmul.f32 %v11900_v9, %v11900_v9  ;;  %v2256_v1 = vadd.f32 %v11911_v14, %v11933_v4 }
 0x20b   :  { %v2453_v43 = vpop.f32.mrf.mxu1  ;;  %v12118_v55 = vadd.f32 %v2451_v8, %v2351_v11  ;;  %v2353_v2 = vadd.f32 %v2352_v7, %v2252_v40  ;;  %v2515_v41 = vadd.f32 %v2514_v26, %v12107_v3  ;;  %v2590_v36 = vmul.f32 %v12107_v3, %v12107_v3  ;;  %v15784_v8 = vld [vmem:[#allocation114_spill] sm:$0xff] }
 0x20c   :  { %2646 = vadd.xlane.f32.xlu0 %v2645_v51  ;;  %v2354_v52 = vpop.f32.mrf.mxu0  ;;  %v2649_v44 = vadd.f32 %v2648_v22, %v2589_v34  ;;  %v2600_v12 = vmul.f32 %v12116_v57, %v12116_v57  ;;  %v2260_v18 = vadd.f32 %v15784_v8, %v11930_v37  ;;  %v2653_v7 = vadd.f32 %v2592_v16, %v2591_v47  ;;  %v15786_v51 = vld [vmem:[#allocation112_spill] sm:$0xff] }
 0x20d   :  { %15782 = vst [vmem:[#allocation130_spill] sm:$0xff] %v12118_v55  ;;  %v2455_v49 = vpop.f32.mrf.mxu1  ;;  %v2593_v58 = vmul.f32 %v12118_v55, %v12118_v55  ;;  %v12133_v60 = vadd.f32 %v2453_v43, %v2353_v2  ;;  %v2355_v33 = vadd.f32 %v2354_v52, %v2254_v13  ;;  %2516 = vadd.xlane.f32.xlu1 %v2515_v41  ;;  %v15788_v52 = vld [vmem:[#allocation115_spill] sm:$0xff] }
 0x20e   :  { %v2519_v40 = vadd.f32 %v2518_v0, %v12118_v55  ;;  %v2356_v14 = vpop.f32.mrf.mxu0  ;;  %v2650_v26 = vadd.f32 %v2649_v44, %v2590_v36  ;;  %v15787_v0 = vld [vmem:[#allocation113_spill] sm:$0xff]  ;;  %v2599_v37 = vmul.f32 %v15788_v52, %v15788_v52 }
 0x20f   :  { %15783 = vst [vmem:[#allocation131_spill] sm:$0xff] %v12133_v60  ;;  %v2457_v11 = vpop.f32.mrf.mxu1  ;;  %v12140_v22 = vadd.f32 %v2455_v49, %v2355_v33  ;;  %v2357_v34 = vadd.f32 %v2356_v14, %v2256_v1  ;;  %v2594_v13 = vmul.f32 %v12133_v60, %v12133_v60  ;;  %v2523_v2 = vadd.f32 %v15787_v0, %v15786_v51  ;;  %v15789_v49 = vld [vmem:[#allocation116_spill] sm:$0xff] }
 0x210   :  { %v2520_v43 = vadd.f32 %v2519_v40, %v12133_v60  ;;  %v2596_v41 = vmul.f32 %v15787_v0, %v15787_v0  ;;  %2651 = vadd.xlane.f32.xlu0 %v2650_v26  ;;  %v2360_v36 = vpop.f32.mrf.mxu0  ;;  %v2654_v47 = vadd.f32 %v2653_v7, %v2593_v58  ;;  %v2595_v1 = vmul.f32 %v15786_v51, %v15786_v51 }
 0x211   :  { %15785 = vst [vmem:[#allocation114_spill] sm:$0xff] %v12140_v22  ;;  %v2461_v16 = vpop.f32.mrf.mxu1  ;;  %v2262_v44 = vadd.f32 %v15789_v49, %v11933_v4  ;;  %v2321_v33 = vadd.f32 %v11967_v50, %v12023_v48  ;;  %v2361_v40 = vadd.f32 %v2360_v36, %v2260_v18  ;;  %v2597_v8 = vmul.f32 %v12140_v22, %v12140_v22 }
 0x212   :  { %2521 = vadd.xlane.f32.xlu1 %v2520_v43  ;;  %v12159_v14 = vadd.f32 %v2457_v11, %v2357_v34  ;;  %v2362_v26 = vpop.f32.mrf.mxu0  ;;  %v2655_v60 = vadd.f32 %v2654_v47, %v2594_v13  ;;  %v2524_v58 = vadd.f32 %v2523_v2, %v12140_v22  ;;  %v2576_v7 = vmul.f32 %v11985_v17, %v11985_v17 }
 0x213   :  { %v2463_v0 = vpop.f32.mrf.mxu1  ;;  %v12164_v51 = vadd.f32 %v2461_v16, %v2361_v40  ;;  %v2363_v49 = vadd.f32 %v2362_v26, %v2262_v44  ;;  %v2664_v50 = vsel %vm2528_vm0, %v2600_v12, 0.0  ;;  %v2530_v48 = vsel %vm2528_vm0, %v12116_v57, 0.0 }
 0x214   :  { %15790 = vst [vmem:[#allocation116_spill] sm:$0xff] %v12159_v14  ;;  %v2315_v18 = vadd.f32 %v11959_v46, %v12008_v20  ;;  %2656 = vadd.xlane.f32.xlu0 %v2655_v60  ;;  %v2364_v11 = vpop.f32.mrf.mxu0  ;;  %v2658_v43 = vadd.f32 %v2596_v41, %v2595_v1  ;;  %v2663_v13 = vsel %vm2528_vm0, %v2599_v37, 0.0  ;;  %v12173_v2 = vadd.f32 %v11969_v15, %v2321_v33 }
 0x215   :  { %15791 = vst [vmem:[#allocation132_spill] sm:$0xff] %v12164_v51  ;;  %v2465_v34 = vpop.f32.mrf.mxu1  ;;  %v2323_v36 = vadd.f32 %v11971_v63, %v12027_v25  ;;  %v2601_v12 = vmul.f32 %v12164_v51, %v12164_v51  ;;  %v12179_v16 = vadd.f32 %v2463_v0, %v2363_v49  ;;  %v2525_v46 = vadd.f32 %v2524_v58, %v12159_v14  ;;  %v15794_v11 = vld [vmem:[#allocation107_spill] sm:$0xff] }
 0x216   :  { %v2365_v47 = vpop.f32.mrf.mxu0  ;;  %v2598_v20 = vmul.f32 %v12159_v14, %v12159_v14  ;;  %v2659_v60 = vadd.f32 %v2658_v43, %v2597_v8  ;;  %v2665_v41 = vadd.f32 %v2664_v50, %v2663_v13  ;;  %v2529_v15 = vsel %vm2528_vm0, %v15788_v52, 0.0  ;;  %v15795_v34 = vld [vmem:[#allocation104_spill] sm:$0xff] }
 0x217   :  { %15792 = vst [vmem:[#allocation133_spill] sm:$0xff] %v12179_v16  ;;  %v2466_v44 = vpop.f32.mrf.mxu1  ;;  %v2602_v63 = vmul.f32 %v12179_v16, %v12179_v16  ;;  %v2666_v25 = vsel %vm2528_vm0, %v2601_v12, 0.0  ;;  %v2532_v0 = vsel %vm2528_vm0, %v12164_v51, 0.0  ;;  %v2311_v37 = vadd.f32 %v11949_v28, %v12004_v62  ;;  %v15796_v12 = vld [vmem:[#allocation122_spill] sm:$0xff] }
 0x218   :  { %v12194_v1 = vadd.f32 %v11961_v29, %v2315_v18  ;;  %2526 = vadd.xlane.f32.xlu0 %v2525_v46  ;;  %v2667_v33 = vadd.f32 %v2666_v25, %v2665_v41  ;;  %v2531_v40 = vadd.f32 %v2530_v48, %v2529_v15  ;;  %v2317_v8 = vadd.f32 %v11963_v27, %v12019_v54  ;;  %v15793_v18 = vld [vmem:[#allocation106_spill] sm:$0xff]  ;;  %v15797_v41 = vld [vmem:[#allocation103_spill] sm:$0xff]  ;;  %v15798_v15 = vld [vmem:[#allocation105_spill] sm:$0xff] }
 0x219   :  { %v12199_v26 = vadd.f32 %v11973_v10, %v2323_v36  ;;  %v2668_v58 = vsel %vm2528_vm0, %v2602_v63, 0.0  ;;  %v2489_v49 = vadd.f32 %v12038_v5, %v12173_v2  ;;  %v2577_v28 = vmul.f32 %v12014_v56, %v12014_v56  ;;  %v15799_v63 = vld [vmem:[#allocation108_spill] sm:$0xff] }
 0x21a   :  { %v2660_v62 = vadd.f32 %v2659_v60, %v2598_v20  ;;  %v2669_v29 = vadd.f32 %v2668_v58, %v2667_v33  ;;  %v2533_v50 = vadd.f32 %v2532_v0, %v2531_v40  ;;  %v2483_v48 = vadd.f32 %v15794_v11, %v15793_v18  ;;  %v15800_v0 = vld [vmem:[#allocation121_spill] sm:$0xff] }
 0x21b   :  { %v2212_v27 = vadd.f32 %v15795_v34, %v11933_v4  ;;  %v2571_v10 = vmul.f32 %v11855_v6, %v11855_v6  ;;  %v2534_v54 = vsel %vm2528_vm0, %v12179_v16, 0.0  ;;  %v2572_v5 = vmul.f32 %v11977_v45, %v11977_v45 }
 0x21c   :  { %v12217_v43 = vadd.f32 %v11951_v38, %v2311_v37  ;;  %2661 = vadd.xlane.f32.xlu0 %v2660_v62  ;;  %2670 = vadd.xlane.f32.xlu1 %v2669_v29  ;;  %v2633_v13 = vadd.f32 %v2576_v7, %v12125_v30  ;;  %v12222_v4 = vadd.f32 %v15796_v12, %v2317_v8  ;;  %v15802_v29 = vld [vmem:[#allocation101_spill] sm:$0xff] }
 0x21d   :  { %v2313_v36 = vadd.f32 %v11955_v32, %v2212_v27  ;;  %v2490_v47 = vadd.f32 %v2489_v49, %v12199_v26  ;;  %v2484_v44 = vadd.f32 %v2483_v48, %v12194_v1  ;;  %v2573_v46 = vmul.f32 %v11989_v61, %v11989_v61  ;;  %v15801_v49 = vld [vmem:[#allocation124_spill] sm:$0xff] }
 0x21e   :  { %v2535_v20 = vadd.f32 %v2534_v54, %v2533_v50  ;;  %v2578_v38 = vmul.f32 %v12033_v24, %v12033_v24  ;;  %v2634_v60 = vadd.f32 %v2633_v13, %v2577_v28  ;;  %v2478_v30 = vadd.f32 %v15798_v15, %v15797_v41  ;;  %v15803_v50 = vld [vmem:[#allocation102_spill] sm:$0xff]  ;;  %v15804_v13 = vld [vmem:[#allocation119_spill] sm:$0xff] }
 0x21f   :  { %v2568_v32 = vmul.f32 %v11850_v39, %v11850_v39  ;;  %v2628_v7 = vadd.f32 %v2572_v5, %v2571_v10  ;;  %v2567_v25 = vmul.f32 %v15799_v63, %v15799_v63  ;;  %v12237_v37 = vadd.f32 %v15800_v0, %v2313_v36 }
 0x220   :  { %2536 = vadd.xlane.f32.xlu0 %v2535_v20  ;;  %2491 = vadd.xlane.f32.xlu1 %v2490_v47  ;;  %v2485_v33 = vadd.f32 %v2484_v44, %v12222_v4  ;;  %v2479_v40 = vadd.f32 %v2478_v30, %v12217_v43  ;;  %v2569_v8 = vmul.f32 %v12173_v2, %v12173_v2  ;;  %v15806_v20 = vld [vmem:[#allocation100_spill] sm:$0xff]  ;;  %v15624_v30 = vmov 0.0  }
 0x221   :  { %v2635_v58 = vadd.f32 %v2634_v60, %v2578_v38  ;;  %v2574_v28 = vmul.f32 %v15801_v49, %v15801_v49  ;;  %v2629_v62 = vadd.f32 %v2628_v7, %v2573_v46  ;;  %v2473_v48 = vadd.f32 %v15803_v50, %v15802_v29  ;;  %v15805_v46 = vld [vmem:[#allocation99_spill] sm:$0xff]  ;;  %9307 = vmatprep.subr.mxu1 %v15624_v30 }
 0x222   :  { %v2564_v34 = vmul.f32 %v15794_v11, %v15794_v11  ;;  %v2623_v27 = vadd.f32 %v2568_v32, %v2567_v25  ;;  %v2563_v10 = vmul.f32 %v15793_v18, %v15793_v18  ;;  %v2565_v54 = vmul.f32 %v12194_v1, %v12194_v1  ;;  %9242 = vmatprep.subr.mxu0 %v15624_v30  ;;  %v15809_v30 = vld [vmem:[#allocation118_spill] sm:$0xff] }
 0x223   :  { %v2480_v5 = vadd.f32 %v2479_v40, %v12237_v37  ;;  %v2474_v36 = vadd.f32 %v2473_v48, %v15804_v13  ;;  %v2630_v12 = vadd.f32 %v2629_v62, %v2574_v28  ;;  %v2570_v47 = vmul.f32 %v12199_v26, %v12199_v26 }
 0x224   :  { %2636 = vadd.xlane.f32.xlu0 %v2635_v58  ;;  %2486 = vadd.xlane.f32.xlu1 %v2485_v33  ;;  %v2624_v44 = vadd.f32 %v2623_v27, %v2569_v8  ;;  %v2468_v38 = vadd.f32 %v15806_v20, %v15805_v46  ;;  %v2552_v60 = vmul.f32 %v15806_v20, %v15806_v20  ;;  %v15807_v33 = vld [vmem:[#allocation117_spill] sm:$0xff]  ;;  %v15808_v8 = vld [vmem:[#allocation120_spill] sm:$0xff] }
 0x225   :  { %v2551_v32 = vmul.f32 %v15805_v46, %v15805_v46  ;;  %v2560_v7 = vmul.f32 %v15798_v15, %v15798_v15  ;;  %v2618_v25 = vadd.f32 %v2564_v34, %v2563_v10  ;;  %v2559_v0 = vmul.f32 %v15797_v41, %v15797_v41 }
 0x226   :  { %v2553_v40 = vmul.f32 %v15807_v33, %v15807_v33  ;;  %v2475_v58 = vadd.f32 %v2474_v36, %v15808_v8  ;;  %v2469_v28 = vadd.f32 %v2468_v38, %v15807_v33  ;;  %v2561_v62 = vmul.f32 %v12217_v43, %v12217_v43 }
 0x227   :  { %v2625_v48 = vadd.f32 %v2624_v44, %v2570_v47  ;;  %v2566_v27 = vmul.f32 %v12222_v4, %v12222_v4  ;;  %v2556_v34 = vmul.f32 %v15803_v50, %v15803_v50  ;;  %v2613_v10 = vadd.f32 %v2560_v7, %v2559_v0 }
 0x228   :  { %2631 = vadd.xlane.f32.xlu0 %v2630_v12  ;;  %2481 = vadd.xlane.f32.xlu1 %v2480_v5  ;;  %v2619_v12 = vadd.f32 %v2618_v25, %v2565_v54  ;;  %v2603_v5 = vadd.f32 %v2552_v60, %v2551_v32  ;;  %v2555_v36 = vmul.f32 %v15802_v29, %v15802_v29 }
 0x229   :  { %v2470_v38 = vadd.f32 %v2469_v28, %v15809_v30  ;;  %v2554_v14 = vmul.f32 %v15809_v30, %v15809_v30  ;;  %v2557_v44 = vmul.f32 %v15804_v13, %v15804_v13  ;;  %v2562_v60 = vmul.f32 %v12237_v37, %v12237_v37 }
 0x22a   :  { %v2604_v47 = vadd.f32 %v2603_v5, %v2553_v40  ;;  %v2620_v54 = vadd.f32 %v2619_v12, %v2566_v27  ;;  %v2614_v32 = vadd.f32 %v2613_v10, %v2561_v62  ;;  %v2608_v7 = vadd.f32 %v2556_v34, %v2555_v36 }
 0x22c   :  { %2626 = vadd.xlane.f32.xlu0 %v2625_v48  ;;  %2476 = vadd.xlane.f32.xlu1 %v2475_v58  ;;  %v2615_v25 = vadd.f32 %v2614_v32, %v2562_v60  ;;  %v2605_v0 = vadd.f32 %v2604_v47, %v2554_v14  ;;  %v2558_v58 = vmul.f32 %v15808_v8, %v15808_v8  ;;  %v15810_v48 = vmov 0.0  }
 0x22d   :  { %v2609_v28 = vadd.f32 %v2608_v7, %v2557_v44  ;;  %9268 = vmatprep.mubr.msk.f32.mxu0 %vm10892_vm1, %v15810_v48  ;;  %9333 = vmatprep.mubr.msk.f32.mxu1 %vm10892_vm1, %v15810_v48 }
 0x22f   :  { %v2610_v40 = vadd.f32 %v2609_v28, %v2558_v58 }
 0x230   :  { %2621 = vadd.xlane.f32.xlu0 %v2620_v54  ;;  %2471 = vadd.xlane.f32.xlu1 %v2470_v38 }
 0x234   :  { %2616 = vadd.xlane.f32.xlu0 %v2615_v25  ;;  %2606 = vadd.xlane.f32.xlu1 %v2605_v0 }
 0x238   :  { %2611 = vadd.xlane.f32.xlu0 %v2610_v40 }
 0x286   :  { %v12294_v62 = vpop.xlane.xlu1 %2496 }
 0x28a   :  { %v2502_v27 = vpop.xlane.xlu1 %2501 }
 0x28e   :  { %v2507_v12 = vpop.xlane.xlu1 %2506 }
 0x291   :  { %v2642_v14 = vpop.xlane.xlu0 %2641 }
 0x292   :  { %v2512_v5 = vpop.xlane.xlu1 %2511 }
 0x295   :  { %v2647_v34 = vpop.xlane.xlu0 %2646 }
 0x296   :  { %v2517_v36 = vpop.xlane.xlu1 %2516 }
 0x299   :  { %v2652_v10 = vpop.xlane.xlu0 %2651 }
 0x29a   :  { %v2681_v40 = vmul.f32 0.001953125, %v2652_v10  ;;  %v2547_v10 = vmul.f32 0.001953125, %v2517_v36  ;;  %v2544_v36 = vmul.f32 0.001953125, %v2502_v27 }
 0x29b   :  { %v2522_v47 = vpop.xlane.xlu1 %2521 }
 0x29c   :  { %v2548_v16 = vmul.f32 0.001953125, %v2522_v47 }
 0x29d   :  { %v2657_v38 = vpop.xlane.xlu0 %2656 }
 0x29e   :  { %v2682_v58 = vmul.f32 0.001953125, %v2657_v38  ;;  %v2679_v38 = vmul.f32 0.001953125, %v2642_v14 }
 0x2a1   :  { %v2527_v44 = vpop.xlane.xlu0 %2526 }
 0x2a2   :  { %v2549_v22 = vmul.f32 0.001953125, %v2527_v44 }
 0x2a5   :  { %v2662_v54 = vpop.xlane.xlu0 %2661  ;;  %v2671_v60 = vpop.xlane.xlu1 %2670 }
 0x2a6   :  { %v2684_v32 = vmul.f32 0.001953125, %v2671_v60  ;;  %v2683_v7 = vmul.f32 0.001953125, %v2662_v54 }
 0x2a8   :  { %9308 = vmatpush3.msk.msra.mxu1 %vm2528_vm0, %v2684_v32  ;;  %v2680_v32 = vmul.f32 0.001953125, %v2647_v34 }
 0x2a9   :  { %v2537_v25 = vpop.xlane.xlu0 %2536  ;;  %9309 = vmatprep.subr.mxu1 %v15810_v48  ;;  %v2492_v0 = vpop.xlane.xlu1 %2491 }
 0x2aa   :  { %v2550_v28 = vmul.f32 0.001953125, %v2537_v25  ;;  %9310 = vmatpush3.msra.mxu1 %v2683_v7  ;;  %v2546_v25 = vmul.f32 0.001953125, %v2512_v5  ;;  %v2543_v5 = vmul.f32 0.001953125, %v12294_v62 }
 0x2ab   :  { %9311 = vmatprep.subr.mxu1 %v15810_v48 }
 0x2ac   :  { %9243 = vmatpush3.msk.msra.mxu0 %vm2528_vm0, %v2550_v28  ;;  %9312 = vmatpush3.msra.mxu1 %v2682_v58  ;;  %v2542_v28 = vmul.f32 0.001953125, %v2492_v0 }
 0x2ad   :  { %9244 = vmatprep.subr.mxu0 %v15810_v48  ;;  %v2637_v60 = vpop.xlane.xlu0 %2636  ;;  %9313 = vmatprep.subr.mxu1 %v15810_v48  ;;  %v2487_v54 = vpop.xlane.xlu1 %2486 }
 0x2ae   :  { %9245 = vmatpush3.msra.mxu0 %v2549_v22  ;;  %9314 = vmatpush3.msra.mxu1 %v2681_v40  ;;  %v2678_v58 = vmul.f32 0.001953125, %v2637_v60  ;;  %v2545_v22 = vmul.f32 0.001953125, %v2507_v12  ;;  %v2541_v60 = vmul.f32 0.001953125, %v2487_v54 }
 0x2af   :  { %9246 = vmatprep.subr.mxu0 %v15810_v48  ;;  %9315 = vmatprep.subr.mxu1 %v15810_v48 }
 0x2b0   :  { %9247 = vmatpush3.msra.mxu0 %v2548_v16  ;;  %9316 = vmatpush3.msra.mxu1 %v2680_v32 }
 0x2b1   :  { %v2632_v44 = vpop.xlane.xlu0 %2631  ;;  %9248 = vmatprep.subr.mxu0 %v15810_v48  ;;  %9317 = vmatprep.subr.mxu1 %v15810_v48  ;;  %v2482_v7 = vpop.xlane.xlu1 %2481 }
 0x2b2   :  { %9249 = vmatpush3.msra.mxu0 %v2547_v10  ;;  %9318 = vmatpush3.msra.mxu1 %v2679_v38  ;;  %v2677_v34 = vmul.f32 0.001953125, %v2632_v44  ;;  %v2540_v62 = vmul.f32 0.001953125, %v2482_v7 }
 0x2b3   :  { %9250 = vmatprep.subr.mxu0 %v15810_v48  ;;  %9319 = vmatprep.subr.mxu1 %v15810_v48 }
 0x2b4   :  { %9251 = vmatpush3.msra.mxu0 %v2546_v25  ;;  %9320 = vmatpush3.msra.mxu1 %v2678_v58  ;;  %v12321_v58 = vld [vmem:[#allocation11] sm:$0xff] }
 0x2b5   :  { %9252 = vmatprep.subr.mxu0 %v15810_v48  ;;  %v2627_v16 = vpop.xlane.xlu0 %2626  ;;  %9321 = vmatprep.subr.mxu1 %v15810_v48  ;;  %v2477_v14 = vpop.xlane.xlu1 %2476  ;;  %15811 = vst [vmem:[#allocation106_spill] sm:$0xff] %v12321_v58 }
 0x2b6   :  { %v2676_v47 = vmul.f32 0.001953125, %v2627_v16  ;;  %9253 = vmatpush3.msra.mxu0 %v2545_v22  ;;  %9322 = vmatpush3.msra.mxu1 %v2677_v34  ;;  %v2539_v10 = vmul.f32 0.001953125, %v2477_v14  ;;  %v12329_v22 = vld [vmem:[#allocation11 + $0x8] sm:$0xff]  ;;  %v12339_v34 = vld [vmem:[#allocation11 + $0x10] sm:$0xff]  ;;  %v12349_v16 = vld [vmem:[#allocation11 + $0x18] sm:$0xff] }
 0x2b7   :  { %9254 = vmatprep.subr.mxu0 %v15810_v48  ;;  %9323 = vmatprep.subr.mxu1 %v15810_v48  ;;  %15812 = vst [vmem:[#allocation107_spill] sm:$0xff] %v12329_v22  ;;  %15813 = vst [vmem:[#allocation104_spill] sm:$0xff] %v12339_v34  ;;  %v12359_v14 = vld [vmem:[#allocation11 + $0x20] sm:$0xff] }
 0x2b8   :  { %9255 = vmatpush3.msra.mxu0 %v2544_v36  ;;  %9324 = vmatpush3.msra.mxu1 %v2676_v47  ;;  %15814 = vst [vmem:[#allocation122_spill] sm:$0xff] %v12349_v16  ;;  %15815 = vst [vmem:[#allocation103_spill] sm:$0xff] %v12359_v14  ;;  %v12369_v36 = vld [vmem:[#allocation11 + $0x28] sm:$0xff]  ;;  %v12379_v47 = vld [vmem:[#allocation11 + $0x30] sm:$0xff] }
 0x2b9   :  { %9256 = vmatprep.subr.mxu0 %v15810_v48  ;;  %v2622_v12 = vpop.xlane.xlu0 %2621  ;;  %9325 = vmatprep.subr.mxu1 %v15810_v48  ;;  %v2472_v27 = vpop.xlane.xlu1 %2471  ;;  %15816 = vst [vmem:[#allocation105_spill] sm:$0xff] %v12369_v36  ;;  %15817 = vst [vmem:[#allocation108_spill] sm:$0xff] %v12379_v47 }
 0x2ba   :  { %v2675_v40 = vmul.f32 0.001953125, %v2622_v12  ;;  %9257 = vmatpush3.msra.mxu0 %v2543_v5  ;;  %v2538_v54 = vmul.f32 0.001953125, %v2472_v27  ;;  %v12389_v5 = vld [vmem:[#allocation11 + $0x38] sm:$0xff]  ;;  %v12399_v12 = vld [vmem:[#allocation11 + $0x40] sm:$0xff] }
 0x2bb   :  { %9258 = vmatprep.subr.mxu0 %v15810_v48  ;;  %15818 = vst [vmem:[#allocation121_spill] sm:$0xff] %v12389_v5  ;;  %15819 = vst [vmem:[#allocation124_spill] sm:$0xff] %v12399_v12  ;;  %v12429_v27 = vld [vmem:[#allocation11 + $0x58] sm:$0xff] }
 0x2bc   :  { %9259 = vmatpush3.msra.mxu0 %v2542_v28  ;;  %9326 = vmatpush3.msra.mxu1 %v2675_v40  ;;  %v12409_v28 = vld [vmem:[#allocation11 + $0x48] sm:$0xff]  ;;  %v12419_v40 = vld [vmem:[#allocation11 + $0x50] sm:$0xff]  ;;  %15822 = vst [vmem:[#allocation119_spill] sm:$0xff] %v12429_v27 }
 0x2bd   :  { %9260 = vmatprep.subr.mxu0 %v15810_v48  ;;  %v2617_v32 = vpop.xlane.xlu0 %2616  ;;  %9327 = vmatprep.subr.mxu1 %v15810_v48  ;;  %v2607_v0 = vpop.xlane.xlu1 %2606  ;;  %15820 = vst [vmem:[#allocation101_spill] sm:$0xff] %v12409_v28  ;;  %15821 = vst [vmem:[#allocation102_spill] sm:$0xff] %v12419_v40 }
 0x2be   :  { %v2674_v38 = vmul.f32 0.001953125, %v2617_v32  ;;  %9261 = vmatpush3.msra.mxu0 %v2541_v60  ;;  %v2672_v7 = vmul.f32 0.001953125, %v2607_v0  ;;  %v12439_v60 = vld [vmem:[#allocation11 + $0x60] sm:$0xf]  ;;  %v15639_v32 = vmov 0  }
 0x2bf   :  { %9262 = vmatprep.subr.mxu0 %v15810_v48  ;;  %15823 = vst [vmem:[#allocation99_spill] sm:$0xff] %v12439_v60  ;;  %9977 = vset.pattern.permute.xlu0 %v15639_v32 }
 0x2c0   :  { %9263 = vmatpush3.msra.mxu0 %v2540_v62  ;;  %9328 = vmatpush3.msra.mxu1 %v2674_v38 }
 0x2c1   :  { %9264 = vmatprep.subr.mxu0 %v15810_v48  ;;  %v2612_v44 = vpop.xlane.xlu0 %2611  ;;  %9329 = vmatprep.subr.mxu1 %v15810_v48 }
 0x2c2   :  { %v2673_v25 = vmul.f32 0.001953125, %v2612_v44  ;;  %9265 = vmatpush3.msra.mxu0 %v2539_v10  ;;  %9978 = vset.pattern.permute.xlu1 %v15639_v32 }
 0x2c3   :  { %9266 = vmatprep.subr.mxu0 %v15810_v48 }
 0x2c4   :  { %9267 = vmatpush3.msra.mxu0 %v2538_v54  ;;  %9330 = vmatpush3.msra.mxu1 %v2673_v25 }
 0x2c5   :  { %9269 = vmatmul.mubr.msk.f32.vlgmr.msra.gmra.mxu0 %vm2685_vm2, %v12321_v58  ;;  %9331 = vmatprep.subr.mxu1 %v15810_v48 }
 0x2c6   :  { %9332 = vmatpush3.msra.mxu1 %v2672_v7  ;;  %9271 = vmatprep.mubr.msk.f32.mxu0 %vm10892_vm1, %v15810_v48 }
 0x2c7   :  { %9334 = vmatmul.mubr.msk.f32.vlgmr.msra.gmra.mxu1 %vm2685_vm2, %v12321_v58 }
 0x2c8   :  { %9336 = vmatprep.mubr.msk.f32.mxu1 %vm10892_vm1, %v15810_v48 }
 0x2c9   :  { %9272 = vmatmul.mubr.msk.f32.gmra.mxu0 %vm2685_vm2, %v12329_v22 }
 0x2ca   :  { %9274 = vmatprep.mubr.msk.f32.mxu0 %vm10892_vm1, %v15810_v48 }
 0x2cb   :  { %9337 = vmatmul.mubr.msk.f32.gmra.mxu1 %vm2685_vm2, %v12329_v22 }
 0x2cc   :  { %9339 = vmatprep.mubr.msk.f32.mxu1 %vm10892_vm1, %v15810_v48 }
 0x2cd   :  { %9275 = vmatmul.mubr.msk.f32.gmra.mxu0 %vm2685_vm2, %v12339_v34 }
 0x2ce   :  { %9277 = vmatprep.mubr.msk.f32.mxu0 %vm10892_vm1, %v15810_v48 }
 0x2cf   :  { %9340 = vmatmul.mubr.msk.f32.gmra.mxu1 %vm2685_vm2, %v12339_v34 }
 0x2d0   :  { %9342 = vmatprep.mubr.msk.f32.mxu1 %vm10892_vm1, %v15810_v48 }
 0x2d1   :  { %9278 = vmatmul.mubr.msk.f32.gmra.mxu0 %vm2685_vm2, %v12349_v16 }
 0x2d2   :  { %9280 = vmatprep.mubr.msk.f32.mxu0 %vm10892_vm1, %v15810_v48 }
 0x2d3   :  { %9343 = vmatmul.mubr.msk.f32.gmra.mxu1 %vm2685_vm2, %v12349_v16 }
 0x2d4   :  { %9345 = vmatprep.mubr.msk.f32.mxu1 %vm10892_vm1, %v15810_v48 }
 0x2d5   :  { %9281 = vmatmul.mubr.msk.f32.gmra.mxu0 %vm2685_vm2, %v12359_v14 }
 0x2d6   :  { %9283 = vmatprep.mubr.msk.f32.mxu0 %vm10892_vm1, %v15810_v48 }
 0x2d7   :  { %9346 = vmatmul.mubr.msk.f32.gmra.mxu1 %vm2685_vm2, %v12359_v14 }
 0x2d8   :  { %9348 = vmatprep.mubr.msk.f32.mxu1 %vm10892_vm1, %v15810_v48 }
 0x2d9   :  { %9284 = vmatmul.mubr.msk.f32.gmra.mxu0 %vm2685_vm2, %v12369_v36 }
 0x2da   :  { %9286 = vmatprep.mubr.msk.f32.mxu0 %vm10892_vm1, %v15810_v48 }
 0x2db   :  { %9349 = vmatmul.mubr.msk.f32.gmra.mxu1 %vm2685_vm2, %v12369_v36 }
 0x2dc   :  { %9351 = vmatprep.mubr.msk.f32.mxu1 %vm10892_vm1, %v15810_v48 }
 0x2dd   :  { %9287 = vmatmul.mubr.msk.f32.gmra.mxu0 %vm2685_vm2, %v12379_v47 }
 0x2de   :  { %9289 = vmatprep.mubr.msk.f32.mxu0 %vm10892_vm1, %v15810_v48 }
 0x2df   :  { %9352 = vmatmul.mubr.msk.f32.gmra.mxu1 %vm2685_vm2, %v12379_v47 }
 0x2e0   :  { %9354 = vmatprep.mubr.msk.f32.mxu1 %vm10892_vm1, %v15810_v48 }
 0x2e1   :  { %9290 = vmatmul.mubr.msk.f32.gmra.mxu0 %vm2685_vm2, %v12389_v5 }
 0x2e2   :  { %9292 = vmatprep.mubr.msk.f32.mxu0 %vm10892_vm1, %v15810_v48 }
 0x2e3   :  { %9355 = vmatmul.mubr.msk.f32.gmra.mxu1 %vm2685_vm2, %v12389_v5 }
 0x2e4   :  { %9357 = vmatprep.mubr.msk.f32.mxu1 %vm10892_vm1, %v15810_v48 }
 0x2e5   :  { %9293 = vmatmul.mubr.msk.f32.gmra.mxu0 %vm2685_vm2, %v12399_v12 }
 0x2e6   :  { %9295 = vmatprep.mubr.msk.f32.mxu0 %vm10892_vm1, %v15810_v48 }
 0x2e7   :  { %9358 = vmatmul.mubr.msk.f32.gmra.mxu1 %vm2685_vm2, %v12399_v12 }
 0x2e8   :  { %9360 = vmatprep.mubr.msk.f32.mxu1 %vm10892_vm1, %v15810_v48 }
 0x2e9   :  { %9296 = vmatmul.mubr.msk.f32.gmra.mxu0 %vm2685_vm2, %v12409_v28 }
 0x2ea   :  { %9298 = vmatprep.mubr.msk.f32.mxu0 %vm10892_vm1, %v15810_v48 }
 0x2eb   :  { %9361 = vmatmul.mubr.msk.f32.gmra.mxu1 %vm2685_vm2, %v12409_v28 }
 0x2ec   :  { %9363 = vmatprep.mubr.msk.f32.mxu1 %vm10892_vm1, %v15810_v48 }
 0x2ed   :  { %9299 = vmatmul.mubr.msk.f32.gmra.mxu0 %vm2685_vm2, %v12419_v40 }
 0x2ee   :  { %9301 = vmatprep.mubr.msk.f32.mxu0 %vm10892_vm1, %v15810_v48 }
 0x2ef   :  { %9364 = vmatmul.mubr.msk.f32.gmra.mxu1 %vm2685_vm2, %v12419_v40 }
 0x2f0   :  { %9366 = vmatprep.mubr.msk.f32.mxu1 %vm10892_vm1, %v15810_v48 }
 0x2f1   :  { %9302 = vmatmul.mubr.msk.f32.gmra.mxu0 %vm2685_vm2, %v12429_v27 }
 0x2f2   :  { %9304 = vmatprep.mubr.msk.f32.mxu0 %vm10892_vm1, %v15810_v48 }
 0x2f3   :  { %9367 = vmatmul.mubr.msk.f32.gmra.mxu1 %vm2685_vm2, %v12429_v27 }
 0x2f4   :  { %9369 = vmatprep.mubr.msk.f32.mxu1 %vm10892_vm1, %v15810_v48 }
 0x2f5   :  { %9305 = vmatmul.mubr.msk.f32.gmra.mxu0 %vm2685_vm2, %v12439_v60 }
 0x2f7   :  { %9370 = vmatmul.mubr.msk.f32.gmra.mxu1 %vm2685_vm2, %v12439_v60 }
 0x385   :  { %v2794_v62 = vpop.f32.mrf.mxu0 }
 0x386   :  { %v12451_v38 = vmul.f32 0.5, %v2794_v62 }
 0x387   :  { %v9270_v10 = vpop.f32.mrf.mxu0  ;;  %v2940_v0 = vpop.f32.mrf.mxu1 }
 0x388   :  { %v3017_v44 = vmul.f32 %v12451_v38, %v12451_v38  ;;  %v3004_v54 = vmul.f32 0.5, %v2940_v0 }
 0x389   :  { %v2799_v25 = vpop.f32.mrf.mxu0  ;;  %v9335_v7 = vpop.f32.mrf.mxu1 }
 0x38a   :  { %v3030_v27 = vsub.f32 %v3004_v54, %v3017_v44  ;;  %v12455_v40 = vmul.f32 0.5, %v2799_v25 }
 0x38b   :  { %v9273_v60 = vpop.f32.mrf.mxu0  ;;  %v2945_v28 = vpop.f32.mrf.mxu1 }
 0x38c   :  { %v3043_v12 = vmax.f32 %v3030_v27, 0.0  ;;  %v3018_v32 = vmul.f32 %v12455_v40, %v12455_v40  ;;  %v3005_v5 = vmul.f32 0.5, %v2945_v28 }
 0x38d   :  { %v2804_v62 = vpop.f32.mrf.mxu0  ;;  %v9338_v47 = vpop.f32.mrf.mxu1 }
 0x38e   :  { %v3069_v10 = vadd.f32 1e-05, %v3043_v12  ;;  %v3031_v36 = vsub.f32 %v3005_v5, %v3018_v32  ;;  %v12459_v14 = vmul.f32 0.5, %v2804_v62 }
 0x38f   :  { %v9276_v16 = vpop.f32.mrf.mxu0  ;;  %v2950_v0 = vpop.f32.mrf.mxu1 }
 0x390   :  { %10327 = vrsqrt.f32 %v3069_v10  ;;  %v3044_v7 = vmax.f32 %v3031_v36, 0.0  ;;  %v3019_v44 = vmul.f32 %v12459_v14, %v12459_v14  ;;  %v3006_v60 = vmul.f32 0.5, %v2950_v0 }
 0x391   :  { %v2809_v54 = vpop.f32.mrf.mxu0  ;;  %v9341_v27 = vpop.f32.mrf.mxu1 }
 0x392   :  { %v3070_v25 = vadd.f32 1e-05, %v3044_v7  ;;  %v3032_v34 = vsub.f32 %v3006_v60, %v3019_v44  ;;  %v12463_v22 = vmul.f32 0.5, %v2809_v54 }
 0x393   :  { %v9279_v28 = vpop.f32.mrf.mxu0  ;;  %v2955_v47 = vpop.f32.mrf.mxu1 }
 0x394   :  { %10329 = vrsqrt.f32 %v3070_v25  ;;  %v3045_v5 = vmax.f32 %v3032_v34, 0.0  ;;  %v3020_v16 = vmul.f32 %v12463_v22, %v12463_v22  ;;  %v3007_v12 = vmul.f32 0.5, %v2955_v47 }
 0x395   :  { %v2814_v32 = vpop.f32.mrf.mxu0  ;;  %v9344_v36 = vpop.f32.mrf.mxu1 }
 0x396   :  { %v3071_v62 = vadd.f32 1e-05, %v3045_v5  ;;  %v3033_v10 = vsub.f32 %v3007_v12, %v3020_v16  ;;  %v12467_v58 = vmul.f32 0.5, %v2814_v32  ;;  %v3056_v5 = vld [vmem:[%s15824_s4] sm:$0xff] }
 0x397   :  { %v9282_v0 = vpop.f32.mrf.mxu0  ;;  %v2960_v27 = vpop.f32.mrf.mxu1 }
 0x398   :  { %10331 = vrsqrt.f32 %v3071_v62  ;;  %v3046_v7 = vmax.f32 %v3033_v10, 0.0  ;;  %v3021_v44 = vmul.f32 %v12467_v58, %v12467_v58  ;;  %v3008_v60 = vmul.f32 0.5, %v2960_v27 }
 0x399   :  { %v2819_v54 = vpop.f32.mrf.mxu0  ;;  %v9347_v34 = vpop.f32.mrf.mxu1 }
 0x39a   :  { %v3072_v25 = vadd.f32 1e-05, %v3046_v7  ;;  %v3034_v28 = vsub.f32 %v3008_v60, %v3021_v44  ;;  %v12471_v48 = vmul.f32 0.5, %v2819_v54 }
 0x39b   :  { %v9285_v47 = vpop.f32.mrf.mxu0  ;;  %v2965_v36 = vpop.f32.mrf.mxu1 }
 0x39c   :  { %v3047_v16 = vmax.f32 %v3034_v28, 0.0  ;;  %v3022_v12 = vmul.f32 %v12471_v48, %v12471_v48  ;;  %v3009_v32 = vmul.f32 0.5, %v2965_v36  ;;  %10333 = vrsqrt.f32 %v3072_v25  ;;  %v3057_v47 = vld [vmem:[%s15824_s4 + $0x8] sm:$0xff]  ;;  %v3108_v25 = vld [vmem:[%s15825_s16] sm:$0xff] }
 0x39d   :  { %v10328_v62 = vpop.eup %10327  ;;  %v2824_v10 = vpop.f32.mrf.mxu0 }
 0x39e   :  { %v9350_v0 = vpop.f32.mrf.mxu1  ;;  %v3073_v27 = vadd.f32 1e-05, %v3047_v16  ;;  %v3035_v7 = vsub.f32 %v3009_v32, %v3022_v12  ;;  %v12478_v44 = vmul.f32 0.5, %v2824_v10  ;;  %v3095_v60 = vmul.f32 %v10328_v62, %v3056_v5 }
 0x39f   :  { %v9288_v54 = vpop.f32.mrf.mxu0 }
 0x3a0   :  { %v2970_v34 = vpop.f32.mrf.mxu1  ;;  %10335 = vrsqrt.f32 %v3073_v27  ;;  %v3023_v28 = vmul.f32 %v12478_v44, %v12478_v44  ;;  %3149 = vperm.xlu0 %9977, %v3095_v60   ;;  %v3048_v12 = vmax.f32 %v3035_v7, 0.0  ;;  %v3121_v62 = vmul.f32 %v3095_v60, %v12451_v38 }
 0x3a1   :  { %v3010_v36 = vmul.f32 0.5, %v2970_v34  ;;  %v10330_v16 = vpop.eup %10329  ;;  %v2829_v32 = vpop.f32.mrf.mxu0  ;;  %v3058_v34 = vld [vmem:[%s15824_s4 + $0x10] sm:$0xff] }
 0x3a2   :  { %v9353_v5 = vpop.f32.mrf.mxu1  ;;  %v12489_v0 = vmul.f32 0.5, %v2829_v32  ;;  %v3096_v54 = vmul.f32 %v10330_v16, %v3057_v47  ;;  %v3134_v57 = vsub.f32 %v3108_v25, %v3121_v62  ;;  %v3074_v19 = vadd.f32 1e-05, %v3048_v12  ;;  %v3109_v62 = vld [vmem:[%s15825_s16 + $0x8] sm:$0xff] }
 0x3a3   :  { %v3036_v10 = vsub.f32 %v3010_v36, %v3023_v28  ;;  %v9291_v27 = vpop.f32.mrf.mxu0 }
 0x3a4   :  { %v2975_v51 = vpop.f32.mrf.mxu1  ;;  %3154 = vperm.xlu1 %9978, %v3096_v54   ;;  %v3024_v7 = vmul.f32 %v12489_v0, %v12489_v0  ;;  %3266 = vperm.xlu0 %9977, %v3134_v57   ;;  %v3122_v25 = vmul.f32 %v3096_v54, %v12455_v40  ;;  %v3110_v57 = vld [vmem:[%s15825_s16 + $0x10] sm:$0xff] }
 0x3a5   :  { %v3049_v52 = vmax.f32 %v3036_v10, 0.0  ;;  %v10332_v55 = vpop.eup %10331  ;;  %v3011_v5 = vmul.f32 0.5, %v2975_v51  ;;  %v2834_v38 = vpop.f32.mrf.mxu0 }
 0x3a6   :  { %v9356_v60 = vpop.f32.mrf.mxu1  ;;  %v12496_v47 = vmul.f32 0.5, %v2834_v38  ;;  %v3097_v36 = vmul.f32 %v10332_v55, %v3058_v34  ;;  %v3135_v38 = vsub.f32 %v3109_v62, %v3122_v25 }
 0x3a7   :  { %v3075_v28 = vadd.f32 1e-05, %v3049_v52  ;;  %v9294_v16 = vpop.f32.mrf.mxu0  ;;  %v3037_v52 = vsub.f32 %v3011_v5, %v3024_v7  ;;  %v3059_v60 = vld [vmem:[%s15824_s4 + $0x18] sm:$0xff]  ;;  %v3060_v7 = vld [vmem:[%s15824_s4 + $0x20] sm:$0xff] }
 0x3a8   :  { %v2980_v32 = vpop.f32.mrf.mxu1  ;;  %v3025_v12 = vmul.f32 %v12496_v47, %v12496_v47  ;;  %3159 = vperm.xlu1 %9978, %v3097_v36   ;;  %v3123_v40 = vmul.f32 %v3097_v36, %v12459_v14 }
 0x3a9   :  { %10337 = vrsqrt.f32 %v3075_v28  ;;  %v3012_v51 = vmul.f32 0.5, %v2980_v32  ;;  %v2839_v55 = vpop.f32.mrf.mxu0  ;;  %v10334_v54 = vpop.eup %10333 }
 0x3aa   :  { %v9359_v10 = vpop.f32.mrf.mxu1  ;;  %10339 = vrsqrt.f32 %v3074_v19  ;;  %v12508_v34 = vmul.f32 0.5, %v2839_v55  ;;  %v3136_v32 = vsub.f32 %v3110_v57, %v3123_v40 }
 0x3ab   :  { %v3038_v27 = vsub.f32 %v3012_v51, %v3025_v12  ;;  %v9297_v28 = vpop.f32.mrf.mxu0  ;;  %v3050_v12 = vmax.f32 %v3037_v52, 0.0  ;;  %v3098_v51 = vmul.f32 %v10334_v54, %v3059_v60  ;;  %v3112_v52 = vld [vmem:[%s15825_s16 + $0x20] sm:$0xff] }
 0x3ac   :  { %v2985_v16 = vpop.f32.mrf.mxu1  ;;  %v3026_v14 = vmul.f32 %v12508_v34, %v12508_v34  ;;  %3271 = vperm.xlu1 %9978, %v3135_v38   ;;  %3276 = vperm.xlu0 %9977, %v3136_v32  }
 0x3ad   :  { %v3051_v5 = vmax.f32 %v3038_v27, 0.0  ;;  %v3013_v19 = vmul.f32 0.5, %v2985_v16  ;;  %v10336_v36 = vpop.eup %10335  ;;  %v2844_v25 = vpop.f32.mrf.mxu0  ;;  %v3076_v38 = vadd.f32 1e-05, %v3050_v12  ;;  %v3062_v12 = vld [vmem:[%s15824_s4 + $0x30] sm:$0xff] }
 0x3ae   :  { %v9362_v62 = vpop.f32.mrf.mxu1  ;;  %v12518_v28 = vmul.f32 0.5, %v2844_v25  ;;  %v3099_v57 = vmul.f32 %v10336_v36, %v3060_v7  ;;  %v3124_v7 = vmul.f32 %v3098_v51, %v12463_v22 }
 0x3af   :  { %v3077_v55 = vadd.f32 1e-05, %v3051_v5  ;;  %v3039_v10 = vsub.f32 %v3013_v19, %v3026_v14  ;;  %v9300_v40 = vpop.f32.mrf.mxu0 }
 0x3b0   :  { %v2990_v9 = vpop.f32.mrf.mxu1  ;;  %v3027_v42 = vmul.f32 %v12518_v28, %v12518_v28  ;;  %3164 = vperm.xlu1 %9978, %v3098_v51   ;;  %v3125_v32 = vmul.f32 %v3099_v57, %v12467_v58 }
 0x3b1   :  { %10341 = vrsqrt.f32 %v3077_v55  ;;  %v3052_v27 = vmax.f32 %v3039_v10, 0.0  ;;  %v3014_v16 = vmul.f32 0.5, %v2990_v9  ;;  %v2849_v54 = vpop.f32.mrf.mxu0  ;;  %v3111_v9 = vld [vmem:[%s15825_s16 + $0x18] sm:$0xff] }
 0x3b2   :  { %v9365_v60 = vpop.f32.mrf.mxu1  ;;  %v12527_v19 = vmul.f32 0.5, %v2849_v54  ;;  %v3138_v25 = vsub.f32 %v3112_v52, %v3125_v32  ;;  %v3137_v51 = vsub.f32 %v3111_v9, %v3124_v7  ;;  %v3061_v32 = vld [vmem:[%s15824_s4 + $0x28] sm:$0xff]  ;;  %v3114_v9 = vld [vmem:[%s15825_s16 + $0x30] sm:$0xff] }
 0x3b3   :  { %v3078_v5 = vadd.f32 1e-05, %v3052_v27  ;;  %v3040_v14 = vsub.f32 %v3014_v16, %v3027_v42  ;;  %v9303_v62 = vpop.f32.mrf.mxu0 }
 0x3b4   :  { %v2995_v36 = vpop.f32.mrf.mxu1  ;;  %v3028_v58 = vmul.f32 %v12527_v19, %v12527_v19  ;;  %3169 = vperm.xlu1 %9978, %v3099_v57   ;;  %3286 = vperm.xlu0 %9977, %v3138_v25  }
 0x3b5   :  { %10343 = vrsqrt.f32 %v3078_v5  ;;  %v3053_v55 = vmax.f32 %v3040_v14, 0.0  ;;  %v3015_v22 = vmul.f32 0.5, %v2995_v36  ;;  %v2854_v40 = vpop.f32.mrf.mxu0 }
 0x3b6   :  { %v10338_v42 = vpop.eup %10337  ;;  %10345 = vrsqrt.f32 %v3076_v38  ;;  %v9368_v10 = vpop.f32.mrf.mxu1  ;;  %v12537_v52 = vmul.f32 0.5, %v2854_v40 }
 0x3b7   :  { %v3079_v27 = vadd.f32 1e-05, %v3053_v55  ;;  %v3041_v16 = vsub.f32 %v3015_v22, %v3028_v58  ;;  %v3101_v54 = vmul.f32 %v10338_v42, %v3062_v12  ;;  %v10340_v60 = vpop.eup %10339  ;;  %v9306_v14 = vpop.f32.mrf.mxu0  ;;  %v3064_v22 = vld [vmem:[%s15824_s4 + $0x40] sm:$0xff] }
 0x3b8   :  { %v3000_v5 = vpop.f32.mrf.mxu1  ;;  %3281 = vperm.xlu1 %9978, %v3137_v51   ;;  %v3029_v38 = vmul.f32 %v12537_v52, %v12537_v52  ;;  %v3100_v12 = vmul.f32 %v10340_v60, %v3061_v32 }
 0x3b9   :  { %10347 = vrsqrt.f32 %v3079_v27  ;;  %v3054_v57 = vmax.f32 %v3041_v16, 0.0  ;;  %v3016_v7 = vmul.f32 0.5, %v3000_v5  ;;  %v3127_v36 = vmul.f32 %v3101_v54, %v12478_v44  ;;  %v3113_v44 = vld [vmem:[%s15825_s16 + $0x28] sm:$0xff] }
 0x3ba   :  { %v9371_v25 = vpop.f32.mrf.mxu1  ;;  %v3126_v40 = vmul.f32 %v3100_v12, %v12471_v48  ;;  %v3065_v16 = vld [vmem:[%s15824_s4 + $0x48] sm:$0xff]  ;;  %v3063_v48 = vld [vmem:[%s15824_s4 + $0x38] sm:$0xff] }
 0x3bb   :  { %v3080_v62 = vadd.f32 1e-05, %v3054_v57  ;;  %v3042_v55 = vsub.f32 %v3016_v7, %v3029_v38  ;;  %v3140_v58 = vsub.f32 %v3114_v9, %v3127_v36  ;;  %v3116_v38 = vld [vmem:[%s15825_s16 + $0x40] sm:$0xff]  ;;  %v3066_v7 = vld [vmem:[%s15824_s4 + $0x50] sm:$0xff] }
 0x3bc   :  { %3174 = vperm.xlu1 %9978, %v3100_v12   ;;  %v3139_v5 = vsub.f32 %v3113_v44, %v3126_v40 }
 0x3bd   :  { %10349 = vrsqrt.f32 %v3080_v62  ;;  %v3055_v42 = vmax.f32 %v3042_v55, 0.0  ;;  %3296 = vperm.xlu0 %9977, %v3140_v58  }
 0x3be   :  { %v10342_v51 = vpop.eup %10341 }
 0x3bf   :  { %v3081_v10 = vadd.f32 1e-05, %v3055_v42  ;;  %v3103_v27 = vmul.f32 %v10342_v51, %v3064_v22  ;;  %v3115_v22 = vld [vmem:[%s15825_s16 + $0x38] sm:$0xff]  ;;  %v3118_v42 = vld [vmem:[%s15825_s16 + $0x50] sm:$0xff]  ;;  %v3068_v51 = vld [vmem:[%s15824_s4 + $0x60] sm:$0xf] }
 0x3c0   :  { %3179 = vperm.xlu1 %9978, %v3101_v54  }
 0x3c1   :  { %10351 = vrsqrt.f32 %v3081_v10  ;;  %v3129_v57 = vmul.f32 %v3103_v27, %v12496_v47  ;;  %v3067_v47 = vld [vmem:[%s15824_s4 + $0x58] sm:$0xff] }
 0x3c2   :  { %v10344_v60 = vpop.eup %10343 }
 0x3c3   :  { %v10346_v32 = vpop.eup %10345  ;;  %v3104_v14 = vmul.f32 %v10344_v60, %v3065_v16  ;;  %v3142_v36 = vsub.f32 %v3116_v38, %v3129_v57 }
 0x3c4   :  { %3291 = vperm.xlu1 %9978, %v3139_v5   ;;  %v3102_v9 = vmul.f32 %v10346_v32, %v3063_v48  ;;  %v3119_v48 = vld [vmem:[%s15825_s16 + $0x58] sm:$0xff] }
 0x3c5   :  { %3194 = vperm.xlu0 %9977, %v3104_v14   ;;  %v3130_v60 = vmul.f32 %v3104_v14, %v12508_v34 }
 0x3c6   :  { %v10348_v54 = vpop.eup %10347  ;;  %v3128_v55 = vmul.f32 %v3102_v9, %v12489_v0 }
 0x3c7   :  { %v3105_v25 = vmul.f32 %v10348_v54, %v3066_v7 }
 0x3c8   :  { %3184 = vperm.xlu1 %9978, %v3102_v9   ;;  %v3141_v40 = vsub.f32 %v3115_v22, %v3128_v55 }
 0x3c9   :  { %3306 = vperm.xlu0 %9977, %v3142_v36   ;;  %v3131_v58 = vmul.f32 %v3105_v25, %v12518_v28  ;;  %v3120_v28 = vld [vmem:[%s15825_s16 + $0x60] sm:$0xf] }
 0x3ca   :  { %v10350_v62 = vpop.eup %10349 }
 0x3cb   :  { %v3106_v12 = vmul.f32 %v10350_v62, %v3067_v47  ;;  %v3144_v44 = vsub.f32 %v3118_v42, %v3131_v58 }
 0x3cc   :  { %3189 = vperm.xlu1 %9978, %v3103_v27   ;;  %v3117_v27 = vld [vmem:[%s15825_s16 + $0x48] sm:$0xff]  ;;  %s10894_s16 = smov [#allocation5]  }
 0x3cd   :  { %3204 = vperm.xlu0 %9977, %v3106_v12   ;;  %v3143_v5 = vsub.f32 %v3117_v27, %v3130_v60  ;;  %v3132_v57 = vmul.f32 %v3106_v12, %v12527_v19  ;;  %s419_s30 = sshll.u32 %s10894_s16, 4  ;;  %s420_s30 = int_to_ptr.vmem [resolvable:$true] %s419_s30 }
 0x3ce   :  { %v10352_v10 = vpop.eup %10351  ;;  %s10816_s6 = scalar_lea.vmem %s420_s30, 1536  ;;  %p10821_p2 = scmp.lt.s32.totalorder %s420_s30, %s420_s30 }
 0x3cf   :  { %v3107_v0 = vmul.f32 %v10352_v10, %v3068_v51  ;;  %v3145_v38 = vsub.f32 %v3119_v48, %v3132_v57  ;;  %p10817_p1 = scmp.ne.s32.totalorder %s420_s30, %s10816_s6  ;;  %p10822_p3 = scmp.lt.s32.totalorder %s10816_s6, %s10816_s6 }
 0x3d0   :  { %3301 = vperm.xlu1 %9978, %v3141_v40  }
 0x3d1   :  { %3316 = vperm.xlu0 %9977, %v3144_v44   ;;  %v3133_v16 = vmul.f32 %v3107_v0, %v12537_v52  ;;  %p10823_p4 = por %p10822_p3, %p10821_p2 }
 0x3d3   :  { %v3146_v32 = vsub.f32 %v3120_v28, %v3133_v16  ;;  %p10824_p5 = pnand %p10823_p4, %p10817_p1 }
 0x3d4   :  { %3199 = vperm.xlu1 %9978, %v3105_v25  }
 0x3d5   :  { %3326 = vperm.xlu0 %9977, %v3146_v32  }
 0x3d8   :  { %3311 = vperm.xlu1 %9978, %v3143_v5  }
 0x3dc   :  { %3209 = vperm.xlu1 %9978, %v3107_v0  }
 0x3e0   :  { %3321 = vperm.xlu1 %9978, %v3145_v38  }
 0x41b   :  { %v3150_v52 = vpop.permute.xlu0 %3149 }
 0x41c   :  { %v3212_v34 = vmul.f32 %v3150_v52, %v15805_v46  ;;  %v3213_v14 = vmul.f32 %v3150_v52, %v15806_v20  ;;  %v3214_v7 = vmul.f32 %v3150_v52, %v15807_v33  ;;  %v3215_v54 = vmul.f32 %v3150_v52, %v15809_v30 }
 0x41f   :  { %v3155_v9 = vpop.permute.xlu1 %3154  ;;  %v3267_v36 = vpop.permute.xlu0 %3266 }
 0x420   :  { %v12598_v25 = vadd.f32 %v3267_v36, %v3212_v34  ;;  %v12600_v19 = vadd.f32 %v3267_v36, %v3213_v14  ;;  %v12602_v47 = vadd.f32 %v3267_v36, %v3214_v7  ;;  %v12604_v62 = vadd.f32 %v3267_v36, %v3215_v54 }
 0x421   :  { %v3216_v55 = vmul.f32 %v3155_v9, %v15802_v29  ;;  %v3217_v58 = vmul.f32 %v3155_v9, %v15803_v50  ;;  %v3218_v22 = vmul.f32 %v3155_v9, %v15804_v13  ;;  %v3219_v44 = vmul.f32 %v3155_v9, %v15808_v8 }
 0x422   :  { %v3381_v12 = vmul.f32 %v12598_v25, %v12598_v25  ;;  %v3382_v46 = vmul.f32 %v12600_v19, %v12600_v19  ;;  %v3383_v20 = vmul.f32 %v12602_v47, %v12602_v47  ;;  %v3384_v30 = vmul.f32 %v12604_v62, %v12604_v62 }
 0x423   :  { %v3160_v33 = vpop.permute.xlu1 %3159 }
 0x424   :  { %v3433_v42 = vmul.f32 %v3381_v12, %v12598_v25  ;;  %v3434_v51 = vmul.f32 %v3382_v46, %v12600_v19  ;;  %v3435_v10 = vmul.f32 %v3383_v20, %v12602_v47  ;;  %v3436_v40 = vmul.f32 %v3384_v30, %v12604_v62 }
 0x425   :  { %v3220_v0 = vmul.f32 %v3160_v33, %v15797_v41  ;;  %v3221_v28 = vmul.f32 %v3160_v33, %v15798_v15  ;;  %v3222_v29 = vmul.f32 %v3160_v33, %v12217_v43  ;;  %v3223_v13 = vmul.f32 %v3160_v33, %v12237_v37 }
 0x426   :  { %v3485_v16 = vmul.f32 0.044715, %v3433_v42  ;;  %v3486_v50 = vmul.f32 0.044715, %v3434_v51  ;;  %v3487_v60 = vmul.f32 0.044715, %v3435_v10 }
 0x427   :  { %v3272_v32 = vpop.permute.xlu1 %3271  ;;  %v3488_v27 = vmul.f32 0.044715, %v3436_v40  ;;  %v3277_v14 = vpop.permute.xlu0 %3276 }
 0x428   :  { %v12626_v5 = vadd.f32 %v3272_v32, %v3216_v55  ;;  %v12628_v57 = vadd.f32 %v3272_v32, %v3217_v58  ;;  %v12630_v48 = vadd.f32 %v3272_v32, %v3218_v22  ;;  %v3537_v8 = vadd.f32 %v3485_v16, %v12598_v25 }
 0x429   :  { %v3538_v41 = vadd.f32 %v3486_v50, %v12600_v19  ;;  %v3539_v15 = vadd.f32 %v3487_v60, %v12602_v47  ;;  %v12635_v43 = vadd.f32 %v3272_v32, %v3219_v44  ;;  %v3540_v38 = vadd.f32 %v3488_v27, %v12604_v62 }
 0x42a   :  { %v3385_v37 = vmul.f32 %v12626_v5, %v12626_v5  ;;  %v3386_v52 = vmul.f32 %v12628_v57, %v12628_v57  ;;  %v3387_v34 = vmul.f32 %v12630_v48, %v12630_v48  ;;  %v3589_v7 = vmul.f32 0.7978846, %v3537_v8 }
 0x42b   :  { %v3590_v54 = vmul.f32 0.7978846, %v3538_v41  ;;  %v3591_v9 = vmul.f32 0.7978846, %v3539_v15  ;;  %v3388_v36 = vmul.f32 %v12635_v43, %v12635_v43  ;;  %v3592_v12 = vmul.f32 0.7978846, %v3540_v38  ;;  %v3165_v33 = vpop.permute.xlu1 %3164 }
 0x42c   :  { %v3437_v46 = vmul.f32 %v3385_v37, %v12626_v5  ;;  %v3438_v20 = vmul.f32 %v3386_v52, %v12628_v57  ;;  %v3439_v30 = vmul.f32 %v3387_v34, %v12630_v48  ;;  %10353 = vtanh.f32 %v3589_v7 }
 0x42d   :  { %v3440_v55 = vmul.f32 %v3388_v36, %v12635_v43  ;;  %v12650_v58 = vadd.f32 %v3277_v14, %v3220_v0  ;;  %v12652_v22 = vadd.f32 %v3277_v14, %v3221_v28  ;;  %10355 = vtanh.f32 %v3590_v54 }
 0x42e   :  { %v3489_v42 = vmul.f32 0.044715, %v3437_v46  ;;  %v3490_v51 = vmul.f32 0.044715, %v3438_v20  ;;  %v3491_v10 = vmul.f32 0.044715, %v3439_v30  ;;  %10357 = vtanh.f32 %v3591_v9 }
 0x42f   :  { %v3492_v40 = vmul.f32 0.044715, %v3440_v55  ;;  %v12654_v44 = vadd.f32 %v3277_v14, %v3222_v29  ;;  %v12656_v16 = vadd.f32 %v3277_v14, %v3223_v13  ;;  %10359 = vtanh.f32 %v3592_v12  ;;  %v3170_v38 = vpop.permute.xlu1 %3169 }
 0x430   :  { %v3541_v50 = vadd.f32 %v3489_v42, %v12626_v5  ;;  %v3542_v60 = vadd.f32 %v3490_v51, %v12628_v57  ;;  %v3543_v0 = vadd.f32 %v3491_v10, %v12630_v48  ;;  %v3389_v32 = vmul.f32 %v12650_v58, %v12650_v58 }
 0x431   :  { %v3544_v28 = vadd.f32 %v3492_v40, %v12635_v43  ;;  %v3390_v27 = vmul.f32 %v12652_v22, %v12652_v22  ;;  %v3391_v29 = vmul.f32 %v12654_v44, %v12654_v44  ;;  %v3392_v15 = vmul.f32 %v12656_v16, %v12656_v16 }
 0x432   :  { %v3593_v13 = vmul.f32 0.7978846, %v3541_v50  ;;  %v3594_v8 = vmul.f32 0.7978846, %v3542_v60  ;;  %v3595_v41 = vmul.f32 0.7978846, %v3543_v0  ;;  %v3441_v52 = vmul.f32 %v3389_v32, %v12650_v58 }
 0x433   :  { %v3596_v37 = vmul.f32 0.7978846, %v3544_v28  ;;  %v3442_v34 = vmul.f32 %v3390_v27, %v12652_v22  ;;  %v3443_v14 = vmul.f32 %v3391_v29, %v12654_v44  ;;  %v3444_v7 = vmul.f32 %v3392_v15, %v12656_v16  ;;  %v3287_v28 = vpop.permute.xlu0 %3286 }
 0x434   :  { %10361 = vtanh.f32 %v3593_v13  ;;  %v3224_v54 = vmul.f32 %v3165_v33, %v15793_v18  ;;  %v3225_v9 = vmul.f32 %v3165_v33, %v15794_v11  ;;  %v3493_v36 = vmul.f32 0.044715, %v3441_v52 }
 0x435   :  { %10363 = vtanh.f32 %v3594_v8  ;;  %v3494_v12 = vmul.f32 0.044715, %v3442_v34  ;;  %v3495_v46 = vmul.f32 0.044715, %v3443_v14  ;;  %v3496_v20 = vmul.f32 0.044715, %v3444_v7 }
 0x436   :  { %10365 = vtanh.f32 %v3595_v41  ;;  %v12677_v30 = vmul.f32 %v3165_v33, %v12194_v1  ;;  %v12680_v55 = vmul.f32 %v3165_v33, %v12222_v4  ;;  %v3545_v42 = vadd.f32 %v3493_v36, %v12650_v58  ;;  %v12689_v1 = vpop.permute.xlu1 %3281 }
 0x437   :  { %10367 = vtanh.f32 %v3596_v37  ;;  %v3546_v51 = vadd.f32 %v3494_v12, %v12652_v22  ;;  %v3547_v18 = vadd.f32 %v3495_v46, %v12654_v44  ;;  %v3548_v11 = vadd.f32 %v3496_v20, %v12656_v16 }
 0x438   :  { %v3228_v10 = vmul.f32 %v3170_v38, %v15799_v63  ;;  %v3229_v40 = vmul.f32 %v3170_v38, %v11850_v39  ;;  %v3230_v50 = vmul.f32 %v3170_v38, %v12173_v2  ;;  %v3597_v60 = vmul.f32 0.7978846, %v3545_v42 }
 0x439   :  { %v3598_v4 = vmul.f32 0.7978846, %v3546_v51  ;;  %v3599_v33 = vmul.f32 0.7978846, %v3547_v18  ;;  %v3231_v0 = vmul.f32 %v3170_v38, %v12199_v26  ;;  %v10354_v32 = vpop.eup %10353  ;;  %v3600_v27 = vmul.f32 0.7978846, %v3548_v11 }
 0x43a   :  { %v12692_v29 = vadd.f32 %v3287_v28, %v3228_v10  ;;  %v12694_v13 = vadd.f32 %v3287_v28, %v3229_v40  ;;  %v12696_v8 = vadd.f32 %v3287_v28, %v3230_v50  ;;  %v10356_v63 = vpop.eup %10355  ;;  %v3693_v39 = vadd.f32 1.0, %v10354_v32 }
 0x43b   :  { %10369 = vtanh.f32 %v3597_v60  ;;  %v12698_v2 = vadd.f32 %v3287_v28, %v3231_v0  ;;  %v12701_v41 = vadd.f32 %v12689_v1, %v3224_v54  ;;  %v10358_v15 = vpop.eup %10357  ;;  %v3694_v37 = vadd.f32 1.0, %v10356_v63 }
 0x43c   :  { %10371 = vtanh.f32 %v3598_v4  ;;  %v3397_v26 = vmul.f32 %v12692_v29, %v12692_v29  ;;  %v3398_v38 = vmul.f32 %v12694_v13, %v12694_v13  ;;  %v10360_v52 = vpop.eup %10359  ;;  %v3695_v34 = vadd.f32 1.0, %v10358_v15 }
 0x43d   :  { %v3745_v14 = vmul.f32 0.5, %v3693_v39  ;;  %10373 = vtanh.f32 %v3599_v33  ;;  %v3399_v7 = vmul.f32 %v12696_v8, %v12696_v8  ;;  %v3696_v36 = vadd.f32 1.0, %v10360_v52 }
 0x43e   :  { %v3746_v12 = vmul.f32 0.5, %v3694_v37  ;;  %10375 = vtanh.f32 %v3600_v27  ;;  %v3400_v54 = vmul.f32 %v12698_v2, %v12698_v2  ;;  %v3747_v46 = vmul.f32 0.5, %v3695_v34 }
 0x43f   :  { %v12712_v20 = vmul.f32 %v3745_v14, %v12598_v25  ;;  %v3449_v42 = vmul.f32 %v3397_v26, %v12692_v29  ;;  %v3450_v51 = vmul.f32 %v3398_v38, %v12694_v13  ;;  %v3748_v18 = vmul.f32 0.5, %v3696_v36 }
 0x440   :  { %v12717_v11 = vmul.f32 %v3746_v12, %v12600_v19  ;;  %v3451_v10 = vmul.f32 %v3399_v7, %v12696_v8  ;;  %v3452_v40 = vmul.f32 %v3400_v54, %v12698_v2  ;;  %v12722_v60 = vmul.f32 %v3747_v46, %v12602_v47 }
 0x441   :  { %v10362_v50 = vpop.eup %10361  ;;  %v3501_v4 = vmul.f32 0.044715, %v3449_v42  ;;  %v3502_v33 = vmul.f32 0.044715, %v3450_v51  ;;  %v12725_v25 = vadd.f32 %v12689_v1, %v3225_v9  ;;  %v12728_v19 = vmul.f32 %v3748_v18, %v12604_v62 }
 0x442   :  { %v10364_v0 = vpop.eup %10363  ;;  %v3697_v28 = vadd.f32 1.0, %v10362_v50  ;;  %v3503_v32 = vmul.f32 0.044715, %v3451_v10  ;;  %v3504_v27 = vmul.f32 0.044715, %v3452_v40  ;;  %v12734_v15 = vadd.f32 %v12689_v1, %v12677_v30 }
 0x443   :  { %v10366_v47 = vpop.eup %10365  ;;  %v3698_v63 = vadd.f32 1.0, %v10364_v0  ;;  %v3553_v39 = vadd.f32 %v3501_v4, %v12692_v29  ;;  %v3554_v9 = vadd.f32 %v3502_v33, %v12694_v13 }
 0x444   :  { %10827 = shalt.err (!%p10824_p5)  }
 0x445   :  { %422 = dma.hbm_to_vmem [thread:$0]  %s15519_s22, 1536, %s420_s30, [#allocation7 + $0x3]  ;;  %v10368_v62 = vpop.eup %10367  ;;  %v3699_v37 = vadd.f32 1.0, %v10366_v47  ;;  %v3749_v26 = vmul.f32 0.5, %v3697_v28  ;;  %v3555_v38 = vadd.f32 %v3503_v32, %v12696_v8  ;;  %v3556_v52 = vadd.f32 %v3504_v27, %v12698_v2  ;;  %v12741_v30 = vpop.permute.xlu1 %3174 }
 0x446   :  { %s10836_s5 = scalar_lea.vmem %s432_s28, 1024  ;;  %p10841_p7 = scmp.lt.s32.totalorder %s432_s28, %s432_s28 }
 0x447   :  { %p10837_p6 = scmp.ne.s32.totalorder %s432_s28, %s10836_s5  ;;  %p10842_p8 = scmp.lt.s32.totalorder %s10836_s5, %s10836_s5 }
 0x449   :  { %p10843_p9 = por %p10842_p8, %p10841_p7 }
 0x44b   :  { %p10844_p10 = pnand %p10843_p9, %p10837_p6 }
 0x44d   :  { %10847 = shalt.err (!%p10844_p10)  }
 0x44e   :  { %434 = dma.hbm_to_vmem [thread:$0]  %s15520_s23, 1024, %s432_s28, [#allocation7 + $0x4]  ;;  %v3700_v34 = vadd.f32 1.0, %v10368_v62  ;;  %v3750_v14 = vmul.f32 0.5, %v3698_v63  ;;  %v3605_v7 = vmul.f32 0.7978846, %v3553_v39  ;;  %v12747_v54 = vmul.f32 %v3749_v26, %v12626_v5  ;;  %v10370_v40 = vpop.eup %10369  ;;  %v3180_v27 = vpop.permute.xlu1 %3179 }
 0x44f   :  { %v3606_v36 = vmul.f32 0.7978846, %v3554_v9  ;;  %v3751_v12 = vmul.f32 0.5, %v3699_v37  ;;  %v3607_v46 = vmul.f32 0.7978846, %v3555_v38  ;;  %v12754_v10 = vadd.f32 %v12689_v1, %v12680_v55  ;;  %v10372_v33 = vpop.eup %10371 }
 0x450   :  { %v3608_v42 = vmul.f32 0.7978846, %v3556_v52  ;;  %v3752_v51 = vmul.f32 0.5, %v3700_v34  ;;  %v12750_v18 = vmul.f32 %v3750_v14, %v12628_v57  ;;  %10377 = vtanh.f32 %v3605_v7  ;;  %v10374_v1 = vpop.eup %10373 }
 0x451   :  { %v12757_v50 = vmul.f32 %v3751_v12, %v12630_v48  ;;  %10379 = vtanh.f32 %v3606_v36  ;;  %v3393_v5 = vmul.f32 %v12701_v41, %v12701_v41  ;;  %v3394_v4 = vmul.f32 %v12725_v25, %v12725_v25  ;;  %v10376_v47 = vpop.eup %10375 }
 0x452   :  { %v12764_v57 = vmul.f32 %v3752_v51, %v12635_v43  ;;  %v3701_v0 = vadd.f32 1.0, %v10370_v40  ;;  %10381 = vtanh.f32 %v3607_v46  ;;  %v3395_v55 = vmul.f32 %v12734_v15, %v12734_v15 }
 0x453   :  { %v3702_v28 = vadd.f32 1.0, %v10372_v33  ;;  %10383 = vtanh.f32 %v3608_v42  ;;  %v3396_v48 = vmul.f32 %v12754_v10, %v12754_v10  ;;  %v3445_v32 = vmul.f32 %v3393_v5, %v12701_v41 }
 0x454   :  { %v3703_v63 = vadd.f32 1.0, %v10374_v1  ;;  %v3753_v39 = vmul.f32 0.5, %v3701_v0  ;;  %v3446_v43 = vmul.f32 %v3394_v4, %v12725_v25  ;;  %v3447_v9 = vmul.f32 %v3395_v55, %v12734_v15  ;;  %v3292_v55 = vpop.permute.xlu1 %3291 }
 0x455   :  { %v3704_v62 = vadd.f32 1.0, %v10376_v47  ;;  %v3754_v37 = vmul.f32 0.5, %v3702_v28  ;;  %v3448_v26 = vmul.f32 %v3396_v48, %v12754_v10  ;;  %v3497_v38 = vmul.f32 0.044715, %v3445_v32 }
 0x456   :  { %v3755_v52 = vmul.f32 0.5, %v3703_v63  ;;  %v12775_v34 = vmul.f32 %v3753_v39, %v12650_v58  ;;  %v3498_v14 = vmul.f32 0.044715, %v3446_v43  ;;  %v3499_v7 = vmul.f32 0.044715, %v3447_v9  ;;  %v3297_v63 = vpop.permute.xlu0 %3296 }
 0x457   :  { %v3756_v36 = vmul.f32 0.5, %v3704_v62  ;;  %v12778_v12 = vmul.f32 %v3754_v37, %v12652_v22  ;;  %v3500_v46 = vmul.f32 0.044715, %v3448_v26  ;;  %v3549_v42 = vadd.f32 %v3497_v38, %v12701_v41 }
 0x458   :  { %v12782_v51 = vmul.f32 %v3755_v52, %v12654_v44  ;;  %v3550_v40 = vadd.f32 %v3498_v14, %v12725_v25  ;;  %v3551_v5 = vadd.f32 %v3499_v7, %v12734_v15  ;;  %v3232_v58 = vmul.f32 %v12741_v30, %v11855_v6 }
 0x459   :  { %v12789_v4 = vmul.f32 %v3756_v36, %v12656_v16  ;;  %v3552_v33 = vadd.f32 %v3500_v46, %v12754_v10  ;;  %v3601_v22 = vmul.f32 0.7978846, %v3549_v42  ;;  %v3233_v0 = vmul.f32 %v12741_v30, %v11977_v45 }
 0x45a   :  { %v3602_v1 = vmul.f32 0.7978846, %v3550_v40  ;;  %v3603_v44 = vmul.f32 0.7978846, %v3551_v5  ;;  %v3234_v28 = vmul.f32 %v12741_v30, %v11989_v61  ;;  %v3235_v48 = vmul.f32 %v12741_v30, %v15801_v49 }
 0x45b   :  { %v3604_v32 = vmul.f32 0.7978846, %v3552_v33  ;;  %10385 = vtanh.f32 %v3601_v22  ;;  %v3236_v6 = vmul.f32 %v3180_v27, %v11864_v23  ;;  %v3237_v16 = vmul.f32 %v3180_v27, %v11985_v17 }
 0x45c   :  { %10387 = vtanh.f32 %v3602_v1  ;;  %v3238_v47 = vmul.f32 %v3180_v27, %v12014_v56  ;;  %v3239_v45 = vmul.f32 %v3180_v27, %v12033_v24  ;;  %v12802_v39 = vadd.f32 %v3292_v55, %v3232_v58 }
 0x45d   :  { %v10378_v43 = vpop.eup %10377  ;;  %10389 = vtanh.f32 %v3603_v44  ;;  %v12804_v61 = vadd.f32 %v3297_v63, %v3236_v6  ;;  %v12806_v9 = vadd.f32 %v3297_v63, %v3237_v16  ;;  %v12808_v49 = vadd.f32 %v3292_v55, %v3233_v0 }
 0x45e   :  { %v10380_v30 = vpop.eup %10379  ;;  %v3709_v23 = vadd.f32 1.0, %v10378_v43  ;;  %10391 = vtanh.f32 %v3604_v32  ;;  %v12810_v17 = vadd.f32 %v3297_v63, %v3238_v47  ;;  %v12812_v62 = vadd.f32 %v3297_v63, %v3239_v45 }
 0x45f   :  { %v10382_v56 = vpop.eup %10381  ;;  %v3710_v24 = vadd.f32 1.0, %v10380_v30  ;;  %v3405_v27 = vmul.f32 %v12804_v61, %v12804_v61  ;;  %v3406_v37 = vmul.f32 %v12806_v9, %v12806_v9  ;;  %v12818_v26 = vadd.f32 %v3292_v55, %v3234_v28  ;;  %v3185_v30 = vpop.permute.xlu1 %3184 }
 0x460   :  { %v10384_v38 = vpop.eup %10383  ;;  %v3711_v52 = vadd.f32 1.0, %v10382_v56  ;;  %v3761_v14 = vmul.f32 0.5, %v3709_v23  ;;  %v3407_v7 = vmul.f32 %v12810_v17, %v12810_v17  ;;  %v3408_v36 = vmul.f32 %v12812_v62, %v12812_v62 }
 0x461   :  { %v3712_v46 = vadd.f32 1.0, %v10384_v38  ;;  %v3762_v42 = vmul.f32 0.5, %v3710_v24  ;;  %v3457_v40 = vmul.f32 %v3405_v27, %v12804_v61  ;;  %v3458_v5 = vmul.f32 %v3406_v37, %v12806_v9 }
 0x462   :  { %v3763_v58 = vmul.f32 0.5, %v3711_v52  ;;  %v12827_v33 = vmul.f32 %v3761_v14, %v12692_v29  ;;  %v3459_v22 = vmul.f32 %v3407_v7, %v12810_v17  ;;  %v3460_v0 = vmul.f32 %v3408_v36, %v12812_v62 }
 0x463   :  { %v3764_v1 = vmul.f32 0.5, %v3712_v46  ;;  %v12832_v44 = vmul.f32 %v3762_v42, %v12694_v13  ;;  %v3509_v28 = vmul.f32 0.044715, %v3457_v40  ;;  %v3510_v32 = vmul.f32 0.044715, %v3458_v5 }
 0x464   :  { %15826 = vst [vmem:[#allocation100_spill] sm:$0xff] %v12827_v33  ;;  %v12835_v6 = vmul.f32 %v3763_v58, %v12696_v8  ;;  %v3511_v16 = vmul.f32 0.044715, %v3459_v22  ;;  %v3512_v47 = vmul.f32 0.044715, %v3460_v0  ;;  %v12837_v45 = vadd.f32 %v3292_v55, %v3235_v48 }
 0x465   :  { %v12840_v29 = vmul.f32 %v3764_v1, %v12698_v2  ;;  %v3561_v63 = vadd.f32 %v3509_v28, %v12804_v61  ;;  %v3562_v43 = vadd.f32 %v3510_v32, %v12806_v9  ;;  %v3401_v13 = vmul.f32 %v12802_v39, %v12802_v39 }
 0x466   :  { %15827 = vst [vmem:[#allocation117_spill] sm:$0xff] %v12835_v6  ;;  %v3563_v23 = vadd.f32 %v3511_v16, %v12810_v17  ;;  %v3564_v8 = vadd.f32 %v3512_v47, %v12812_v62  ;;  %v3402_v56 = vmul.f32 %v12808_v49, %v12808_v49  ;;  %v3403_v55 = vmul.f32 %v12818_v26, %v12818_v26  ;;  %v3190_v47 = vpop.permute.xlu1 %3189 }
 0x467   :  { %v3613_v2 = vmul.f32 0.7978846, %v3561_v63  ;;  %v3614_v48 = vmul.f32 0.7978846, %v3562_v43  ;;  %v3404_v24 = vmul.f32 %v12837_v45, %v12837_v45  ;;  %v3453_v27 = vmul.f32 %v3401_v13, %v12802_v39 }
 0x468   :  { %v10386_v37 = vpop.eup %10385  ;;  %v3615_v38 = vmul.f32 0.7978846, %v3563_v23  ;;  %v3616_v52 = vmul.f32 0.7978846, %v3564_v8  ;;  %v3454_v14 = vmul.f32 %v3402_v56, %v12808_v49  ;;  %v3455_v7 = vmul.f32 %v3403_v55, %v12818_v26  ;;  %v3195_v23 = vpop.permute.xlu0 %3194 }
 0x469   :  { %v10388_v36 = vpop.eup %10387  ;;  %v3705_v46 = vadd.f32 1.0, %v10386_v37  ;;  %10393 = vtanh.f32 %v3613_v2  ;;  %v3456_v42 = vmul.f32 %v3404_v24, %v12837_v45  ;;  %v3505_v40 = vmul.f32 0.044715, %v3453_v27 }
 0x46a   :  { %v10390_v5 = vpop.eup %10389  ;;  %v3706_v58 = vadd.f32 1.0, %v10388_v36  ;;  %10395 = vtanh.f32 %v3614_v48  ;;  %v3506_v22 = vmul.f32 0.044715, %v3454_v14  ;;  %v3507_v0 = vmul.f32 0.044715, %v3455_v7 }
 0x46b   :  { %v10392_v1 = vpop.eup %10391  ;;  %v3707_v28 = vadd.f32 1.0, %v10390_v5  ;;  %v3757_v32 = vmul.f32 0.5, %v3705_v46  ;;  %10397 = vtanh.f32 %v3615_v38  ;;  %v3508_v16 = vmul.f32 0.044715, %v3456_v42  ;;  %v15828_v42 = vld [vmem:[#allocation109_spill] sm:$0xff]  ;;  %v3302_v5 = vpop.permute.xlu1 %3301 }
 0x46c   :  { %v3708_v63 = vadd.f32 1.0, %v10392_v1  ;;  %v3758_v43 = vmul.f32 0.5, %v3706_v58  ;;  %10399 = vtanh.f32 %v3616_v52  ;;  %v3557_v13 = vadd.f32 %v3505_v40, %v12802_v39 }
 0x46d   :  { %v3759_v8 = vmul.f32 0.5, %v3707_v28  ;;  %v12860_v56 = vmul.f32 %v3757_v32, %v12701_v41  ;;  %v3558_v55 = vadd.f32 %v3506_v22, %v12808_v49  ;;  %v3559_v2 = vadd.f32 %v3507_v0, %v12818_v26  ;;  %v15830_v22 = vld [vmem:[#allocation126_spill] sm:$0xff]  ;;  %v15832_v28 = vld [vmem:[#allocation125_spill] sm:$0xff] }
 0x46e   :  { %v3760_v48 = vmul.f32 0.5, %v3708_v63  ;;  %v12865_v24 = vmul.f32 %v3758_v43, %v12725_v25  ;;  %v3560_v27 = vadd.f32 %v3508_v16, %v12837_v45  ;;  %v3609_v37 = vmul.f32 0.7978846, %v3557_v13  ;;  %v3307_v16 = vpop.permute.xlu0 %3306 }
 0x46f   :  { %v12869_v38 = vmul.f32 %v3759_v8, %v12734_v15  ;;  %v3610_v52 = vmul.f32 0.7978846, %v3558_v55  ;;  %v3611_v14 = vmul.f32 0.7978846, %v3559_v2  ;;  %v12872_v7 = vmul.f32 %v3195_v23, %v11891_v21  ;;  %v15829_v21 = vld [vmem:[#allocation123_spill] sm:$0xff] }
 0x470   :  { %v12875_v41 = vmul.f32 %v3760_v48, %v12754_v10  ;;  %v3612_v36 = vmul.f32 0.7978846, %v3560_v27  ;;  %10401 = vtanh.f32 %v3609_v37  ;;  %v12878_v46 = vmul.f32 %v3195_v23, %v12057_v59  ;;  %v15831_v59 = vld [vmem:[#allocation110_spill] sm:$0xff] }
 0x471   :  { %10403 = vtanh.f32 %v3610_v52  ;;  %v12881_v25 = vmul.f32 %v3195_v23, %v12096_v53  ;;  %v12884_v15 = vmul.f32 %v3195_v23, %v12107_v3  ;;  %v3240_v40 = vmul.f32 %v3185_v30, %v15828_v42  ;;  %v15833_v3 = vld [vmem:[#allocation128_spill] sm:$0xff] }
 0x472   :  { %10405 = vtanh.f32 %v3611_v14  ;;  %v3241_v58 = vmul.f32 %v3185_v30, %v15829_v21  ;;  %v3242_v10 = vmul.f32 %v3185_v30, %v12050_v31  ;;  %v3243_v0 = vmul.f32 %v3185_v30, %v15830_v22 }
 0x473   :  { %10407 = vtanh.f32 %v3612_v36  ;;  %v3244_v1 = vmul.f32 %v3190_v47, %v15831_v59  ;;  %v3245_v32 = vmul.f32 %v3190_v47, %v15832_v28  ;;  %v3246_v53 = vmul.f32 %v3190_v47, %v12074_v35 }
 0x474   :  { %v3247_v63 = vmul.f32 %v3190_v47, %v15833_v3  ;;  %v12894_v43 = vadd.f32 %v3302_v5, %v3240_v40  ;;  %v12896_v13 = vadd.f32 %v3302_v5, %v3241_v58  ;;  %v12898_v23 = vadd.f32 %v3302_v5, %v3242_v10 }
 0x475   :  { %v12900_v8 = vadd.f32 %v3307_v16, %v3244_v1  ;;  %v12902_v31 = vadd.f32 %v3307_v16, %v3245_v32  ;;  %v12904_v30 = vadd.f32 %v3307_v16, %v3246_v53  ;;  %v12906_v55 = vadd.f32 %v3302_v5, %v3243_v0 }
 0x476   :  { %v10394_v2 = vpop.eup %10393  ;;  %v12908_v48 = vadd.f32 %v3307_v16, %v3247_v63  ;;  %v3409_v35 = vmul.f32 %v12894_v43, %v12894_v43  ;;  %v3410_v47 = vmul.f32 %v12896_v13, %v12896_v13  ;;  %v3411_v27 = vmul.f32 %v12898_v23, %v12898_v23 }
 0x477   :  { %v10396_v37 = vpop.eup %10395  ;;  %v3717_v52 = vadd.f32 1.0, %v10394_v2  ;;  %v3413_v14 = vmul.f32 %v12900_v8, %v12900_v8  ;;  %v3414_v36 = vmul.f32 %v12902_v31, %v12902_v31  ;;  %v3415_v42 = vmul.f32 %v12904_v30, %v12904_v30 }
 0x478   :  { %v10398_v40 = vpop.eup %10397  ;;  %v3718_v5 = vadd.f32 1.0, %v10396_v37  ;;  %v3416_v21 = vmul.f32 %v12908_v48, %v12908_v48  ;;  %v3412_v58 = vmul.f32 %v12906_v55, %v12906_v55  ;;  %v3461_v10 = vmul.f32 %v3409_v35, %v12894_v43 }
 0x479   :  { %v10400_v22 = vpop.eup %10399  ;;  %v3719_v0 = vadd.f32 1.0, %v10398_v40  ;;  %v3769_v59 = vmul.f32 0.5, %v3717_v52  ;;  %v3465_v1 = vmul.f32 %v3413_v14, %v12900_v8  ;;  %v3466_v28 = vmul.f32 %v3414_v36, %v12902_v31 }
 0x47a   :  { %v3720_v32 = vadd.f32 1.0, %v10400_v22  ;;  %v3770_v53 = vmul.f32 0.5, %v3718_v5  ;;  %v3467_v16 = vmul.f32 %v3415_v42, %v12904_v30  ;;  %v3468_v3 = vmul.f32 %v3416_v21, %v12908_v48 }
 0x47b   :  { %v3771_v63 = vmul.f32 0.5, %v3719_v0  ;;  %v12932_v2 = vmul.f32 %v3769_v59, %v12804_v61  ;;  %v3517_v37 = vmul.f32 0.044715, %v3465_v1  ;;  %v3518_v6 = vmul.f32 0.044715, %v3466_v28 }
 0x47c   :  { %v3772_v35 = vmul.f32 0.5, %v3720_v32  ;;  %v12935_v40 = vmul.f32 %v3770_v53, %v12806_v9  ;;  %v3519_v52 = vmul.f32 0.044715, %v3467_v16  ;;  %v3520_v14 = vmul.f32 0.044715, %v3468_v3 }
 0x47d   :  { %15834 = vst [vmem:[#allocation120_spill] sm:$0xff] %v12932_v2  ;;  %v10402_v33 = vpop.eup %10401  ;;  %v12938_v36 = vmul.f32 %v3771_v63, %v12810_v17  ;;  %v3569_v42 = vadd.f32 %v3517_v37, %v12900_v8  ;;  %v3570_v5 = vadd.f32 %v3518_v6, %v12902_v31  ;;  %v3462_v21 = vmul.f32 %v3410_v47, %v12896_v13  ;;  %v12949_v37 = vpop.permute.xlu0 %3204 }
 0x47e   :  { %15835 = vst [vmem:[#allocation118_spill] sm:$0xff] %v12935_v40  ;;  %v10404_v61 = vpop.eup %10403  ;;  %v12944_v22 = vmul.f32 %v3772_v35, %v12812_v62  ;;  %v3713_v0 = vadd.f32 1.0, %v10402_v33  ;;  %v3571_v9 = vadd.f32 %v3519_v52, %v12904_v30  ;;  %v3572_v59 = vadd.f32 %v3520_v14, %v12908_v48  ;;  %v3200_v62 = vpop.permute.xlu1 %3199 }
 0x47f   :  { %15836 = vst [vmem:[#allocation109_spill] sm:$0xff] %v12938_v36  ;;  %v10406_v1 = vpop.eup %10405  ;;  %v3714_v28 = vadd.f32 1.0, %v10404_v61  ;;  %v3621_v32 = vmul.f32 0.7978846, %v3569_v42  ;;  %v3622_v17 = vmul.f32 0.7978846, %v3570_v5  ;;  %v3463_v53 = vmul.f32 %v3411_v27, %v12898_v23 }
 0x480   :  { %15837 = vst [vmem:[#allocation123_spill] sm:$0xff] %v12944_v22  ;;  %v10408_v16 = vpop.eup %10407  ;;  %v3715_v3 = vadd.f32 1.0, %v10406_v1  ;;  %v3765_v6 = vmul.f32 0.5, %v3713_v0  ;;  %v3623_v63 = vmul.f32 0.7978846, %v3571_v9  ;;  %v3464_v52 = vmul.f32 %v3412_v58, %v12906_v55 }
 0x481   :  { %v3624_v47 = vmul.f32 0.7978846, %v3572_v59  ;;  %v3716_v35 = vadd.f32 1.0, %v10408_v16  ;;  %v3766_v33 = vmul.f32 0.5, %v3714_v28  ;;  %10409 = vtanh.f32 %v3621_v32 }
 0x482   :  { %v3767_v14 = vmul.f32 0.5, %v3715_v3  ;;  %v12953_v61 = vmul.f32 %v3765_v6, %v12802_v39  ;;  %10411 = vtanh.f32 %v3622_v17  ;;  %v3513_v42 = vmul.f32 0.044715, %v3461_v10  ;;  %v15839_v10 = vld [vmem:[#allocation111_spill] sm:$0xff]  ;;  %v3317_v6 = vpop.permute.xlu0 %3316 }
 0x483   :  { %v3768_v27 = vmul.f32 0.5, %v3716_v35  ;;  %v12956_v5 = vmul.f32 %v3766_v33, %v12808_v49  ;;  %10413 = vtanh.f32 %v3623_v63  ;;  %v3514_v0 = vmul.f32 0.044715, %v3462_v21  ;;  %v15840_v21 = vld [vmem:[#allocation127_spill] sm:$0xff] }
 0x484   :  { %v12959_v9 = vmul.f32 %v3767_v14, %v12818_v26  ;;  %10415 = vtanh.f32 %v3624_v47  ;;  %v3515_v59 = vmul.f32 0.044715, %v3463_v53  ;;  %v3516_v1 = vmul.f32 0.044715, %v3464_v52  ;;  %v15841_v26 = vld [vmem:[#allocation130_spill] sm:$0xff]  ;;  %v3312_v53 = vpop.permute.xlu1 %3311 }
 0x485   :  { %v12962_v58 = vmul.f32 %v3768_v27, %v12837_v45  ;;  %v3565_v39 = vadd.f32 %v3513_v42, %v12894_v43  ;;  %v3566_v28 = vadd.f32 %v3514_v0, %v12896_v13  ;;  %v3252_v32 = vmul.f32 %v3200_v62, %v15839_v10  ;;  %v15842_v45 = vld [vmem:[#allocation131_spill] sm:$0xff] }
 0x486   :  { %15838 = vst [vmem:[#allocation126_spill] sm:$0xff] %v12959_v9  ;;  %v3567_v49 = vadd.f32 %v3515_v59, %v12898_v23  ;;  %v3568_v17 = vadd.f32 %v3516_v1, %v12906_v55  ;;  %v3253_v16 = vmul.f32 %v3200_v62, %v15840_v21  ;;  %v3254_v3 = vmul.f32 %v3200_v62, %v15841_v26 }
 0x487   :  { %v3617_v63 = vmul.f32 0.7978846, %v3565_v39  ;;  %v3618_v47 = vmul.f32 0.7978846, %v3566_v28  ;;  %v3255_v35 = vmul.f32 %v3200_v62, %v15842_v45  ;;  %v12972_v33 = vadd.f32 %v3317_v6, %v3252_v32 }
 0x488   :  { %v3619_v52 = vmul.f32 0.7978846, %v3567_v49  ;;  %v3620_v14 = vmul.f32 0.7978846, %v3568_v17  ;;  %v12974_v42 = vadd.f32 %v3317_v6, %v3253_v16  ;;  %v12976_v27 = vadd.f32 %v3317_v6, %v3254_v3 }
 0x489   :  { %10417 = vtanh.f32 %v3617_v63  ;;  %v12978_v0 = vadd.f32 %v3317_v6, %v3255_v35  ;;  %v3421_v59 = vmul.f32 %v12972_v33, %v12972_v33  ;;  %v12983_v1 = vadd.f32 %v3312_v53, %v12872_v7 }
 0x48a   :  { %10419 = vtanh.f32 %v3618_v47  ;;  %v3422_v62 = vmul.f32 %v12974_v42, %v12974_v42  ;;  %v3423_v39 = vmul.f32 %v12976_v27, %v12976_v27  ;;  %v12990_v28 = vadd.f32 %v3312_v53, %v12878_v46 }
 0x48b   :  { %10421 = vtanh.f32 %v3619_v52  ;;  %v3424_v10 = vmul.f32 %v12978_v0, %v12978_v0  ;;  %v3473_v32 = vmul.f32 %v3421_v59, %v12972_v33  ;;  %v12996_v49 = vadd.f32 %v3312_v53, %v12881_v25 }
 0x48c   :  { %10423 = vtanh.f32 %v3620_v14  ;;  %v3474_v7 = vmul.f32 %v3422_v62, %v12974_v42  ;;  %v3475_v17 = vmul.f32 %v3423_v39, %v12976_v27  ;;  %v13001_v21 = vadd.f32 %v3312_v53, %v12884_v15 }
 0x48d   :  { %v3476_v46 = vmul.f32 %v3424_v10, %v12978_v0  ;;  %v3525_v16 = vmul.f32 0.044715, %v3473_v32  ;;  %v3417_v26 = vmul.f32 %v12983_v1, %v12983_v1  ;;  %v3418_v3 = vmul.f32 %v12990_v28, %v12990_v28 }
 0x48e   :  { %v10410_v6 = vpop.eup %10409  ;;  %v3526_v25 = vmul.f32 0.044715, %v3474_v7  ;;  %v3527_v63 = vmul.f32 0.044715, %v3475_v17  ;;  %v3419_v47 = vmul.f32 %v12996_v49, %v12996_v49  ;;  %v3420_v45 = vmul.f32 %v13001_v21, %v13001_v21 }
 0x48f   :  { %v10412_v15 = vpop.eup %10411  ;;  %v3725_v53 = vadd.f32 1.0, %v10410_v6  ;;  %v3528_v35 = vmul.f32 0.044715, %v3476_v46  ;;  %v3577_v52 = vadd.f32 %v3525_v16, %v12972_v33  ;;  %v3469_v14 = vmul.f32 %v3417_v26, %v12983_v1 }
 0x490   :  { %v10414_v59 = vpop.eup %10413  ;;  %v3726_v62 = vadd.f32 1.0, %v10412_v15  ;;  %v3578_v39 = vadd.f32 %v3526_v25, %v12974_v42  ;;  %v3579_v10 = vadd.f32 %v3527_v63, %v12976_v27  ;;  %v3470_v32 = vmul.f32 %v3418_v3, %v12990_v28 }
 0x491   :  { %v10416_v7 = vpop.eup %10415  ;;  %v3727_v17 = vadd.f32 1.0, %v10414_v59  ;;  %v3777_v36 = vmul.f32 0.5, %v3725_v53  ;;  %v3580_v2 = vadd.f32 %v3528_v35, %v12978_v0  ;;  %v3629_v22 = vmul.f32 0.7978846, %v3577_v52  ;;  %v3210_v53 = vpop.permute.xlu1 %3209 }
 0x492   :  { %v3728_v6 = vadd.f32 1.0, %v10416_v7  ;;  %v3778_v46 = vmul.f32 0.5, %v3726_v62  ;;  %v3630_v40 = vmul.f32 0.7978846, %v3578_v39  ;;  %v3631_v16 = vmul.f32 0.7978846, %v3579_v10 }
 0x493   :  { %v3779_v9 = vmul.f32 0.5, %v3727_v17  ;;  %v13019_v26 = vmul.f32 %v3777_v36, %v12900_v8  ;;  %v3632_v15 = vmul.f32 0.7978846, %v3580_v2  ;;  %10425 = vtanh.f32 %v3629_v22  ;;  %v15847_v39 = vld [vmem:[#allocation115_spill] sm:$0xff] }
 0x494   :  { %v3780_v25 = vmul.f32 0.5, %v3728_v6  ;;  %v13022_v63 = vmul.f32 %v3778_v46, %v12902_v31  ;;  %10427 = vtanh.f32 %v3630_v40  ;;  %v3471_v3 = vmul.f32 %v3419_v47, %v12996_v49 }
 0x495   :  { %15843 = vst [vmem:[#allocation110_spill] sm:$0xff] %v13019_v26  ;;  %v13026_v35 = vmul.f32 %v3779_v9, %v12904_v30  ;;  %10429 = vtanh.f32 %v3631_v16  ;;  %v3472_v52 = vmul.f32 %v3420_v45, %v13001_v21  ;;  %v3521_v59 = vmul.f32 0.044715, %v3469_v14  ;;  %v15848_v14 = vld [vmem:[#allocation129_spill] sm:$0xff] }
 0x496   :  { %15844 = vst [vmem:[#allocation125_spill] sm:$0xff] %v13022_v63  ;;  %v10418_v62 = vpop.eup %10417  ;;  %v13030_v8 = vmul.f32 %v3780_v25, %v12908_v48  ;;  %10431 = vtanh.f32 %v3632_v15  ;;  %v3522_v2 = vmul.f32 0.044715, %v3470_v32  ;;  %v3523_v36 = vmul.f32 0.044715, %v3471_v3 }
 0x497   :  { %15845 = vst [vmem:[#allocation128_spill] sm:$0xff] %v13026_v35  ;;  %v10420_v31 = vpop.eup %10419  ;;  %v3721_v22 = vadd.f32 1.0, %v10418_v62  ;;  %v3524_v40 = vmul.f32 0.044715, %v3472_v52  ;;  %v3573_v47 = vadd.f32 %v3521_v59, %v12983_v1  ;;  %v3260_v10 = vmul.f32 %v3210_v53, %v15847_v39  ;;  %v3327_v39 = vpop.permute.xlu0 %3326 }
 0x498   :  { %15846 = vst [vmem:[#allocation111_spill] sm:$0xff] %v13030_v8  ;;  %v10422_v30 = vpop.eup %10421  ;;  %v3722_v9 = vadd.f32 1.0, %v10420_v31  ;;  %v3574_v7 = vadd.f32 %v3522_v2, %v12990_v28  ;;  %v3575_v45 = vadd.f32 %v3523_v36, %v12996_v49  ;;  %v3261_v17 = vmul.f32 %v3210_v53, %v15848_v14  ;;  %v3322_v14 = vpop.permute.xlu1 %3321 }
 0x499   :  { %v10424_v48 = vpop.eup %10423  ;;  %v3723_v6 = vadd.f32 1.0, %v10422_v30  ;;  %v3773_v46 = vmul.f32 0.5, %v3721_v22  ;;  %v3576_v32 = vadd.f32 %v3524_v40, %v13001_v21  ;;  %v3625_v16 = vmul.f32 0.7978846, %v3573_v47  ;;  %v15849_v22 = vld [vmem:[#allocation132_spill] sm:$0xff]  ;;  %v15850_v47 = vld [vmem:[#allocation133_spill] sm:$0xff] }
 0x49a   :  { %v3724_v15 = vadd.f32 1.0, %v10424_v48  ;;  %v3774_v25 = vmul.f32 0.5, %v3722_v9  ;;  %v3626_v3 = vmul.f32 0.7978846, %v3574_v7  ;;  %v3627_v52 = vmul.f32 0.7978846, %v3575_v45 }
 0x49b   :  { %v3775_v59 = vmul.f32 0.5, %v3723_v6  ;;  %v13039_v62 = vmul.f32 %v3773_v46, %v12894_v43  ;;  %v3628_v31 = vmul.f32 0.7978846, %v3576_v32  ;;  %10433 = vtanh.f32 %v3625_v16  ;;  %v15851_v6 = vld [vmem:[#allocation112_spill] sm:$0xff]  ;;  %v15853_v16 = vld [vmem:[#allocation114_spill] sm:$0xff] }
 0x49c   :  { %v3776_v2 = vmul.f32 0.5, %v3724_v15  ;;  %v13042_v36 = vmul.f32 %v3774_v25, %v12896_v13  ;;  %10435 = vtanh.f32 %v3626_v3  ;;  %v3262_v30 = vmul.f32 %v3210_v53, %v15849_v22  ;;  %v15854_v25 = vld [vmem:[#allocation116_spill] sm:$0xff] }
 0x49d   :  { %v13046_v40 = vmul.f32 %v3775_v59, %v12898_v23  ;;  %10437 = vtanh.f32 %v3627_v52  ;;  %v3263_v9 = vmul.f32 %v3210_v53, %v15850_v47  ;;  %v13049_v7 = vadd.f32 %v3327_v39, %v3260_v10  ;;  %v15852_v53 = vld [vmem:[#allocation113_spill] sm:$0xff] }
 0x49e   :  { %v13052_v43 = vmul.f32 %v3776_v2, %v12906_v55  ;;  %10439 = vtanh.f32 %v3628_v31  ;;  %v13054_v45 = vadd.f32 %v3327_v39, %v3261_v17  ;;  %v13056_v13 = vadd.f32 %v3327_v39, %v3262_v30 }
 0x49f   :  { %v13058_v48 = vadd.f32 %v3327_v39, %v3263_v9  ;;  %v3429_v23 = vmul.f32 %v13049_v7, %v13049_v7  ;;  %v3256_v46 = vmul.f32 %v12949_v37, %v15851_v6  ;;  %v3257_v10 = vmul.f32 %v12949_v37, %v15852_v53 }
 0x4a0   :  { %v10426_v32 = vpop.eup %10425  ;;  %v3430_v55 = vmul.f32 %v13054_v45, %v13054_v45  ;;  %v3431_v17 = vmul.f32 %v13056_v13, %v13056_v13  ;;  %v3258_v15 = vmul.f32 %v12949_v37, %v15853_v16  ;;  %v3259_v3 = vmul.f32 %v12949_v37, %v15854_v25 }
 0x4a1   :  { %v10428_v52 = vpop.eup %10427  ;;  %v3733_v59 = vadd.f32 1.0, %v10426_v32  ;;  %v3432_v31 = vmul.f32 %v13058_v48, %v13058_v48  ;;  %v3481_v2 = vmul.f32 %v3429_v23, %v13049_v7  ;;  %v13077_v39 = vadd.f32 %v3322_v14, %v3256_v46 }
 0x4a2   :  { %v10430_v22 = vpop.eup %10429  ;;  %v3734_v30 = vadd.f32 1.0, %v10428_v52  ;;  %v3482_v47 = vmul.f32 %v3430_v55, %v13054_v45  ;;  %v3483_v9 = vmul.f32 %v3431_v17, %v13056_v13  ;;  %v13081_v6 = vadd.f32 %v3322_v14, %v3257_v10 }
 0x4a3   :  { %v10432_v53 = vpop.eup %10431  ;;  %v3735_v16 = vadd.f32 1.0, %v10430_v22  ;;  %v3785_v37 = vmul.f32 0.5, %v3733_v59  ;;  %v3484_v32 = vmul.f32 %v3432_v31, %v13058_v48  ;;  %v3533_v25 = vmul.f32 0.044715, %v3481_v2 }
 0x4a4   :  { %v3736_v35 = vadd.f32 1.0, %v10432_v53  ;;  %v3786_v26 = vmul.f32 0.5, %v3734_v30  ;;  %v3534_v8 = vmul.f32 0.044715, %v3482_v47  ;;  %v3535_v23 = vmul.f32 0.044715, %v3483_v9 }
 0x4a5   :  { %v3787_v46 = vmul.f32 0.5, %v3735_v16  ;;  %v13085_v63 = vmul.f32 %v3785_v37, %v12972_v33  ;;  %v3536_v52 = vmul.f32 0.044715, %v3484_v32  ;;  %v3585_v55 = vadd.f32 %v3533_v25, %v13049_v7 }
 0x4a6   :  { %v3788_v17 = vmul.f32 0.5, %v3736_v35  ;;  %v13089_v10 = vmul.f32 %v3786_v26, %v12974_v42  ;;  %v3586_v59 = vadd.f32 %v3534_v8, %v13054_v45  ;;  %v3587_v31 = vadd.f32 %v3535_v23, %v13056_v13 }
 0x4a7   :  { %v13094_v2 = vmul.f32 %v3787_v46, %v12976_v27  ;;  %v3588_v22 = vadd.f32 %v3536_v52, %v13058_v48  ;;  %v3637_v30 = vmul.f32 0.7978846, %v3585_v55  ;;  %v13097_v47 = vadd.f32 %v3322_v14, %v3258_v15 }
 0x4a8   :  { %v10434_v33 = vpop.eup %10433  ;;  %v13100_v9 = vmul.f32 %v3788_v17, %v12978_v0  ;;  %v3638_v35 = vmul.f32 0.7978846, %v3586_v59  ;;  %v3639_v53 = vmul.f32 0.7978846, %v3587_v31  ;;  %v13102_v42 = vadd.f32 %v3322_v14, %v3259_v3 }
 0x4a9   :  { %v10436_v26 = vpop.eup %10435  ;;  %v3729_v8 = vadd.f32 1.0, %v10434_v33  ;;  %v3640_v16 = vmul.f32 0.7978846, %v3588_v22  ;;  %10441 = vtanh.f32 %v3637_v30  ;;  %v3425_v27 = vmul.f32 %v13077_v39, %v13077_v39 }
 0x4aa   :  { %v10438_v37 = vpop.eup %10437  ;;  %v3730_v32 = vadd.f32 1.0, %v10436_v26  ;;  %10443 = vtanh.f32 %v3638_v35  ;;  %v3426_v15 = vmul.f32 %v13081_v6, %v13081_v6  ;;  %v3427_v0 = vmul.f32 %v13097_v47, %v13097_v47 }
 0x4ab   :  { %v10440_v25 = vpop.eup %10439  ;;  %v3731_v23 = vadd.f32 1.0, %v10438_v37  ;;  %v3781_v14 = vmul.f32 0.5, %v3729_v8  ;;  %10445 = vtanh.f32 %v3639_v53  ;;  %v3428_v3 = vmul.f32 %v13102_v42, %v13102_v42 }
 0x4ac   :  { %v3732_v46 = vadd.f32 1.0, %v10440_v25  ;;  %v3782_v52 = vmul.f32 0.5, %v3730_v32  ;;  %10447 = vtanh.f32 %v3640_v16  ;;  %v3477_v55 = vmul.f32 %v3425_v27, %v13077_v39 }
 0x4ad   :  { %v3783_v17 = vmul.f32 0.5, %v3731_v23  ;;  %v13114_v59 = vmul.f32 %v3781_v14, %v12983_v1  ;;  %v3478_v31 = vmul.f32 %v3426_v15, %v13081_v6  ;;  %v3479_v22 = vmul.f32 %v3427_v0, %v13097_v47 }
 0x4ae   :  { %v3784_v30 = vmul.f32 0.5, %v3732_v46  ;;  %v13119_v33 = vmul.f32 %v3782_v52, %v12990_v28  ;;  %v3480_v35 = vmul.f32 %v3428_v3, %v13102_v42  ;;  %v3529_v53 = vmul.f32 0.044715, %v3477_v55 }
 0x4af   :  { %v13123_v26 = vmul.f32 %v3783_v17, %v12996_v49  ;;  %v3530_v8 = vmul.f32 0.044715, %v3478_v31  ;;  %v3531_v16 = vmul.f32 0.044715, %v3479_v22 }
 0x4b0   :  { %v13126_v27 = vmul.f32 %v3784_v30, %v13001_v21  ;;  %v3532_v1 = vmul.f32 0.044715, %v3480_v35  ;;  %v3581_v37 = vadd.f32 %v3529_v53, %v13077_v39 }
 0x4b1   :  { %v3582_v32 = vadd.f32 %v3530_v8, %v13081_v6  ;;  %v3583_v15 = vadd.f32 %v3531_v16, %v13097_v47 }
 0x4b2   :  { %v3584_v28 = vadd.f32 %v3532_v1, %v13102_v42  ;;  %v3633_v0 = vmul.f32 0.7978846, %v3581_v37 }
 0x4b3   :  { %v3634_v25 = vmul.f32 0.7978846, %v3582_v32  ;;  %v3635_v23 = vmul.f32 0.7978846, %v3583_v15 }
 0x4b4   :  { %v3636_v14 = vmul.f32 0.7978846, %v3584_v28  ;;  %10449 = vtanh.f32 %v3633_v0 }
 0x4b5   :  { %10451 = vtanh.f32 %v3634_v25 }
 0x4b6   :  { %v10442_v49 = vpop.eup %10441  ;;  %10453 = vtanh.f32 %v3635_v23 }
 0x4b7   :  { %v10444_v3 = vpop.eup %10443  ;;  %v3741_v21 = vadd.f32 1.0, %v10442_v49  ;;  %10455 = vtanh.f32 %v3636_v14 }
 0x4b8   :  { %v10446_v46 = vpop.eup %10445  ;;  %v3742_v52 = vadd.f32 1.0, %v10444_v3 }
 0x4b9   :  { %v10448_v55 = vpop.eup %10447  ;;  %v3743_v17 = vadd.f32 1.0, %v10446_v46  ;;  %v3793_v31 = vmul.f32 0.5, %v3741_v21 }
 0x4ba   :  { %v3744_v22 = vadd.f32 1.0, %v10448_v55  ;;  %v3794_v30 = vmul.f32 0.5, %v3742_v52  ;;  %v15855_v55 = vld [vmem:[#allocation47_spill] sm:$0xff] }
 0x4bb   :  { %v3795_v35 = vmul.f32 0.5, %v3743_v17  ;;  %v13133_v53 = vmul.f32 %v3793_v31, %v13049_v7  ;;  %v15856_v17 = vld [vmem:[#allocation46_spill] sm:$0xff] }
 0x4bc   :  { %v3796_v8 = vmul.f32 0.5, %v3744_v22  ;;  %v13136_v16 = vmul.f32 %v3794_v30, %v13054_v45  ;;  %v8698_v31 = vcombine.high %v15856_v17, %v15855_v55  ;;  %v15857_v22 = vld [vmem:[#allocation79_spill] sm:$0xff]  ;;  %v15858_v30 = vld [vmem:[#allocation78_spill] sm:$0xff] }
 0x4bd   :  { %v13139_v1 = vmul.f32 %v3795_v35, %v13056_v13  ;;  %v8730_v35 = vcombine.high %v15858_v30, %v15857_v22 }
 0x4be   :  { %v13142_v37 = vmul.f32 %v3796_v8, %v13058_v48  ;;  %v8729_v8 = vcombine.low %v15858_v30, %v15857_v22 }
 0x4c1   :  { %v10450_v32 = vpop.eup %10449 }
 0x4c2   :  { %v10452_v15 = vpop.eup %10451  ;;  %v3737_v28 = vadd.f32 1.0, %v10450_v32 }
 0x4c3   :  { %v10454_v0 = vpop.eup %10453  ;;  %v3738_v25 = vadd.f32 1.0, %v10452_v15 }
 0x4c4   :  { %v10456_v23 = vpop.eup %10455  ;;  %v3739_v14 = vadd.f32 1.0, %v10454_v0  ;;  %v3789_v49 = vmul.f32 0.5, %v3737_v28 }
 0x4c5   :  { %v3740_v7 = vadd.f32 1.0, %v10456_v23  ;;  %v3790_v3 = vmul.f32 0.5, %v3738_v25 }
 0x4c6   :  { %v3791_v21 = vmul.f32 0.5, %v3739_v14  ;;  %v13145_v45 = vmul.f32 %v3789_v49, %v13077_v39  ;;  %v8697_v39 = vcombine.low %v15856_v17, %v15855_v55 }
 0x4c7   :  { %v3792_v46 = vmul.f32 0.5, %v3740_v7  ;;  %v13148_v13 = vmul.f32 %v3790_v3, %v13081_v6 }
 0x4c8   :  { %v13151_v48 = vmul.f32 %v3791_v21, %v13097_v47 }
 0x4c9   :  { %v13154_v52 = vmul.f32 %v3792_v46, %v13102_v42 }
 0x4ca   :  { %10872 = dma.done.wait [#allocation7], 8192 }
 0x4cb   :  { %10873 = vsyncadd [#allocation7], 4294959104  ;;  %v15859_v6 = vmov 0   ;;  %v15860_v47 = vld [vmem:[#allocation45_spill] sm:$0xff]  ;;  %v15861_v32 = vld [vmem:[#allocation44_spill] sm:$0xff]  ;;  %4277 = vmatprep.subr.bf16.mxu0 %v8698_v31  ;;  %4378 = vmatprep.subr.bf16.mxu1 %v8730_v35  ;;  %s15932_s26 = sld [smem:[#allocation139_spill]] }
 0x4cc   :  { %10458 = vset.pattern.permute.xlu0 %v15859_v6  ;;  %v8696_v42 = vcombine.high %v15861_v32, %v15860_v47  ;;  %v15862_v15 = vld [vmem:[#allocation77_spill] sm:$0xff]  ;;  %v15863_v28 = vld [vmem:[#allocation76_spill] sm:$0xff]  ;;  %10459 = vset.pattern.permute.xlu1 %v15859_v6  ;;  %v8695_v25 = vcombine.low %v15861_v32, %v15860_v47  ;;  %v15864_v14 = vld [vmem:[#allocation43_spill] sm:$0xff]  ;;  %s15948_s29 = sld [smem:[#allocation140_spill]] }
 0x4cd   :  { %v8728_v0 = vcombine.high %v15863_v28, %v15862_v15  ;;  %4278 = vmatpush1.bf16.msra.mxu0 %v8697_v39  ;;  %4379 = vmatpush1.bf16.msra.mxu1 %v8729_v8  ;;  %v8727_v23 = vcombine.low %v15863_v28, %v15862_v15  ;;  %v15865_v49 = vld [vmem:[#allocation42_spill] sm:$0xff]  ;;  %v15866_v3 = vld [vmem:[#allocation75_spill] sm:$0xff]  ;;  %v15868_v31 = vld [vmem:[#allocation41_spill] sm:$0xff]  ;;  %s15949_s4 = sld [smem:[#allocation141_spill]] }
 0x4ce   :  { %4279 = vmatprep.subr.bf16.mxu0 %v8696_v42  ;;  %v8694_v7 = vcombine.high %v15865_v49, %v15864_v14  ;;  %v15867_v21 = vld [vmem:[#allocation74_spill] sm:$0xff]  ;;  %v8693_v55 = vcombine.low %v15865_v49, %v15864_v14  ;;  %v15869_v22 = vld [vmem:[#allocation40_spill] sm:$0xff]  ;;  %v15870_v35 = vld [vmem:[#allocation73_spill] sm:$0xff] }
 0x4cf   :  { %4380 = vmatprep.subr.bf16.mxu1 %v8728_v0  ;;  %v8726_v46 = vcombine.high %v15867_v21, %v15866_v3  ;;  %v8725_v17 = vcombine.low %v15867_v21, %v15866_v3  ;;  %v8692_v30 = vcombine.high %v15869_v22, %v15868_v31  ;;  %v15871_v39 = vld [vmem:[#allocation72_spill] sm:$0xff]  ;;  %v8691_v47 = vcombine.low %v15869_v22, %v15868_v31  ;;  %v15872_v42 = vld [vmem:[#allocation39_spill] sm:$0xff]  ;;  %v15873_v15 = vld [vmem:[#allocation38_spill] sm:$0xff] }
 0x4d0   :  { %v8724_v8 = vcombine.high %v15871_v39, %v15870_v35  ;;  %v8723_v32 = vcombine.low %v15871_v39, %v15870_v35  ;;  %v8690_v28 = vcombine.high %v15873_v15, %v15872_v42  ;;  %v15874_v0 = vld [vmem:[#allocation71_spill] sm:$0xff]  ;;  %v8689_v14 = vcombine.low %v15873_v15, %v15872_v42  ;;  %v15877_v3 = vld [vmem:[#allocation36_spill] sm:$0xff]  ;;  %v15883_v42 = vld [vmem:[#allocation66_spill] sm:$0xff] }
 0x4d1   :  { %4280 = vmatpush1.bf16.msra.mxu0 %v8695_v25  ;;  %4381 = vmatpush1.bf16.msra.mxu1 %v8727_v23  ;;  %v15875_v25 = vld [vmem:[#allocation70_spill] sm:$0xff]  ;;  %v3918_v31 = vpack.c.bf16 %v12750_v18, %v12717_v11  ;;  %v3920_v22 = vpack.c.bf16 %v12764_v57, %v12728_v19  ;;  %v15880_v39 = vld [vmem:[#allocation35_spill] sm:$0xff]  ;;  %v15884_v18 = vld [vmem:[#allocation33_spill] sm:$0xff] }
 0x4d2   :  { %4281 = vmatprep.subr.bf16.mxu0 %v8694_v7  ;;  %4382 = vmatprep.subr.bf16.mxu1 %v8726_v46  ;;  %v8722_v23 = vcombine.high %v15875_v25, %v15874_v0  ;;  %v8721_v49 = vcombine.low %v15875_v25, %v15874_v0  ;;  %v15876_v7 = vld [vmem:[#allocation37_spill] sm:$0xff]  ;;  %v15885_v57 = vld [vmem:[#allocation32_spill] sm:$0xff] }
 0x4d3   :  { %v8688_v21 = vcombine.high %v15877_v3, %v15876_v7  ;;  %v15878_v46 = vld [vmem:[#allocation69_spill] sm:$0xff]  ;;  %4309 = vmatprep.mubr.bf16.mxu0 %v3918_v31  ;;  %4410 = vmatprep.mubr.bf16.mxu1 %v3920_v22  ;;  %v15887_v25 = vld [vmem:[#allocation64_spill] sm:$0xff] }
 0x4d4   :  { %v15886_v0 = vld [vmem:[#allocation65_spill] sm:$0xff] }
 0x4d5   :  { %4282 = vmatpush1.bf16.msra.mxu0 %v8693_v55  ;;  %4383 = vmatpush1.bf16.msra.mxu1 %v8725_v17  ;;  %v15879_v55 = vld [vmem:[#allocation68_spill] sm:$0xff] }
 0x4d6   :  { %4283 = vmatprep.subr.bf16.mxu0 %v8692_v30  ;;  %4384 = vmatprep.subr.bf16.mxu1 %v8724_v8  ;;  %v8720_v17 = vcombine.high %v15879_v55, %v15878_v46  ;;  %v8687_v30 = vcombine.low %v15877_v3, %v15876_v7  ;;  %v8719_v35 = vcombine.low %v15879_v55, %v15878_v46  ;;  %v15881_v8 = vld [vmem:[#allocation34_spill] sm:$0xff]  ;;  %v15888_v7 = vld [vmem:[#allocation63_spill] sm:$0xff] }
 0x4d7   :  { %v8685_v11 = vcombine.low %v15881_v8, %v15880_v39  ;;  %v15889_v3 = vld [vmem:[#allocation62_spill] sm:$0xff]  ;;  %v15890_v46 = vld [vmem:[#allocation95_spill] sm:$0xff] }
 0x4d8   :  { %v15891_v55 = vld [vmem:[#allocation94_spill] sm:$0xff]  ;;  %v8713_v31 = vcombine.low %v15889_v3, %v15888_v7 }
 0x4d9   :  { %4284 = vmatpush1.bf16.msra.mxu0 %v8691_v47  ;;  %4385 = vmatpush1.bf16.msra.mxu1 %v8723_v32  ;;  %v8686_v47 = vcombine.high %v15881_v8, %v15880_v39  ;;  %v15882_v32 = vld [vmem:[#allocation67_spill] sm:$0xff]  ;;  %v8745_v22 = vcombine.low %v15891_v55, %v15890_v46  ;;  %v15894_v8 = vld [vmem:[#allocation93_spill] sm:$0xff] }
 0x4da   :  { %4285 = vmatprep.subr.bf16.mxu0 %v8690_v28  ;;  %4386 = vmatprep.subr.bf16.mxu1 %v8722_v23  ;;  %v8718_v15 = vcombine.high %v15883_v42, %v15882_v32  ;;  %v8717_v19 = vcombine.low %v15883_v42, %v15882_v32  ;;  %v8684_v28 = vcombine.high %v15885_v57, %v15884_v18 }
 0x4db   :  { %v8716_v23 = vcombine.high %v15887_v25, %v15886_v0 }
 0x4dd   :  { %4286 = vmatpush1.bf16.msra.mxu0 %v8689_v14  ;;  %4387 = vmatpush1.bf16.msra.mxu1 %v8721_v49  ;;  %v8683_v14 = vcombine.low %v15885_v57, %v15884_v18  ;;  %v8715_v49 = vcombine.low %v15887_v25, %v15886_v0  ;;  %v15898_v57 = vld [vmem:[#allocation91_spill] sm:$0xff] }
 0x4de   :  { %4287 = vmatprep.subr.bf16.mxu0 %v8688_v21  ;;  %4388 = vmatprep.subr.bf16.mxu1 %v8720_v17  ;;  %v8714_v21 = vcombine.high %v15889_v3, %v15888_v7  ;;  %v8746_v17 = vcombine.high %v15891_v55, %v15890_v46  ;;  %v15902_v3 = vld [vmem:[#allocation89_spill] sm:$0xff] }
 0x4e1   :  { %4288 = vmatpush1.bf16.msra.mxu0 %v8687_v30  ;;  %4389 = vmatpush1.bf16.msra.mxu1 %v8719_v35  ;;  %v15892_v30 = vld [vmem:[#allocation61_spill] sm:$0xff]  ;;  %v15893_v35 = vld [vmem:[#allocation60_spill] sm:$0xff] }
 0x4e2   :  { %4289 = vmatprep.subr.bf16.mxu0 %v8686_v47  ;;  %4390 = vmatprep.subr.bf16.mxu1 %v8718_v15  ;;  %v8712_v39 = vcombine.high %v15893_v35, %v15892_v30  ;;  %v15895_v47 = vld [vmem:[#allocation92_spill] sm:$0xff]  ;;  %v8711_v42 = vcombine.low %v15893_v35, %v15892_v30  ;;  %v15906_v35 = vld [vmem:[#allocation87_spill] sm:$0xff] }
 0x4e3   :  { %v8744_v32 = vcombine.high %v15895_v47, %v15894_v8  ;;  %v8743_v15 = vcombine.low %v15895_v47, %v15894_v8 }
 0x4e5   :  { %4290 = vmatpush1.bf16.msra.mxu0 %v8685_v11  ;;  %4391 = vmatpush1.bf16.msra.mxu1 %v8717_v19  ;;  %v15896_v11 = vld [vmem:[#allocation59_spill] sm:$0xff]  ;;  %v15897_v19 = vld [vmem:[#allocation58_spill] sm:$0xff] }
 0x4e6   :  { %4291 = vmatprep.subr.bf16.mxu0 %v8684_v28  ;;  %4392 = vmatprep.subr.bf16.mxu1 %v8716_v23  ;;  %v8710_v18 = vcombine.high %v15897_v19, %v15896_v11  ;;  %v15899_v28 = vld [vmem:[#allocation90_spill] sm:$0xff]  ;;  %v8709_v25 = vcombine.low %v15897_v19, %v15896_v11  ;;  %v15910_v19 = vld [vmem:[#allocation85_spill] sm:$0xff] }
 0x4e7   :  { %v8742_v0 = vcombine.high %v15899_v28, %v15898_v57  ;;  %v8741_v23 = vcombine.low %v15899_v28, %v15898_v57 }
 0x4e9   :  { %4292 = vmatpush1.bf16.msra.mxu0 %v8683_v14  ;;  %4393 = vmatpush1.bf16.msra.mxu1 %v8715_v49  ;;  %v15900_v14 = vld [vmem:[#allocation57_spill] sm:$0xff]  ;;  %v15901_v49 = vld [vmem:[#allocation56_spill] sm:$0xff] }
 0x4ea   :  { %4293 = vmatprep.subr.bf16.mxu0 %v8714_v21  ;;  %4394 = vmatprep.subr.bf16.mxu1 %v8746_v17  ;;  %v8708_v7 = vcombine.high %v15901_v49, %v15900_v14  ;;  %v15903_v21 = vld [vmem:[#allocation88_spill] sm:$0xff]  ;;  %v8707_v55 = vcombine.low %v15901_v49, %v15900_v14  ;;  %v15914_v49 = vld [vmem:[#allocation83_spill] sm:$0xff] }
 0x4eb   :  { %v8740_v46 = vcombine.high %v15903_v21, %v15902_v3  ;;  %v8739_v17 = vcombine.low %v15903_v21, %v15902_v3 }
 0x4ed   :  { %4294 = vmatpush2.bf16.msra.mxu0 %v8713_v31  ;;  %4395 = vmatpush2.bf16.msra.mxu1 %v8745_v22  ;;  %v15904_v31 = vld [vmem:[#allocation55_spill] sm:$0xff]  ;;  %v15905_v22 = vld [vmem:[#allocation54_spill] sm:$0xff] }
 0x4ee   :  { %4295 = vmatprep.subr.bf16.mxu0 %v8712_v39  ;;  %4396 = vmatprep.subr.bf16.mxu1 %v8744_v32  ;;  %v8706_v30 = vcombine.high %v15905_v22, %v15904_v31  ;;  %v15907_v39 = vld [vmem:[#allocation86_spill] sm:$0xff]  ;;  %v8705_v47 = vcombine.low %v15905_v22, %v15904_v31  ;;  %v15918_v22 = vld [vmem:[#allocation81_spill] sm:$0xff] }
 0x4ef   :  { %v8738_v8 = vcombine.high %v15907_v39, %v15906_v35  ;;  %v8737_v32 = vcombine.low %v15907_v39, %v15906_v35 }
 0x4f1   :  { %4296 = vmatpush2.bf16.msra.mxu0 %v8711_v42  ;;  %4397 = vmatpush2.bf16.msra.mxu1 %v8743_v15  ;;  %v15908_v42 = vld [vmem:[#allocation53_spill] sm:$0xff]  ;;  %v15909_v15 = vld [vmem:[#allocation52_spill] sm:$0xff] }
 0x4f2   :  { %4297 = vmatprep.subr.bf16.mxu0 %v8710_v18  ;;  %4398 = vmatprep.subr.bf16.mxu1 %v8742_v0  ;;  %v8704_v11 = vcombine.high %v15909_v15, %v15908_v42  ;;  %v15911_v18 = vld [vmem:[#allocation84_spill] sm:$0xff]  ;;  %v8703_v28 = vcombine.low %v15909_v15, %v15908_v42  ;;  %v3922_v42 = vpack.c.bf16 %v12865_v24, %v12778_v12  ;;  %v15922_v24 = vld [vmem:[#allocation117_spill] sm:$0xff] }
 0x4f3   :  { %v8736_v57 = vcombine.high %v15911_v18, %v15910_v19  ;;  %v8735_v0 = vcombine.low %v15911_v18, %v15910_v19  ;;  %v3924_v15 = vpack.c.bf16 %v12875_v41, %v12789_v4  ;;  %v15921_v12 = vld [vmem:[#allocation100_spill] sm:$0xff]  ;;  %v15923_v41 = vld [vmem:[#allocation126_spill] sm:$0xff] }
 0x4f4   :  { %v3925_v4 = vpack.c.bf16 %v12953_v61, %v15921_v12  ;;  %v3927_v19 = vpack.c.bf16 %v15923_v41, %v15922_v24  ;;  %v15928_v61 = vld [vmem:[#allocation125_spill] sm:$0xff] }
 0x4f5   :  { %4298 = vmatpush2.bf16.msra.mxu0 %v8709_v25  ;;  %4399 = vmatpush2.bf16.msra.mxu1 %v8741_v23  ;;  %v15912_v25 = vld [vmem:[#allocation51_spill] sm:$0xff]  ;;  %v15913_v23 = vld [vmem:[#allocation50_spill] sm:$0xff]  ;;  %v3934_v18 = vpack.c.bf16 %v13119_v33, %v15928_v61  ;;  %v3937_v33 = vpack.c.bf16 %v13145_v45, %v13085_v63  ;;  %v3945_v63 = vld [vmem:[%s15932_s26] sm:$0x3] }
 0x4f6   :  { %4299 = vmatprep.subr.bf16.mxu0 %v8708_v7  ;;  %4400 = vmatprep.subr.bf16.mxu1 %v8740_v46  ;;  %v8702_v14 = vcombine.high %v15913_v23, %v15912_v25  ;;  %v15915_v7 = vld [vmem:[#allocation82_spill] sm:$0xff]  ;;  %v8701_v21 = vcombine.low %v15913_v23, %v15912_v25 }
 0x4f7   :  { %v8734_v3 = vcombine.high %v15915_v7, %v15914_v49  ;;  %v8733_v46 = vcombine.low %v15915_v7, %v15914_v49 }
 0x4f9   :  { %4300 = vmatpush2.bf16.msra.mxu0 %v8707_v55  ;;  %4401 = vmatpush2.bf16.msra.mxu1 %v8739_v17  ;;  %v15916_v55 = vld [vmem:[#allocation49_spill] sm:$0xff]  ;;  %v15917_v17 = vld [vmem:[#allocation48_spill] sm:$0xff] }
 0x4fa   :  { %4301 = vmatprep.subr.bf16.mxu0 %v8706_v30  ;;  %4402 = vmatprep.subr.bf16.mxu1 %v8738_v8  ;;  %v8700_v31 = vcombine.high %v15917_v17, %v15916_v55  ;;  %v15919_v30 = vld [vmem:[#allocation80_spill] sm:$0xff]  ;;  %v8699_v39 = vcombine.low %v15917_v17, %v15916_v55 }
 0x4fb   :  { %v8732_v35 = vcombine.high %v15919_v30, %v15918_v22  ;;  %v8731_v8 = vcombine.low %v15919_v30, %v15918_v22 }
 0x4fd   :  { %4302 = vmatpush2.bf16.msra.mxu0 %v8705_v47  ;;  %4403 = vmatpush2.bf16.msra.mxu1 %v8737_v32  ;;  %v3917_v47 = vpack.c.bf16 %v12747_v54, %v12712_v20  ;;  %v3919_v32 = vpack.c.bf16 %v12757_v50, %v12722_v60  ;;  %v3921_v20 = vpack.c.bf16 %v12860_v56, %v12775_v34  ;;  %v15924_v34 = vld [vmem:[#allocation118_spill] sm:$0xff] }
 0x4fe   :  { %4303 = vmatprep.subr.bf16.mxu0 %v8704_v11  ;;  %4404 = vmatprep.subr.bf16.mxu1 %v8736_v57  ;;  %v15920_v11 = vmov 0.0   ;;  %v3923_v60 = vpack.c.bf16 %v12869_v38, %v12782_v51  ;;  %v3926_v54 = vpack.c.bf16 %v12956_v5, %v12832_v44  ;;  %v3928_v50 = vpack.c.bf16 %v12962_v58, %v12840_v29  ;;  %v15925_v51 = vld [vmem:[#allocation123_spill] sm:$0xff]  ;;  %v15926_v44 = vld [vmem:[#allocation120_spill] sm:$0xff]  ;;  %v15927_v5 = vld [vmem:[#allocation109_spill] sm:$0xff] }
 0x4ff   :  { %v3930_v56 = vpack.c.bf16 %v13042_v36, %v15924_v34  ;;  %v3932_v38 = vpack.c.bf16 %v13052_v43, %v15925_v51  ;;  %v3929_v29 = vpack.c.bf16 %v13039_v62, %v15926_v44  ;;  %v3931_v58 = vpack.c.bf16 %v13046_v40, %v15927_v5  ;;  %v15929_v57 = vld [vmem:[#allocation111_spill] sm:$0xff]  ;;  %v15930_v36 = vld [vmem:[#allocation110_spill] sm:$0xff] }
 0x500   :  { %v3933_v43 = vpack.c.bf16 %v13114_v59, %v15930_v36  ;;  %v3938_v62 = vpack.c.bf16 %v13148_v13, %v13089_v10  ;;  %v3940_v40 = vpack.c.bf16 %v13154_v52, %v13100_v9  ;;  %v3942_v59 = vpack.c.bf16 %v13136_v16, %v13136_v16 }
 0x501   :  { %4304 = vmatpush2.bf16.msra.mxu0 %v8703_v28  ;;  %4405 = vmatpush2.bf16.msra.mxu1 %v8735_v0  ;;  %v3936_v28 = vpack.c.bf16 %v13126_v27, %v15929_v57  ;;  %v15931_v0 = vld [vmem:[#allocation128_spill] sm:$0xff]  ;;  %v3939_v27 = vpack.c.bf16 %v13151_v48, %v13094_v2  ;;  %v3941_v10 = vpack.c.bf16 %v13133_v53, %v13133_v53  ;;  %v15933_v2 = vld [vmem:[#allocation97_spill] sm:$0xff] }
 0x502   :  { %4305 = vmatprep.subr.bf16.mxu0 %v8702_v14  ;;  %4406 = vmatprep.subr.bf16.mxu1 %v8734_v3  ;;  %v3935_v25 = vpack.c.bf16 %v13123_v26, %v15931_v0  ;;  %v3944_v26 = vpack.c.bf16 %v13142_v37, %v13142_v37  ;;  %v3943_v9 = vpack.c.bf16 %v13139_v1, %v13139_v1  ;;  %v15934_v37 = vld [vmem:[#allocation98_spill] sm:$0xff] }
 0x503   :  { %v13352_v16 = vrot.slane %v3945_v63, %v15933_v2  ;;  %v13355_v53 = vrot.slane %v3945_v63, %v15934_v37 }
 0x505   :  { %4306 = vmatpush2.bf16.msra.mxu0 %v8701_v21  ;;  %4407 = vmatpush2.bf16.msra.mxu1 %v8733_v46 }
 0x506   :  { %4307 = vmatprep.subr.bf16.mxu0 %v8700_v31  ;;  %4408 = vmatprep.subr.bf16.mxu1 %v8732_v35 }
 0x509   :  { %4308 = vmatpush2.bf16.msra.mxu0 %v8699_v39  ;;  %4409 = vmatpush2.bf16.msra.mxu1 %v8731_v8 }
 0x50a   :  { %9437 = vmatprep.subr.mxu1 %v15920_v11  ;;  %9372 = vmatprep.subr.mxu0 %v15920_v11 }
 0x50c   :  { %4310 = vmatmul.mubr.bf16.vlgmr.msra.gmra.mxu0 %v3917_v47  ;;  %4411 = vmatmul.mubr.bf16.vlgmr.msra.gmra.mxu1 %v3919_v32 }
 0x50d   :  { %4319 = vmatprep.mubr.bf16.mxu0 %v3922_v42  ;;  %4420 = vmatprep.mubr.bf16.mxu1 %v3924_v15 }
 0x514   :  { %4320 = vmatmul.mubr.bf16.gmra.mxu0 %v3921_v20  ;;  %4421 = vmatmul.mubr.bf16.gmra.mxu1 %v3923_v60 }
 0x515   :  { %4329 = vmatprep.mubr.bf16.mxu0 %v3926_v54  ;;  %4430 = vmatprep.mubr.bf16.mxu1 %v3928_v50 }
 0x51c   :  { %4330 = vmatmul.mubr.bf16.gmra.mxu0 %v3925_v4  ;;  %4431 = vmatmul.mubr.bf16.gmra.mxu1 %v3927_v19 }
 0x51d   :  { %4339 = vmatprep.mubr.bf16.mxu0 %v3930_v56  ;;  %4440 = vmatprep.mubr.bf16.mxu1 %v3932_v38 }
 0x524   :  { %4340 = vmatmul.mubr.bf16.gmra.mxu0 %v3929_v29  ;;  %4441 = vmatmul.mubr.bf16.gmra.mxu1 %v3931_v58 }
 0x525   :  { %4349 = vmatprep.mubr.bf16.mxu0 %v3934_v18  ;;  %4450 = vmatprep.mubr.bf16.mxu1 %v3936_v28 }
 0x52c   :  { %4350 = vmatmul.mubr.bf16.gmra.mxu0 %v3933_v43  ;;  %4451 = vmatmul.mubr.bf16.gmra.mxu1 %v3935_v25 }
 0x52d   :  { %4359 = vmatprep.mubr.bf16.mxu0 %v3938_v62  ;;  %4460 = vmatprep.mubr.bf16.mxu1 %v3940_v40 }
 0x534   :  { %4360 = vmatmul.mubr.bf16.gmra.mxu0 %v3937_v33  ;;  %4461 = vmatmul.mubr.bf16.gmra.mxu1 %v3939_v27 }
 0x535   :  { %4369 = vmatprep.mubr.bf16.mxu0 %v3942_v59  ;;  %4470 = vmatprep.mubr.bf16.mxu1 %v3944_v26 }
 0x53c   :  { %4370 = vmatmul.mubr.bf16.gmra.mxu0 %v3941_v10  ;;  %4471 = vmatmul.mubr.bf16.gmra.mxu1 %v3943_v9 }
 0x53d   :  { %9398 = vmatprep.mubr.msk.f32.mxu0 %vm10892_vm1, %v15920_v11  ;;  %9463 = vmatprep.mubr.msk.f32.mxu1 %vm10892_vm1, %v15920_v11 }
 0x5cc   :  { %v4311_v45 = vpop.f32.mrf.mxu0  ;;  %v4412_v1 = vpop.f32.mrf.mxu1 }
 0x5cd   :  { %v4312_v13 = vadd.f32 %v4311_v45, %v13352_v16 }
 0x5ce   :  { %v4313_v48 = vpop.f32.mrf.mxu0  ;;  %v4414_v52 = vpop.f32.mrf.mxu1 }
 0x5cf   :  { %v13358_v23 = vadd.f32 %v4412_v1, %v4312_v13  ;;  %v4314_v14 = vadd.f32 %v4313_v48, %v13355_v53 }
 0x5d0   :  { %v4315_v49 = vpop.f32.mrf.mxu0  ;;  %v4416_v7 = vpop.f32.mrf.mxu1 }
 0x5d1   :  { %v13361_v3 = vadd.f32 %v4414_v52, %v4314_v14  ;;  %v4316_v21 = vadd.f32 %v4315_v49, %v13352_v16 }
 0x5d2   :  { %v13364_v46 = vpop.f32.mrf.mxu0  ;;  %v13366_v55 = vpop.f32.mrf.mxu1 }
 0x5d3   :  { %v13368_v17 = vadd.f32 %v4416_v7, %v4316_v21 }
 0x5d4   :  { %v13370_v31 = vpop.f32.mrf.mxu0  ;;  %v13372_v22 = vpop.f32.mrf.mxu1 }
 0x5d6   :  { %v13374_v30 = vpop.f32.mrf.mxu0  ;;  %v13376_v35 = vpop.f32.mrf.mxu1 }
 0x5d8   :  { %v13378_v39 = vpop.f32.mrf.mxu0  ;;  %v13380_v8 = vpop.f32.mrf.mxu1 }
 0x5da   :  { %v13382_v47 = vpop.f32.mrf.mxu0  ;;  %v13384_v32 = vpop.f32.mrf.mxu1 }
 0x5dc   :  { %v13386_v42 = vpop.f32.mrf.mxu0  ;;  %v13388_v15 = vpop.f32.mrf.mxu1 }
 0x5de   :  { %v13390_v20 = vpop.f32.mrf.mxu0  ;;  %v13392_v60 = vpop.f32.mrf.mxu1 }
 0x5e0   :  { %v4335_v54 = vpop.f32.mrf.mxu0  ;;  %v4436_v50 = vpop.f32.mrf.mxu1 }
 0x5e1   :  { %v4336_v12 = vadd.f32 %v4335_v54, %v13352_v16 }
 0x5e2   :  { %v4337_v4 = vpop.f32.mrf.mxu0  ;;  %v4438_v24 = vpop.f32.mrf.mxu1 }
 0x5e3   :  { %v4338_v41 = vadd.f32 %v4337_v4, %v13355_v53  ;;  %v13396_v56 = vadd.f32 %v4436_v50, %v4336_v12 }
 0x5e4   :  { %v4341_v19 = vpop.f32.mrf.mxu0  ;;  %v4442_v34 = vpop.f32.mrf.mxu1 }
 0x5e5   :  { %v13398_v51 = vadd.f32 %v4438_v24, %v4338_v41  ;;  %v4342_v38 = vadd.f32 %v4341_v19, %v13352_v16 }
 0x5e6   :  { %v4343_v44 = vpop.f32.mrf.mxu0  ;;  %v4444_v29 = vpop.f32.mrf.mxu1 }
 0x5e7   :  { %v4344_v5 = vadd.f32 %v4343_v44, %v13355_v53  ;;  %v4494_v58 = vadd.f32 %v13398_v51, %v13396_v56  ;;  %v13404_v57 = vadd.f32 %v4442_v34, %v4342_v38 }
 0x5e8   :  { %v4345_v61 = vpop.f32.mrf.mxu0  ;;  %v4446_v18 = vpop.f32.mrf.mxu1 }
 0x5e9   :  { %v13406_v28 = vadd.f32 %v4444_v29, %v4344_v5  ;;  %v4346_v36 = vadd.f32 %v4345_v61, %v13352_v16  ;;  %4495 = vadd.xlane.f32.xlu1 %v4494_v58 }
 0x5ea   :  { %v4347_v43 = vpop.f32.mrf.mxu0  ;;  %v4448_v0 = vpop.f32.mrf.mxu1 }
 0x5eb   :  { %v13409_v25 = vadd.f32 %v4446_v18, %v4346_v36  ;;  %v4348_v62 = vadd.f32 %v4347_v43, %v13355_v53  ;;  %v4497_v40 = vadd.f32 %v13406_v28, %v13404_v57 }
 0x5ec   :  { %v4351_v33 = vpop.f32.mrf.mxu0  ;;  %v4452_v27 = vpop.f32.mrf.mxu1 }
 0x5ed   :  { %v13414_v59 = vadd.f32 %v4448_v0, %v4348_v62  ;;  %v4352_v26 = vadd.f32 %v4351_v33, %v13352_v16  ;;  %4498 = vadd.xlane.f32.xlu1 %v4497_v40  ;;  %v4547_v63 = vmul.f32 %v13409_v25, %v13409_v25 }
 0x5ee   :  { %v4353_v10 = vpop.f32.mrf.mxu0  ;;  %v4454_v9 = vpop.f32.mrf.mxu1 }
 0x5ef   :  { %v13419_v45 = vadd.f32 %v4452_v27, %v4352_v26  ;;  %v4354_v1 = vadd.f32 %v4353_v10, %v13355_v53  ;;  %v4500_v13 = vadd.f32 %v13414_v59, %v13409_v25  ;;  %v4548_v48 = vmul.f32 %v13414_v59, %v13414_v59 }
 0x5f0   :  { %v4355_v52 = vpop.f32.mrf.mxu0  ;;  %v4456_v14 = vpop.f32.mrf.mxu1 }
 0x5f1   :  { %v13426_v49 = vadd.f32 %v4454_v9, %v4354_v1  ;;  %v4356_v7 = vadd.f32 %v4355_v52, %v13352_v16  ;;  %4501 = vadd.xlane.f32.xlu1 %v4500_v13  ;;  %v4580_v21 = vadd.f32 %v4548_v48, %v4547_v63  ;;  %v4549_v12 = vmul.f32 %v13419_v45, %v13419_v45 }
 0x5f2   :  { %v4357_v54 = vpop.f32.mrf.mxu0  ;;  %v4458_v50 = vpop.f32.mrf.mxu1 }
 0x5f3   :  { %v13431_v4 = vadd.f32 %v4456_v14, %v4356_v7  ;;  %v4358_v24 = vadd.f32 %v4357_v54, %v13355_v53  ;;  %4581 = vadd.xlane.f32.xlu0 %v4580_v21  ;;  %v4503_v41 = vadd.f32 %v13426_v49, %v13419_v45  ;;  %v4550_v19 = vmul.f32 %v13426_v49, %v13426_v49 }
 0x5f4   :  { %v4361_v34 = vpop.f32.mrf.mxu0  ;;  %v4462_v38 = vpop.f32.mrf.mxu1 }
 0x5f5   :  { %v13438_v44 = vadd.f32 %v4458_v50, %v4358_v24  ;;  %v4362_v29 = vadd.f32 %v4361_v34, %v13352_v16  ;;  %4504 = vadd.xlane.f32.xlu1 %v4503_v41  ;;  %v4583_v5 = vadd.f32 %v4550_v19, %v4549_v12  ;;  %v4551_v18 = vmul.f32 %v13431_v4, %v13431_v4 }
 0x5f6   :  { %v4363_v58 = vpop.f32.mrf.mxu0  ;;  %v4464_v61 = vpop.f32.mrf.mxu1 }
 0x5f7   :  { %v13443_v36 = vadd.f32 %v4462_v38, %v4362_v29  ;;  %v4364_v43 = vadd.f32 %v4363_v58, %v13355_v53  ;;  %4584 = vadd.xlane.f32.xlu0 %v4583_v5  ;;  %v4506_v0 = vadd.f32 %v13438_v44, %v13431_v4  ;;  %v4552_v62 = vmul.f32 %v13438_v44, %v13438_v44 }
 0x5f8   :  { %v4365_v40 = vpop.f32.mrf.mxu0  ;;  %v4466_v33 = vpop.f32.mrf.mxu1 }
 0x5f9   :  { %v13450_v27 = vadd.f32 %v4464_v61, %v4364_v43  ;;  %4507 = vadd.xlane.f32.xlu1 %v4506_v0  ;;  %v4586_v26 = vadd.f32 %v4552_v62, %v4551_v18  ;;  %v4366_v10 = vadd.f32 %v4365_v40, %v13352_v16  ;;  %v4553_v48 = vmul.f32 %v13443_v36, %v13443_v36 }
 0x5fa   :  { %v4367_v9 = vpop.f32.mrf.mxu0  ;;  %v4468_v63 = vpop.f32.mrf.mxu1  ;;  %v4334_v43 = vadd.f32 %v13390_v20, %v13355_v53 }
 0x5fb   :  { %v4368_v1 = vadd.f32 %v4367_v9, %v13355_v53  ;;  %4587 = vadd.xlane.f32.xlu0 %v4586_v26  ;;  %v4509_v13 = vadd.f32 %v13450_v27, %v13443_v36  ;;  %v4554_v52 = vmul.f32 %v13450_v27, %v13450_v27  ;;  %v13463_v41 = vadd.f32 %v4466_v33, %v4366_v10 }
 0x5fc   :  { %v4371_v14 = vpop.f32.mrf.mxu0  ;;  %v4472_v7 = vpop.f32.mrf.mxu1  ;;  %v4332_v10 = vadd.f32 %v13386_v42, %v13352_v16  ;;  %v4328_v9 = vadd.f32 %v13382_v47, %v13355_v53  ;;  %v4326_v42 = vadd.f32 %v13378_v39, %v13352_v16  ;;  %v4545_v39 = vmul.f32 %v13404_v57, %v13404_v57 }
 0x5fd   :  { %v13460_v21 = vadd.f32 %v4468_v63, %v4368_v1  ;;  %v4372_v54 = vadd.f32 %v4371_v14, %v13352_v16  ;;  %4510 = vadd.xlane.f32.xlu1 %v4509_v13  ;;  %v4589_v50 = vadd.f32 %v4554_v52, %v4553_v48  ;;  %v4555_v40 = vmul.f32 %v13463_v41, %v13463_v41 }
 0x5fe   :  { %v4373_v12 = vpop.f32.mrf.mxu0  ;;  %v4474_v24 = vpop.f32.mrf.mxu1  ;;  %v13489_v1 = vadd.f32 %v13392_v60, %v4334_v43  ;;  %v13498_v14 = vadd.f32 %v13388_v15, %v4332_v10  ;;  %v4546_v60 = vmul.f32 %v13406_v28, %v13406_v28  ;;  %v4322_v15 = vadd.f32 %v13370_v31, %v13352_v16 }
 0x5ff   :  { %v13465_v19 = vadd.f32 %v4472_v7, %v4372_v54  ;;  %v4374_v34 = vadd.f32 %v4373_v12, %v13355_v53  ;;  %4590 = vadd.xlane.f32.xlu0 %v4589_v50  ;;  %v4512_v58 = vadd.f32 %v13460_v21, %v13463_v41  ;;  %v4556_v61 = vmul.f32 %v13460_v21, %v13460_v21 }
 0x600   :  { %v4375_v38 = vpop.f32.mrf.mxu0  ;;  %v4476_v29 = vpop.f32.mrf.mxu1  ;;  %v4324_v7 = vadd.f32 %v13374_v30, %v13355_v53  ;;  %v13505_v54 = vadd.f32 %v13384_v32, %v4328_v9  ;;  %v4491_v50 = vadd.f32 %v13489_v1, %v13498_v14  ;;  %v13514_v12 = vadd.f32 %v13380_v8, %v4326_v42 }
 0x601   :  { %v13468_v5 = vadd.f32 %v4474_v24, %v4374_v34  ;;  %v4557_v18 = vmul.f32 %v13465_v19, %v13465_v19  ;;  %v4592_v63 = vadd.f32 %v4556_v61, %v4555_v40  ;;  %v4515_v48 = vsel %vm2528_vm0, %v13465_v19, 0.0 }
 0x602   :  { %v4376_v0 = vpop.f32.mrf.mxu0  ;;  %v4477_v62 = vpop.f32.mrf.mxu1  ;;  %v4577_v24 = vadd.f32 %v4546_v60, %v4545_v39  ;;  %v4544_v30 = vmul.f32 %v13398_v51, %v13398_v51  ;;  %v4318_v32 = vadd.f32 %v13364_v46, %v13355_v53  ;;  %v13521_v34 = vadd.f32 %v13376_v35, %v4324_v7 }
 0x603   :  { %4513 = vadd.xlane.f32.xlu0 %v4512_v58  ;;  %v4558_v33 = vmul.f32 %v13468_v5, %v13468_v5  ;;  %v4595_v26 = vsel %vm2528_vm0, %v4557_v18, 0.0  ;;  %v4516_v52 = vsel %vm2528_vm0, %v13468_v5, 0.0  ;;  %v4488_v38 = vadd.f32 %v13505_v54, %v13514_v12 }
 0x604   :  { %v4517_v47 = vadd.f32 %v4516_v52, %v4515_v48  ;;  %v4543_v16 = vmul.f32 %v13396_v56, %v13396_v56  ;;  %v13528_v31 = vadd.f32 %v13372_v22, %v4322_v15  ;;  %v4542_v29 = vmul.f32 %v13489_v1, %v13489_v1 }
 0x605   :  { %v4596_v20 = vsel %vm2528_vm0, %v4558_v33, 0.0  ;;  %v13533_v53 = vadd.f32 %v13366_v55, %v4318_v32  ;;  %v4541_v35 = vmul.f32 %v13498_v14, %v13498_v14  ;;  %v4540_v22 = vmul.f32 %v13505_v54, %v13505_v54 }
 0x606   :  { %v4597_v13 = vadd.f32 %v4596_v20, %v4595_v26  ;;  %v4574_v8 = vadd.f32 %v4544_v30, %v4543_v16  ;;  %v4485_v46 = vadd.f32 %v13521_v34, %v13528_v31  ;;  %v4539_v55 = vmul.f32 %v13514_v12, %v13514_v12 }
 0x607   :  { %4593 = vadd.xlane.f32.xlu0 %v4592_v63  ;;  %v4571_v58 = vadd.f32 %v4542_v29, %v4541_v35  ;;  %v4482_v61 = vadd.f32 %v13533_v53, %v13368_v17  ;;  %v4538_v43 = vmul.f32 %v13521_v34, %v13521_v34  ;;  %v4479_v0 = vadd.f32 %v13361_v3, %v13358_v23 }
 0x608   :  { %4598 = vadd.xlane.f32.xlu1 %v4597_v13  ;;  %v4568_v18 = vadd.f32 %v4540_v22, %v4539_v55  ;;  %v4534_v62 = vmul.f32 %v13361_v3, %v13361_v3  ;;  %v4537_v40 = vmul.f32 %v13528_v31, %v13528_v31  ;;  %v4533_v33 = vmul.f32 %v13358_v23, %v13358_v23 }
 0x609   :  { %v4536_v10 = vmul.f32 %v13533_v53, %v13533_v53  ;;  %v4535_v63 = vmul.f32 %v13368_v17, %v13368_v17 }
 0x60a   :  { %v4565_v26 = vadd.f32 %v4538_v43, %v4537_v40  ;;  %v4559_v9 = vadd.f32 %v4534_v62, %v4533_v33 }
 0x60b   :  { %4518 = vadd.xlane.f32.xlu0 %v4517_v47  ;;  %v4562_v20 = vadd.f32 %v4536_v10, %v4535_v63 }
 0x60c   :  { %4492 = vadd.xlane.f32.xlu1 %v4491_v50 }
 0x60f   :  { %4578 = vadd.xlane.f32.xlu0 %v4577_v24 }
 0x610   :  { %4489 = vadd.xlane.f32.xlu1 %v4488_v38 }
 0x613   :  { %4575 = vadd.xlane.f32.xlu0 %v4574_v8 }
 0x614   :  { %4486 = vadd.xlane.f32.xlu1 %v4485_v46 }
 0x617   :  { %4572 = vadd.xlane.f32.xlu0 %v4571_v58 }
 0x618   :  { %4483 = vadd.xlane.f32.xlu1 %v4482_v61 }
 0x61b   :  { %4569 = vadd.xlane.f32.xlu0 %v4568_v18 }
 0x61c   :  { %4480 = vadd.xlane.f32.xlu1 %v4479_v0 }
 0x61f   :  { %4566 = vadd.xlane.f32.xlu0 %v4565_v26 }
 0x620   :  { %4560 = vadd.xlane.f32.xlu1 %v4559_v9 }
 0x623   :  { %4563 = vadd.xlane.f32.xlu0 %v4562_v20 }
 0x672   :  { %v13559_v13 = vpop.xlane.xlu1 %4495 }
 0x676   :  { %v4499_v48 = vpop.xlane.xlu1 %4498 }
 0x67a   :  { %v4502_v52 = vpop.xlane.xlu1 %4501 }
 0x67b   :  { %v4527_v9 = vmul.f32 0.00390625, %v4502_v52 }
 0x67c   :  { %v4582_v42 = vpop.xlane.xlu0 %4581 }
 0x67d   :  { %v4607_v62 = vmul.f32 0.00390625, %v4582_v42  ;;  %v4526_v42 = vmul.f32 0.00390625, %v4499_v48 }
 0x67e   :  { %v4505_v60 = vpop.xlane.xlu1 %4504 }
 0x67f   :  { %v4528_v33 = vmul.f32 0.00390625, %v4505_v60 }
 0x680   :  { %v4585_v47 = vpop.xlane.xlu0 %4584 }
 0x681   :  { %v4608_v43 = vmul.f32 0.00390625, %v4585_v47 }
 0x682   :  { %v4508_v50 = vpop.xlane.xlu1 %4507 }
 0x683   :  { %v4529_v0 = vmul.f32 0.00390625, %v4508_v50 }
 0x684   :  { %v4588_v7 = vpop.xlane.xlu0 %4587 }
 0x685   :  { %v4609_v22 = vmul.f32 0.00390625, %v4588_v7  ;;  %v4525_v7 = vmul.f32 0.00390625, %v13559_v13 }
 0x686   :  { %v4511_v24 = vpop.xlane.xlu1 %4510 }
 0x687   :  { %v4530_v55 = vmul.f32 0.00390625, %v4511_v24 }
 0x688   :  { %v4591_v39 = vpop.xlane.xlu0 %4590 }
 0x689   :  { %v4610_v35 = vmul.f32 0.00390625, %v4591_v39 }
 0x68c   :  { %v4514_v15 = vpop.xlane.xlu0 %4513 }
 0x68d   :  { %v4531_v58 = vmul.f32 0.00390625, %v4514_v15 }
 0x690   :  { %v4594_v30 = vpop.xlane.xlu0 %4593 }
 0x691   :  { %v4599_v32 = vpop.xlane.xlu1 %4598  ;;  %v4611_v16 = vmul.f32 0.00390625, %v4594_v30 }
 0x692   :  { %v4612_v38 = vmul.f32 0.00390625, %v4599_v32 }
 0x694   :  { %v4519_v8 = vpop.xlane.xlu0 %4518  ;;  %9438 = vmatpush3.msk.msra.mxu1 %vm2528_vm0, %v4612_v38 }
 0x695   :  { %v4532_v29 = vmul.f32 0.00390625, %v4519_v8  ;;  %9439 = vmatprep.subr.mxu1 %v15920_v11  ;;  %v4493_v46 = vpop.xlane.xlu1 %4492 }
 0x696   :  { %9440 = vmatpush3.msra.mxu1 %v4611_v16  ;;  %v4524_v50 = vmul.f32 0.00390625, %v4493_v46 }
 0x697   :  { %9373 = vmatpush3.msk.msra.mxu0 %vm2528_vm0, %v4532_v29  ;;  %9441 = vmatprep.subr.mxu1 %v15920_v11 }
 0x698   :  { %9374 = vmatprep.subr.mxu0 %v15920_v11  ;;  %v4579_v61 = vpop.xlane.xlu0 %4578  ;;  %9442 = vmatpush3.msra.mxu1 %v4610_v35  ;;  %v15935_v35 = vld [vmem:[#allocation106_spill] sm:$0xff] }
 0x699   :  { %9375 = vmatpush3.msra.mxu0 %v4531_v58  ;;  %9443 = vmatprep.subr.mxu1 %v15920_v11  ;;  %v4490_v18 = vpop.xlane.xlu1 %4489  ;;  %v4606_v10 = vmul.f32 0.00390625, %v4579_v61  ;;  %v15936_v58 = vld [vmem:[#allocation107_spill] sm:$0xff]  ;;  %v15938_v61 = vld [vmem:[#allocation122_spill] sm:$0xff] }
 0x69a   :  { %9376 = vmatprep.subr.mxu0 %v15920_v11  ;;  %9444 = vmatpush3.msra.mxu1 %v4609_v22  ;;  %v4523_v15 = vmul.f32 0.00390625, %v4490_v18  ;;  %v15937_v22 = vld [vmem:[#allocation104_spill] sm:$0xff]  ;;  %v15940_v18 = vld [vmem:[#allocation105_spill] sm:$0xff] }
 0x69b   :  { %9377 = vmatpush3.msra.mxu0 %v4530_v55  ;;  %9445 = vmatprep.subr.mxu1 %v15920_v11  ;;  %v15939_v55 = vld [vmem:[#allocation103_spill] sm:$0xff] }
 0x69c   :  { %v4576_v40 = vpop.xlane.xlu0 %4575  ;;  %9378 = vmatprep.subr.mxu0 %v15920_v11  ;;  %9446 = vmatpush3.msra.mxu1 %v4608_v43  ;;  %v15941_v43 = vld [vmem:[#allocation108_spill] sm:$0xff] }
 0x69d   :  { %9379 = vmatpush3.msra.mxu0 %v4529_v0  ;;  %9447 = vmatprep.subr.mxu1 %v15920_v11  ;;  %v4487_v26 = vpop.xlane.xlu1 %4486  ;;  %v4605_v63 = vmul.f32 0.00390625, %v4576_v40  ;;  %v15942_v0 = vld [vmem:[#allocation121_spill] sm:$0xff] }
 0x69e   :  { %9380 = vmatprep.subr.mxu0 %v15920_v11  ;;  %9448 = vmatpush3.msra.mxu1 %v4607_v62  ;;  %v4522_v24 = vmul.f32 0.00390625, %v4487_v26  ;;  %v15943_v62 = vld [vmem:[#allocation124_spill] sm:$0xff]  ;;  %v15944_v40 = vld [vmem:[#allocation101_spill] sm:$0xff]  ;;  %v15946_v26 = vld [vmem:[#allocation119_spill] sm:$0xff] }
 0x69f   :  { %9381 = vmatpush3.msra.mxu0 %v4528_v33  ;;  %9449 = vmatprep.subr.mxu1 %v15920_v11  ;;  %v15945_v33 = vld [vmem:[#allocation102_spill] sm:$0xff] }
 0x6a0   :  { %9382 = vmatprep.subr.mxu0 %v15920_v11  ;;  %9450 = vmatpush3.msra.mxu1 %v4606_v10  ;;  %v4573_v20 = vpop.xlane.xlu0 %4572  ;;  %v15947_v10 = vld [vmem:[#allocation99_spill] sm:$0xff] }
 0x6a1   :  { %v4604_v47 = vmul.f32 0.00390625, %v4573_v20  ;;  %9383 = vmatpush3.msra.mxu0 %v4527_v9  ;;  %9451 = vmatprep.subr.mxu1 %v15920_v11  ;;  %v4484_v60 = vpop.xlane.xlu1 %4483 }
 0x6a2   :  { %9384 = vmatprep.subr.mxu0 %v15920_v11  ;;  %9452 = vmatpush3.msra.mxu1 %v4605_v63  ;;  %v4521_v32 = vmul.f32 0.00390625, %v4484_v60 }
 0x6a3   :  { %9385 = vmatpush3.msra.mxu0 %v4526_v42  ;;  %9453 = vmatprep.subr.mxu1 %v15920_v11 }
 0x6a4   :  { %9386 = vmatprep.subr.mxu0 %v15920_v11  ;;  %9454 = vmatpush3.msra.mxu1 %v4604_v47  ;;  %v4570_v52 = vpop.xlane.xlu0 %4569 }
 0x6a5   :  { %v4603_v39 = vmul.f32 0.00390625, %v4570_v52  ;;  %9387 = vmatpush3.msra.mxu0 %v4525_v7  ;;  %9455 = vmatprep.subr.mxu1 %v15920_v11  ;;  %v4481_v48 = vpop.xlane.xlu1 %4480 }
 0x6a6   :  { %9388 = vmatprep.subr.mxu0 %v15920_v11  ;;  %v4520_v8 = vmul.f32 0.00390625, %v4481_v48 }
 0x6a7   :  { %9389 = vmatpush3.msra.mxu0 %v4524_v50  ;;  %9456 = vmatpush3.msra.mxu1 %v4603_v39 }
 0x6a8   :  { %9390 = vmatprep.subr.mxu0 %v15920_v11  ;;  %v4567_v13 = vpop.xlane.xlu0 %4566  ;;  %9457 = vmatprep.subr.mxu1 %v15920_v11 }
 0x6a9   :  { %v4602_v30 = vmul.f32 0.00390625, %v4567_v13  ;;  %9391 = vmatpush3.msra.mxu0 %v4523_v15  ;;  %v4561_v38 = vpop.xlane.xlu1 %4560 }
 0x6aa   :  { %9392 = vmatprep.subr.mxu0 %v15920_v11  ;;  %v4600_v46 = vmul.f32 0.00390625, %v4561_v38 }
 0x6ab   :  { %9393 = vmatpush3.msra.mxu0 %v4522_v24  ;;  %9458 = vmatpush3.msra.mxu1 %v4602_v30 }
 0x6ac   :  { %9394 = vmatprep.subr.mxu0 %v15920_v11  ;;  %v4564_v16 = vpop.xlane.xlu0 %4563  ;;  %9459 = vmatprep.subr.mxu1 %v15920_v11 }
 0x6ad   :  { %v4601_v29 = vmul.f32 0.00390625, %v4564_v16  ;;  %9395 = vmatpush3.msra.mxu0 %v4521_v32 }
 0x6ae   :  { %9396 = vmatprep.subr.mxu0 %v15920_v11 }
 0x6af   :  { %9397 = vmatpush3.msra.mxu0 %v4520_v8  ;;  %9460 = vmatpush3.msra.mxu1 %v4601_v29 }
 0x6b0   :  { %9399 = vmatmul.mubr.msk.f32.vlgmr.msra.gmra.mxu0 %vm2685_vm2, %v15935_v35  ;;  %9461 = vmatprep.subr.mxu1 %v15920_v11 }
 0x6b1   :  { %9462 = vmatpush3.msra.mxu1 %v4600_v46  ;;  %9401 = vmatprep.mubr.msk.f32.mxu0 %vm10892_vm1, %v15920_v11 }
 0x6b2   :  { %9464 = vmatmul.mubr.msk.f32.vlgmr.msra.gmra.mxu1 %vm2685_vm2, %v15935_v35 }
 0x6b3   :  { %9466 = vmatprep.mubr.msk.f32.mxu1 %vm10892_vm1, %v15920_v11 }
 0x6b4   :  { %9402 = vmatmul.mubr.msk.f32.gmra.mxu0 %vm2685_vm2, %v15936_v58 }
 0x6b5   :  { %9404 = vmatprep.mubr.msk.f32.mxu0 %vm10892_vm1, %v15920_v11 }
 0x6b6   :  { %9467 = vmatmul.mubr.msk.f32.gmra.mxu1 %vm2685_vm2, %v15936_v58 }
 0x6b7   :  { %9469 = vmatprep.mubr.msk.f32.mxu1 %vm10892_vm1, %v15920_v11 }
 0x6b8   :  { %9405 = vmatmul.mubr.msk.f32.gmra.mxu0 %vm2685_vm2, %v15937_v22 }
 0x6b9   :  { %9407 = vmatprep.mubr.msk.f32.mxu0 %vm10892_vm1, %v15920_v11 }
 0x6ba   :  { %9470 = vmatmul.mubr.msk.f32.gmra.mxu1 %vm2685_vm2, %v15937_v22 }
 0x6bb   :  { %9472 = vmatprep.mubr.msk.f32.mxu1 %vm10892_vm1, %v15920_v11 }
 0x6bc   :  { %9408 = vmatmul.mubr.msk.f32.gmra.mxu0 %vm2685_vm2, %v15938_v61 }
 0x6bd   :  { %9410 = vmatprep.mubr.msk.f32.mxu0 %vm10892_vm1, %v15920_v11 }
 0x6be   :  { %9473 = vmatmul.mubr.msk.f32.gmra.mxu1 %vm2685_vm2, %v15938_v61 }
 0x6bf   :  { %9475 = vmatprep.mubr.msk.f32.mxu1 %vm10892_vm1, %v15920_v11 }
 0x6c0   :  { %9411 = vmatmul.mubr.msk.f32.gmra.mxu0 %vm2685_vm2, %v15939_v55 }
 0x6c1   :  { %9413 = vmatprep.mubr.msk.f32.mxu0 %vm10892_vm1, %v15920_v11 }
 0x6c2   :  { %9476 = vmatmul.mubr.msk.f32.gmra.mxu1 %vm2685_vm2, %v15939_v55 }
 0x6c3   :  { %9478 = vmatprep.mubr.msk.f32.mxu1 %vm10892_vm1, %v15920_v11 }
 0x6c4   :  { %9414 = vmatmul.mubr.msk.f32.gmra.mxu0 %vm2685_vm2, %v15940_v18 }
 0x6c5   :  { %9416 = vmatprep.mubr.msk.f32.mxu0 %vm10892_vm1, %v15920_v11 }
 0x6c6   :  { %9479 = vmatmul.mubr.msk.f32.gmra.mxu1 %vm2685_vm2, %v15940_v18 }
 0x6c7   :  { %9481 = vmatprep.mubr.msk.f32.mxu1 %vm10892_vm1, %v15920_v11 }
 0x6c8   :  { %9417 = vmatmul.mubr.msk.f32.gmra.mxu0 %vm2685_vm2, %v15941_v43 }
 0x6c9   :  { %9419 = vmatprep.mubr.msk.f32.mxu0 %vm10892_vm1, %v15920_v11 }
 0x6ca   :  { %9482 = vmatmul.mubr.msk.f32.gmra.mxu1 %vm2685_vm2, %v15941_v43 }
 0x6cb   :  { %9484 = vmatprep.mubr.msk.f32.mxu1 %vm10892_vm1, %v15920_v11 }
 0x6cc   :  { %9420 = vmatmul.mubr.msk.f32.gmra.mxu0 %vm2685_vm2, %v15942_v0 }
 0x6cd   :  { %9422 = vmatprep.mubr.msk.f32.mxu0 %vm10892_vm1, %v15920_v11 }
 0x6ce   :  { %9485 = vmatmul.mubr.msk.f32.gmra.mxu1 %vm2685_vm2, %v15942_v0 }
 0x6cf   :  { %9487 = vmatprep.mubr.msk.f32.mxu1 %vm10892_vm1, %v15920_v11 }
 0x6d0   :  { %9423 = vmatmul.mubr.msk.f32.gmra.mxu0 %vm2685_vm2, %v15943_v62 }
 0x6d1   :  { %9425 = vmatprep.mubr.msk.f32.mxu0 %vm10892_vm1, %v15920_v11 }
 0x6d2   :  { %9488 = vmatmul.mubr.msk.f32.gmra.mxu1 %vm2685_vm2, %v15943_v62 }
 0x6d3   :  { %9490 = vmatprep.mubr.msk.f32.mxu1 %vm10892_vm1, %v15920_v11 }
 0x6d4   :  { %9426 = vmatmul.mubr.msk.f32.gmra.mxu0 %vm2685_vm2, %v15944_v40 }
 0x6d5   :  { %9428 = vmatprep.mubr.msk.f32.mxu0 %vm10892_vm1, %v15920_v11 }
 0x6d6   :  { %9491 = vmatmul.mubr.msk.f32.gmra.mxu1 %vm2685_vm2, %v15944_v40 }
 0x6d7   :  { %9493 = vmatprep.mubr.msk.f32.mxu1 %vm10892_vm1, %v15920_v11 }
 0x6d8   :  { %9429 = vmatmul.mubr.msk.f32.gmra.mxu0 %vm2685_vm2, %v15945_v33 }
 0x6d9   :  { %9431 = vmatprep.mubr.msk.f32.mxu0 %vm10892_vm1, %v15920_v11 }
 0x6da   :  { %9494 = vmatmul.mubr.msk.f32.gmra.mxu1 %vm2685_vm2, %v15945_v33 }
 0x6db   :  { %9496 = vmatprep.mubr.msk.f32.mxu1 %vm10892_vm1, %v15920_v11 }
 0x6dc   :  { %9432 = vmatmul.mubr.msk.f32.gmra.mxu0 %vm2685_vm2, %v15946_v26 }
 0x6dd   :  { %9434 = vmatprep.mubr.msk.f32.mxu0 %vm10892_vm1, %v15920_v11 }
 0x6de   :  { %9497 = vmatmul.mubr.msk.f32.gmra.mxu1 %vm2685_vm2, %v15946_v26 }
 0x6df   :  { %9499 = vmatprep.mubr.msk.f32.mxu1 %vm10892_vm1, %v15920_v11 }
 0x6e0   :  { %9435 = vmatmul.mubr.msk.f32.gmra.mxu0 %vm2685_vm2, %v15947_v10 }
 0x6e2   :  { %9500 = vmatmul.mubr.msk.f32.gmra.mxu1 %vm2685_vm2, %v15947_v10 }
 0x770   :  { %v4682_v9 = vpop.f32.mrf.mxu0 }
 0x771   :  { %v13688_v63 = vmul.f32 0.5, %v4682_v9 }
 0x772   :  { %v9400_v20 = vpop.f32.mrf.mxu0  ;;  %v4828_v42 = vpop.f32.mrf.mxu1 }
 0x773   :  { %v4905_v47 = vmul.f32 %v13688_v63, %v13688_v63  ;;  %v4892_v60 = vmul.f32 0.5, %v4828_v42 }
 0x774   :  { %v4687_v7 = vpop.f32.mrf.mxu0  ;;  %v9465_v52 = vpop.f32.mrf.mxu1 }
 0x775   :  { %v4918_v50 = vsub.f32 %v4892_v60, %v4905_v47  ;;  %v13692_v39 = vmul.f32 0.5, %v4687_v7 }
 0x776   :  { %v9403_v48 = vpop.f32.mrf.mxu0  ;;  %v4833_v15 = vpop.f32.mrf.mxu1 }
 0x777   :  { %v4931_v13 = vmax.f32 %v4918_v50, 0.0  ;;  %v4906_v24 = vmul.f32 %v13692_v39, %v13692_v39  ;;  %v4893_v30 = vmul.f32 0.5, %v4833_v15 }
 0x778   :  { %v4692_v32 = vpop.f32.mrf.mxu0  ;;  %v9468_v38 = vpop.f32.mrf.mxu1 }
 0x779   :  { %v4957_v16 = vadd.f32 1e-05, %v4931_v13  ;;  %v4919_v8 = vsub.f32 %v4893_v30, %v4906_v24  ;;  %v13696_v29 = vmul.f32 0.5, %v4692_v32 }
 0x77a   :  { %v9406_v46 = vpop.f32.mrf.mxu0  ;;  %v4838_v9 = vpop.f32.mrf.mxu1 }
 0x77b   :  { %10460 = vrsqrt.f32 %v4957_v16  ;;  %v4932_v20 = vmax.f32 %v4919_v8, 0.0  ;;  %v4907_v42 = vmul.f32 %v13696_v29, %v13696_v29  ;;  %v4894_v47 = vmul.f32 0.5, %v4838_v9 }
 0x77c   :  { %v4697_v60 = vpop.f32.mrf.mxu0  ;;  %v9471_v7 = vpop.f32.mrf.mxu1 }
 0x77d   :  { %v4958_v52 = vadd.f32 1e-05, %v4932_v20  ;;  %v4920_v50 = vsub.f32 %v4894_v47, %v4907_v42  ;;  %v13700_v48 = vmul.f32 0.5, %v4697_v60 }
 0x77e   :  { %v9409_v15 = vpop.f32.mrf.mxu0  ;;  %v4843_v38 = vpop.f32.mrf.mxu1 }
 0x77f   :  { %10462 = vrsqrt.f32 %v4958_v52  ;;  %v4933_v13 = vmax.f32 %v4920_v50, 0.0  ;;  %v4908_v24 = vmul.f32 %v13700_v48, %v13700_v48  ;;  %v4895_v30 = vmul.f32 0.5, %v4843_v38 }
 0x780   :  { %v4702_v32 = vpop.f32.mrf.mxu0  ;;  %v9474_v16 = vpop.f32.mrf.mxu1 }
 0x781   :  { %v4959_v8 = vadd.f32 1e-05, %v4933_v13  ;;  %v4921_v46 = vsub.f32 %v4895_v30, %v4908_v24  ;;  %v13704_v37 = vmul.f32 0.5, %v4702_v32  ;;  %v4944_v13 = vld [vmem:[%s15948_s29] sm:$0xff] }
 0x782   :  { %v9412_v9 = vpop.f32.mrf.mxu0  ;;  %v4848_v7 = vpop.f32.mrf.mxu1 }
 0x783   :  { %10464 = vrsqrt.f32 %v4959_v8  ;;  %v4934_v20 = vmax.f32 %v4921_v46, 0.0  ;;  %v4909_v42 = vmul.f32 %v13704_v37, %v13704_v37  ;;  %v4896_v47 = vmul.f32 0.5, %v4848_v7 }
 0x784   :  { %v4707_v60 = vpop.f32.mrf.mxu0  ;;  %v9477_v52 = vpop.f32.mrf.mxu1 }
 0x785   :  { %v4960_v50 = vadd.f32 1e-05, %v4934_v20  ;;  %v4922_v15 = vsub.f32 %v4896_v47, %v4909_v42  ;;  %v13708_v2 = vmul.f32 0.5, %v4707_v60 }
 0x786   :  { %v9415_v38 = vpop.f32.mrf.mxu0  ;;  %v4853_v16 = vpop.f32.mrf.mxu1 }
 0x787   :  { %v4935_v24 = vmax.f32 %v4922_v15, 0.0  ;;  %v4910_v30 = vmul.f32 %v13708_v2, %v13708_v2  ;;  %v4897_v32 = vmul.f32 0.5, %v4853_v16  ;;  %10466 = vrsqrt.f32 %v4960_v50  ;;  %v4945_v38 = vld [vmem:[%s15948_s29 + $0x8] sm:$0xff]  ;;  %v4996_v50 = vld [vmem:[%s15949_s4] sm:$0xff] }
 0x788   :  { %v10461_v8 = vpop.eup %10460  ;;  %v4712_v46 = vpop.f32.mrf.mxu0 }
 0x789   :  { %v9480_v9 = vpop.f32.mrf.mxu1  ;;  %v4961_v7 = vadd.f32 1e-05, %v4935_v24  ;;  %v4923_v20 = vsub.f32 %v4897_v32, %v4910_v30  ;;  %v13715_v42 = vmul.f32 0.5, %v4712_v46  ;;  %v4983_v47 = vmul.f32 %v10461_v8, %v4944_v13 }
 0x78a   :  { %v9418_v60 = vpop.f32.mrf.mxu0 }
 0x78b   :  { %v4858_v52 = vpop.f32.mrf.mxu1  ;;  %10468 = vrsqrt.f32 %v4961_v7  ;;  %v4911_v15 = vmul.f32 %v13715_v42, %v13715_v42  ;;  %5037 = vperm.xlu0 %10458, %v4983_v47   ;;  %v4936_v30 = vmax.f32 %v4923_v20, 0.0  ;;  %v5009_v8 = vmul.f32 %v4983_v47, %v13688_v63 }
 0x78c   :  { %v4898_v16 = vmul.f32 0.5, %v4858_v52  ;;  %v10463_v24 = vpop.eup %10462  ;;  %v4717_v32 = vpop.f32.mrf.mxu0  ;;  %v4946_v52 = vld [vmem:[%s15948_s29 + $0x10] sm:$0xff] }
 0x78d   :  { %v9483_v13 = vpop.f32.mrf.mxu1  ;;  %v13726_v9 = vmul.f32 0.5, %v4717_v32  ;;  %v4984_v60 = vmul.f32 %v10463_v24, %v4945_v38  ;;  %v5022_v26 = vsub.f32 %v4996_v50, %v5009_v8  ;;  %v4962_v62 = vadd.f32 1e-05, %v4936_v30  ;;  %v4997_v8 = vld [vmem:[%s15949_s4 + $0x8] sm:$0xff] }
 0x78e   :  { %v4924_v46 = vsub.f32 %v4898_v16, %v4911_v15  ;;  %v9421_v7 = vpop.f32.mrf.mxu0 }
 0x78f   :  { %v4863_v10 = vpop.f32.mrf.mxu1  ;;  %5042 = vperm.xlu1 %10459, %v4984_v60   ;;  %v4912_v20 = vmul.f32 %v13726_v9, %v13726_v9  ;;  %5128 = vperm.xlu0 %10458, %v5022_v26   ;;  %v5010_v50 = vmul.f32 %v4984_v60, %v13692_v39 }
 0x790   :  { %v4937_v33 = vmax.f32 %v4924_v46, 0.0  ;;  %v10465_v40 = vpop.eup %10464  ;;  %v4899_v13 = vmul.f32 0.5, %v4863_v10  ;;  %v4722_v63 = vpop.f32.mrf.mxu0 }
 0x791   :  { %v9486_v47 = vpop.f32.mrf.mxu1  ;;  %v13733_v38 = vmul.f32 0.5, %v4722_v63  ;;  %v4985_v16 = vmul.f32 %v10465_v40, %v4946_v52  ;;  %v5023_v63 = vsub.f32 %v4997_v8, %v5010_v50 }
 0x792   :  { %v4963_v15 = vadd.f32 1e-05, %v4937_v33  ;;  %v9424_v24 = vpop.f32.mrf.mxu0  ;;  %v4998_v33 = vld [vmem:[%s15949_s4 + $0x10] sm:$0xff]  ;;  %v4925_v26 = vsub.f32 %v4899_v13, %v4912_v20  ;;  %v4947_v47 = vld [vmem:[%s15948_s29 + $0x18] sm:$0xff]  ;;  %v4948_v20 = vld [vmem:[%s15948_s29 + $0x20] sm:$0xff] }
 0x793   :  { %v4868_v32 = vpop.f32.mrf.mxu1  ;;  %v4913_v30 = vmul.f32 %v13733_v38, %v13733_v38  ;;  %5047 = vperm.xlu1 %10459, %v4985_v16   ;;  %v5011_v39 = vmul.f32 %v4985_v16, %v13696_v29 }
 0x794   :  { %10470 = vrsqrt.f32 %v4963_v15  ;;  %v4900_v10 = vmul.f32 0.5, %v4868_v32  ;;  %v4727_v40 = vpop.f32.mrf.mxu0  ;;  %v10467_v60 = vpop.eup %10466 }
 0x795   :  { %v9489_v46 = vpop.f32.mrf.mxu1  ;;  %10472 = vrsqrt.f32 %v4962_v62  ;;  %v13745_v52 = vmul.f32 0.5, %v4727_v40  ;;  %v5024_v32 = vsub.f32 %v4998_v33, %v5011_v39 }
 0x796   :  { %v4926_v7 = vsub.f32 %v4900_v10, %v4913_v30  ;;  %v9427_v15 = vpop.f32.mrf.mxu0  ;;  %v4938_v30 = vmax.f32 %v4925_v26, 0.0  ;;  %v4986_v10 = vmul.f32 %v10467_v60, %v4947_v47  ;;  %v5000_v26 = vld [vmem:[%s15949_s4 + $0x20] sm:$0xff] }
 0x797   :  { %v4873_v24 = vpop.f32.mrf.mxu1  ;;  %v4914_v29 = vmul.f32 %v13745_v52, %v13745_v52  ;;  %5133 = vperm.xlu1 %10459, %v5023_v63   ;;  %5138 = vperm.xlu0 %10458, %v5024_v32  }
 0x798   :  { %v4939_v13 = vmax.f32 %v4926_v7, 0.0  ;;  %v4901_v62 = vmul.f32 0.5, %v4873_v24  ;;  %v10469_v16 = vpop.eup %10468  ;;  %v4732_v50 = vpop.f32.mrf.mxu0  ;;  %v4964_v63 = vadd.f32 1e-05, %v4938_v30  ;;  %v4950_v30 = vld [vmem:[%s15948_s29 + $0x30] sm:$0xff] }
 0x799   :  { %v9492_v8 = vpop.f32.mrf.mxu1  ;;  %v13755_v15 = vmul.f32 0.5, %v4732_v50  ;;  %v4987_v33 = vmul.f32 %v10469_v16, %v4948_v20  ;;  %v5012_v20 = vmul.f32 %v4986_v10, %v13700_v48 }
 0x79a   :  { %v4965_v40 = vadd.f32 1e-05, %v4939_v13  ;;  %v4927_v46 = vsub.f32 %v4901_v62, %v4914_v29  ;;  %v9430_v39 = vpop.f32.mrf.mxu0 }
 0x79b   :  { %v4878_v0 = vpop.f32.mrf.mxu1  ;;  %v4915_v43 = vmul.f32 %v13755_v15, %v13755_v15  ;;  %5052 = vperm.xlu1 %10459, %v4986_v10   ;;  %v5013_v32 = vmul.f32 %v4987_v33, %v13704_v37 }
 0x79c   :  { %10474 = vrsqrt.f32 %v4965_v40  ;;  %v4940_v7 = vmax.f32 %v4927_v46, 0.0  ;;  %v4902_v24 = vmul.f32 0.5, %v4878_v0  ;;  %v4737_v60 = vpop.f32.mrf.mxu0  ;;  %v4999_v0 = vld [vmem:[%s15949_s4 + $0x18] sm:$0xff] }
 0x79d   :  { %v9495_v47 = vpop.f32.mrf.mxu1  ;;  %v13764_v62 = vmul.f32 0.5, %v4737_v60  ;;  %v5026_v50 = vsub.f32 %v5000_v26, %v5013_v32  ;;  %v5025_v10 = vsub.f32 %v4999_v0, %v5012_v20  ;;  %v4949_v32 = vld [vmem:[%s15948_s29 + $0x28] sm:$0xff]  ;;  %v5002_v0 = vld [vmem:[%s15949_s4 + $0x30] sm:$0xff] }
 0x79e   :  { %v4966_v13 = vadd.f32 1e-05, %v4940_v7  ;;  %v4928_v29 = vsub.f32 %v4902_v24, %v4915_v43  ;;  %v9433_v8 = vpop.f32.mrf.mxu0 }
 0x79f   :  { %v4883_v16 = vpop.f32.mrf.mxu1  ;;  %v4916_v37 = vmul.f32 %v13764_v62, %v13764_v62  ;;  %5057 = vperm.xlu1 %10459, %v4987_v33   ;;  %5148 = vperm.xlu0 %10458, %v5026_v50  }
 0x7a0   :  { %10476 = vrsqrt.f32 %v4966_v13  ;;  %v4941_v40 = vmax.f32 %v4928_v29, 0.0  ;;  %v4903_v48 = vmul.f32 0.5, %v4883_v16  ;;  %v4742_v46 = vpop.f32.mrf.mxu0 }
 0x7a1   :  { %v10471_v43 = vpop.eup %10470  ;;  %10478 = vrsqrt.f32 %v4964_v63  ;;  %v9498_v39 = vpop.f32.mrf.mxu1  ;;  %v13774_v26 = vmul.f32 0.5, %v4742_v46 }
 0x7a2   :  { %v4967_v7 = vadd.f32 1e-05, %v4941_v40  ;;  %v4929_v24 = vsub.f32 %v4903_v48, %v4916_v37  ;;  %v4989_v60 = vmul.f32 %v10471_v43, %v4950_v30  ;;  %v10473_v47 = vpop.eup %10472  ;;  %v9436_v29 = vpop.f32.mrf.mxu0  ;;  %v4952_v48 = vld [vmem:[%s15948_s29 + $0x40] sm:$0xff] }
 0x7a3   :  { %v4888_v13 = vpop.f32.mrf.mxu1  ;;  %5143 = vperm.xlu1 %10459, %v5025_v10   ;;  %v4917_v63 = vmul.f32 %v13774_v26, %v13774_v26  ;;  %v4988_v30 = vmul.f32 %v10473_v47, %v4949_v32 }
 0x7a4   :  { %10480 = vrsqrt.f32 %v4967_v7  ;;  %v4942_v33 = vmax.f32 %v4929_v24, 0.0  ;;  %v4904_v20 = vmul.f32 0.5, %v4888_v13  ;;  %v5015_v16 = vmul.f32 %v4989_v60, %v13715_v42  ;;  %v5001_v42 = vld [vmem:[%s15949_s4 + $0x28] sm:$0xff] }
 0x7a5   :  { %v9501_v50 = vpop.f32.mrf.mxu1  ;;  %v5014_v39 = vmul.f32 %v4988_v30, %v13708_v2  ;;  %v4953_v24 = vld [vmem:[%s15948_s29 + $0x48] sm:$0xff]  ;;  %v4951_v2 = vld [vmem:[%s15948_s29 + $0x38] sm:$0xff] }
 0x7a6   :  { %v4968_v8 = vadd.f32 1e-05, %v4942_v33  ;;  %v4930_v40 = vsub.f32 %v4904_v20, %v4917_v63  ;;  %v5028_v37 = vsub.f32 %v5002_v0, %v5015_v16  ;;  %v5004_v63 = vld [vmem:[%s15949_s4 + $0x40] sm:$0xff]  ;;  %v4954_v20 = vld [vmem:[%s15948_s29 + $0x50] sm:$0xff] }
 0x7a7   :  { %5062 = vperm.xlu1 %10459, %v4988_v30   ;;  %v5027_v13 = vsub.f32 %v5001_v42, %v5014_v39 }
 0x7a8   :  { %10482 = vrsqrt.f32 %v4968_v8  ;;  %v4943_v43 = vmax.f32 %v4930_v40, 0.0  ;;  %5158 = vperm.xlu0 %10458, %v5028_v37  }
 0x7a9   :  { %v10475_v10 = vpop.eup %10474 }
 0x7aa   :  { %v4969_v46 = vadd.f32 1e-05, %v4943_v43  ;;  %v4991_v7 = vmul.f32 %v10475_v10, %v4952_v48  ;;  %v5003_v48 = vld [vmem:[%s15949_s4 + $0x38] sm:$0xff]  ;;  %v5006_v43 = vld [vmem:[%s15949_s4 + $0x50] sm:$0xff]  ;;  %v4956_v10 = vld [vmem:[%s15948_s29 + $0x60] sm:$0xf] }
 0x7ab   :  { %5067 = vperm.xlu1 %10459, %v4989_v60  }
 0x7ac   :  { %10484 = vrsqrt.f32 %v4969_v46  ;;  %v5017_v33 = vmul.f32 %v4991_v7, %v13733_v38  ;;  %v4955_v38 = vld [vmem:[%s15948_s29 + $0x58] sm:$0xff] }
 0x7ad   :  { %v10477_v47 = vpop.eup %10476 }
 0x7ae   :  { %v10479_v32 = vpop.eup %10478  ;;  %v4992_v29 = vmul.f32 %v10477_v47, %v4953_v24  ;;  %v5030_v16 = vsub.f32 %v5004_v63, %v5017_v33 }
 0x7af   :  { %5153 = vperm.xlu1 %10459, %v5027_v13   ;;  %v4990_v0 = vmul.f32 %v10479_v32, %v4951_v2  ;;  %v5007_v2 = vld [vmem:[%s15949_s4 + $0x58] sm:$0xff] }
 0x7b0   :  { %5082 = vperm.xlu0 %10458, %v4992_v29   ;;  %v5018_v47 = vmul.f32 %v4992_v29, %v13745_v52 }
 0x7b1   :  { %v10481_v60 = vpop.eup %10480  ;;  %v5016_v40 = vmul.f32 %v4990_v0, %v13726_v9 }
 0x7b2   :  { %v4993_v50 = vmul.f32 %v10481_v60, %v4954_v20 }
 0x7b3   :  { %5072 = vperm.xlu1 %10459, %v4990_v0   ;;  %v5029_v39 = vsub.f32 %v5003_v48, %v5016_v40 }
 0x7b4   :  { %5168 = vperm.xlu0 %10458, %v5030_v16   ;;  %v5019_v37 = vmul.f32 %v4993_v50, %v13755_v15  ;;  %v5008_v15 = vld [vmem:[%s15949_s4 + $0x60] sm:$0xf] }
 0x7b5   :  { %v10483_v8 = vpop.eup %10482 }
 0x7b6   :  { %v4994_v30 = vmul.f32 %v10483_v8, %v4955_v38  ;;  %v5032_v42 = vsub.f32 %v5006_v43, %v5019_v37 }
 0x7b7   :  { %5077 = vperm.xlu1 %10459, %v4991_v7   ;;  %v5005_v7 = vld [vmem:[%s15949_s4 + $0x48] sm:$0xff] }
 0x7b8   :  { %5092 = vperm.xlu0 %10458, %v4994_v30   ;;  %v5031_v13 = vsub.f32 %v5005_v7, %v5018_v47  ;;  %v5020_v33 = vmul.f32 %v4994_v30, %v13764_v62 }
 0x7b9   :  { %v10485_v46 = vpop.eup %10484 }
 0x7ba   :  { %v4995_v9 = vmul.f32 %v10485_v46, %v4956_v10  ;;  %v5033_v63 = vsub.f32 %v5007_v2, %v5020_v33 }
 0x7bb   :  { %5163 = vperm.xlu1 %10459, %v5029_v39  }
 0x7bc   :  { %5178 = vperm.xlu0 %10458, %v5032_v42   ;;  %v5021_v24 = vmul.f32 %v4995_v9, %v13774_v26 }
 0x7be   :  { %v5034_v32 = vsub.f32 %v5008_v15, %v5021_v24 }
 0x7bf   :  { %5087 = vperm.xlu1 %10459, %v4993_v50  }
 0x7c0   :  { %5188 = vperm.xlu0 %10458, %v5034_v32  }
 0x7c3   :  { %5173 = vperm.xlu1 %10459, %v5031_v13  }
 0x7c7   :  { %5097 = vperm.xlu1 %10459, %v4995_v9  }
 0x7cb   :  { %5183 = vperm.xlu1 %10459, %v5033_v63  }
 0x806   :  { %v5038_v26 = vpop.permute.xlu0 %5037 }
 0x807   :  { %v5100_v52 = vmul.f32 %v5038_v26, %v13358_v23  ;;  %v5101_v29 = vmul.f32 %v5038_v26, %v13361_v3 }
 0x80a   :  { %v5043_v20 = vpop.permute.xlu1 %5042  ;;  %v5129_v60 = vpop.permute.xlu0 %5128 }
 0x80b   :  { %v13833_v0 = vadd.f32 %v5129_v60, %v5100_v52  ;;  %v13835_v16 = vadd.f32 %v5129_v60, %v5101_v29  ;;  %v5102_v23 = vmul.f32 %v5043_v20, %v13368_v17  ;;  %v5103_v3 = vmul.f32 %v5043_v20, %v13533_v53 }
 0x80d   :  { %v5217_v62 = vmul.f32 %v13833_v0, %v13833_v0  ;;  %v5218_v50 = vmul.f32 %v13835_v16, %v13835_v16 }
 0x80e   :  { %v5048_v38 = vpop.permute.xlu1 %5047 }
 0x80f   :  { %v5243_v8 = vmul.f32 %v5217_v62, %v13833_v0  ;;  %v5244_v30 = vmul.f32 %v5218_v50, %v13835_v16  ;;  %v5104_v48 = vmul.f32 %v5048_v38, %v13528_v31  ;;  %v5105_v43 = vmul.f32 %v5048_v38, %v13521_v34 }
 0x811   :  { %v5269_v40 = vmul.f32 0.044715, %v5243_v8  ;;  %v5270_v37 = vmul.f32 0.044715, %v5244_v30 }
 0x812   :  { %v5134_v10 = vpop.permute.xlu1 %5133  ;;  %v5139_v42 = vpop.permute.xlu0 %5138 }
 0x813   :  { %v13847_v46 = vadd.f32 %v5134_v10, %v5102_v23  ;;  %v13849_v39 = vadd.f32 %v5134_v10, %v5103_v3  ;;  %v5295_v9 = vadd.f32 %v5269_v40, %v13833_v0  ;;  %v5296_v15 = vadd.f32 %v5270_v37, %v13835_v16 }
 0x814   :  { %v13853_v24 = vadd.f32 %v5139_v42, %v5104_v48  ;;  %v13855_v17 = vadd.f32 %v5139_v42, %v5105_v43 }
 0x815   :  { %v5219_v53 = vmul.f32 %v13847_v46, %v13847_v46  ;;  %v5220_v34 = vmul.f32 %v13849_v39, %v13849_v39  ;;  %v5321_v31 = vmul.f32 0.7978846, %v5295_v9  ;;  %v5322_v47 = vmul.f32 0.7978846, %v5296_v15 }
 0x816   :  { %v5221_v32 = vmul.f32 %v13853_v24, %v13853_v24  ;;  %v5222_v7 = vmul.f32 %v13855_v17, %v13855_v17  ;;  %v5053_v13 = vpop.permute.xlu1 %5052 }
 0x817   :  { %v5245_v33 = vmul.f32 %v5219_v53, %v13847_v46  ;;  %v5246_v2 = vmul.f32 %v5220_v34, %v13849_v39  ;;  %10486 = vtanh.f32 %v5321_v31  ;;  %v5106_v40 = vmul.f32 %v5053_v13, %v13514_v12 }
 0x818   :  { %v5247_v63 = vmul.f32 %v5221_v32, %v13853_v24  ;;  %v5248_v26 = vmul.f32 %v5222_v7, %v13855_v17  ;;  %10488 = vtanh.f32 %v5322_v47  ;;  %v5107_v53 = vmul.f32 %v5053_v13, %v13505_v54 }
 0x819   :  { %v5271_v52 = vmul.f32 0.044715, %v5245_v33  ;;  %v5272_v29 = vmul.f32 0.044715, %v5246_v2 }
 0x81a   :  { %v5273_v20 = vmul.f32 0.044715, %v5247_v63  ;;  %v5274_v60 = vmul.f32 0.044715, %v5248_v26  ;;  %v5058_v62 = vpop.permute.xlu1 %5057  ;;  %v5149_v37 = vpop.permute.xlu0 %5148 }
 0x81b   :  { %v5297_v50 = vadd.f32 %v5271_v52, %v13847_v46  ;;  %v5298_v38 = vadd.f32 %v5272_v29, %v13849_v39  ;;  %v5108_v8 = vmul.f32 %v5058_v62, %v13498_v14  ;;  %v5109_v30 = vmul.f32 %v5058_v62, %v13489_v1 }
 0x81c   :  { %v5299_v23 = vadd.f32 %v5273_v20, %v13853_v24  ;;  %v5300_v3 = vadd.f32 %v5274_v60, %v13855_v17 }
 0x81d   :  { %v5323_v48 = vmul.f32 0.7978846, %v5297_v50  ;;  %v5324_v43 = vmul.f32 0.7978846, %v5298_v38  ;;  %v13876_v10 = vadd.f32 %v5149_v37, %v5108_v8  ;;  %v13878_v42 = vadd.f32 %v5149_v37, %v5109_v30 }
 0x81e   :  { %v5325_v9 = vmul.f32 0.7978846, %v5299_v23  ;;  %v5326_v15 = vmul.f32 0.7978846, %v5300_v3  ;;  %v5144_v14 = vpop.permute.xlu1 %5143 }
 0x81f   :  { %10490 = vtanh.f32 %v5323_v48  ;;  %v5225_v1 = vmul.f32 %v13876_v10, %v13876_v10  ;;  %v5226_v34 = vmul.f32 %v13878_v42, %v13878_v42  ;;  %v13885_v12 = vadd.f32 %v5144_v14, %v5106_v40 }
 0x820   :  { %10492 = vtanh.f32 %v5324_v43  ;;  %v13887_v31 = vadd.f32 %v5144_v14, %v5107_v53 }
 0x821   :  { %10494 = vtanh.f32 %v5325_v9  ;;  %v5251_v47 = vmul.f32 %v5225_v1, %v13876_v10  ;;  %v5252_v32 = vmul.f32 %v5226_v34, %v13878_v42  ;;  %v5223_v54 = vmul.f32 %v13885_v12, %v13885_v12 }
 0x822   :  { %10496 = vtanh.f32 %v5326_v15  ;;  %v5224_v7 = vmul.f32 %v13887_v31, %v13887_v31  ;;  %v5063_v13 = vpop.permute.xlu1 %5062 }
 0x823   :  { %v5277_v33 = vmul.f32 0.044715, %v5251_v47  ;;  %v5278_v2 = vmul.f32 0.044715, %v5252_v32  ;;  %v5249_v63 = vmul.f32 %v5223_v54, %v13885_v12  ;;  %v5110_v8 = vmul.f32 %v5063_v13, %v13396_v56  ;;  %v5159_v23 = vpop.permute.xlu0 %5158 }
 0x824   :  { %v5250_v26 = vmul.f32 %v5224_v7, %v13887_v31  ;;  %v10487_v52 = vpop.eup %10486  ;;  %v5111_v34 = vmul.f32 %v5063_v13, %v13398_v51 }
 0x825   :  { %v5303_v29 = vadd.f32 %v5277_v33, %v13876_v10  ;;  %v5304_v20 = vadd.f32 %v5278_v2, %v13878_v42  ;;  %v5275_v60 = vmul.f32 0.044715, %v5249_v63  ;;  %v10489_v62 = vpop.eup %10488  ;;  %v5373_v50 = vadd.f32 1.0, %v10487_v52 }
 0x826   :  { %v5276_v38 = vmul.f32 0.044715, %v5250_v26  ;;  %v5068_v30 = vpop.permute.xlu1 %5067  ;;  %v5374_v3 = vadd.f32 1.0, %v10489_v62 }
 0x827   :  { %v5329_v40 = vmul.f32 0.7978846, %v5303_v29  ;;  %v5330_v37 = vmul.f32 0.7978846, %v5304_v20  ;;  %v5301_v48 = vadd.f32 %v5275_v60, %v13885_v12  ;;  %v5399_v43 = vmul.f32 0.5, %v5373_v50 }
 0x828   :  { %v5302_v9 = vadd.f32 %v5276_v38, %v13887_v31  ;;  %v5112_v15 = vmul.f32 %v5068_v30, %v13404_v57  ;;  %v5113_v53 = vmul.f32 %v5068_v30, %v13406_v28  ;;  %v5400_v14 = vmul.f32 0.5, %v5374_v3 }
 0x829   :  { %10498 = vtanh.f32 %v5329_v40  ;;  %v5327_v1 = vmul.f32 0.7978846, %v5301_v48  ;;  %v13906_v56 = vmul.f32 %v5399_v43, %v13833_v0 }
 0x82a   :  { %10500 = vtanh.f32 %v5330_v37  ;;  %v5328_v47 = vmul.f32 0.7978846, %v5302_v9  ;;  %v13908_v32 = vadd.f32 %v5159_v23, %v5112_v15  ;;  %v5154_v54 = vpop.permute.xlu1 %5153  ;;  %v13911_v33 = vmul.f32 %v5400_v14, %v13835_v16 }
 0x82b   :  { %v5083_v7 = vpop.permute.xlu0 %5082  ;;  %10502 = vtanh.f32 %v5327_v1  ;;  %v13913_v57 = vadd.f32 %v5159_v23, %v5113_v53  ;;  %v13915_v28 = vadd.f32 %v5154_v54, %v5110_v8  ;;  %v13919_v0 = vadd.f32 %v5154_v54, %v5111_v34 }
 0x82c   :  { %v10491_v2 = vpop.eup %10490  ;;  %10504 = vtanh.f32 %v5328_v47  ;;  %v5229_v51 = vmul.f32 %v13908_v32, %v13908_v32  ;;  %v13926_v52 = vmul.f32 %v5083_v7, %v13431_v4  ;;  %v13932_v50 = vmul.f32 %v5083_v7, %v13438_v44 }
 0x82d   :  { %v10493_v13 = vpop.eup %10492  ;;  %v5375_v63 = vadd.f32 1.0, %v10491_v2  ;;  %v5230_v26 = vmul.f32 %v13913_v57, %v13913_v57  ;;  %v5227_v16 = vmul.f32 %v13915_v28, %v13915_v28  ;;  %v5228_v62 = vmul.f32 %v13919_v0, %v13919_v0 }
 0x82e   :  { %v10495_v29 = vpop.eup %10494  ;;  %v5376_v20 = vadd.f32 1.0, %v10493_v13  ;;  %v5255_v60 = vmul.f32 %v5229_v51, %v13908_v32  ;;  %v5073_v38 = vpop.permute.xlu1 %5072 }
 0x82f   :  { %v5169_v8 = vpop.permute.xlu0 %5168  ;;  %v10497_v30 = vpop.eup %10496  ;;  %v5401_v23 = vmul.f32 0.5, %v5375_v63  ;;  %v5377_v3 = vadd.f32 1.0, %v10495_v29  ;;  %v5256_v40 = vmul.f32 %v5230_v26, %v13913_v57  ;;  %v5253_v4 = vmul.f32 %v5227_v16, %v13915_v28 }
 0x830   :  { %v5402_v37 = vmul.f32 0.5, %v5376_v20  ;;  %v5378_v48 = vadd.f32 1.0, %v10497_v30  ;;  %v5281_v43 = vmul.f32 0.044715, %v5255_v60  ;;  %v5254_v9 = vmul.f32 %v5228_v62, %v13919_v0 }
 0x831   :  { %v13938_v15 = vmul.f32 %v5401_v23, %v13847_v46  ;;  %v5403_v53 = vmul.f32 0.5, %v5377_v3  ;;  %v5282_v44 = vmul.f32 0.044715, %v5256_v40  ;;  %v5279_v14 = vmul.f32 0.044715, %v5253_v4 }
 0x832   :  { %v13941_v1 = vmul.f32 %v5402_v37, %v13849_v39  ;;  %v5404_v34 = vmul.f32 0.5, %v5378_v48  ;;  %v5307_v47 = vadd.f32 %v5281_v43, %v13908_v32  ;;  %v5280_v54 = vmul.f32 0.044715, %v5254_v9  ;;  %v5078_v7 = vpop.permute.xlu1 %5077 }
 0x833   :  { %v13945_v2 = vmul.f32 %v5403_v53, %v13853_v24  ;;  %v5308_v51 = vadd.f32 %v5282_v44, %v13913_v57  ;;  %v5305_v13 = vadd.f32 %v5279_v14, %v13915_v28  ;;  %v5114_v46 = vmul.f32 %v5073_v38, %v13409_v25  ;;  %v5093_v63 = vpop.permute.xlu0 %5092 }
 0x834   :  { %v13951_v26 = vmul.f32 %v5404_v34, %v13855_v17  ;;  %v5333_v39 = vmul.f32 0.7978846, %v5307_v47  ;;  %v5306_v16 = vadd.f32 %v5280_v54, %v13919_v0  ;;  %v5115_v29 = vmul.f32 %v5073_v38, %v13414_v59 }
 0x835   :  { %v5334_v20 = vmul.f32 0.7978846, %v5308_v51  ;;  %v5331_v60 = vmul.f32 0.7978846, %v5305_v13  ;;  %v5116_v24 = vmul.f32 %v5078_v7, %v13419_v45  ;;  %v5117_v62 = vmul.f32 %v5078_v7, %v13426_v49 }
 0x836   :  { %v10499_v30 = vpop.eup %10498  ;;  %10506 = vtanh.f32 %v5333_v39  ;;  %v5332_v23 = vmul.f32 0.7978846, %v5306_v16  ;;  %v13958_v25 = vmul.f32 %v5093_v63, %v13463_v41  ;;  %v13961_v17 = vmul.f32 %v5093_v63, %v13460_v21  ;;  %v5164_v3 = vpop.permute.xlu1 %5163 }
 0x837   :  { %v10501_v40 = vpop.eup %10500  ;;  %v5381_v4 = vadd.f32 1.0, %v10499_v30  ;;  %10508 = vtanh.f32 %v5334_v20  ;;  %v13963_v59 = vadd.f32 %v5169_v8, %v5116_v24  ;;  %v13965_v38 = vadd.f32 %v5169_v8, %v5117_v62  ;;  %v5179_v30 = vpop.permute.xlu0 %5178 }
 0x838   :  { %v10503_v45 = vpop.eup %10502  ;;  %v5382_v37 = vadd.f32 1.0, %v10501_v40  ;;  %10510 = vtanh.f32 %v5331_v60  ;;  %v13967_v49 = vadd.f32 %v5164_v3, %v5114_v46  ;;  %v13969_v48 = vadd.f32 %v5164_v3, %v5115_v29 }
 0x839   :  { %v10505_v41 = vpop.eup %10504  ;;  %v5407_v43 = vmul.f32 0.5, %v5381_v4  ;;  %v5379_v9 = vadd.f32 1.0, %v10503_v45  ;;  %10512 = vtanh.f32 %v5332_v23  ;;  %v5233_v21 = vmul.f32 %v13963_v59, %v13963_v59 }
 0x83a   :  { %v5408_v53 = vmul.f32 0.5, %v5382_v37  ;;  %v5380_v44 = vadd.f32 1.0, %v10505_v41  ;;  %v5234_v8 = vmul.f32 %v13965_v38, %v13965_v38  ;;  %v5231_v14 = vmul.f32 %v13967_v49, %v13967_v49  ;;  %v5088_v34 = vpop.permute.xlu1 %5087 }
 0x83b   :  { %v13978_v47 = vmul.f32 %v5407_v43, %v13876_v10  ;;  %v5405_v54 = vmul.f32 0.5, %v5379_v9  ;;  %v5259_v7 = vmul.f32 %v5233_v21, %v13963_v59  ;;  %v5232_v51 = vmul.f32 %v13969_v48, %v13969_v48 }
 0x83c   :  { %v13984_v13 = vmul.f32 %v5408_v53, %v13878_v42  ;;  %v5406_v46 = vmul.f32 0.5, %v5380_v44  ;;  %v5260_v63 = vmul.f32 %v5234_v8, %v13965_v38  ;;  %v5257_v39 = vmul.f32 %v5231_v14, %v13967_v49 }
 0x83d   :  { %v13989_v16 = vmul.f32 %v5405_v54, %v13885_v12  ;;  %v5285_v29 = vmul.f32 0.044715, %v5259_v7  ;;  %v5258_v10 = vmul.f32 %v5232_v51, %v13969_v48  ;;  %v5120_v20 = vmul.f32 %v5088_v34, %v13443_v36 }
 0x83e   :  { %v13994_v60 = vmul.f32 %v5406_v46, %v13887_v31  ;;  %v5286_v24 = vmul.f32 0.044715, %v5260_v63  ;;  %v5283_v62 = vmul.f32 0.044715, %v5257_v39  ;;  %v5121_v42 = vmul.f32 %v5088_v34, %v13450_v27  ;;  %v5174_v23 = vpop.permute.xlu1 %5173 }
 0x83f   :  { %v5311_v3 = vadd.f32 %v5285_v29, %v13963_v59  ;;  %v5284_v40 = vmul.f32 0.044715, %v5258_v10  ;;  %v13998_v4 = vadd.f32 %v5179_v30, %v5120_v20  ;;  %v14001_v12 = vadd.f32 %v5174_v23, %v13926_v52 }
 0x840   :  { %v5312_v45 = vadd.f32 %v5286_v24, %v13965_v38  ;;  %v5309_v36 = vadd.f32 %v5283_v62, %v13967_v49  ;;  %v14005_v31 = vadd.f32 %v5179_v30, %v5121_v42  ;;  %v14008_v37 = vadd.f32 %v5174_v23, %v13932_v50 }
 0x841   :  { %v5337_v27 = vmul.f32 0.7978846, %v5311_v3  ;;  %v5310_v41 = vadd.f32 %v5284_v40, %v13969_v48  ;;  %v5237_v43 = vmul.f32 %v13998_v4, %v13998_v4  ;;  %v5235_v9 = vmul.f32 %v14001_v12, %v14001_v12 }
 0x842   :  { %v5338_v52 = vmul.f32 0.7978846, %v5312_v45  ;;  %v5335_v21 = vmul.f32 0.7978846, %v5309_v36  ;;  %v5238_v53 = vmul.f32 %v14005_v31, %v14005_v31  ;;  %v5236_v44 = vmul.f32 %v14008_v37, %v14008_v37  ;;  %v5098_v54 = vpop.permute.xlu1 %5097 }
 0x843   :  { %v10507_v8 = vpop.eup %10506  ;;  %10514 = vtanh.f32 %v5337_v27  ;;  %v5336_v50 = vmul.f32 0.7978846, %v5310_v41  ;;  %v5263_v14 = vmul.f32 %v5237_v43, %v13998_v4  ;;  %v5261_v34 = vmul.f32 %v5235_v9, %v14001_v12 }
 0x844   :  { %v10509_v7 = vpop.eup %10508  ;;  %v5385_v51 = vadd.f32 1.0, %v10507_v8  ;;  %10516 = vtanh.f32 %v5338_v52  ;;  %v5264_v46 = vmul.f32 %v5238_v53, %v14005_v31  ;;  %v5262_v63 = vmul.f32 %v5236_v44, %v14008_v37 }
 0x845   :  { %v10511_v39 = vpop.eup %10510  ;;  %v5386_v29 = vadd.f32 1.0, %v10509_v7  ;;  %10518 = vtanh.f32 %v5335_v21  ;;  %v5289_v10 = vmul.f32 0.044715, %v5263_v14  ;;  %v5287_v20 = vmul.f32 0.044715, %v5261_v34 }
 0x846   :  { %v10513_v24 = vpop.eup %10512  ;;  %v5411_v62 = vmul.f32 0.5, %v5385_v51  ;;  %v5383_v42 = vadd.f32 1.0, %v10511_v39  ;;  %10520 = vtanh.f32 %v5336_v50  ;;  %v5290_v30 = vmul.f32 0.044715, %v5264_v46  ;;  %v5184_v44 = vpop.permute.xlu1 %5183 }
 0x847   :  { %v5412_v23 = vmul.f32 0.5, %v5386_v29  ;;  %v5384_v3 = vadd.f32 1.0, %v10513_v24  ;;  %v5315_v40 = vadd.f32 %v5289_v10, %v13998_v4  ;;  %v5288_v45 = vmul.f32 0.044715, %v5262_v63  ;;  %v5189_v51 = vpop.permute.xlu0 %5188 }
 0x848   :  { %v14025_v36 = vmul.f32 %v5411_v62, %v13908_v32  ;;  %v5409_v27 = vmul.f32 0.5, %v5383_v42  ;;  %v5316_v41 = vadd.f32 %v5290_v30, %v14005_v31  ;;  %v5313_v43 = vadd.f32 %v5287_v20, %v14001_v12 }
 0x849   :  { %v14030_v9 = vmul.f32 %v5412_v23, %v13913_v57  ;;  %v5410_v52 = vmul.f32 0.5, %v5384_v3  ;;  %v5341_v21 = vmul.f32 0.7978846, %v5315_v40  ;;  %v5314_v53 = vadd.f32 %v5288_v45, %v14008_v37 }
 0x84a   :  { %v14034_v8 = vmul.f32 %v5409_v27, %v13915_v28  ;;  %v5342_v50 = vmul.f32 0.7978846, %v5316_v41  ;;  %v5339_v14 = vmul.f32 0.7978846, %v5313_v43  ;;  %v5124_v32 = vmul.f32 %v5098_v54, %v13465_v19 }
 0x84b   :  { %v14038_v34 = vmul.f32 %v5410_v52, %v13919_v0  ;;  %10522 = vtanh.f32 %v5341_v21  ;;  %v5340_v7 = vmul.f32 0.7978846, %v5314_v53  ;;  %v5125_v57 = vmul.f32 %v5098_v54, %v13468_v5 }
 0x84c   :  { %10524 = vtanh.f32 %v5342_v50  ;;  %v14041_v46 = vadd.f32 %v5189_v51, %v5124_v32  ;;  %v14044_v63 = vadd.f32 %v5184_v44, %v13958_v25  ;;  %v14047_v28 = vadd.f32 %v5184_v44, %v13961_v17 }
 0x84d   :  { %10526 = vtanh.f32 %v5339_v14  ;;  %v14049_v39 = vadd.f32 %v5189_v51, %v5125_v57 }
 0x84e   :  { %10528 = vtanh.f32 %v5340_v7  ;;  %v5241_v19 = vmul.f32 %v14041_v46, %v14041_v46  ;;  %v5239_v0 = vmul.f32 %v14044_v63, %v14044_v63  ;;  %v5240_v5 = vmul.f32 %v14047_v28, %v14047_v28 }
 0x84f   :  { %v5242_v25 = vmul.f32 %v14049_v39, %v14049_v39 }
 0x850   :  { %v10515_v54 = vpop.eup %10514  ;;  %v5267_v17 = vmul.f32 %v5241_v19, %v14041_v46  ;;  %v5265_v29 = vmul.f32 %v5239_v0, %v14044_v63  ;;  %v5266_v10 = vmul.f32 %v5240_v5, %v14047_v28 }
 0x851   :  { %v10517_v20 = vpop.eup %10516  ;;  %v5389_v24 = vadd.f32 1.0, %v10515_v54  ;;  %v5268_v62 = vmul.f32 %v5242_v25, %v14049_v39 }
 0x852   :  { %v10519_v42 = vpop.eup %10518  ;;  %v5390_v30 = vadd.f32 1.0, %v10517_v20  ;;  %v5293_v23 = vmul.f32 0.044715, %v5267_v17  ;;  %v5291_v3 = vmul.f32 0.044715, %v5265_v29 }
 0x853   :  { %v10521_v40 = vpop.eup %10520  ;;  %v5415_v45 = vmul.f32 0.5, %v5389_v24  ;;  %v5387_v27 = vadd.f32 1.0, %v10519_v42  ;;  %v5294_v41 = vmul.f32 0.044715, %v5268_v62  ;;  %v5292_v43 = vmul.f32 0.044715, %v5266_v10 }
 0x854   :  { %v5416_v52 = vmul.f32 0.5, %v5390_v30  ;;  %v5388_v21 = vadd.f32 1.0, %v10521_v40  ;;  %v5319_v53 = vadd.f32 %v5293_v23, %v14041_v46  ;;  %v5317_v44 = vadd.f32 %v5291_v3, %v14044_v63 }
 0x855   :  { %v14066_v50 = vmul.f32 %v5415_v45, %v13963_v59  ;;  %v5413_v14 = vmul.f32 0.5, %v5387_v27  ;;  %v5320_v32 = vadd.f32 %v5294_v41, %v14049_v39  ;;  %v5318_v7 = vadd.f32 %v5292_v43, %v14047_v28 }
 0x856   :  { %v14071_v51 = vmul.f32 %v5416_v52, %v13965_v38  ;;  %v5414_v57 = vmul.f32 0.5, %v5388_v21  ;;  %v5345_v19 = vmul.f32 0.7978846, %v5319_v53  ;;  %v5343_v0 = vmul.f32 0.7978846, %v5317_v44 }
 0x857   :  { %v14074_v5 = vmul.f32 %v5413_v14, %v13967_v49  ;;  %v5346_v25 = vmul.f32 0.7978846, %v5320_v32  ;;  %v5344_v54 = vmul.f32 0.7978846, %v5318_v7 }
 0x858   :  { %v10523_v17 = vpop.eup %10522  ;;  %v14077_v59 = vmul.f32 %v5414_v57, %v13969_v48  ;;  %10530 = vtanh.f32 %v5345_v19 }
 0x859   :  { %v10525_v29 = vpop.eup %10524  ;;  %v5393_v10 = vadd.f32 1.0, %v10523_v17  ;;  %10532 = vtanh.f32 %v5346_v25 }
 0x85a   :  { %v10527_v20 = vpop.eup %10526  ;;  %v5394_v24 = vadd.f32 1.0, %v10525_v29  ;;  %10534 = vtanh.f32 %v5343_v0 }
 0x85b   :  { %v10529_v38 = vpop.eup %10528  ;;  %v5419_v62 = vmul.f32 0.5, %v5393_v10  ;;  %v5391_v42 = vadd.f32 1.0, %v10527_v20  ;;  %10536 = vtanh.f32 %v5344_v54 }
 0x85c   :  { %v5420_v30 = vmul.f32 0.5, %v5394_v24  ;;  %v5392_v49 = vadd.f32 1.0, %v10529_v38 }
 0x85d   :  { %v14080_v23 = vmul.f32 %v5419_v62, %v13998_v4  ;;  %v5417_v3 = vmul.f32 0.5, %v5391_v42 }
 0x85e   :  { %v14083_v48 = vmul.f32 %v5420_v30, %v14005_v31  ;;  %v5418_v40 = vmul.f32 0.5, %v5392_v49 }
 0x85f   :  { %v14086_v45 = vmul.f32 %v5417_v3, %v14001_v12 }
 0x860   :  { %v14089_v27 = vmul.f32 %v5418_v40, %v14008_v37 }
 0x865   :  { %v10531_v41 = vpop.eup %10530 }
 0x866   :  { %v10533_v43 = vpop.eup %10532  ;;  %v5397_v52 = vadd.f32 1.0, %v10531_v41 }
 0x867   :  { %v10535_v21 = vpop.eup %10534  ;;  %v5398_v53 = vadd.f32 1.0, %v10533_v43 }
 0x868   :  { %v10537_v44 = vpop.eup %10536  ;;  %v5423_v14 = vmul.f32 0.5, %v5397_v52  ;;  %v5395_v4 = vadd.f32 1.0, %v10535_v21 }
 0x869   :  { %v5424_v32 = vmul.f32 0.5, %v5398_v53  ;;  %v5396_v7 = vadd.f32 1.0, %v10537_v44 }
 0x86a   :  { %v14092_v31 = vmul.f32 %v5423_v14, %v14041_v46  ;;  %v5421_v57 = vmul.f32 0.5, %v5395_v4 }
 0x86b   :  { %v14095_v12 = vmul.f32 %v5424_v32, %v14049_v39  ;;  %v5422_v19 = vmul.f32 0.5, %v5396_v7 }
 0x86c   :  { %v14098_v37 = vmul.f32 %v5421_v57, %v14044_v63 }
 0x86d   :  { %v5448_v0 = vmul.f32 %v5422_v19, %v14047_v28 }
 0x86e   :  { %10874 = dma.done.wait [#allocation7 + $0x1], 2048 }
 0x86f   :  { %10875 = vsyncadd [#allocation7 + $0x1], 4294965248  ;;  %v5488_v25 = vpack.c.bf16 %v13941_v1, %v13911_v33  ;;  %9502 = vmatprep.subr.mxu1 %v15920_v11  ;;  %9528 = vmatprep.mubr.msk.f32.mxu1 %vm10892_vm1, %v15920_v11  ;;  %v10540_v46 = vld [vmem:[#allocation3 + $0x78] sm:$0xff]   ;;  %v10542_v39 = vld [vmem:[#allocation3 + $0x70] sm:$0xff]   ;;  %v5487_v49 = vpack.c.bf16 %v13938_v15, %v13906_v56  ;;  %v5490_v3 = vpack.c.bf16 %v13994_v60, %v13951_v26  ;;  %s15950_s8 = sld [smem:[#allocation142_spill]] }
 0x870   :  { %10538 = vset.pattern.permute.xlu0 %v15859_v6  ;;  %10539 = vset.pattern.permute.xlu1 %v15859_v6  ;;  %v10541_v63 = vld [vmem:[#allocation3 + $0x38] sm:$0xff]   ;;  %v10543_v28 = vld [vmem:[#allocation3 + $0x30] sm:$0xff]   ;;  %v10544_v54 = vld [vmem:[#allocation3 + $0x68] sm:$0xff]   ;;  %v5489_v40 = vpack.c.bf16 %v13989_v16, %v13945_v2  ;;  %v5492_v41 = vpack.c.bf16 %v14038_v34, %v13984_v13  ;;  %v5491_v43 = vpack.c.bf16 %v14034_v8, %v13978_v47 }
 0x871   :  { %5636 = vmatprep.mubr.bf16.mxu0 %v5488_v25  ;;  %9009 = vmatprep.subr.bf16.mxu0 %v10540_v46  ;;  %v10545_v33 = vld [vmem:[#allocation3 + $0x28] sm:$0xff]   ;;  %v10546_v1 = vld [vmem:[#allocation3 + $0x60] sm:$0xff]   ;;  %v10548_v29 = vld [vmem:[#allocation3 + $0x58] sm:$0xff]   ;;  %v5494_v56 = vpack.c.bf16 %v14077_v59, %v14030_v9  ;;  %v5493_v15 = vpack.c.bf16 %v14074_v5, %v14025_v36  ;;  %v5496_v26 = vpack.c.bf16 %v14089_v27, %v14071_v51 }
 0x872   :  { %9010 = vmatpush3.bf16.msra.mxu0 %v10541_v63  ;;  %v10547_v17 = vld [vmem:[#allocation3 + $0x20] sm:$0xff]   ;;  %v10549_v10 = vld [vmem:[#allocation3 + $0x18] sm:$0xff]   ;;  %v10550_v20 = vld [vmem:[#allocation3 + $0x50] sm:$0xff]   ;;  %v5495_v2 = vpack.c.bf16 %v14086_v45, %v14066_v50  ;;  %v5498_v13 = vpack.c.bf16 %v5448_v0, %v14083_v48  ;;  %v5497_v47 = vpack.c.bf16 %v14098_v37, %v14080_v23  ;;  %v5500_v16 = vpack.c.bf16 %v14095_v12, %v14095_v12 }
 0x873   :  { %9011 = vmatprep.subr.bf16.mxu0 %v10542_v39  ;;  %v10551_v24 = vld [vmem:[#allocation3 + $0x10] sm:$0xff]   ;;  %v10552_v38 = vld [vmem:[#allocation3 + $0x48] sm:$0xff]   ;;  %v10554_v42 = vld [vmem:[#allocation3 + $0x40] sm:$0xff]   ;;  %v5499_v60 = vpack.c.bf16 %v14092_v31, %v14092_v31 }
 0x874   :  { %v10553_v62 = vld [vmem:[#allocation3 + $0x8] sm:$0xff]   ;;  %v10555_v30 = vld [vmem:[#allocation3] sm:$0xff]  }
 0x875   :  { %v8775_v37 = vld [vmem:[%s15950_s8] ss:$0 sm:$0xff] }
 0x876   :  { %9012 = vmatpush3.bf16.msra.mxu0 %v10543_v28 }
 0x877   :  { %9013 = vmatprep.subr.bf16.mxu0 %v10544_v54 }
 0x87a   :  { %9014 = vmatpush3.bf16.msra.mxu0 %v10545_v33 }
 0x87b   :  { %9015 = vmatprep.subr.bf16.mxu0 %v10546_v1 }
 0x87e   :  { %9016 = vmatpush3.bf16.msra.mxu0 %v10547_v17 }
 0x87f   :  { %9017 = vmatprep.subr.bf16.mxu0 %v10548_v29 }
 0x882   :  { %9018 = vmatpush3.bf16.msra.mxu0 %v10549_v10 }
 0x883   :  { %9019 = vmatprep.subr.bf16.mxu0 %v10550_v20 }
 0x886   :  { %9020 = vmatpush3.bf16.msra.mxu0 %v10551_v24 }
 0x887   :  { %9021 = vmatprep.subr.bf16.mxu0 %v10552_v38 }
 0x88a   :  { %9022 = vmatpush3.bf16.msra.mxu0 %v10553_v62 }
 0x88b   :  { %9023 = vmatprep.subr.bf16.mxu0 %v10554_v42 }
 0x88e   :  { %9024 = vmatpush3.bf16.msra.mxu0 %v10555_v30 }
 0x891   :  { %5637 = vmatmul.mubr.bf16.vlgmr.msra.gmra.mxu0 %v5487_v49 }
 0x892   :  { %5644 = vmatprep.mubr.bf16.mxu0 %v5490_v3 }
 0x899   :  { %5645 = vmatmul.mubr.bf16.gmra.mxu0 %v5489_v40 }
 0x89a   :  { %5652 = vmatprep.mubr.bf16.mxu0 %v5492_v41 }
 0x8a1   :  { %5653 = vmatmul.mubr.bf16.gmra.mxu0 %v5491_v43 }
 0x8a2   :  { %5660 = vmatprep.mubr.bf16.mxu0 %v5494_v56 }
 0x8a9   :  { %5661 = vmatmul.mubr.bf16.gmra.mxu0 %v5493_v15 }
 0x8aa   :  { %5668 = vmatprep.mubr.bf16.mxu0 %v5496_v26 }
 0x8b1   :  { %5669 = vmatmul.mubr.bf16.gmra.mxu0 %v5495_v2 }
 0x8b2   :  { %5676 = vmatprep.mubr.bf16.mxu0 %v5498_v13 }
 0x8b9   :  { %5677 = vmatmul.mubr.bf16.gmra.mxu0 %v5497_v47 }
 0x8ba   :  { %5684 = vmatprep.mubr.bf16.mxu0 %v5500_v16 }
 0x8c1   :  { %5685 = vmatmul.mubr.bf16.gmra.mxu0 %v5499_v60 }
 0x951   :  { %v9025_v36 = vpop.f32.mrf.mxu0 }
 0x953   :  { %v9026_v9 = vpop.f32.mrf.mxu0 }
 0x954   :  { %v14133_v8 = vadd.f32 %v9026_v9, %v9025_v36 }
 0x955   :  { %v9028_v34 = vpop.f32.mrf.mxu0 }
 0x957   :  { %v9029_v50 = vpop.f32.mrf.mxu0 }
 0x958   :  { %v9030_v40 = vadd.f32 %v9029_v50, %v9028_v34  ;;  %v14183_v50 = vadd.f32 %v14133_v8, %v8775_v37 }
 0x959   :  { %v9031_v51 = vpop.f32.mrf.mxu0 }
 0x95a   :  { %v14163_v15 = vadd.f32 %v9030_v40, %v8775_v37 }
 0x95b   :  { %v9032_v5 = vpop.f32.mrf.mxu0 }
 0x95c   :  { %v9033_v47 = vadd.f32 %v9032_v5, %v9031_v51 }
 0x95d   :  { %v9034_v59 = vpop.f32.mrf.mxu0 }
 0x95e   :  { %v14177_v9 = vadd.f32 %v9033_v47, %v8775_v37 }
 0x95f   :  { %v9035_v48 = vpop.f32.mrf.mxu0 }
 0x960   :  { %v9036_v42 = vadd.f32 %v9035_v48, %v9034_v59  ;;  %v5734_v8 = vmul.f32 %v14177_v9, %v14177_v9 }
 0x961   :  { %v9037_v23 = vpop.f32.mrf.mxu0 }
 0x962   :  { %v14157_v41 = vadd.f32 %v9036_v42, %v8775_v37 }
 0x963   :  { %v9038_v45 = vpop.f32.mrf.mxu0 }
 0x964   :  { %v9039_v26 = vadd.f32 %v9038_v45, %v9037_v23  ;;  %v5732_v45 = vmul.f32 %v14183_v50, %v14183_v50 }
 0x965   :  { %v9040_v27 = vpop.f32.mrf.mxu0 }
 0x966   :  { %v14171_v16 = vadd.f32 %v9039_v26, %v8775_v37 }
 0x967   :  { %v9041_v52 = vpop.f32.mrf.mxu0 }
 0x968   :  { %v9042_v29 = vadd.f32 %v9041_v52, %v9040_v27  ;;  %v5736_v59 = vmul.f32 %v14171_v16, %v14171_v16  ;;  %v5735_v52 = vmul.f32 %v14157_v41, %v14157_v41 }
 0x969   :  { %v9043_v21 = vpop.f32.mrf.mxu0 }
 0x96a   :  { %v14151_v30 = vadd.f32 %v9042_v29, %v8775_v37 }
 0x96b   :  { %v9044_v53 = vpop.f32.mrf.mxu0 }
 0x96c   :  { %v9045_v43 = vadd.f32 %v9044_v53, %v9043_v21  ;;  %v5737_v27 = vmul.f32 %v14151_v30, %v14151_v30  ;;  %v5733_v21 = vmul.f32 %v14163_v15, %v14163_v15 }
 0x96d   :  { %v9046_v44 = vpop.f32.mrf.mxu0 }
 0x96e   :  { %v14165_v2 = vadd.f32 %v9045_v43, %v8775_v37 }
 0x96f   :  { %v9047_v14 = vpop.f32.mrf.mxu0 }
 0x970   :  { %v9048_v28 = vadd.f32 %v9047_v14, %v9046_v44  ;;  %v5738_v51 = vmul.f32 %v14165_v2, %v14165_v2 }
 0x971   :  { %v9049_v4 = vpop.f32.mrf.mxu0 }
 0x972   :  { %v14144_v10 = vadd.f32 %v9048_v28, %v8775_v37 }
 0x973   :  { %v9050_v32 = vpop.f32.mrf.mxu0 }
 0x974   :  { %v9051_v49 = vadd.f32 %v9050_v32, %v9049_v4  ;;  %v5739_v23 = vmul.f32 %v14144_v10, %v14144_v10 }
 0x975   :  { %v9052_v7 = vpop.f32.mrf.mxu0 }
 0x976   :  { %v14159_v56 = vadd.f32 %v9051_v49, %v8775_v37 }
 0x977   :  { %v9053_v31 = vpop.f32.mrf.mxu0 }
 0x978   :  { %v9054_v25 = vadd.f32 %v9053_v31, %v9052_v7  ;;  %v5740_v34 = vmul.f32 %v14159_v56, %v14159_v56 }
 0x979   :  { %v9055_v57 = vpop.f32.mrf.mxu0 }
 0x97a   :  { %v14141_v54 = vadd.f32 %v9054_v25, %v8775_v37 }
 0x97b   :  { %v9056_v12 = vpop.f32.mrf.mxu0 }
 0x97c   :  { %v9057_v19 = vadd.f32 %v9056_v12, %v9055_v57  ;;  %v5741_v48 = vmul.f32 %v14141_v54, %v14141_v54 }
 0x97d   :  { %v9058_v0 = vpop.f32.mrf.mxu0 }
 0x97e   :  { %v14138_v46 = vadd.f32 %v9057_v19, %v8775_v37 }
 0x97f   :  { %v9059_v63 = vpop.f32.mrf.mxu0 }
 0x980   :  { %5712 = vadd.xlane.f32.xlu1 %v14138_v46  ;;  %v9060_v24 = vadd.f32 %v9059_v63, %v9058_v0  ;;  %v5742_v36 = vmul.f32 %v14138_v46, %v14138_v46 }
 0x981   :  { %v9061_v39 = vpop.f32.mrf.mxu0 }
 0x982   :  { %v14153_v3 = vadd.f32 %v9060_v24, %v8775_v37 }
 0x983   :  { %v9062_v33 = vpop.f32.mrf.mxu0 }
 0x984   :  { %v9063_v1 = vadd.f32 %v9062_v33, %v9061_v39  ;;  %5710 = vadd.xlane.f32.xlu1 %v14141_v54  ;;  %v5743_v5 = vmul.f32 %v14153_v3, %v14153_v3 }
 0x985   :  { %v9064_v17 = vpop.f32.mrf.mxu0 }
 0x986   :  { %v14146_v20 = vadd.f32 %v9063_v1, %v8775_v37 }
 0x987   :  { %v9065_v38 = vpop.f32.mrf.mxu0 }
 0x988   :  { %5706 = vadd.xlane.f32.xlu1 %v14144_v10  ;;  %v5716_v62 = vsel %vm2528_vm0, %v14146_v20, 0.0  ;;  %v5744_v13 = vmul.f32 %v14146_v20, %v14146_v20 }
 0x989   :  { %5717 = vadd.xlane.f32.xlu0 %v5716_v62 }
 0x98a   :  { %v5769_v60 = vsel %vm2528_vm0, %v5744_v13, 0.0 }
 0x98c   :  { %5702 = vadd.xlane.f32.xlu1 %v14151_v30 }
 0x98d   :  { %5714 = vadd.xlane.f32.xlu0 %v14153_v3 }
 0x990   :  { %5698 = vadd.xlane.f32.xlu1 %v14157_v41 }
 0x991   :  { %5708 = vadd.xlane.f32.xlu0 %v14159_v56 }
 0x994   :  { %5694 = vadd.xlane.f32.xlu1 %v14163_v15 }
 0x995   :  { %5704 = vadd.xlane.f32.xlu0 %v14165_v2 }
 0x998   :  { %5770 = vadd.xlane.f32.xlu1 %v5769_v60 }
 0x999   :  { %5700 = vadd.xlane.f32.xlu0 %v14171_v16 }
 0x99c   :  { %5765 = vadd.xlane.f32.xlu1 %v5742_v36 }
 0x99d   :  { %5696 = vadd.xlane.f32.xlu0 %v14177_v9 }
 0x9a0   :  { %5761 = vadd.xlane.f32.xlu1 %v5740_v34 }
 0x9a1   :  { %5692 = vadd.xlane.f32.xlu0 %v14183_v50 }
 0x9a4   :  { %5757 = vadd.xlane.f32.xlu1 %v5738_v51 }
 0x9a5   :  { %5767 = vadd.xlane.f32.xlu0 %v5743_v5 }
 0x9a8   :  { %5753 = vadd.xlane.f32.xlu1 %v5736_v59 }
 0x9a9   :  { %5763 = vadd.xlane.f32.xlu0 %v5741_v48 }
 0x9ac   :  { %5749 = vadd.xlane.f32.xlu1 %v5734_v8 }
 0x9ad   :  { %5759 = vadd.xlane.f32.xlu0 %v5739_v23 }
 0x9b0   :  { %5745 = vadd.xlane.f32.xlu1 %v5732_v45 }
 0x9b1   :  { %5755 = vadd.xlane.f32.xlu0 %v5737_v27 }
 0x9b5   :  { %5751 = vadd.xlane.f32.xlu0 %v5735_v52 }
 0x9b9   :  { %5747 = vadd.xlane.f32.xlu0 %v5733_v21 }
 0xa09   :  { %v5713_v53 = vpop.xlane.xlu1 %5712 }
 0xa0a   :  { %v5729_v12 = vmul.f32 0.0078125, %v5713_v53 }
 0xa0d   :  { %v5711_v44 = vpop.xlane.xlu1 %5710 }
 0xa0e   :  { %v5728_v0 = vmul.f32 0.0078125, %v5711_v44 }
 0xa11   :  { %v5707_v14 = vpop.xlane.xlu1 %5706 }
 0xa12   :  { %v5718_v4 = vpop.xlane.xlu0 %5717  ;;  %v5726_v28 = vmul.f32 0.0078125, %v5707_v14 }
 0xa13   :  { %v5731_v32 = vmul.f32 0.0078125, %v5718_v4 }
 0xa15   :  { %9503 = vmatpush3.msk.msra.mxu1 %vm2528_vm0, %v5731_v32  ;;  %v5703_v7 = vpop.xlane.xlu1 %5702 }
 0xa16   :  { %v5715_v31 = vpop.xlane.xlu0 %5714  ;;  %9504 = vmatprep.subr.mxu1 %v15920_v11  ;;  %v5724_v29 = vmul.f32 0.0078125, %v5703_v7 }
 0xa17   :  { %v5730_v57 = vmul.f32 0.0078125, %v5715_v31 }
 0xa19   :  { %9505 = vmatpush3.msra.mxu1 %v5730_v57  ;;  %v5699_v19 = vpop.xlane.xlu1 %5698 }
 0xa1a   :  { %9506 = vmatprep.subr.mxu1 %v15920_v11  ;;  %v5709_v37 = vpop.xlane.xlu0 %5708  ;;  %v5722_v42 = vmul.f32 0.0078125, %v5699_v19  ;;  %v15951_v19 = vld [vmem:[#allocation108_spill] sm:$0xff] }
 0xa1b   :  { %9507 = vmatpush3.msra.mxu1 %v5729_v12  ;;  %v5727_v25 = vmul.f32 0.0078125, %v5709_v37  ;;  %v15952_v37 = vld [vmem:[#allocation121_spill] sm:$0xff] }
 0xa1c   :  { %9508 = vmatprep.subr.mxu1 %v15920_v11 }
 0xa1d   :  { %9509 = vmatpush3.msra.mxu1 %v5728_v0  ;;  %v5695_v63 = vpop.xlane.xlu1 %5694  ;;  %v15953_v0 = vld [vmem:[#allocation124_spill] sm:$0xff] }
 0xa1e   :  { %9510 = vmatprep.subr.mxu1 %v15920_v11  ;;  %v5705_v39 = vpop.xlane.xlu0 %5704  ;;  %v5720_v43 = vmul.f32 0.0078125, %v5695_v63  ;;  %v15955_v63 = vld [vmem:[#allocation102_spill] sm:$0xff] }
 0xa1f   :  { %9511 = vmatpush3.msra.mxu1 %v5727_v25  ;;  %v5725_v33 = vmul.f32 0.0078125, %v5705_v39  ;;  %v15954_v25 = vld [vmem:[#allocation101_spill] sm:$0xff]  ;;  %v15956_v39 = vld [vmem:[#allocation119_spill] sm:$0xff] }
 0xa20   :  { %9512 = vmatprep.subr.mxu1 %v15920_v11 }
 0xa21   :  { %9513 = vmatpush3.msra.mxu1 %v5726_v28  ;;  %v5771_v1 = vpop.xlane.xlu1 %5770  ;;  %v15957_v28 = vld [vmem:[#allocation99_spill] sm:$0xff] }
 0xa22   :  { %9514 = vmatprep.subr.mxu1 %v15920_v11  ;;  %v5701_v17 = vpop.xlane.xlu0 %5700  ;;  %v5784_v60 = vmul.f32 0.0078125, %v5771_v1 }
 0xa23   :  { %9515 = vmatpush3.msra.mxu1 %v5725_v33  ;;  %v5723_v24 = vmul.f32 0.0078125, %v5701_v17 }
 0xa24   :  { %9516 = vmatprep.subr.mxu1 %v15920_v11 }
 0xa25   :  { %9517 = vmatpush3.msra.mxu1 %v5724_v29  ;;  %v5766_v38 = vpop.xlane.xlu1 %5765 }
 0xa26   :  { %9518 = vmatprep.subr.mxu1 %v15920_v11  ;;  %v5697_v62 = vpop.xlane.xlu0 %5696  ;;  %v5782_v5 = vmul.f32 0.0078125, %v5766_v38 }
 0xa27   :  { %9519 = vmatpush3.msra.mxu1 %v5723_v24  ;;  %v5721_v49 = vmul.f32 0.0078125, %v5697_v62 }
 0xa28   :  { %9520 = vmatprep.subr.mxu1 %v15920_v11 }
 0xa29   :  { %9521 = vmatpush3.msra.mxu1 %v5722_v42  ;;  %v5762_v26 = vpop.xlane.xlu1 %5761 }
 0xa2a   :  { %9522 = vmatprep.subr.mxu1 %v15920_v11  ;;  %v5693_v40 = vpop.xlane.xlu0 %5692  ;;  %v5780_v8 = vmul.f32 0.0078125, %v5762_v26 }
 0xa2b   :  { %9523 = vmatpush3.msra.mxu1 %v5721_v49  ;;  %v5719_v13 = vmul.f32 0.0078125, %v5693_v40 }
 0xa2c   :  { %9524 = vmatprep.subr.mxu1 %v15920_v11 }
 0xa2d   :  { %9525 = vmatpush3.msra.mxu1 %v5720_v43  ;;  %v5758_v34 = vpop.xlane.xlu1 %5757 }
 0xa2e   :  { %9526 = vmatprep.subr.mxu1 %v15920_v11  ;;  %v5768_v47 = vpop.xlane.xlu0 %5767  ;;  %v5778_v52 = vmul.f32 0.0078125, %v5758_v34 }
 0xa2f   :  { %9527 = vmatpush3.msra.mxu1 %v5719_v13  ;;  %v5783_v36 = vmul.f32 0.0078125, %v5768_v47 }
 0xa30   :  { %9529 = vmatmul.mubr.msk.f32.vlgmr.msra.gmra.mxu1 %vm2685_vm2, %v15935_v35  ;;  %9567 = vmatprep.subr.mxu1 %v15920_v11 }
 0xa31   :  { %9568 = vmatpush3.msk.msra.mxu1 %vm2528_vm0, %v5784_v60  ;;  %9531 = vmatprep.mubr.msk.f32.mxu1 %vm10892_vm1, %v15920_v11  ;;  %v5754_v23 = vpop.xlane.xlu1 %5753 }
 0xa32   :  { %9569 = vmatprep.subr.mxu1 %v15920_v11  ;;  %v5764_v51 = vpop.xlane.xlu0 %5763  ;;  %v5776_v14 = vmul.f32 0.0078125, %v5754_v23 }
 0xa33   :  { %9570 = vmatpush3.msra.mxu1 %v5783_v36  ;;  %v5781_v59 = vmul.f32 0.0078125, %v5764_v51 }
 0xa34   :  { %9532 = vmatmul.mubr.msk.f32.gmra.mxu1 %vm2685_vm2, %v15936_v58  ;;  %9571 = vmatprep.subr.mxu1 %v15920_v11 }
 0xa35   :  { %9572 = vmatpush3.msra.mxu1 %v5782_v5  ;;  %9534 = vmatprep.mubr.msk.f32.mxu1 %vm10892_vm1, %v15920_v11  ;;  %v5750_v53 = vpop.xlane.xlu1 %5749 }
 0xa36   :  { %9573 = vmatprep.subr.mxu1 %v15920_v11  ;;  %v5760_v48 = vpop.xlane.xlu0 %5759  ;;  %v5774_v7 = vmul.f32 0.0078125, %v5750_v53 }
 0xa37   :  { %9574 = vmatpush3.msra.mxu1 %v5781_v59  ;;  %v5779_v45 = vmul.f32 0.0078125, %v5760_v48 }
 0xa38   :  { %9535 = vmatmul.mubr.msk.f32.gmra.mxu1 %vm2685_vm2, %v15937_v22  ;;  %9575 = vmatprep.subr.mxu1 %v15920_v11 }
 0xa39   :  { %9576 = vmatpush3.msra.mxu1 %v5780_v8  ;;  %9537 = vmatprep.mubr.msk.f32.mxu1 %vm10892_vm1, %v15920_v11  ;;  %v5746_v31 = vpop.xlane.xlu1 %5745 }
 0xa3a   :  { %9577 = vmatprep.subr.mxu1 %v15920_v11  ;;  %v5756_v27 = vpop.xlane.xlu0 %5755  ;;  %v5772_v12 = vmul.f32 0.0078125, %v5746_v31 }
 0xa3b   :  { %9578 = vmatpush3.msra.mxu1 %v5779_v45  ;;  %v5777_v21 = vmul.f32 0.0078125, %v5756_v27 }
 0xa3c   :  { %9538 = vmatmul.mubr.msk.f32.gmra.mxu1 %vm2685_vm2, %v15938_v61  ;;  %9579 = vmatprep.subr.mxu1 %v15920_v11 }
 0xa3d   :  { %9580 = vmatpush3.msra.mxu1 %v5778_v52  ;;  %9540 = vmatprep.mubr.msk.f32.mxu1 %vm10892_vm1, %v15920_v11 }
 0xa3e   :  { %9581 = vmatprep.subr.mxu1 %v15920_v11  ;;  %v5752_v44 = vpop.xlane.xlu0 %5751 }
 0xa3f   :  { %9582 = vmatpush3.msra.mxu1 %v5777_v21  ;;  %v5775_v4 = vmul.f32 0.0078125, %v5752_v44 }
 0xa40   :  { %9541 = vmatmul.mubr.msk.f32.gmra.mxu1 %vm2685_vm2, %v15939_v55  ;;  %9583 = vmatprep.subr.mxu1 %v15920_v11 }
 0xa41   :  { %9584 = vmatpush3.msra.mxu1 %v5776_v14  ;;  %9543 = vmatprep.mubr.msk.f32.mxu1 %vm10892_vm1, %v15920_v11 }
 0xa42   :  { %9585 = vmatprep.subr.mxu1 %v15920_v11  ;;  %v5748_v32 = vpop.xlane.xlu0 %5747 }
 0xa43   :  { %9586 = vmatpush3.msra.mxu1 %v5775_v4  ;;  %v5773_v57 = vmul.f32 0.0078125, %v5748_v32 }
 0xa44   :  { %9544 = vmatmul.mubr.msk.f32.gmra.mxu1 %vm2685_vm2, %v15940_v18  ;;  %9587 = vmatprep.subr.mxu1 %v15920_v11 }
 0xa45   :  { %9588 = vmatpush3.msra.mxu1 %v5774_v7  ;;  %9546 = vmatprep.mubr.msk.f32.mxu1 %vm10892_vm1, %v15920_v11 }
 0xa46   :  { %9589 = vmatprep.subr.mxu1 %v15920_v11 }
 0xa47   :  { %9590 = vmatpush3.msra.mxu1 %v5773_v57 }
 0xa48   :  { %9547 = vmatmul.mubr.msk.f32.gmra.mxu1 %vm2685_vm2, %v15951_v19  ;;  %9591 = vmatprep.subr.mxu1 %v15920_v11 }
 0xa49   :  { %9592 = vmatpush3.msra.mxu1 %v5772_v12  ;;  %9549 = vmatprep.mubr.msk.f32.mxu1 %vm10892_vm1, %v15920_v11 }
 0xa4c   :  { %9550 = vmatmul.mubr.msk.f32.gmra.mxu1 %vm2685_vm2, %v15952_v37 }
 0xa4d   :  { %9552 = vmatprep.mubr.msk.f32.mxu1 %vm10892_vm1, %v15920_v11 }
 0xa50   :  { %9553 = vmatmul.mubr.msk.f32.gmra.mxu1 %vm2685_vm2, %v15953_v0 }
 0xa51   :  { %9555 = vmatprep.mubr.msk.f32.mxu1 %vm10892_vm1, %v15920_v11 }
 0xa54   :  { %9556 = vmatmul.mubr.msk.f32.gmra.mxu1 %vm2685_vm2, %v15954_v25 }
 0xa55   :  { %9558 = vmatprep.mubr.msk.f32.mxu1 %vm10892_vm1, %v15920_v11 }
 0xa58   :  { %9559 = vmatmul.mubr.msk.f32.gmra.mxu1 %vm2685_vm2, %v15955_v63 }
 0xa59   :  { %9561 = vmatprep.mubr.msk.f32.mxu1 %vm10892_vm1, %v15920_v11 }
 0xa5c   :  { %9562 = vmatmul.mubr.msk.f32.gmra.mxu1 %vm2685_vm2, %v15956_v39 }
 0xa5d   :  { %9564 = vmatprep.mubr.msk.f32.mxu1 %vm10892_vm1, %v15920_v11 }
 0xa60   :  { %9565 = vmatmul.mubr.msk.f32.gmra.mxu1 %vm2685_vm2, %v15957_v28 }
 0xa61   :  { %9593 = vmatprep.mubr.msk.f32.mxu1 %vm10892_vm1, %v15920_v11 }
 0xa64   :  { %9594 = vmatmul.mubr.msk.f32.vlgmr.msra.gmra.mxu1 %vm2685_vm2, %v15935_v35 }
 0xa65   :  { %9596 = vmatprep.mubr.msk.f32.mxu1 %vm10892_vm1, %v15920_v11 }
 0xa68   :  { %9597 = vmatmul.mubr.msk.f32.gmra.mxu1 %vm2685_vm2, %v15936_v58 }
 0xa69   :  { %9599 = vmatprep.mubr.msk.f32.mxu1 %vm10892_vm1, %v15920_v11 }
 0xa6c   :  { %9600 = vmatmul.mubr.msk.f32.gmra.mxu1 %vm2685_vm2, %v15937_v22 }
 0xa6d   :  { %9602 = vmatprep.mubr.msk.f32.mxu1 %vm10892_vm1, %v15920_v11 }
 0xa70   :  { %9603 = vmatmul.mubr.msk.f32.gmra.mxu1 %vm2685_vm2, %v15938_v61 }
 0xa71   :  { %9605 = vmatprep.mubr.msk.f32.mxu1 %vm10892_vm1, %v15920_v11 }
 0xa74   :  { %9606 = vmatmul.mubr.msk.f32.gmra.mxu1 %vm2685_vm2, %v15939_v55 }
 0xa75   :  { %9608 = vmatprep.mubr.msk.f32.mxu1 %vm10892_vm1, %v15920_v11 }
 0xa78   :  { %9609 = vmatmul.mubr.msk.f32.gmra.mxu1 %vm2685_vm2, %v15940_v18 }
 0xa79   :  { %9611 = vmatprep.mubr.msk.f32.mxu1 %vm10892_vm1, %v15920_v11 }
 0xa7c   :  { %9612 = vmatmul.mubr.msk.f32.gmra.mxu1 %vm2685_vm2, %v15951_v19 }
 0xa7d   :  { %9614 = vmatprep.mubr.msk.f32.mxu1 %vm10892_vm1, %v15920_v11 }
 0xa80   :  { %9615 = vmatmul.mubr.msk.f32.gmra.mxu1 %vm2685_vm2, %v15952_v37 }
 0xa81   :  { %9617 = vmatprep.mubr.msk.f32.mxu1 %vm10892_vm1, %v15920_v11 }
 0xa84   :  { %9618 = vmatmul.mubr.msk.f32.gmra.mxu1 %vm2685_vm2, %v15953_v0 }
 0xa85   :  { %9620 = vmatprep.mubr.msk.f32.mxu1 %vm10892_vm1, %v15920_v11 }
 0xa88   :  { %9621 = vmatmul.mubr.msk.f32.gmra.mxu1 %vm2685_vm2, %v15954_v25 }
 0xa89   :  { %9623 = vmatprep.mubr.msk.f32.mxu1 %vm10892_vm1, %v15920_v11 }
 0xa8c   :  { %9624 = vmatmul.mubr.msk.f32.gmra.mxu1 %vm2685_vm2, %v15955_v63 }
 0xa8d   :  { %9626 = vmatprep.mubr.msk.f32.mxu1 %vm10892_vm1, %v15920_v11 }
 0xa90   :  { %9627 = vmatmul.mubr.msk.f32.gmra.mxu1 %vm2685_vm2, %v15956_v39 }
 0xa91   :  { %9629 = vmatprep.mubr.msk.f32.mxu1 %vm10892_vm1, %v15920_v11 }
 0xa94   :  { %9630 = vmatmul.mubr.msk.f32.gmra.mxu1 %vm2685_vm2, %v15957_v28 }
 0xaf0   :  { %v5854_v33 = vpop.f32.mrf.mxu1 }
 0xaf1   :  { %v5918_v52 = vmul.f32 0.5, %v5854_v33 }
 0xaf2   :  { %v9530_v1 = vpop.f32.mrf.mxu1 }
 0xaf3   :  { %v6077_v44 = vmul.f32 %v5918_v52, %v5918_v52 }
 0xaf4   :  { %v5859_v17 = vpop.f32.mrf.mxu1 }
 0xaf5   :  { %v14347_v14 = vmul.f32 0.5, %v5859_v17 }
 0xaf6   :  { %v9533_v29 = vpop.f32.mrf.mxu1 }
 0xaf7   :  { %v6078_v12 = vmul.f32 %v14347_v14, %v14347_v14 }
 0xaf8   :  { %v5864_v24 = vpop.f32.mrf.mxu1 }
 0xaf9   :  { %v14349_v31 = vmul.f32 0.5, %v5864_v24 }
 0xafa   :  { %v9536_v38 = vpop.f32.mrf.mxu1 }
 0xafb   :  { %v6079_v33 = vmul.f32 %v14349_v31, %v14349_v31 }
 0xafc   :  { %v5869_v62 = vpop.f32.mrf.mxu1 }
 0xafd   :  { %v14355_v17 = vmul.f32 0.5, %v5869_v62 }
 0xafe   :  { %v9539_v42 = vpop.f32.mrf.mxu1 }
 0xb00   :  { %v5874_v49 = vpop.f32.mrf.mxu1 }
 0xb02   :  { %v9542_v40 = vpop.f32.mrf.mxu1 }
 0xb04   :  { %v5879_v43 = vpop.f32.mrf.mxu1 }
 0xb06   :  { %v9545_v26 = vpop.f32.mrf.mxu1 }
 0xb08   :  { %v5884_v13 = vpop.f32.mrf.mxu1 }
 0xb0a   :  { %v9548_v47 = vpop.f32.mrf.mxu1 }
 0xb0c   :  { %v14335_v60 = vpop.f32.mrf.mxu1 }
 0xb0e   :  { %v9551_v36 = vpop.f32.mrf.mxu1 }
 0xb10   :  { %v14337_v34 = vpop.f32.mrf.mxu1 }
 0xb12   :  { %v9554_v51 = vpop.f32.mrf.mxu1 }
 0xb14   :  { %v14339_v5 = vpop.f32.mrf.mxu1 }
 0xb16   :  { %v9557_v59 = vpop.f32.mrf.mxu1 }
 0xb18   :  { %v14341_v48 = vpop.f32.mrf.mxu1 }
 0xb1a   :  { %v9560_v8 = vpop.f32.mrf.mxu1 }
 0xb1b   :  { %v14357_v8 = vmul.f32 0.5, %v5874_v49 }
 0xb1c   :  { %v14343_v23 = vpop.f32.mrf.mxu1 }
 0xb1d   :  { %v6081_v62 = vmul.f32 %v14357_v8, %v14357_v8 }
 0xb1e   :  { %v9563_v45 = vpop.f32.mrf.mxu1 }
 0xb20   :  { %v14345_v27 = vpop.f32.mrf.mxu1 }
 0xb22   :  { %v9566_v21 = vpop.f32.mrf.mxu1 }
 0xb23   :  { %v6080_v21 = vmul.f32 %v14355_v17, %v14355_v17 }
 0xb24   :  { %v6000_v53 = vpop.f32.mrf.mxu1 }
 0xb25   :  { %v6064_v4 = vmul.f32 0.5, %v6000_v53 }
 0xb26   :  { %v9595_v32 = vpop.f32.mrf.mxu1 }
 0xb27   :  { %v6090_v7 = vsub.f32 %v6064_v4, %v6077_v44 }
 0xb28   :  { %v6005_v57 = vpop.f32.mrf.mxu1 }
 0xb29   :  { %v6103_v1 = vmax.f32 %v6090_v7, 0.0  ;;  %v6065_v29 = vmul.f32 0.5, %v6005_v57 }
 0xb2a   :  { %v9598_v38 = vpop.f32.mrf.mxu1 }
 0xb2b   :  { %v6129_v42 = vadd.f32 1e-05, %v6103_v1  ;;  %v6091_v40 = vsub.f32 %v6065_v29, %v6078_v12  ;;  %v14363_v12 = vmul.f32 0.5, %v5879_v43 }
 0xb2c   :  { %v6010_v26 = vpop.f32.mrf.mxu1 }
 0xb2d   :  { %10556 = vrsqrt.f32 %v6129_v42  ;;  %v6104_v47 = vmax.f32 %v6091_v40, 0.0  ;;  %v6066_v36 = vmul.f32 0.5, %v6010_v26  ;;  %v6082_v26 = vmul.f32 %v14363_v12, %v14363_v12 }
 0xb2e   :  { %v9601_v24 = vpop.f32.mrf.mxu1 }
 0xb2f   :  { %v6130_v51 = vadd.f32 1e-05, %v6104_v47  ;;  %v6092_v59 = vsub.f32 %v6066_v36, %v6079_v33  ;;  %v6116_v33 = vld [vmem:[%s15506_s9] sm:$0xff]  ;;  %v14370_v47 = vmul.f32 0.5, %v5884_v13 }
 0xb30   :  { %v6015_v45 = vpop.f32.mrf.mxu1 }
 0xb31   :  { %10558 = vrsqrt.f32 %v6130_v51  ;;  %v6105_v53 = vmax.f32 %v6092_v59, 0.0  ;;  %v6067_v44 = vmul.f32 0.5, %v6015_v45  ;;  %v6083_v13 = vmul.f32 %v14370_v47, %v14370_v47 }
 0xb32   :  { %v9604_v4 = vpop.f32.mrf.mxu1 }
 0xb33   :  { %v6131_v32 = vadd.f32 1e-05, %v6105_v53  ;;  %v6093_v7 = vsub.f32 %v6067_v44, %v6080_v21  ;;  %v6168_v44 = vld [vmem:[%s15507_s10] sm:$0xff]  ;;  %v6117_v4 = vld [vmem:[%s15506_s9 + $0x8] sm:$0xff] }
 0xb34   :  { %v6020_v57 = vpop.f32.mrf.mxu1 }
 0xb35   :  { %10560 = vrsqrt.f32 %v6131_v32  ;;  %v6106_v1 = vmax.f32 %v6093_v7, 0.0  ;;  %v6068_v49 = vmul.f32 0.5, %v6020_v57 }
 0xb36   :  { %v9607_v29 = vpop.f32.mrf.mxu1 }
 0xb37   :  { %v6132_v38 = vadd.f32 1e-05, %v6106_v1  ;;  %v6094_v42 = vsub.f32 %v6068_v49, %v6081_v62 }
 0xb38   :  { %v6025_v40 = vpop.f32.mrf.mxu1 }
 0xb39   :  { %v6107_v36 = vmax.f32 %v6094_v42, 0.0  ;;  %v6069_v24 = vmul.f32 0.5, %v6025_v40  ;;  %10562 = vrsqrt.f32 %v6132_v38  ;;  %v14381_v42 = vmul.f32 0.5, %v14335_v60 }
 0xb3a   :  { %v10557_v43 = vpop.eup %10556  ;;  %v9610_v51 = vpop.f32.mrf.mxu1  ;;  %v14384_v40 = vmul.f32 0.5, %v14337_v34 }
 0xb3b   :  { %v6133_v59 = vadd.f32 1e-05, %v6107_v36  ;;  %v6095_v45 = vsub.f32 %v6069_v24, %v6082_v26  ;;  %v6155_v21 = vmul.f32 %v10557_v43, %v6116_v33  ;;  %v6118_v26 = vld [vmem:[%s15506_s9 + $0x10] sm:$0xff]  ;;  %v6084_v34 = vmul.f32 %v14381_v42, %v14381_v42 }
 0xb3c   :  { %v6030_v53 = vpop.f32.mrf.mxu1 }
 0xb3d   :  { %10564 = vrsqrt.f32 %v6133_v59  ;;  %v6070_v32 = vmul.f32 0.5, %v6030_v53  ;;  %6209 = vperm.xlu0 %10538, %v6155_v21   ;;  %v6181_v7 = vmul.f32 %v6155_v21, %v5918_v52  ;;  %v6108_v1 = vmax.f32 %v6095_v45, 0.0 }
 0xb3e   :  { %v10559_v62 = vpop.eup %10558  ;;  %v9613_v57 = vpop.f32.mrf.mxu1  ;;  %v6085_v21 = vmul.f32 %v14384_v40, %v14384_v40 }
 0xb3f   :  { %v6096_v49 = vsub.f32 %v6070_v32, %v6083_v13  ;;  %v6194_v29 = vsub.f32 %v6168_v44, %v6181_v7  ;;  %v6156_v38 = vmul.f32 %v10559_v62, %v6117_v4  ;;  %v6134_v51 = vadd.f32 1e-05, %v6108_v1  ;;  %v6169_v44 = vld [vmem:[%s15507_s10 + $0x8] sm:$0xff]  ;;  %v6170_v4 = vld [vmem:[%s15507_s10 + $0x10] sm:$0xff] }
 0xb40   :  { %v6035_v33 = vpop.f32.mrf.mxu1  ;;  %v14401_v13 = vmul.f32 0.5, %v14339_v5  ;;  %v6119_v5 = vld [vmem:[%s15506_s9 + $0x18] sm:$0xff] }
 0xb41   :  { %v6109_v36 = vmax.f32 %v6096_v49, 0.0  ;;  %6287 = vperm.xlu0 %10538, %v6194_v29   ;;  %6214 = vperm.xlu1 %10539, %v6156_v38   ;;  %v6071_v24 = vmul.f32 0.5, %v6035_v33  ;;  %v6182_v60 = vmul.f32 %v6156_v38, %v14347_v14  ;;  %v14405_v38 = vmul.f32 0.5, %v14341_v48 }
 0xb42   :  { %v10561_v52 = vpop.eup %10560  ;;  %v9616_v43 = vpop.f32.mrf.mxu1 }
 0xb43   :  { %v6135_v59 = vadd.f32 1e-05, %v6109_v36  ;;  %v6157_v45 = vmul.f32 %v10561_v52, %v6118_v26  ;;  %v6097_v7 = vsub.f32 %v6071_v24, %v6084_v34  ;;  %v6195_v1 = vsub.f32 %v6169_v44, %v6182_v60  ;;  %v6120_v26 = vld [vmem:[%s15506_s9 + $0x20] sm:$0xff] }
 0xb44   :  { %v6040_v53 = vpop.f32.mrf.mxu1  ;;  %v6087_v34 = vmul.f32 %v14405_v38, %v14405_v38  ;;  %v6172_v44 = vld [vmem:[%s15507_s10 + $0x20] sm:$0xff] }
 0xb45   :  { %10566 = vrsqrt.f32 %v6135_v59  ;;  %v6072_v14 = vmul.f32 0.5, %v6040_v53  ;;  %6219 = vperm.xlu1 %10539, %v6157_v45   ;;  %v6183_v32 = vmul.f32 %v6157_v45, %v14349_v31  ;;  %v6086_v31 = vmul.f32 %v14401_v13, %v14401_v13 }
 0xb46   :  { %v9619_v62 = vpop.f32.mrf.mxu1  ;;  %10568 = vrsqrt.f32 %v6134_v51  ;;  %v10563_v29 = vpop.eup %10562  ;;  %v6110_v43 = vmax.f32 %v6097_v7, 0.0 }
 0xb47   :  { %v6098_v57 = vsub.f32 %v6072_v14, %v6085_v21  ;;  %v6196_v49 = vsub.f32 %v6170_v4, %v6183_v32  ;;  %v6158_v45 = vmul.f32 %v10563_v29, %v6119_v5  ;;  %v14418_v21 = vmul.f32 0.5, %v14343_v23  ;;  %v6171_v5 = vld [vmem:[%s15507_s10 + $0x18] sm:$0xff] }
 0xb48   :  { %v6045_v33 = vpop.f32.mrf.mxu1  ;;  %v6136_v7 = vadd.f32 1e-05, %v6110_v43  ;;  %v14426_v23 = vmul.f32 0.5, %v14345_v27 }
 0xb49   :  { %v6111_v36 = vmax.f32 %v6098_v57, 0.0  ;;  %v6073_v52 = vmul.f32 0.5, %v6045_v33  ;;  %6292 = vperm.xlu1 %10539, %v6195_v1   ;;  %6297 = vperm.xlu0 %10538, %v6196_v49   ;;  %v6184_v29 = vmul.f32 %v6158_v45, %v14355_v17 }
 0xb4a   :  { %v10565_v24 = vpop.eup %10564  ;;  %v9622_v48 = vpop.f32.mrf.mxu1 }
 0xb4b   :  { %v6137_v51 = vadd.f32 1e-05, %v6111_v36  ;;  %v6099_v59 = vsub.f32 %v6073_v52, %v6086_v31  ;;  %v6159_v60 = vmul.f32 %v10565_v24, %v6120_v26  ;;  %v6122_v26 = vld [vmem:[%s15506_s9 + $0x30] sm:$0xff]  ;;  %v6197_v43 = vsub.f32 %v6171_v5, %v6184_v29 }
 0xb4c   :  { %v6050_v53 = vpop.f32.mrf.mxu1 }
 0xb4d   :  { %10570 = vrsqrt.f32 %v6137_v51  ;;  %v6112_v4 = vmax.f32 %v6099_v59, 0.0  ;;  %v6074_v14 = vmul.f32 0.5, %v6050_v53  ;;  %6224 = vperm.xlu1 %10539, %v6158_v45   ;;  %v6185_v32 = vmul.f32 %v6159_v60, %v14357_v8 }
 0xb4e   :  { %v9625_v62 = vpop.f32.mrf.mxu1  ;;  %v6088_v8 = vmul.f32 %v14418_v21, %v14418_v21  ;;  %v6089_v59 = vmul.f32 %v14426_v23, %v14426_v23 }
 0xb4f   :  { %v6138_v57 = vadd.f32 1e-05, %v6112_v4  ;;  %v6100_v1 = vsub.f32 %v6074_v14, %v6087_v34  ;;  %v6198_v49 = vsub.f32 %v6172_v44, %v6185_v32  ;;  %v6121_v34 = vld [vmem:[%s15506_s9 + $0x28] sm:$0xff] }
 0xb50   :  { %v6055_v33 = vpop.f32.mrf.mxu1 }
 0xb51   :  { %10572 = vrsqrt.f32 %v6138_v57  ;;  %v6113_v31 = vmax.f32 %v6100_v1, 0.0  ;;  %v6075_v36 = vmul.f32 0.5, %v6055_v33  ;;  %6229 = vperm.xlu1 %10539, %v6159_v60   ;;  %6307 = vperm.xlu0 %10538, %v6198_v49   ;;  %v6174_v60 = vld [vmem:[%s15507_s10 + $0x30] sm:$0xff]  ;;  %v6124_v1 = vld [vmem:[%s15506_s9 + $0x40] sm:$0xff] }
 0xb52   :  { %v10567_v17 = vpop.eup %10566  ;;  %10574 = vrsqrt.f32 %v6136_v7  ;;  %v9628_v27 = vpop.f32.mrf.mxu1 }
 0xb53   :  { %v6139_v52 = vadd.f32 1e-05, %v6113_v31  ;;  %v6101_v24 = vsub.f32 %v6075_v36, %v6088_v8  ;;  %v6161_v48 = vmul.f32 %v10567_v17, %v6122_v26  ;;  %v10569_v51 = vpop.eup %10568  ;;  %v6125_v8 = vld [vmem:[%s15506_s9 + $0x48] sm:$0xff] }
 0xb54   :  { %v6060_v45 = vpop.f32.mrf.mxu1  ;;  %v6160_v62 = vmul.f32 %v10569_v51, %v6121_v34 }
 0xb55   :  { %10576 = vrsqrt.f32 %v6139_v52  ;;  %v6114_v53 = vmax.f32 %v6101_v24, 0.0  ;;  %v6076_v44 = vmul.f32 0.5, %v6060_v45  ;;  %6302 = vperm.xlu1 %10539, %v6197_v43   ;;  %v6187_v4 = vmul.f32 %v6161_v48, %v14370_v47  ;;  %v6173_v47 = vld [vmem:[%s15507_s10 + $0x28] sm:$0xff]  ;;  %v6176_v24 = vld [vmem:[%s15507_s10 + $0x40] sm:$0xff]  ;;  %v6126_v43 = vld [vmem:[%s15506_s9 + $0x50] sm:$0xff] }
 0xb56   :  { %v9631_v14 = vpop.f32.mrf.mxu1  ;;  %v6186_v5 = vmul.f32 %v6160_v62, %v14363_v12  ;;  %v6123_v12 = vld [vmem:[%s15506_s9 + $0x38] sm:$0xff] }
 0xb57   :  { %v6140_v32 = vadd.f32 1e-05, %v6114_v53  ;;  %v6102_v7 = vsub.f32 %v6076_v44, %v6089_v59  ;;  %v6200_v57 = vsub.f32 %v6174_v60, %v6187_v4  ;;  %v6175_v4 = vld [vmem:[%s15507_s10 + $0x38] sm:$0xff]  ;;  %v6178_v14 = vld [vmem:[%s15507_s10 + $0x50] sm:$0xff] }
 0xb58   :  { %v6199_v17 = vsub.f32 %v6173_v47, %v6186_v5  ;;  %v6179_v47 = vld [vmem:[%s15507_s10 + $0x58] sm:$0xff] }
 0xb59   :  { %10578 = vrsqrt.f32 %v6140_v32  ;;  %v6115_v49 = vmax.f32 %v6102_v7, 0.0  ;;  %6234 = vperm.xlu1 %10539, %v6160_v62   ;;  %6317 = vperm.xlu0 %10538, %v6200_v57   ;;  %v6128_v32 = vld [vmem:[%s15506_s9 + $0x60] sm:$0xf] }
 0xb5a   :  { %v10571_v29 = vpop.eup %10570 }
 0xb5b   :  { %v6141_v33 = vadd.f32 1e-05, %v6115_v49  ;;  %v6163_v26 = vmul.f32 %v10571_v29, %v6124_v1 }
 0xb5d   :  { %10580 = vrsqrt.f32 %v6141_v33  ;;  %6239 = vperm.xlu1 %10539, %v6161_v48   ;;  %v6189_v52 = vmul.f32 %v6163_v26, %v14384_v40  ;;  %v6127_v40 = vld [vmem:[%s15506_s9 + $0x58] sm:$0xff]  ;;  %v6177_v33 = vld [vmem:[%s15507_s10 + $0x48] sm:$0xff] }
 0xb5e   :  { %v10573_v31 = vpop.eup %10572 }
 0xb5f   :  { %v10575_v36 = vpop.eup %10574  ;;  %v6164_v27 = vmul.f32 %v10573_v31, %v6125_v8  ;;  %v6202_v59 = vsub.f32 %v6176_v24, %v6189_v52 }
 0xb60   :  { %v6162_v51 = vmul.f32 %v10575_v36, %v6123_v12 }
 0xb61   :  { %6312 = vperm.xlu1 %10539, %v6199_v17   ;;  %6254 = vperm.xlu0 %10538, %v6164_v27   ;;  %v6190_v29 = vmul.f32 %v6164_v27, %v14401_v13 }
 0xb62   :  { %v10577_v48 = vpop.eup %10576  ;;  %v6188_v53 = vmul.f32 %v6162_v51, %v14381_v42 }
 0xb63   :  { %v6165_v45 = vmul.f32 %v10577_v48, %v6126_v43  ;;  %v6203_v5 = vsub.f32 %v6177_v33, %v6190_v29 }
 0xb64   :  { %v6201_v62 = vsub.f32 %v6175_v4, %v6188_v53 }
 0xb65   :  { %6244 = vperm.xlu1 %10539, %v6162_v51   ;;  %6327 = vperm.xlu0 %10538, %v6202_v59   ;;  %v6191_v44 = vmul.f32 %v6165_v45, %v14405_v38  ;;  %v6180_v38 = vld [vmem:[%s15507_s10 + $0x60] sm:$0xf] }
 0xb66   :  { %v10579_v34 = vpop.eup %10578 }
 0xb67   :  { %v6166_v60 = vmul.f32 %v10579_v34, %v6127_v40  ;;  %v6204_v57 = vsub.f32 %v6178_v14, %v6191_v44 }
 0xb69   :  { %6249 = vperm.xlu1 %10539, %v6163_v26   ;;  %6264 = vperm.xlu0 %10538, %v6166_v60   ;;  %v6192_v26 = vmul.f32 %v6166_v60, %v14418_v21 }
 0xb6a   :  { %v10581_v7 = vpop.eup %10580 }
 0xb6b   :  { %v6167_v42 = vmul.f32 %v10581_v7, %v6128_v32  ;;  %v6205_v8 = vsub.f32 %v6179_v47, %v6192_v26 }
 0xb6d   :  { %6322 = vperm.xlu1 %10539, %v6201_v62   ;;  %6337 = vperm.xlu0 %10538, %v6204_v57   ;;  %v6193_v1 = vmul.f32 %v6167_v42, %v14426_v23 }
 0xb6f   :  { %v6206_v49 = vsub.f32 %v6180_v38, %v6193_v1 }
 0xb71   :  { %6259 = vperm.xlu1 %10539, %v6165_v45   ;;  %6347 = vperm.xlu0 %10538, %v6206_v49  }
 0xb75   :  { %6332 = vperm.xlu1 %10539, %v6203_v5  }
 0xb79   :  { %6269 = vperm.xlu1 %10539, %v6167_v42  }
 0xb7d   :  { %6342 = vperm.xlu1 %10539, %v6205_v8  }
 0xbb8   :  { %v6210_v23 = vpop.permute.xlu0 %6209 }
 0xbb9   :  { %v6272_v13 = vmul.f32 %v6210_v23, %v14183_v50 }
 0xbbc   :  { %v6288_v31 = vpop.permute.xlu0 %6287  ;;  %v6215_v36 = vpop.permute.xlu1 %6214 }
 0xbbd   :  { %v6350_v17 = vadd.f32 %v6288_v31, %v6272_v13  ;;  %v6273_v43 = vmul.f32 %v6215_v36, %v14163_v15 }
 0xbbf   :  { %v6363_v27 = vmul.f32 %v6350_v17, %v6350_v17 }
 0xbc0   :  { %v6220_v52 = vpop.permute.xlu1 %6219 }
 0xbc1   :  { %v6376_v12 = vmul.f32 %v6363_v27, %v6350_v17  ;;  %v6274_v21 = vmul.f32 %v6220_v52, %v14177_v9 }
 0xbc3   :  { %v6389_v24 = vmul.f32 0.044715, %v6376_v12 }
 0xbc4   :  { %v6293_v48 = vpop.permute.xlu1 %6292  ;;  %v6298_v51 = vpop.permute.xlu0 %6297 }
 0xbc5   :  { %v6402_v59 = vadd.f32 %v6389_v24, %v6350_v17  ;;  %v6351_v45 = vadd.f32 %v6293_v48, %v6273_v43  ;;  %v14494_v40 = vadd.f32 %v6298_v51, %v6274_v21 }
 0xbc7   :  { %v6415_v34 = vmul.f32 0.7978846, %v6402_v59  ;;  %v6364_v60 = vmul.f32 %v6351_v45, %v6351_v45  ;;  %v6365_v50 = vmul.f32 %v14494_v40, %v14494_v40 }
 0xbc8   :  { %v6225_v53 = vpop.permute.xlu1 %6224 }
 0xbc9   :  { %10582 = vtanh.f32 %v6415_v34  ;;  %v6377_v44 = vmul.f32 %v6364_v60, %v6351_v45  ;;  %v6378_v4 = vmul.f32 %v6365_v50, %v14494_v40  ;;  %v6275_v1 = vmul.f32 %v6225_v53, %v14157_v41 }
 0xbcb   :  { %v6390_v14 = vmul.f32 0.044715, %v6377_v44  ;;  %v6391_v15 = vmul.f32 0.044715, %v6378_v4 }
 0xbcc   :  { %v6230_v32 = vpop.permute.xlu1 %6229  ;;  %v6308_v57 = vpop.permute.xlu0 %6307 }
 0xbcd   :  { %v6403_v9 = vadd.f32 %v6390_v14, %v6351_v45  ;;  %v6404_v7 = vadd.f32 %v6391_v15, %v14494_v40  ;;  %v6276_v62 = vmul.f32 %v6230_v32, %v14171_v16 }
 0xbcf   :  { %v6416_v42 = vmul.f32 0.7978846, %v6403_v9  ;;  %v6417_v38 = vmul.f32 0.7978846, %v6404_v7  ;;  %v14502_v49 = vadd.f32 %v6308_v57, %v6276_v62 }
 0xbd0   :  { %v6303_v29 = vpop.permute.xlu1 %6302 }
 0xbd1   :  { %10584 = vtanh.f32 %v6416_v42  ;;  %v6367_v33 = vmul.f32 %v14502_v49, %v14502_v49  ;;  %v14506_v5 = vadd.f32 %v6303_v29, %v6275_v1 }
 0xbd2   :  { %10586 = vtanh.f32 %v6417_v38 }
 0xbd3   :  { %v6380_v26 = vmul.f32 %v6367_v33, %v14502_v49  ;;  %v6366_v16 = vmul.f32 %v14506_v5, %v14506_v5 }
 0xbd4   :  { %v6235_v47 = vpop.permute.xlu1 %6234  ;;  %v6318_v43 = vpop.permute.xlu0 %6317 }
 0xbd5   :  { %v6393_v8 = vmul.f32 0.044715, %v6380_v26  ;;  %v6379_v23 = vmul.f32 %v6366_v16, %v14506_v5  ;;  %v6277_v48 = vmul.f32 %v6235_v47, %v14151_v30 }
 0xbd6   :  { %v10583_v41 = vpop.eup %10582 }
 0xbd7   :  { %v6441_v13 = vadd.f32 1.0, %v10583_v41  ;;  %v6406_v31 = vadd.f32 %v6393_v8, %v14502_v49  ;;  %v6392_v36 = vmul.f32 0.044715, %v6379_v23 }
 0xbd8   :  { %v6240_v27 = vpop.permute.xlu1 %6239 }
 0xbd9   :  { %v6454_v52 = vmul.f32 0.5, %v6441_v13  ;;  %v6419_v12 = vmul.f32 0.7978846, %v6406_v31  ;;  %v6405_v24 = vadd.f32 %v6392_v36, %v14506_v5  ;;  %v6278_v21 = vmul.f32 %v6240_v27, %v14165_v2 }
 0xbdb   :  { %v14516_v51 = vmul.f32 %v6454_v52, %v6350_v17  ;;  %10588 = vtanh.f32 %v6419_v12  ;;  %v6418_v59 = vmul.f32 0.7978846, %v6405_v24  ;;  %v14518_v34 = vadd.f32 %v6318_v43, %v6278_v21 }
 0xbdc   :  { %v6313_v60 = vpop.permute.xlu1 %6312  ;;  %v6255_v44 = vpop.permute.xlu0 %6254 }
 0xbdd   :  { %10590 = vtanh.f32 %v6418_v59  ;;  %v6369_v50 = vmul.f32 %v14518_v34, %v14518_v34  ;;  %v14522_v53 = vadd.f32 %v6313_v60, %v6277_v48 }
 0xbde   :  { %v10585_v4 = vpop.eup %10584 }
 0xbdf   :  { %v10587_v14 = vpop.eup %10586  ;;  %v6442_v15 = vadd.f32 1.0, %v10585_v4  ;;  %v6382_v2 = vmul.f32 %v6369_v50, %v14518_v34  ;;  %v6368_v30 = vmul.f32 %v14522_v53, %v14522_v53 }
 0xbe0   :  { %v6443_v17 = vadd.f32 1.0, %v10587_v14  ;;  %v6245_v32 = vpop.permute.xlu1 %6244  ;;  %v6328_v29 = vpop.permute.xlu0 %6327 }
 0xbe1   :  { %v6455_v9 = vmul.f32 0.5, %v6442_v15  ;;  %v6395_v7 = vmul.f32 0.044715, %v6382_v2  ;;  %v6381_v62 = vmul.f32 %v6368_v30, %v14522_v53  ;;  %v6279_v41 = vmul.f32 %v6245_v32, %v14144_v10 }
 0xbe2   :  { %v6456_v57 = vmul.f32 0.5, %v6443_v17  ;;  %v6281_v15 = vmul.f32 %v6255_v44, %v14141_v54 }
 0xbe3   :  { %v14528_v42 = vmul.f32 %v6455_v9, %v6351_v45  ;;  %v6408_v38 = vadd.f32 %v6395_v7, %v14518_v34  ;;  %v6394_v1 = vmul.f32 0.044715, %v6381_v62 }
 0xbe4   :  { %v14532_v33 = vmul.f32 %v6456_v57, %v14494_v40  ;;  %v6250_v26 = vpop.permute.xlu1 %6249  ;;  %v6265_v27 = vpop.permute.xlu0 %6264 }
 0xbe5   :  { %v6421_v16 = vmul.f32 0.7978846, %v6408_v38  ;;  %v6407_v47 = vadd.f32 %v6394_v1, %v14522_v53  ;;  %v6280_v8 = vmul.f32 %v6250_v26, %v14159_v56 }
 0xbe7   :  { %10592 = vtanh.f32 %v6421_v16  ;;  %v6420_v23 = vmul.f32 0.7978846, %v6407_v47  ;;  %v14537_v13 = vadd.f32 %v6328_v29, %v6280_v8 }
 0xbe8   :  { %v10589_v45 = vpop.eup %10588  ;;  %v6323_v31 = vpop.permute.xlu1 %6322 }
 0xbe9   :  { %v6445_v36 = vadd.f32 1.0, %v10589_v45  ;;  %10594 = vtanh.f32 %v6420_v23  ;;  %v6371_v40 = vmul.f32 %v14537_v13, %v14537_v13  ;;  %v14541_v52 = vadd.f32 %v6323_v31, %v6279_v41  ;;  %v6338_v17 = vpop.permute.xlu0 %6337 }
 0xbea   :  { %v10591_v12 = vpop.eup %10590 }
 0xbeb   :  { %v6458_v24 = vmul.f32 0.5, %v6445_v36  ;;  %v6444_v43 = vadd.f32 1.0, %v10591_v12  ;;  %v6384_v56 = vmul.f32 %v6371_v40, %v14537_v13  ;;  %v6370_v10 = vmul.f32 %v14541_v52, %v14541_v52 }
 0xbec   :  { %v6260_v21 = vpop.permute.xlu1 %6259  ;;  %v6283_v36 = vmul.f32 %v6265_v27, %v14153_v3 }
 0xbed   :  { %v14547_v48 = vmul.f32 %v6458_v24, %v14502_v49  ;;  %v6457_v59 = vmul.f32 0.5, %v6444_v43  ;;  %v6397_v60 = vmul.f32 0.044715, %v6384_v56  ;;  %v6383_v50 = vmul.f32 %v6370_v10, %v14541_v52  ;;  %v6348_v8 = vpop.permute.xlu0 %6347 }
 0xbee   :  { %v6282_v4 = vmul.f32 %v6260_v21, %v14138_v46 }
 0xbef   :  { %v14552_v14 = vmul.f32 %v6457_v59, %v14506_v5  ;;  %v6410_v2 = vadd.f32 %v6397_v60, %v14537_v13  ;;  %v6396_v30 = vmul.f32 0.044715, %v6383_v50 }
 0xbf0   :  { %v6360_v32 = vadd.f32 %v6338_v17, %v6282_v4  ;;  %v6333_v9 = vpop.permute.xlu1 %6332 }
 0xbf1   :  { %v6423_v7 = vmul.f32 0.7978846, %v6410_v2  ;;  %v6409_v49 = vadd.f32 %v6396_v30, %v14541_v52  ;;  %v6359_v62 = vadd.f32 %v6333_v9, %v6281_v15 }
 0xbf2   :  { %v6373_v57 = vmul.f32 %v6360_v32, %v6360_v32 }
 0xbf3   :  { %10596 = vtanh.f32 %v6423_v7  ;;  %v6422_v38 = vmul.f32 0.7978846, %v6409_v49  ;;  %v6372_v1 = vmul.f32 %v6359_v62, %v6359_v62 }
 0xbf4   :  { %v10593_v46 = vpop.eup %10592  ;;  %v6386_v29 = vmul.f32 %v6373_v57, %v6360_v32  ;;  %v6270_v5 = vpop.permute.xlu1 %6269 }
 0xbf5   :  { %v6447_v26 = vadd.f32 1.0, %v10593_v46  ;;  %10598 = vtanh.f32 %v6422_v38  ;;  %v6385_v54 = vmul.f32 %v6372_v1, %v6359_v62  ;;  %v6284_v44 = vmul.f32 %v6270_v5, %v14146_v20 }
 0xbf6   :  { %v10595_v16 = vpop.eup %10594  ;;  %v6399_v47 = vmul.f32 0.044715, %v6386_v29 }
 0xbf7   :  { %v6460_v23 = vmul.f32 0.5, %v6447_v26  ;;  %v6446_v41 = vadd.f32 1.0, %v10595_v16  ;;  %v6398_v45 = vmul.f32 0.044715, %v6385_v54  ;;  %v6362_v31 = vadd.f32 %v6348_v8, %v6284_v44 }
 0xbf8   :  { %v6412_v40 = vadd.f32 %v6399_v47, %v6360_v32  ;;  %v6343_v12 = vpop.permute.xlu1 %6342 }
 0xbf9   :  { %v14560_v24 = vmul.f32 %v6460_v23, %v14518_v34  ;;  %v6459_v43 = vmul.f32 0.5, %v6446_v41  ;;  %v6411_v56 = vadd.f32 %v6398_v45, %v6359_v62  ;;  %v6375_v10 = vmul.f32 %v6362_v31, %v6362_v31 }
 0xbfa   :  { %v6425_v21 = vmul.f32 0.7978846, %v6412_v40  ;;  %v6361_v59 = vadd.f32 %v6343_v12, %v6283_v36 }
 0xbfb   :  { %v14563_v20 = vmul.f32 %v6459_v43, %v14522_v53  ;;  %v6424_v60 = vmul.f32 0.7978846, %v6411_v56  ;;  %v6388_v50 = vmul.f32 %v6375_v10, %v6362_v31 }
 0xbfc   :  { %10600 = vtanh.f32 %v6425_v21  ;;  %v6374_v4 = vmul.f32 %v6361_v59, %v6361_v59 }
 0xbfd   :  { %10602 = vtanh.f32 %v6424_v60  ;;  %v6401_v15 = vmul.f32 0.044715, %v6388_v50 }
 0xbfe   :  { %v6387_v3 = vmul.f32 %v6374_v4, %v6361_v59 }
 0xbff   :  { %v6414_v27 = vadd.f32 %v6401_v15, %v6362_v31 }
 0xc00   :  { %v10597_v2 = vpop.eup %10596  ;;  %v6400_v30 = vmul.f32 0.044715, %v6387_v3 }
 0xc01   :  { %v6449_v34 = vadd.f32 1.0, %v10597_v2  ;;  %v6427_v17 = vmul.f32 0.7978846, %v6414_v27 }
 0xc02   :  { %v10599_v9 = vpop.eup %10598  ;;  %v6413_v7 = vadd.f32 %v6400_v30, %v6361_v59 }
 0xc03   :  { %v6462_v49 = vmul.f32 0.5, %v6449_v34  ;;  %v6448_v57 = vadd.f32 1.0, %v10599_v9  ;;  %10604 = vtanh.f32 %v6427_v17 }
 0xc04   :  { %v6426_v38 = vmul.f32 0.7978846, %v6413_v7 }
 0xc05   :  { %v14566_v53 = vmul.f32 %v6462_v49, %v14537_v13  ;;  %v6461_v1 = vmul.f32 0.5, %v6448_v57 }
 0xc06   :  { %10606 = vtanh.f32 %v6426_v38 }
 0xc07   :  { %v6474_v46 = vmul.f32 %v6461_v1, %v14541_v52 }
 0xc09   :  { %v10601_v29 = vpop.eup %10600 }
 0xc0a   :  { %v10603_v5 = vpop.eup %10602  ;;  %v6451_v26 = vadd.f32 1.0, %v10601_v29 }
 0xc0b   :  { %v6450_v54 = vadd.f32 1.0, %v10603_v5 }
 0xc0c   :  { %v6464_v44 = vmul.f32 0.5, %v6451_v26 }
 0xc0d   :  { %v6463_v16 = vmul.f32 0.5, %v6450_v54 }
 0xc0e   :  { %v6477_v47 = vmul.f32 %v6464_v44, %v6360_v32 }
 0xc0f   :  { %v6476_v8 = vmul.f32 %v6463_v16, %v6359_v62 }
 0xc10   :  { %v10605_v23 = vpop.eup %10604 }
 0xc11   :  { %v6453_v41 = vadd.f32 1.0, %v10605_v23 }
 0xc13   :  { %v10607_v45 = vpop.eup %10606  ;;  %v6466_v36 = vmul.f32 0.5, %v6453_v41 }
 0xc14   :  { %v6452_v40 = vadd.f32 1.0, %v10607_v45 }
 0xc15   :  { %v6479_v12 = vmul.f32 %v6466_v36, %v6362_v31 }
 0xc16   :  { %v6465_v13 = vmul.f32 0.5, %v6452_v40 }
 0xc18   :  { %v6478_v43 = vmul.f32 %v6465_v13, %v6361_v59 }
 0xc19   :  { %10876 = dma.done.wait [#allocation7 + $0x2], 1024 }
 0xc1a   :  { %10877 = vsyncadd [#allocation7 + $0x2], 4294966272  ;;  %9632 = vmatprep.subr.bf16.mxu0 %v15920_v11  ;;  %9648 = vmatprep.mubr.msk.bf16.mxu0 %vm10892_vm1, %v15920_v11  ;;  %v10610_v52 = vld [vmem:[#allocation4 + $0x38] sm:$0xff]   ;;  %v10611_v32 = vld [vmem:[#allocation4 + $0x30] sm:$0xff]   ;;  %v6500_v60 = vpack.c.bf16 %v14528_v42, %v14516_v51  ;;  %v6501_v50 = vpack.c.bf16 %v14552_v14, %v14532_v33  ;;  %v6502_v4 = vpack.c.bf16 %v14563_v20, %v14547_v48  ;;  %vm6650_vm3 = vcmask 523264  }
 0xc1b   :  { %9676 = vmatprep.subr.mxu1 %v15920_v11  ;;  %9702 = vmatprep.mubr.msk.f32.mxu1 %vm10892_vm1, %v15920_v11  ;;  %v10612_v62 = vld [vmem:[#allocation4 + $0x28] sm:$0xff]   ;;  %v10613_v31 = vld [vmem:[#allocation4 + $0x20] sm:$0xff]   ;;  %v10614_v56 = vld [vmem:[#allocation4 + $0x18] sm:$0xff]   ;;  %v6503_v51 = vpack.c.bf16 %v6474_v46, %v14560_v24  ;;  %v6504_v42 = vpack.c.bf16 %v6476_v8, %v14566_v53  ;;  %v6505_v33 = vpack.c.bf16 %v6478_v43, %v6477_v47  ;;  %vm6687_vm4 = vcmask 519168  }
 0xc1c   :  { %10608 = vset.pattern.permute.xlu0 %v15859_v6  ;;  %10609 = vset.pattern.permute.xlu1 %v15859_v6  ;;  %v10615_v10 = vld [vmem:[#allocation4 + $0x10] sm:$0xff]   ;;  %v10616_v21 = vld [vmem:[#allocation4 + $0x8] sm:$0xff]   ;;  %v10617_v59 = vld [vmem:[#allocation4] sm:$0xff]   ;;  %v6506_v48 = vpack.c.bf16 %v6479_v12, %v6479_v12 }
 0xc1d   :  { %9633 = vmatpush3.bf16.msra.mxu0 %v10610_v52  ;;  %v14618_v9 = vld [vmem:[%s15508_s11] ss:$0 sm:$0xff] }
 0xc1e   :  { %9634 = vmatprep.subr.bf16.mxu0 %v15920_v11 }
 0xc21   :  { %9635 = vmatpush3.bf16.msra.mxu0 %v10611_v32 }
 0xc22   :  { %9636 = vmatprep.subr.bf16.mxu0 %v15920_v11 }
 0xc25   :  { %9637 = vmatpush3.bf16.msra.mxu0 %v10612_v62 }
 0xc26   :  { %9638 = vmatprep.subr.bf16.mxu0 %v15920_v11 }
 0xc29   :  { %9639 = vmatpush3.bf16.msra.mxu0 %v10613_v31 }
 0xc2a   :  { %9640 = vmatprep.subr.bf16.mxu0 %v15920_v11 }
 0xc2d   :  { %9641 = vmatpush3.bf16.msra.mxu0 %v10614_v56 }
 0xc2e   :  { %9642 = vmatprep.subr.bf16.mxu0 %v15920_v11 }
 0xc31   :  { %9643 = vmatpush3.bf16.msra.mxu0 %v10615_v10 }
 0xc32   :  { %9644 = vmatprep.subr.bf16.mxu0 %v15920_v11 }
 0xc35   :  { %9645 = vmatpush3.bf16.msra.mxu0 %v10616_v21 }
 0xc36   :  { %9646 = vmatprep.subr.bf16.mxu0 %v15920_v11 }
 0xc39   :  { %9647 = vmatpush3.bf16.msra.mxu0 %v10617_v59 }
 0xc3a   :  { %9741 = vmatprep.subr.mxu0 %v15920_v11 }
 0xc3c   :  { %9649 = vmatmul.mubr.bf16.vlgmr.msra.gmra.mxu0 %v6500_v60 }
 0xc3d   :  { %9652 = vmatprep.mubr.msk.bf16.mxu0 %vm10892_vm1, %v15920_v11 }
 0xc44   :  { %9653 = vmatmul.mubr.bf16.gmra.mxu0 %v6501_v50 }
 0xc45   :  { %9656 = vmatprep.mubr.msk.bf16.mxu0 %vm10892_vm1, %v15920_v11 }
 0xc4c   :  { %9657 = vmatmul.mubr.bf16.gmra.mxu0 %v6502_v4 }
 0xc4d   :  { %9660 = vmatprep.mubr.msk.bf16.mxu0 %vm10892_vm1, %v15920_v11 }
 0xc54   :  { %9661 = vmatmul.mubr.bf16.gmra.mxu0 %v6503_v51 }
 0xc55   :  { %9664 = vmatprep.mubr.msk.bf16.mxu0 %vm10892_vm1, %v15920_v11 }
 0xc5c   :  { %9665 = vmatmul.mubr.bf16.gmra.mxu0 %v6504_v42 }
 0xc5d   :  { %9668 = vmatprep.mubr.msk.bf16.mxu0 %vm10892_vm1, %v15920_v11 }
 0xc64   :  { %9669 = vmatmul.mubr.bf16.gmra.mxu0 %v6505_v33 }
 0xc65   :  { %9672 = vmatprep.mubr.msk.bf16.mxu0 %vm10892_vm1, %v15920_v11 }
 0xc6c   :  { %9673 = vmatmul.mubr.bf16.gmra.mxu0 %v6506_v48 }
 0xc6d   :  { %9767 = vmatprep.mubr.msk.f32.mxu0 %vm10892_vm1, %v15920_v11 }
 0xcfc   :  { %v14607_v14 = vpop.f32.mrf.mxu0 }
 0xcfe   :  { %v9650_v24 = vpop.f32.mrf.mxu0 }
 0xd00   :  { %v14609_v20 = vpop.f32.mrf.mxu0 }
 0xd02   :  { %v9651_v15 = vpop.f32.mrf.mxu0 }
 0xd04   :  { %v14611_v3 = vpop.f32.mrf.mxu0 }
 0xd06   :  { %v9654_v27 = vpop.f32.mrf.mxu0 }
 0xd08   :  { %v14613_v2 = vpop.f32.mrf.mxu0 }
 0xd0a   :  { %v9655_v30 = vpop.f32.mrf.mxu0 }
 0xd0c   :  { %v6612_v34 = vpop.f32.mrf.mxu0 }
 0xd0e   :  { %v9658_v17 = vpop.f32.mrf.mxu0 }
 0xd0f   :  { %v14675_v17 = vadd.f32 %v14618_v9, %v6612_v34  ;;  %v14689_v34 = vadd.f32 %v14618_v9, %v14611_v3 }
 0xd10   :  { %v6615_v7 = vpop.f32.mrf.mxu0 }
 0xd11   :  { %v14621_v49 = vadd.f32 %v14618_v9, %v6615_v7 }
 0xd12   :  { %v9659_v57 = vpop.f32.mrf.mxu0 }
 0xd13   :  { %v6666_v38 = vsel %vm6650_vm3, %v14621_v49, 0.0 }
 0xd14   :  { %6667 = vadd.xlane.f32.xlu1 %v6666_v38  ;;  %v6620_v53 = vpop.f32.mrf.mxu0 }
 0xd15   :  { %v14626_v1 = vadd.f32 %v14618_v9, %v6620_v53 }
 0xd16   :  { %v9662_v46 = vpop.f32.mrf.mxu0 }
 0xd17   :  { %v6669_v29 = vsel %vm6650_vm3, %v14626_v1, 0.0  ;;  %v14681_v46 = vadd.f32 %v14618_v9, %v14613_v2  ;;  %v6709_v2 = vmul.f32 %v14621_v49, %v14621_v49 }
 0xd18   :  { %6670 = vadd.xlane.f32.xlu1 %v6669_v29  ;;  %v6623_v5 = vpop.f32.mrf.mxu0  ;;  %v6663_v29 = vsel %vm6650_vm3, %v14675_v17, 0.0 }
 0xd19   :  { %v14631_v26 = vadd.f32 %v14618_v9, %v6623_v5  ;;  %v6710_v5 = vmul.f32 %v14626_v1, %v14626_v1  ;;  %v6732_v3 = vsel %vm6650_vm3, %v6709_v2, 0.0 }
 0xd1a   :  { %v9663_v54 = vpop.f32.mrf.mxu0 }
 0xd1b   :  { %v6672_v44 = vsel %vm6650_vm3, %v14631_v26, 0.0  ;;  %v6711_v16 = vmul.f32 %v14631_v26, %v14631_v26  ;;  %v6660_v54 = vsel %vm6650_vm3, %v14681_v46, 0.0 }
 0xd1c   :  { %6673 = vadd.xlane.f32.xlu1 %v6672_v44  ;;  %v6628_v47 = vpop.f32.mrf.mxu0  ;;  %v6735_v44 = vsel %vm6650_vm3, %v6710_v5, 0.0 }
 0xd1d   :  { %v14638_v8 = vadd.f32 %v14618_v9, %v6628_v47  ;;  %v6738_v23 = vsel %vm6650_vm3, %v6711_v16, 0.0  ;;  %v14698_v16 = vadd.f32 %v14618_v9, %v14609_v20  ;;  %v6657_v47 = vsel %vm6650_vm3, %v14689_v34, 0.0 }
 0xd1e   :  { %6739 = vadd.xlane.f32.xlu0 %v6738_v23  ;;  %v9666_v41 = vpop.f32.mrf.mxu0  ;;  %v6708_v23 = vmul.f32 %v14675_v17, %v14675_v17 }
 0xd1f   :  { %v6675_v45 = vsel %vm6650_vm3, %v14638_v8, 0.0  ;;  %v6712_v36 = vmul.f32 %v14638_v8, %v14638_v8  ;;  %v14707_v41 = vadd.f32 %v14618_v9, %v14607_v14  ;;  %v6706_v14 = vmul.f32 %v14689_v34, %v14689_v34 }
 0xd20   :  { %6676 = vadd.xlane.f32.xlu1 %v6675_v45  ;;  %v6631_v40 = vpop.f32.mrf.mxu0  ;;  %v6654_v45 = vsel %vm6650_vm3, %v14698_v16, 0.0  ;;  %v6729_v20 = vsel %vm6650_vm3, %v6708_v23, 0.0 }
 0xd21   :  { %v14646_v12 = vadd.f32 %v14618_v9, %v6631_v40  ;;  %v6741_v13 = vsel %vm6650_vm3, %v6712_v36, 0.0  ;;  %v6707_v36 = vmul.f32 %v14681_v46, %v14681_v46  ;;  %v6651_v40 = vsel %vm6650_vm3, %v14707_v41, 0.0 }
 0xd22   :  { %6742 = vadd.xlane.f32.xlu0 %v6741_v13  ;;  %v9667_v43 = vpop.f32.mrf.mxu0 }
 0xd23   :  { %v6678_v52 = vsel %vm6650_vm3, %v14646_v12, 0.0  ;;  %v6713_v32 = vmul.f32 %v14646_v12, %v14646_v12  ;;  %v6726_v13 = vsel %vm6650_vm3, %v6707_v36, 0.0  ;;  %v6704_v43 = vmul.f32 %v14707_v41, %v14707_v41 }
 0xd24   :  { %6679 = vadd.xlane.f32.xlu1 %v6678_v52  ;;  %v6636_v62 = vpop.f32.mrf.mxu0  ;;  %v6723_v52 = vsel %vm6650_vm3, %v6706_v14, 0.0 }
 0xd25   :  { %v14654_v31 = vadd.f32 %v14618_v9, %v6636_v62  ;;  %v6744_v56 = vsel %vm6650_vm3, %v6713_v32, 0.0  ;;  %v6705_v32 = vmul.f32 %v14698_v16, %v14698_v16 }
 0xd26   :  { %6745 = vadd.xlane.f32.xlu0 %v6744_v56  ;;  %v9670_v10 = vpop.f32.mrf.mxu0 }
 0xd27   :  { %v6681_v21 = vsel %vm6650_vm3, %v14654_v31, 0.0  ;;  %v6714_v59 = vmul.f32 %v14654_v31, %v14654_v31  ;;  %v6720_v62 = vsel %vm6650_vm3, %v6705_v32, 0.0 }
 0xd28   :  { %6682 = vadd.xlane.f32.xlu1 %v6681_v21  ;;  %v6639_v60 = vpop.f32.mrf.mxu0 }
 0xd29   :  { %v14662_v50 = vadd.f32 %v14618_v9, %v6639_v60  ;;  %v6747_v4 = vsel %vm6650_vm3, %v6714_v59, 0.0 }
 0xd2a   :  { %6748 = vadd.xlane.f32.xlu0 %v6747_v4  ;;  %v9671_v51 = vpop.f32.mrf.mxu0 }
 0xd2b   :  { %v6684_v48 = vsel %vm6650_vm3, %v14662_v50, 0.0  ;;  %v6715_v24 = vmul.f32 %v14662_v50, %v14662_v50 }
 0xd2c   :  { %v6644_v42 = vpop.f32.mrf.mxu0 }
 0xd2d   :  { %v14666_v33 = vadd.f32 %v14618_v9, %v6644_v42  ;;  %v6750_v7 = vsel %vm6650_vm3, %v6715_v24, 0.0  ;;  %v6717_v9 = vsel %vm6650_vm3, %v6704_v43, 0.0 }
 0xd2e   :  { %6685 = vadd.xlane.f32.xlu0 %v6684_v48  ;;  %v9674_v15 = vpop.f32.mrf.mxu0 }
 0xd2f   :  { %v6716_v27 = vmul.f32 %v14666_v33, %v14666_v33  ;;  %v6688_v53 = vsel %vm6687_vm4, %v14666_v33, 0.0 }
 0xd30   :  { %v6647_v30 = vpop.f32.mrf.mxu0 }
 0xd31   :  { %v6753_v57 = vsel %vm6687_vm4, %v6716_v27, 0.0 }
 0xd32   :  { %6751 = vadd.xlane.f32.xlu0 %v6750_v7  ;;  %6754 = vadd.xlane.f32.xlu1 %v6753_v57  ;;  %v9675_v38 = vpop.f32.mrf.mxu0 }
 0xd36   :  { %6664 = vadd.xlane.f32.xlu1 %v6663_v29  ;;  %6689 = vadd.xlane.f32.xlu0 %v6688_v53 }
 0xd3a   :  { %6661 = vadd.xlane.f32.xlu1 %v6660_v54  ;;  %6736 = vadd.xlane.f32.xlu0 %v6735_v44 }
 0xd3e   :  { %6658 = vadd.xlane.f32.xlu1 %v6657_v47  ;;  %6733 = vadd.xlane.f32.xlu0 %v6732_v3 }
 0xd42   :  { %6655 = vadd.xlane.f32.xlu1 %v6654_v45  ;;  %6730 = vadd.xlane.f32.xlu0 %v6729_v20 }
 0xd46   :  { %6652 = vadd.xlane.f32.xlu1 %v6651_v40  ;;  %6727 = vadd.xlane.f32.xlu0 %v6726_v13 }
 0xd4a   :  { %6718 = vadd.xlane.f32.xlu1 %v6717_v9  ;;  %6724 = vadd.xlane.f32.xlu0 %v6723_v52 }
 0xd4e   :  { %6721 = vadd.xlane.f32.xlu0 %v6720_v62 }
 0xd9d   :  { %v14726_v56 = vpop.xlane.xlu1 %6667 }
 0xda1   :  { %v6671_v10 = vpop.xlane.xlu1 %6670 }
 0xda2   :  { %v6697_v62 = vmul.f32 0.015625, %v6671_v10 }
 0xda5   :  { %v6674_v21 = vpop.xlane.xlu1 %6673 }
 0xda6   :  { %v6698_v14 = vmul.f32 0.015625, %v6674_v21 }
 0xda7   :  { %v6740_v59 = vpop.xlane.xlu0 %6739 }
 0xda8   :  { %v6763_v45 = vmul.f32 0.015625, %v6740_v59 }
 0xda9   :  { %v6677_v60 = vpop.xlane.xlu1 %6676 }
 0xdaa   :  { %v6699_v13 = vmul.f32 0.015625, %v6677_v60  ;;  %v6696_v60 = vmul.f32 0.015625, %v14726_v56 }
 0xdab   :  { %v6743_v4 = vpop.xlane.xlu0 %6742 }
 0xdac   :  { %v6764_v3 = vmul.f32 0.015625, %v6743_v4 }
 0xdad   :  { %v6680_v42 = vpop.xlane.xlu1 %6679 }
 0xdae   :  { %v6700_v20 = vmul.f32 0.015625, %v6680_v42 }
 0xdaf   :  { %v6746_v51 = vpop.xlane.xlu0 %6745 }
 0xdb0   :  { %v6765_v54 = vmul.f32 0.015625, %v6746_v51 }
 0xdb1   :  { %v6683_v24 = vpop.xlane.xlu1 %6682 }
 0xdb2   :  { %v6701_v23 = vmul.f32 0.015625, %v6683_v24 }
 0xdb3   :  { %v6749_v48 = vpop.xlane.xlu0 %6748 }
 0xdb4   :  { %v6766_v29 = vmul.f32 0.015625, %v6749_v48 }
 0xdb7   :  { %v6686_v15 = vpop.xlane.xlu0 %6685 }
 0xdb8   :  { %v6702_v44 = vmul.f32 0.015625, %v6686_v15 }
 0xdbb   :  { %v6752_v27 = vpop.xlane.xlu0 %6751  ;;  %v6755_v30 = vpop.xlane.xlu1 %6754 }
 0xdbc   :  { %v6768_v7 = vmul.f32 0.015625, %v6755_v30  ;;  %v6767_v57 = vmul.f32 0.015625, %v6752_v27 }
 0xdbe   :  { %9742 = vmatpush3.msk.msra.mxu0 %vm2528_vm0, %v6768_v7 }
 0xdbf   :  { %9743 = vmatprep.subr.mxu0 %v15920_v11  ;;  %v6665_v38 = vpop.xlane.xlu1 %6664  ;;  %v6690_v53 = vpop.xlane.xlu0 %6689 }
 0xdc0   :  { %v6703_v5 = vmul.f32 0.015625, %v6690_v53  ;;  %9744 = vmatpush3.msra.mxu0 %v6767_v57  ;;  %v6695_v4 = vmul.f32 0.015625, %v6665_v38 }
 0xdc1   :  { %9745 = vmatprep.subr.mxu0 %v15920_v11 }
 0xdc2   :  { %9677 = vmatpush3.msk.msra.mxu1 %vm2528_vm0, %v6703_v5  ;;  %9746 = vmatpush3.msra.mxu0 %v6766_v29 }
 0xdc3   :  { %9747 = vmatprep.subr.mxu0 %v15920_v11  ;;  %v6662_v2 = vpop.xlane.xlu1 %6661  ;;  %9678 = vmatprep.subr.mxu1 %v15920_v11  ;;  %v6737_v47 = vpop.xlane.xlu0 %6736 }
 0xdc4   :  { %9679 = vmatpush3.msra.mxu1 %v6702_v44  ;;  %9748 = vmatpush3.msra.mxu0 %v6765_v54  ;;  %v6762_v43 = vmul.f32 0.015625, %v6737_v47  ;;  %v6694_v42 = vmul.f32 0.015625, %v6662_v2 }
 0xdc5   :  { %9680 = vmatprep.subr.mxu1 %v15920_v11  ;;  %9749 = vmatprep.subr.mxu0 %v15920_v11 }
 0xdc6   :  { %9681 = vmatpush3.msra.mxu1 %v6701_v23  ;;  %9750 = vmatpush3.msra.mxu0 %v6764_v3 }
 0xdc7   :  { %9751 = vmatprep.subr.mxu0 %v15920_v11  ;;  %v6659_v36 = vpop.xlane.xlu1 %6658  ;;  %9682 = vmatprep.subr.mxu1 %v15920_v11  ;;  %v6734_v40 = vpop.xlane.xlu0 %6733 }
 0xdc8   :  { %9683 = vmatpush3.msra.mxu1 %v6700_v20  ;;  %9752 = vmatpush3.msra.mxu0 %v6763_v45  ;;  %v6761_v9 = vmul.f32 0.015625, %v6734_v40  ;;  %v6693_v56 = vmul.f32 0.015625, %v6659_v36 }
 0xdc9   :  { %9684 = vmatprep.subr.mxu1 %v15920_v11  ;;  %9753 = vmatprep.subr.mxu0 %v15920_v11 }
 0xdca   :  { %9685 = vmatpush3.msra.mxu1 %v6699_v13  ;;  %9754 = vmatpush3.msra.mxu0 %v6762_v43 }
 0xdcb   :  { %v6656_v52 = vpop.xlane.xlu1 %6655  ;;  %9686 = vmatprep.subr.mxu1 %v15920_v11  ;;  %9755 = vmatprep.subr.mxu0 %v15920_v11  ;;  %v6731_v32 = vpop.xlane.xlu0 %6730 }
 0xdcc   :  { %v6760_v59 = vmul.f32 0.015625, %v6731_v32  ;;  %9687 = vmatpush3.msra.mxu1 %v6698_v14  ;;  %9756 = vmatpush3.msra.mxu0 %v6761_v9  ;;  %v6692_v15 = vmul.f32 0.015625, %v6656_v52 }
 0xdcd   :  { %9688 = vmatprep.subr.mxu1 %v15920_v11  ;;  %9757 = vmatprep.subr.mxu0 %v15920_v11 }
 0xdce   :  { %9689 = vmatpush3.msra.mxu1 %v6697_v62  ;;  %9758 = vmatpush3.msra.mxu0 %v6760_v59 }
 0xdcf   :  { %9690 = vmatprep.subr.mxu1 %v15920_v11  ;;  %v6728_v21 = vpop.xlane.xlu0 %6727  ;;  %9759 = vmatprep.subr.mxu0 %v15920_v11  ;;  %v6653_v10 = vpop.xlane.xlu1 %6652 }
 0xdd0   :  { %v6759_v51 = vmul.f32 0.015625, %v6728_v21  ;;  %9691 = vmatpush3.msra.mxu1 %v6696_v60  ;;  %v6691_v7 = vmul.f32 0.015625, %v6653_v10 }
 0xdd1   :  { %9692 = vmatprep.subr.mxu1 %v15920_v11 }
 0xdd2   :  { %9693 = vmatpush3.msra.mxu1 %v6695_v4  ;;  %9760 = vmatpush3.msra.mxu0 %v6759_v51 }
 0xdd3   :  { %9694 = vmatprep.subr.mxu1 %v15920_v11  ;;  %v6725_v48 = vpop.xlane.xlu0 %6724  ;;  %9761 = vmatprep.subr.mxu0 %v15920_v11  ;;  %v6719_v27 = vpop.xlane.xlu1 %6718 }
 0xdd4   :  { %v6758_v24 = vmul.f32 0.015625, %v6725_v48  ;;  %9695 = vmatpush3.msra.mxu1 %v6694_v42  ;;  %v6756_v38 = vmul.f32 0.015625, %v6719_v27 }
 0xdd5   :  { %9696 = vmatprep.subr.mxu1 %v15920_v11 }
 0xdd6   :  { %9697 = vmatpush3.msra.mxu1 %v6693_v56  ;;  %9762 = vmatpush3.msra.mxu0 %v6758_v24 }
 0xdd7   :  { %9698 = vmatprep.subr.mxu1 %v15920_v11  ;;  %v6722_v30 = vpop.xlane.xlu0 %6721  ;;  %9763 = vmatprep.subr.mxu0 %v15920_v11 }
 0xdd8   :  { %v6757_v57 = vmul.f32 0.015625, %v6722_v30  ;;  %9699 = vmatpush3.msra.mxu1 %v6692_v15 }
 0xdd9   :  { %9700 = vmatprep.subr.mxu1 %v15920_v11 }
 0xdda   :  { %9701 = vmatpush3.msra.mxu1 %v6691_v7  ;;  %9764 = vmatpush3.msra.mxu0 %v6757_v57 }
 0xddb   :  { %9703 = vmatmul.mubr.msk.f32.vlgmr.msra.gmra.mxu1 %vm2685_vm2, %v15935_v35  ;;  %9765 = vmatprep.subr.mxu0 %v15920_v11 }
 0xddc   :  { %9766 = vmatpush3.msra.mxu0 %v6756_v38  ;;  %9705 = vmatprep.mubr.msk.f32.mxu1 %vm10892_vm1, %v15920_v11 }
 0xddd   :  { %9768 = vmatmul.mubr.msk.f32.vlgmr.msra.gmra.mxu0 %vm2685_vm2, %v15935_v35 }
 0xdde   :  { %9770 = vmatprep.mubr.msk.f32.mxu0 %vm10892_vm1, %v15920_v11 }
 0xddf   :  { %9706 = vmatmul.mubr.msk.f32.gmra.mxu1 %vm2685_vm2, %v15936_v58 }
 0xde0   :  { %9708 = vmatprep.mubr.msk.f32.mxu1 %vm10892_vm1, %v15920_v11 }
 0xde1   :  { %9771 = vmatmul.mubr.msk.f32.gmra.mxu0 %vm2685_vm2, %v15936_v58 }
 0xde2   :  { %9773 = vmatprep.mubr.msk.f32.mxu0 %vm10892_vm1, %v15920_v11 }
 0xde3   :  { %9709 = vmatmul.mubr.msk.f32.gmra.mxu1 %vm2685_vm2, %v15937_v22 }
 0xde4   :  { %9711 = vmatprep.mubr.msk.f32.mxu1 %vm10892_vm1, %v15920_v11 }
 0xde5   :  { %9774 = vmatmul.mubr.msk.f32.gmra.mxu0 %vm2685_vm2, %v15937_v22 }
 0xde6   :  { %9776 = vmatprep.mubr.msk.f32.mxu0 %vm10892_vm1, %v15920_v11 }
 0xde7   :  { %9712 = vmatmul.mubr.msk.f32.gmra.mxu1 %vm2685_vm2, %v15938_v61 }
 0xde8   :  { %9714 = vmatprep.mubr.msk.f32.mxu1 %vm10892_vm1, %v15920_v11 }
 0xde9   :  { %9777 = vmatmul.mubr.msk.f32.gmra.mxu0 %vm2685_vm2, %v15938_v61 }
 0xdea   :  { %9779 = vmatprep.mubr.msk.f32.mxu0 %vm10892_vm1, %v15920_v11 }
 0xdeb   :  { %9715 = vmatmul.mubr.msk.f32.gmra.mxu1 %vm2685_vm2, %v15939_v55 }
 0xdec   :  { %9717 = vmatprep.mubr.msk.f32.mxu1 %vm10892_vm1, %v15920_v11 }
 0xded   :  { %9780 = vmatmul.mubr.msk.f32.gmra.mxu0 %vm2685_vm2, %v15939_v55 }
 0xdee   :  { %9782 = vmatprep.mubr.msk.f32.mxu0 %vm10892_vm1, %v15920_v11 }
 0xdef   :  { %9718 = vmatmul.mubr.msk.f32.gmra.mxu1 %vm2685_vm2, %v15940_v18 }
 0xdf0   :  { %9720 = vmatprep.mubr.msk.f32.mxu1 %vm10892_vm1, %v15920_v11 }
 0xdf1   :  { %9783 = vmatmul.mubr.msk.f32.gmra.mxu0 %vm2685_vm2, %v15940_v18 }
 0xdf2   :  { %9785 = vmatprep.mubr.msk.f32.mxu0 %vm10892_vm1, %v15920_v11 }
 0xdf3   :  { %9721 = vmatmul.mubr.msk.f32.gmra.mxu1 %vm2685_vm2, %v15951_v19 }
 0xdf4   :  { %9723 = vmatprep.mubr.msk.f32.mxu1 %vm10892_vm1, %v15920_v11 }
 0xdf5   :  { %9786 = vmatmul.mubr.msk.f32.gmra.mxu0 %vm2685_vm2, %v15951_v19 }
 0xdf6   :  { %9788 = vmatprep.mubr.msk.f32.mxu0 %vm10892_vm1, %v15920_v11 }
 0xdf7   :  { %9724 = vmatmul.mubr.msk.f32.gmra.mxu1 %vm2685_vm2, %v15952_v37 }
 0xdf8   :  { %9726 = vmatprep.mubr.msk.f32.mxu1 %vm10892_vm1, %v15920_v11 }
 0xdf9   :  { %9789 = vmatmul.mubr.msk.f32.gmra.mxu0 %vm2685_vm2, %v15952_v37 }
 0xdfa   :  { %9791 = vmatprep.mubr.msk.f32.mxu0 %vm10892_vm1, %v15920_v11 }
 0xdfb   :  { %9727 = vmatmul.mubr.msk.f32.gmra.mxu1 %vm2685_vm2, %v15953_v0 }
 0xdfc   :  { %9729 = vmatprep.mubr.msk.f32.mxu1 %vm10892_vm1, %v15920_v11 }
 0xdfd   :  { %9792 = vmatmul.mubr.msk.f32.gmra.mxu0 %vm2685_vm2, %v15953_v0 }
 0xdfe   :  { %9794 = vmatprep.mubr.msk.f32.mxu0 %vm10892_vm1, %v15920_v11 }
 0xdff   :  { %9730 = vmatmul.mubr.msk.f32.gmra.mxu1 %vm2685_vm2, %v15954_v25 }
 0xe00   :  { %9732 = vmatprep.mubr.msk.f32.mxu1 %vm10892_vm1, %v15920_v11 }
 0xe01   :  { %9795 = vmatmul.mubr.msk.f32.gmra.mxu0 %vm2685_vm2, %v15954_v25 }
 0xe02   :  { %9797 = vmatprep.mubr.msk.f32.mxu0 %vm10892_vm1, %v15920_v11 }
 0xe03   :  { %9733 = vmatmul.mubr.msk.f32.gmra.mxu1 %vm2685_vm2, %v15955_v63 }
 0xe04   :  { %9735 = vmatprep.mubr.msk.f32.mxu1 %vm10892_vm1, %v15920_v11 }
 0xe05   :  { %9798 = vmatmul.mubr.msk.f32.gmra.mxu0 %vm2685_vm2, %v15955_v63 }
 0xe06   :  { %9800 = vmatprep.mubr.msk.f32.mxu0 %vm10892_vm1, %v15920_v11 }
 0xe07   :  { %9736 = vmatmul.mubr.msk.f32.gmra.mxu1 %vm2685_vm2, %v15956_v39 }
 0xe08   :  { %9738 = vmatprep.mubr.msk.f32.mxu1 %vm10892_vm1, %v15920_v11 }
 0xe09   :  { %9801 = vmatmul.mubr.msk.f32.gmra.mxu0 %vm2685_vm2, %v15956_v39 }
 0xe0a   :  { %9803 = vmatprep.mubr.msk.f32.mxu0 %vm10892_vm1, %v15920_v11 }
 0xe0b   :  { %9739 = vmatmul.mubr.msk.f32.gmra.mxu1 %vm2685_vm2, %v15957_v28 }
 0xe0d   :  { %9804 = vmatmul.mubr.msk.f32.gmra.mxu0 %vm2685_vm2, %v15957_v28 }
 0xe9b   :  { %v6838_v35 = vpop.f32.mrf.mxu1 }
 0xe9c   :  { %v14855_v58 = vmul.f32 0.5, %v6838_v35 }
 0xe9d   :  { %v9704_v22 = vpop.f32.mrf.mxu1  ;;  %v6984_v61 = vpop.f32.mrf.mxu0 }
 0xe9e   :  { %v7061_v55 = vmul.f32 %v14855_v58, %v14855_v58  ;;  %v7048_v18 = vmul.f32 0.5, %v6984_v61 }
 0xe9f   :  { %v6843_v19 = vpop.f32.mrf.mxu1  ;;  %v9769_v37 = vpop.f32.mrf.mxu0 }
 0xea0   :  { %v7074_v0 = vsub.f32 %v7048_v18, %v7061_v55  ;;  %v14859_v25 = vmul.f32 0.5, %v6843_v19  ;;  %v7100_v55 = vld [vmem:[%s15509_s12] sm:$0xff] }
 0xea1   :  { %v9707_v63 = vpop.f32.mrf.mxu1  ;;  %v6989_v39 = vpop.f32.mrf.mxu0 }
 0xea2   :  { %v7087_v53 = vmax.f32 %v7074_v0, 0.0  ;;  %v7062_v28 = vmul.f32 %v14859_v25, %v14859_v25  ;;  %v7049_v29 = vmul.f32 0.5, %v6989_v39 }
 0xea3   :  { %v6848_v5 = vpop.f32.mrf.mxu1  ;;  %v9772_v54 = vpop.f32.mrf.mxu0 }
 0xea4   :  { %v7113_v44 = vadd.f32 1e-05, %v7087_v53  ;;  %v7075_v2 = vsub.f32 %v7049_v29, %v7062_v28  ;;  %v14863_v47 = vmul.f32 0.5, %v6848_v5 }
 0xea5   :  { %v9710_v3 = vpop.f32.mrf.mxu1  ;;  %v6994_v23 = vpop.f32.mrf.mxu0 }
 0xea6   :  { %10618 = vrsqrt.f32 %v7113_v44  ;;  %v7088_v45 = vmax.f32 %v7075_v2, 0.0  ;;  %v7063_v20 = vmul.f32 %v14863_v47, %v14863_v47  ;;  %v7050_v36 = vmul.f32 0.5, %v6994_v23  ;;  %v7101_v2 = vld [vmem:[%s15509_s12 + $0x8] sm:$0xff] }
 0xea7   :  { %v6853_v40 = vpop.f32.mrf.mxu1  ;;  %v9775_v13 = vpop.f32.mrf.mxu0 }
 0xea8   :  { %v7114_v43 = vadd.f32 1e-05, %v7088_v45  ;;  %v7076_v14 = vsub.f32 %v7050_v36, %v7063_v20  ;;  %v14867_v9 = vmul.f32 0.5, %v6853_v40  ;;  %v7152_v45 = vld [vmem:[%s15510_s13] sm:$0xff] }
 0xea9   :  { %v9713_v52 = vpop.f32.mrf.mxu1  ;;  %v6999_v32 = vpop.f32.mrf.mxu0 }
 0xeaa   :  { %10620 = vrsqrt.f32 %v7114_v43  ;;  %v7089_v62 = vmax.f32 %v7076_v14, 0.0  ;;  %v7064_v59 = vmul.f32 %v14867_v9, %v14867_v9  ;;  %v7051_v60 = vmul.f32 0.5, %v6999_v32 }
 0xeab   :  { %v6858_v21 = vpop.f32.mrf.mxu1  ;;  %v9778_v4 = vpop.f32.mrf.mxu0 }
 0xeac   :  { %v7115_v51 = vadd.f32 1e-05, %v7089_v62  ;;  %v7077_v10 = vsub.f32 %v7051_v60, %v7064_v59  ;;  %v14871_v42 = vmul.f32 0.5, %v6858_v21  ;;  %v7102_v21 = vld [vmem:[%s15509_s12 + $0x10] sm:$0xff] }
 0xead   :  { %v9716_v48 = vpop.f32.mrf.mxu1  ;;  %v7004_v56 = vpop.f32.mrf.mxu0 }
 0xeae   :  { %10622 = vrsqrt.f32 %v7115_v51  ;;  %v7090_v24 = vmax.f32 %v7077_v10, 0.0  ;;  %v7065_v15 = vmul.f32 %v14871_v42, %v14871_v42  ;;  %v7052_v27 = vmul.f32 0.5, %v7004_v56 }
 0xeaf   :  { %v6863_v30 = vpop.f32.mrf.mxu1  ;;  %v9781_v7 = vpop.f32.mrf.mxu0 }
 0xeb0   :  { %v7116_v57 = vadd.f32 1e-05, %v7090_v24  ;;  %v7078_v38 = vsub.f32 %v7052_v27, %v7065_v15  ;;  %v14875_v35 = vmul.f32 0.5, %v6863_v30 }
 0xeb1   :  { %v9719_v22 = vpop.f32.mrf.mxu1  ;;  %v7009_v61 = vpop.f32.mrf.mxu0 }
 0xeb2   :  { %v7091_v18 = vmax.f32 %v7078_v38, 0.0  ;;  %v7066_v19 = vmul.f32 %v14875_v35, %v14875_v35  ;;  %v7053_v37 = vmul.f32 0.5, %v7009_v61  ;;  %10624 = vrsqrt.f32 %v7116_v57  ;;  %v7153_v22 = vld [vmem:[%s15510_s13 + $0x8] sm:$0xff] }
 0xeb3   :  { %v10619_v0 = vpop.eup %10618  ;;  %v6868_v63 = vpop.f32.mrf.mxu1 }
 0xeb4   :  { %v9784_v39 = vpop.f32.mrf.mxu0  ;;  %v7117_v53 = vadd.f32 1e-05, %v7091_v18  ;;  %v7079_v28 = vsub.f32 %v7053_v37, %v7066_v19  ;;  %v14882_v29 = vmul.f32 0.5, %v6868_v63  ;;  %v7139_v5 = vmul.f32 %v10619_v0, %v7100_v55  ;;  %v7154_v18 = vld [vmem:[%s15510_s13 + $0x10] sm:$0xff] }
 0xeb5   :  { %v9722_v54 = vpop.f32.mrf.mxu1 }
 0xeb6   :  { %v7014_v44 = vpop.f32.mrf.mxu0  ;;  %10626 = vrsqrt.f32 %v7117_v53  ;;  %v7067_v3 = vmul.f32 %v14882_v29, %v14882_v29  ;;  %7193 = vperm.xlu0 %10608, %v7139_v5   ;;  %v7092_v36 = vmax.f32 %v7079_v28, 0.0  ;;  %v7165_v43 = vmul.f32 %v7139_v5, %v14855_v58  ;;  %v7103_v5 = vld [vmem:[%s15509_s12 + $0x18] sm:$0xff] }
 0xeb7   :  { %v7054_v23 = vmul.f32 0.5, %v7014_v44  ;;  %v10621_v20 = vpop.eup %10620  ;;  %v6873_v40 = vpop.f32.mrf.mxu1 }
 0xeb8   :  { %v9787_v13 = vpop.f32.mrf.mxu0  ;;  %v14893_v52 = vmul.f32 0.5, %v6873_v40  ;;  %v7140_v32 = vmul.f32 %v10621_v20, %v7101_v2  ;;  %v7178_v60 = vsub.f32 %v7152_v45, %v7165_v43  ;;  %v7118_v10 = vadd.f32 1e-05, %v7092_v36 }
 0xeb9   :  { %v7080_v14 = vsub.f32 %v7054_v23, %v7067_v3  ;;  %v9725_v62 = vpop.f32.mrf.mxu1  ;;  %v7104_v3 = vld [vmem:[%s15509_s12 + $0x20] sm:$0xff] }
 0xeba   :  { %v7019_v59 = vpop.f32.mrf.mxu0  ;;  %7198 = vperm.xlu1 %10609, %v7140_v32   ;;  %v7068_v48 = vmul.f32 %v14893_v52, %v14893_v52  ;;  %7271 = vperm.xlu0 %10608, %v7178_v60   ;;  %v7166_v7 = vmul.f32 %v7140_v32, %v14859_v25 }
 0xebb   :  { %v7093_v4 = vmax.f32 %v7080_v14, 0.0  ;;  %v10623_v51 = vpop.eup %10622  ;;  %v7055_v56 = vmul.f32 0.5, %v7019_v59  ;;  %v6878_v58 = vpop.f32.mrf.mxu1 }
 0xebc   :  { %v9790_v24 = vpop.f32.mrf.mxu0  ;;  %v14900_v27 = vmul.f32 0.5, %v6878_v58  ;;  %v7141_v30 = vmul.f32 %v10623_v51, %v7102_v21  ;;  %v7179_v28 = vsub.f32 %v7153_v22, %v7166_v7  ;;  %v7155_v22 = vld [vmem:[%s15510_s13 + $0x18] sm:$0xff] }
 0xebd   :  { %v7119_v15 = vadd.f32 1e-05, %v7093_v4  ;;  %v9728_v57 = vpop.f32.mrf.mxu1  ;;  %v7081_v19 = vsub.f32 %v7055_v56, %v7068_v48  ;;  %v7156_v48 = vld [vmem:[%s15510_s13 + $0x20] sm:$0xff] }
 0xebe   :  { %v7024_v38 = vpop.f32.mrf.mxu0  ;;  %v7069_v61 = vmul.f32 %v14900_v27, %v14900_v27  ;;  %7203 = vperm.xlu1 %10609, %v7141_v30   ;;  %v7167_v25 = vmul.f32 %v7141_v30, %v14863_v47 }
 0xebf   :  { %10628 = vrsqrt.f32 %v7119_v15  ;;  %v7056_v55 = vmul.f32 0.5, %v7024_v38  ;;  %v6883_v37 = vpop.f32.mrf.mxu1  ;;  %v10625_v63 = vpop.eup %10624  ;;  %v7094_v36 = vmax.f32 %v7081_v19, 0.0  ;;  %v7106_v19 = vld [vmem:[%s15509_s12 + $0x30] sm:$0xff] }
 0xec0   :  { %v9793_v0 = vpop.f32.mrf.mxu0  ;;  %10630 = vrsqrt.f32 %v7118_v10  ;;  %v14912_v53 = vmul.f32 0.5, %v6883_v37  ;;  %v7180_v2 = vsub.f32 %v7154_v18, %v7167_v25  ;;  %v7142_v43 = vmul.f32 %v10625_v63, %v7103_v5 }
 0xec1   :  { %v7082_v39 = vsub.f32 %v7056_v55, %v7069_v61  ;;  %v9731_v54 = vpop.f32.mrf.mxu1  ;;  %v7120_v56 = vadd.f32 1e-05, %v7094_v36 }
 0xec2   :  { %v7029_v44 = vpop.f32.mrf.mxu0  ;;  %v7070_v47 = vmul.f32 %v14912_v53, %v14912_v53  ;;  %7276 = vperm.xlu1 %10609, %v7179_v28   ;;  %7281 = vperm.xlu0 %10608, %v7180_v2   ;;  %v7168_v30 = vmul.f32 %v7142_v43, %v14867_v9 }
 0xec3   :  { %v7095_v23 = vmax.f32 %v7082_v39, 0.0  ;;  %v7057_v45 = vmul.f32 0.5, %v7029_v44  ;;  %v10627_v20 = vpop.eup %10626  ;;  %v6888_v40 = vpop.f32.mrf.mxu1 }
 0xec4   :  { %v9796_v13 = vpop.f32.mrf.mxu0  ;;  %v14922_v62 = vmul.f32 0.5, %v6888_v40  ;;  %v7143_v59 = vmul.f32 %v10627_v20, %v7104_v3  ;;  %v7181_v39 = vsub.f32 %v7155_v22, %v7168_v30  ;;  %v7158_v40 = vld [vmem:[%s15510_s13 + $0x30] sm:$0xff]  ;;  %v7160_v22 = vld [vmem:[%s15510_s13 + $0x40] sm:$0xff] }
 0xec5   :  { %v7121_v14 = vadd.f32 1e-05, %v7095_v23  ;;  %v7083_v32 = vsub.f32 %v7057_v45, %v7070_v47  ;;  %v9734_v60 = vpop.f32.mrf.mxu1  ;;  %v7105_v23 = vld [vmem:[%s15509_s12 + $0x28] sm:$0xff] }
 0xec6   :  { %v7034_v21 = vpop.f32.mrf.mxu0  ;;  %v7071_v51 = vmul.f32 %v14922_v62, %v14922_v62  ;;  %7208 = vperm.xlu1 %10609, %v7142_v43   ;;  %v7169_v15 = vmul.f32 %v7143_v59, %v14871_v42 }
 0xec7   :  { %10632 = vrsqrt.f32 %v7121_v14  ;;  %v7096_v4 = vmax.f32 %v7083_v32, 0.0  ;;  %v7058_v10 = vmul.f32 0.5, %v7034_v21  ;;  %v6893_v58 = vpop.f32.mrf.mxu1  ;;  %v7108_v21 = vld [vmem:[%s15509_s12 + $0x40] sm:$0xff] }
 0xec8   :  { %v9799_v24 = vpop.f32.mrf.mxu0  ;;  %v14931_v38 = vmul.f32 0.5, %v6893_v58  ;;  %v7182_v18 = vsub.f32 %v7156_v48, %v7169_v15  ;;  %v7109_v58 = vld [vmem:[%s15509_s12 + $0x48] sm:$0xff] }
 0xec9   :  { %v7122_v7 = vadd.f32 1e-05, %v7096_v4  ;;  %v7084_v57 = vsub.f32 %v7058_v10, %v7071_v51  ;;  %v9737_v55 = vpop.f32.mrf.mxu1 }
 0xeca   :  { %v7039_v61 = vpop.f32.mrf.mxu0  ;;  %v7072_v9 = vmul.f32 %v14931_v38, %v14931_v38  ;;  %7213 = vperm.xlu1 %10609, %v7143_v59   ;;  %7291 = vperm.xlu0 %10608, %v7182_v18  }
 0xecb   :  { %10634 = vrsqrt.f32 %v7122_v7  ;;  %v7097_v37 = vmax.f32 %v7084_v57, 0.0  ;;  %v7059_v42 = vmul.f32 0.5, %v7039_v61  ;;  %v6898_v25 = vpop.f32.mrf.mxu1  ;;  %v7110_v61 = vld [vmem:[%s15509_s12 + $0x50] sm:$0xff] }
 0xecc   :  { %v10629_v0 = vpop.eup %10628  ;;  %10636 = vrsqrt.f32 %v7120_v56  ;;  %v9802_v63 = vpop.f32.mrf.mxu0  ;;  %v14941_v54 = vmul.f32 0.5, %v6898_v25 }
 0xecd   :  { %v7123_v28 = vadd.f32 1e-05, %v7097_v37  ;;  %v7085_v5 = vsub.f32 %v7059_v42, %v7072_v9  ;;  %v7145_v44 = vmul.f32 %v10629_v0, %v7106_v19  ;;  %v10631_v2 = vpop.eup %10630  ;;  %v9740_v47 = vpop.f32.mrf.mxu1  ;;  %v7159_v63 = vld [vmem:[%s15510_s13 + $0x38] sm:$0xff] }
 0xece   :  { %v7044_v3 = vpop.f32.mrf.mxu0  ;;  %v7073_v20 = vmul.f32 %v14941_v54, %v14941_v54  ;;  %7286 = vperm.xlu1 %10609, %v7181_v39   ;;  %v7144_v59 = vmul.f32 %v10631_v2, %v7105_v23  ;;  %v7162_v39 = vld [vmem:[%s15510_s13 + $0x50] sm:$0xff] }
 0xecf   :  { %10638 = vrsqrt.f32 %v7123_v28  ;;  %v7098_v45 = vmax.f32 %v7085_v5, 0.0  ;;  %v7060_v36 = vmul.f32 0.5, %v7044_v3  ;;  %v7171_v13 = vmul.f32 %v7145_v44, %v14882_v29  ;;  %v7157_v29 = vld [vmem:[%s15510_s13 + $0x28] sm:$0xff]  ;;  %v7112_v28 = vld [vmem:[%s15509_s12 + $0x60] sm:$0xf] }
 0xed0   :  { %v9805_v43 = vpop.f32.mrf.mxu0  ;;  %v7170_v48 = vmul.f32 %v7144_v59, %v14875_v35  ;;  %v7107_v35 = vld [vmem:[%s15509_s12 + $0x38] sm:$0xff] }
 0xed1   :  { %v7124_v14 = vadd.f32 1e-05, %v7098_v45  ;;  %v7086_v32 = vsub.f32 %v7060_v36, %v7073_v20  ;;  %v7184_v60 = vsub.f32 %v7158_v40, %v7171_v13  ;;  %v7161_v45 = vld [vmem:[%s15510_s13 + $0x48] sm:$0xff]  ;;  %v7163_v40 = vld [vmem:[%s15510_s13 + $0x58] sm:$0xff] }
 0xed2   :  { %7218 = vperm.xlu1 %10609, %v7144_v59   ;;  %v7183_v30 = vsub.f32 %v7157_v29, %v7170_v48 }
 0xed3   :  { %10640 = vrsqrt.f32 %v7124_v14  ;;  %v7099_v4 = vmax.f32 %v7086_v32, 0.0  ;;  %7301 = vperm.xlu0 %10608, %v7184_v60  }
 0xed4   :  { %v10633_v51 = vpop.eup %10632 }
 0xed5   :  { %v7125_v10 = vadd.f32 1e-05, %v7099_v4  ;;  %v7147_v56 = vmul.f32 %v10633_v51, %v7108_v21 }
 0xed6   :  { %7223 = vperm.xlu1 %10609, %v7145_v44  }
 0xed7   :  { %10642 = vrsqrt.f32 %v7125_v10  ;;  %v7173_v57 = vmul.f32 %v7147_v56, %v14900_v27  ;;  %v7111_v27 = vld [vmem:[%s15509_s12 + $0x58] sm:$0xff] }
 0xed8   :  { %v10635_v24 = vpop.eup %10634 }
 0xed9   :  { %v10637_v15 = vpop.eup %10636  ;;  %v7148_v7 = vmul.f32 %v10635_v24, %v7109_v58  ;;  %v7186_v19 = vsub.f32 %v7160_v22, %v7173_v57 }
 0xeda   :  { %7296 = vperm.xlu1 %10609, %v7183_v30   ;;  %v7146_v18 = vmul.f32 %v10637_v15, %v7107_v35 }
 0xedb   :  { %7238 = vperm.xlu0 %10608, %v7148_v7   ;;  %v7174_v47 = vmul.f32 %v7148_v7, %v14912_v53 }
 0xedc   :  { %v10639_v55 = vpop.eup %10638  ;;  %v7172_v0 = vmul.f32 %v7146_v18, %v14893_v52 }
 0xedd   :  { %v7149_v37 = vmul.f32 %v10639_v55, %v7110_v61  ;;  %v7187_v20 = vsub.f32 %v7161_v45, %v7174_v47 }
 0xede   :  { %7228 = vperm.xlu1 %10609, %v7146_v18   ;;  %v7185_v44 = vsub.f32 %v7159_v63, %v7172_v0 }
 0xedf   :  { %7311 = vperm.xlu0 %10608, %v7186_v19   ;;  %v7175_v25 = vmul.f32 %v7149_v37, %v14922_v62  ;;  %v7164_v62 = vld [vmem:[%s15510_s13 + $0x60] sm:$0xf] }
 0xee0   :  { %v10641_v9 = vpop.eup %10640 }
 0xee1   :  { %v7150_v42 = vmul.f32 %v10641_v9, %v7111_v27  ;;  %v7188_v2 = vsub.f32 %v7162_v39, %v7175_v25 }
 0xee2   :  { %7233 = vperm.xlu1 %10609, %v7147_v56  }
 0xee3   :  { %7248 = vperm.xlu0 %10608, %v7150_v42   ;;  %v7176_v36 = vmul.f32 %v7150_v42, %v14931_v38 }
 0xee4   :  { %v10643_v5 = vpop.eup %10642 }
 0xee5   :  { %v7151_v52 = vmul.f32 %v10643_v5, %v7112_v28  ;;  %v7189_v13 = vsub.f32 %v7163_v40, %v7176_v36 }
 0xee6   :  { %7306 = vperm.xlu1 %10609, %v7185_v44  }
 0xee7   :  { %7321 = vperm.xlu0 %10608, %v7188_v2   ;;  %v7177_v3 = vmul.f32 %v7151_v52, %v14941_v54 }
 0xee9   :  { %v7190_v23 = vsub.f32 %v7164_v62, %v7177_v3 }
 0xeea   :  { %7243 = vperm.xlu1 %10609, %v7149_v37  }
 0xeeb   :  { %7331 = vperm.xlu0 %10608, %v7190_v23  }
 0xeee   :  { %7316 = vperm.xlu1 %10609, %v7187_v20  }
 0xef2   :  { %7253 = vperm.xlu1 %10609, %v7151_v52  }
 0xef6   :  { %7326 = vperm.xlu1 %10609, %v7189_v13  }
 0xf31   :  { %v7194_v54 = vpop.permute.xlu0 %7193 }
 0xf32   :  { %v7256_v53 = vmul.f32 %v7194_v54, %v14707_v41 }
 0xf35   :  { %v7199_v43 = vpop.permute.xlu1 %7198  ;;  %v7272_v14 = vpop.permute.xlu0 %7271 }
 0xf36   :  { %v7334_v32 = vadd.f32 %v7272_v14, %v7256_v53  ;;  %v7257_v4 = vmul.f32 %v7199_v43, %v14698_v16 }
 0xf38   :  { %v7347_v59 = vmul.f32 %v7334_v32, %v7334_v32 }
 0xf39   :  { %v7204_v60 = vpop.permute.xlu1 %7203 }
 0xf3a   :  { %v7360_v21 = vmul.f32 %v7347_v59, %v7334_v32  ;;  %v7258_v38 = vmul.f32 %v7204_v60, %v14689_v34 }
 0xf3c   :  { %v7373_v51 = vmul.f32 0.044715, %v7360_v21 }
 0xf3d   :  { %v7277_v10 = vpop.permute.xlu1 %7276  ;;  %v7282_v56 = vpop.permute.xlu0 %7281 }
 0xf3e   :  { %v15001_v48 = vadd.f32 %v7277_v10, %v7257_v4  ;;  %v7386_v29 = vadd.f32 %v7373_v51, %v7334_v32  ;;  %v15003_v58 = vadd.f32 %v7282_v56, %v7258_v38 }
 0xf40   :  { %v7348_v41 = vmul.f32 %v15001_v48, %v15001_v48  ;;  %v7399_v24 = vmul.f32 0.7978846, %v7386_v29  ;;  %v7349_v15 = vmul.f32 %v15003_v58, %v15003_v58 }
 0xf41   :  { %v7209_v30 = vpop.permute.xlu1 %7208 }
 0xf42   :  { %v7361_v16 = vmul.f32 %v7348_v41, %v15001_v48  ;;  %10644 = vtanh.f32 %v7399_v24  ;;  %v7362_v34 = vmul.f32 %v7349_v15, %v15003_v58  ;;  %v7259_v37 = vmul.f32 %v7209_v30, %v14681_v46 }
 0xf44   :  { %v7374_v7 = vmul.f32 0.044715, %v7361_v16  ;;  %v7375_v57 = vmul.f32 0.044715, %v7362_v34 }
 0xf45   :  { %v7214_v35 = vpop.permute.xlu1 %7213  ;;  %v7292_v18 = vpop.permute.xlu0 %7291 }
 0xf46   :  { %v7387_v22 = vadd.f32 %v7374_v7, %v15001_v48  ;;  %v7260_v61 = vmul.f32 %v7214_v35, %v14675_v17  ;;  %v7388_v55 = vadd.f32 %v7375_v57, %v15003_v58 }
 0xf48   :  { %v7400_v19 = vmul.f32 0.7978846, %v7387_v22  ;;  %v15015_v27 = vadd.f32 %v7292_v18, %v7260_v61  ;;  %v7401_v9 = vmul.f32 0.7978846, %v7388_v55 }
 0xf49   :  { %v7287_v42 = vpop.permute.xlu1 %7286 }
 0xf4a   :  { %10646 = vtanh.f32 %v7400_v19  ;;  %v7351_v0 = vmul.f32 %v15015_v27, %v15015_v27  ;;  %v15019_v25 = vadd.f32 %v7287_v42, %v7259_v37 }
 0xf4b   :  { %10648 = vtanh.f32 %v7401_v9 }
 0xf4c   :  { %v7364_v63 = vmul.f32 %v7351_v0, %v15015_v27  ;;  %v7350_v17 = vmul.f32 %v15019_v25, %v15019_v25 }
 0xf4d   :  { %v7219_v39 = vpop.permute.xlu1 %7218 }
 0xf4e   :  { %v7377_v28 = vmul.f32 0.044715, %v7364_v63  ;;  %v7363_v46 = vmul.f32 %v7350_v17, %v15019_v25  ;;  %v7302_v45 = vpop.permute.xlu0 %7301  ;;  %v7261_v40 = vmul.f32 %v7219_v39, %v14621_v49 }
 0xf4f   :  { %v10645_v5 = vpop.eup %10644 }
 0xf50   :  { %v7390_v44 = vadd.f32 %v7377_v28, %v15015_v27  ;;  %v7376_v2 = vmul.f32 0.044715, %v7363_v46  ;;  %v7425_v52 = vadd.f32 1.0, %v10645_v5 }
 0xf51   :  { %v7224_v62 = vpop.permute.xlu1 %7223 }
 0xf52   :  { %v7403_v3 = vmul.f32 0.7978846, %v7390_v44  ;;  %v7389_v23 = vadd.f32 %v7376_v2, %v15019_v25  ;;  %v7262_v47 = vmul.f32 %v7224_v62, %v14626_v1  ;;  %v7438_v20 = vmul.f32 0.5, %v7425_v52 }
 0xf54   :  { %10650 = vtanh.f32 %v7403_v3  ;;  %v7402_v36 = vmul.f32 0.7978846, %v7389_v23  ;;  %v15029_v13 = vadd.f32 %v7302_v45, %v7262_v47  ;;  %v15031_v54 = vmul.f32 %v7438_v20, %v7334_v32 }
 0xf55   :  { %v7297_v53 = vpop.permute.xlu1 %7296 }
 0xf56   :  { %10652 = vtanh.f32 %v7402_v36  ;;  %v7353_v43 = vmul.f32 %v15029_v13, %v15029_v13  ;;  %v15035_v14 = vadd.f32 %v7297_v53, %v7261_v40  ;;  %v7239_v59 = vpop.permute.xlu0 %7238 }
 0xf57   :  { %v10647_v60 = vpop.eup %10646  ;;  %v7265_v52 = vmul.f32 %v7239_v59, %v14646_v12 }
 0xf58   :  { %v10649_v1 = vpop.eup %10648  ;;  %v7426_v21 = vadd.f32 1.0, %v10647_v60  ;;  %v7366_v4 = vmul.f32 %v7353_v43, %v15029_v13  ;;  %v7352_v49 = vmul.f32 %v15035_v14, %v15035_v14 }
 0xf59   :  { %v7427_v51 = vadd.f32 1.0, %v10649_v1  ;;  %v7229_v38 = vpop.permute.xlu1 %7228 }
 0xf5a   :  { %v7439_v32 = vmul.f32 0.5, %v7426_v21  ;;  %v7379_v10 = vmul.f32 0.044715, %v7366_v4  ;;  %v7365_v56 = vmul.f32 %v7352_v49, %v15035_v14  ;;  %v7312_v30 = vpop.permute.xlu0 %7311  ;;  %v7263_v61 = vmul.f32 %v7229_v38, %v14631_v26 }
 0xf5b   :  { %v7440_v29 = vmul.f32 0.5, %v7427_v51 }
 0xf5c   :  { %v15042_v41 = vmul.f32 %v7439_v32, %v15001_v48  ;;  %v7392_v24 = vadd.f32 %v7379_v10, %v15029_v13  ;;  %v7378_v15 = vmul.f32 0.044715, %v7365_v56 }
 0xf5d   :  { %v15046_v16 = vmul.f32 %v7440_v29, %v15003_v58  ;;  %v7234_v34 = vpop.permute.xlu1 %7233 }
 0xf5e   :  { %v7405_v7 = vmul.f32 0.7978846, %v7392_v24  ;;  %v7391_v57 = vadd.f32 %v7378_v15, %v15035_v14  ;;  %v7264_v35 = vmul.f32 %v7234_v34, %v14638_v8  ;;  %v7249_v37 = vpop.permute.xlu0 %7248 }
 0xf5f   :  { %v7267_v56 = vmul.f32 %v7249_v37, %v14662_v50 }
 0xf60   :  { %10654 = vtanh.f32 %v7405_v7  ;;  %v7404_v22 = vmul.f32 0.7978846, %v7391_v57  ;;  %v15051_v55 = vadd.f32 %v7312_v30, %v7264_v35 }
 0xf61   :  { %v10651_v48 = vpop.eup %10650  ;;  %v7307_v18 = vpop.permute.xlu1 %7306 }
 0xf62   :  { %v7429_v19 = vadd.f32 1.0, %v10651_v48  ;;  %10656 = vtanh.f32 %v7404_v22  ;;  %v7355_v58 = vmul.f32 %v15051_v55, %v15051_v55  ;;  %v15055_v9 = vadd.f32 %v7307_v18, %v7263_v61  ;;  %v7322_v23 = vpop.permute.xlu0 %7321 }
 0xf63   :  { %v10653_v42 = vpop.eup %10652 }
 0xf64   :  { %v7442_v0 = vmul.f32 0.5, %v7429_v19  ;;  %v7428_v63 = vadd.f32 1.0, %v10653_v42  ;;  %v7368_v8 = vmul.f32 %v7355_v58, %v15051_v55  ;;  %v7354_v26 = vmul.f32 %v15055_v9, %v15055_v9 }
 0xf65   :  { %v7244_v17 = vpop.permute.xlu1 %7243 }
 0xf66   :  { %v15061_v39 = vmul.f32 %v7442_v0, %v15015_v27  ;;  %v7441_v28 = vmul.f32 0.5, %v7428_v63  ;;  %v7381_v46 = vmul.f32 0.044715, %v7368_v8  ;;  %v7367_v5 = vmul.f32 %v7354_v26, %v15055_v9  ;;  %v7332_v49 = vpop.permute.xlu0 %7331 }
 0xf67   :  { %v7266_v44 = vmul.f32 %v7244_v17, %v14654_v31 }
 0xf68   :  { %v15066_v2 = vmul.f32 %v7441_v28, %v15019_v25  ;;  %v7394_v62 = vadd.f32 %v7381_v46, %v15051_v55  ;;  %v7380_v3 = vmul.f32 0.044715, %v7367_v5 }
 0xf69   :  { %v7344_v47 = vadd.f32 %v7322_v23, %v7266_v44  ;;  %v7317_v45 = vpop.permute.xlu1 %7316 }
 0xf6a   :  { %v7407_v20 = vmul.f32 0.7978846, %v7394_v62  ;;  %v7393_v27 = vadd.f32 %v7380_v3, %v15055_v9  ;;  %v7343_v36 = vadd.f32 %v7317_v45, %v7265_v52 }
 0xf6b   :  { %v7357_v40 = vmul.f32 %v7344_v47, %v7344_v47 }
 0xf6c   :  { %10658 = vtanh.f32 %v7407_v20  ;;  %v7406_v53 = vmul.f32 0.7978846, %v7393_v27  ;;  %v7356_v43 = vmul.f32 %v7343_v36, %v7343_v36 }
 0xf6d   :  { %v10655_v31 = vpop.eup %10654  ;;  %v7370_v60 = vmul.f32 %v7357_v40, %v7344_v47  ;;  %v7254_v25 = vpop.permute.xlu1 %7253 }
 0xf6e   :  { %v7431_v1 = vadd.f32 1.0, %v10655_v31  ;;  %10660 = vtanh.f32 %v7406_v53  ;;  %v7369_v12 = vmul.f32 %v7356_v43, %v7343_v36  ;;  %v7268_v59 = vmul.f32 %v7254_v25, %v14666_v33 }
 0xf6f   :  { %v10657_v21 = vpop.eup %10656  ;;  %v7383_v4 = vmul.f32 0.044715, %v7370_v60 }
 0xf70   :  { %v7444_v51 = vmul.f32 0.5, %v7431_v1  ;;  %v7430_v38 = vadd.f32 1.0, %v10657_v21  ;;  %v7382_v32 = vmul.f32 0.044715, %v7369_v12  ;;  %v7346_v10 = vadd.f32 %v7332_v49, %v7268_v59 }
 0xf71   :  { %v7396_v29 = vadd.f32 %v7383_v4, %v7344_v47  ;;  %v7327_v24 = vpop.permute.xlu1 %7326 }
 0xf72   :  { %v15074_v15 = vmul.f32 %v7444_v51, %v15029_v13  ;;  %v7443_v30 = vmul.f32 0.5, %v7430_v38  ;;  %v7395_v34 = vadd.f32 %v7382_v32, %v7343_v36  ;;  %v7359_v7 = vmul.f32 %v7346_v10, %v7346_v10 }
 0xf73   :  { %v7409_v57 = vmul.f32 0.7978846, %v7396_v29  ;;  %v7345_v35 = vadd.f32 %v7327_v24, %v7267_v56 }
 0xf74   :  { %v15077_v33 = vmul.f32 %v7443_v30, %v15035_v14  ;;  %v7408_v22 = vmul.f32 0.7978846, %v7395_v34  ;;  %v7372_v61 = vmul.f32 %v7359_v7, %v7346_v10 }
 0xf75   :  { %10662 = vtanh.f32 %v7409_v57  ;;  %v7358_v48 = vmul.f32 %v7345_v35, %v7345_v35 }
 0xf76   :  { %10664 = vtanh.f32 %v7408_v22  ;;  %v7385_v18 = vmul.f32 0.044715, %v7372_v61 }
 0xf77   :  { %v7371_v50 = vmul.f32 %v7358_v48, %v7345_v35 }
 0xf78   :  { %v7398_v19 = vadd.f32 %v7385_v18, %v7346_v10 }
 0xf79   :  { %v10659_v58 = vpop.eup %10658  ;;  %v7384_v37 = vmul.f32 0.044715, %v7371_v50 }
 0xf7a   :  { %v7433_v13 = vadd.f32 1.0, %v10659_v58  ;;  %v7411_v42 = vmul.f32 0.7978846, %v7398_v19 }
 0xf7b   :  { %v10661_v0 = vpop.eup %10660  ;;  %v7397_v63 = vadd.f32 %v7384_v37, %v7345_v35 }
 0xf7c   :  { %v7446_v8 = vmul.f32 0.5, %v7433_v13  ;;  %v7432_v26 = vadd.f32 1.0, %v10661_v0  ;;  %10666 = vtanh.f32 %v7411_v42 }
 0xf7d   :  { %v7410_v17 = vmul.f32 0.7978846, %v7397_v63 }
 0xf7e   :  { %v7459_v14 = vmul.f32 %v7446_v8, %v15051_v55  ;;  %v7445_v28 = vmul.f32 0.5, %v7432_v26 }
 0xf7f   :  { %10668 = vtanh.f32 %v7410_v17 }
 0xf80   :  { %v7458_v46 = vmul.f32 %v7445_v28, %v15055_v9 }
 0xf82   :  { %v10663_v5 = vpop.eup %10662 }
 0xf83   :  { %v10665_v44 = vpop.eup %10664  ;;  %v7435_v52 = vadd.f32 1.0, %v10663_v5 }
 0xf84   :  { %v7434_v62 = vadd.f32 1.0, %v10665_v44 }
 0xf85   :  { %v7448_v3 = vmul.f32 0.5, %v7435_v52 }
 0xf86   :  { %v7447_v23 = vmul.f32 0.5, %v7434_v62 }
 0xf87   :  { %v7461_v45 = vmul.f32 %v7448_v3, %v7344_v47 }
 0xf88   :  { %v7460_v20 = vmul.f32 %v7447_v23, %v7343_v36 }
 0xf89   :  { %v10667_v27 = vpop.eup %10666 }
 0xf8a   :  { %v7437_v40 = vadd.f32 1.0, %v10667_v27 }
 0xf8c   :  { %v10669_v53 = vpop.eup %10668  ;;  %v7450_v43 = vmul.f32 0.5, %v7437_v40 }
 0xf8d   :  { %v7436_v31 = vadd.f32 1.0, %v10669_v53 }
 0xf8e   :  { %v7463_v60 = vmul.f32 %v7450_v43, %v7346_v10 }
 0xf8f   :  { %v7449_v25 = vmul.f32 0.5, %v7436_v31 }
 0xf91   :  { %v7462_v55 = vmul.f32 %v7449_v25, %v7345_v35 }
 0xf92   :  { %10878 = dma.done.wait [#allocation7 + $0x3], 1536 }
 0xf93   :  { %10879 = vsyncadd [#allocation7 + $0x3], 4294965760  ;;  %7625 = vmatprep.mubr.bf16.mxu1 %v15859_v6  ;;  %9806 = vmatprep.subr.bf16.mxu0 %v15920_v11  ;;  %v10670_v9 = vld [vmem:[#allocation5 + $0x4c] ss:$12 sps:$4 sm:$0xff]   ;;  %v10672_v47 = vld [vmem:[#allocation5 + $0x48] ss:$12 sps:$4 sm:$0xff]   ;;  %v15087_v49 = vpack.c.bf16 %v15042_v41, %v15031_v54  ;;  %v15095_v51 = vpack.c.bf16 %v15066_v2, %v15046_v16  ;;  %v15102_v54 = vpack.c.bf16 %v15077_v33, %v15061_v39 }
 0xf94   :  { %9814 = vmatprep.mubr.msk.bf16.mxu0 %vm10892_vm1, %v15920_v11  ;;  %7601 = vmatprep.subr.bf16.mxu1 %v10670_v9  ;;  %v10673_v36 = vld [vmem:[#allocation5 + $0x34] ss:$12 sps:$4 sm:$0xff]   ;;  %v10675_v1 = vld [vmem:[#allocation5 + $0x30] ss:$12 sps:$4 sm:$0xff]   ;;  %v10678_v59 = vld [vmem:[#allocation5 + $0x18] ss:$12 sps:$4 sm:$0xff]   ;;  %v15108_v41 = vpack.c.bf16 %v7458_v46, %v15074_v15  ;;  %v15113_v16 = vpack.c.bf16 %v7460_v20, %v7459_v14  ;;  %v15118_v39 = vpack.c.bf16 %v7462_v55, %v7461_v45 }
 0xf95   :  { %7602 = vmatpush1.bf16.msra.mxu1 %v10672_v47  ;;  %v10676_v12 = vld [vmem:[#allocation5 + $0x1c] ss:$12 sps:$4 sm:$0xff]   ;;  %v10679_v21 = vld [vmem:[#allocation5 + $0x4] ss:$12 sps:$4 sm:$0xff]   ;;  %v10681_v4 = vld [vmem:[#allocation5] ss:$12 sps:$4 sm:$0xff]   ;;  %v15123_v2 = vpack.c.bf16 %v7463_v60, %v7463_v60 }
 0xf96   :  { %7603 = vmatprep.subr.bf16.mxu1 %v10673_v36  ;;  %v15132_v38 = vld [vmem:[%s15511_s14] sm:$0x7]  ;;  %v10682_v45 = vld [vmem:[#allocation5 + $0x50] ss:$12 sps:$4 sm:$0xff]   ;;  %v10683_v40 = vld [vmem:[#allocation5 + $0x38] ss:$12 sps:$4 sm:$0xff]  }
 0xf97   :  { %v15958_v10 = vld [vmem:[#allocation97_spill] sm:$0xff]  ;;  %9807 = vmatpush3.bf16.msra.mxu0 %v10682_v45  ;;  %v10685_v36 = vld [vmem:[#allocation5 + $0x8] ss:$12 sps:$4 sm:$0xff]   ;;  %vm7940_vm5 = vcmask 814080   ;;  %vm8076_vm6 = vcmask 1041408  }
 0xf98   :  { %v15136_v56 = vrot.slane %v15132_v38, %v15958_v10  ;;  %9808 = vmatprep.subr.bf16.mxu0 %v15920_v11  ;;  %v10684_v31 = vld [vmem:[#allocation5 + $0x20] ss:$12 sps:$4 sm:$0xff]  }
 0xf99   :  { %7604 = vmatpush1.bf16.msra.mxu1 %v10675_v1 }
 0xf9a   :  { %7605 = vmatprep.subr.bf16.mxu1 %v10676_v12 }
 0xf9b   :  { %9809 = vmatpush3.bf16.msra.mxu0 %v10683_v40 }
 0xf9c   :  { %9810 = vmatprep.subr.bf16.mxu0 %v15920_v11 }
 0xf9d   :  { %7606 = vmatpush1.bf16.msra.mxu1 %v10678_v59 }
 0xf9e   :  { %7607 = vmatprep.subr.bf16.mxu1 %v10679_v21 }
 0xf9f   :  { %9811 = vmatpush3.bf16.msra.mxu0 %v10684_v31  ;;  %v7809_v31 = vld [vmem:[#allocation13 + $0x30] sm:$0xff] }
 0xfa0   :  { %9812 = vmatprep.subr.bf16.mxu0 %v15920_v11 }
 0xfa1   :  { %7608 = vmatpush1.bf16.msra.mxu1 %v10681_v4 }
 0xfa2   :  { %9842 = vmatprep.subr.bf16.mxu1 %v15920_v11 }
 0xfa3   :  { %9813 = vmatpush3.bf16.msra.mxu0 %v10685_v36 }
 0xfa4   :  { %8869 = vmatmul.mubr.msk.bf16.vlgmr.msra.gmra.mxu1 %vm6650_vm3, %v15087_v49  ;;  %9884 = vmatprep.subr.bf16.mxu0 %v15920_v11 }
 0xfa5   :  { %7635 = vmatprep.mubr.bf16.mxu1 %v15859_v6 }
 0xfa6   :  { %9815 = vmatmul.mubr.msk.bf16.vlgmr.msra.gmra.mxu0 %vm6650_vm3, %v15087_v49 }
 0xfa7   :  { %9818 = vmatprep.mubr.msk.bf16.mxu0 %vm10892_vm1, %v15920_v11 }
 0xfac   :  { %8870 = vmatmul.mubr.msk.bf16.gmra.mxu1 %vm6650_vm3, %v15095_v51 }
 0xfad   :  { %7645 = vmatprep.mubr.bf16.mxu1 %v15859_v6 }
 0xfae   :  { %9819 = vmatmul.mubr.msk.bf16.gmra.mxu0 %vm6650_vm3, %v15095_v51 }
 0xfaf   :  { %9822 = vmatprep.mubr.msk.bf16.mxu0 %vm10892_vm1, %v15920_v11 }
 0xfb4   :  { %8871 = vmatmul.mubr.msk.bf16.gmra.mxu1 %vm6650_vm3, %v15102_v54 }
 0xfb5   :  { %7655 = vmatprep.mubr.bf16.mxu1 %v15859_v6 }
 0xfb6   :  { %9823 = vmatmul.mubr.msk.bf16.gmra.mxu0 %vm6650_vm3, %v15102_v54 }
 0xfb7   :  { %9826 = vmatprep.mubr.msk.bf16.mxu0 %vm10892_vm1, %v15920_v11 }
 0xfbc   :  { %8872 = vmatmul.mubr.msk.bf16.gmra.mxu1 %vm6650_vm3, %v15108_v41 }
 0xfbd   :  { %7665 = vmatprep.mubr.bf16.mxu1 %v15859_v6 }
 0xfbe   :  { %9827 = vmatmul.mubr.msk.bf16.gmra.mxu0 %vm6650_vm3, %v15108_v41 }
 0xfbf   :  { %9830 = vmatprep.mubr.msk.bf16.mxu0 %vm10892_vm1, %v15920_v11 }
 0xfc4   :  { %8873 = vmatmul.mubr.msk.bf16.gmra.mxu1 %vm6650_vm3, %v15113_v16 }
 0xfc5   :  { %7675 = vmatprep.mubr.bf16.mxu1 %v15859_v6 }
 0xfc6   :  { %9831 = vmatmul.mubr.msk.bf16.gmra.mxu0 %vm6650_vm3, %v15113_v16 }
 0xfc7   :  { %9834 = vmatprep.mubr.msk.bf16.mxu0 %vm10892_vm1, %v15920_v11 }
 0xfcc   :  { %8874 = vmatmul.mubr.msk.bf16.gmra.mxu1 %vm6650_vm3, %v15118_v39 }
 0xfcd   :  { %7685 = vmatprep.mubr.bf16.mxu1 %v15859_v6  ;;  %v15959_v6 = vld [vmem:[#allocation98_spill] sm:$0xff] }
 0xfce   :  { %v15140_v24 = vrot.slane %v15132_v38, %v15959_v6  ;;  %9835 = vmatmul.mubr.msk.bf16.gmra.mxu0 %vm6650_vm3, %v15118_v39 }
 0xfcf   :  { %9838 = vmatprep.mubr.msk.bf16.mxu0 %vm10892_vm1, %v15920_v11 }
 0xfd4   :  { %8875 = vmatmul.mubr.msk.bf16.gmra.mxu1 %vm6650_vm3, %v15123_v2 }
 0xfd5   :  { %9856 = vmatprep.mubr.msk.bf16.mxu1 %vm10892_vm1, %v15920_v11 }
 0xfd6   :  { %9839 = vmatmul.mubr.msk.bf16.gmra.mxu0 %vm6650_vm3, %v15123_v2  ;;  %v7803_v2 = vld [vmem:[#allocation13] sm:$0xff] }
 0xfd7   :  { %9898 = vmatprep.mubr.msk.bf16.mxu0 %vm10892_vm1, %v15920_v11 }
0x1064   :  { %v7627_v32 = vpop.f32.mrf.mxu1 }
0x1065   :  { %v15143_v30 = vadd.f32 %v7627_v32, %v15136_v56 }
0x1066   :  { %v7629_v29 = vpop.f32.mrf.mxu1 }
0x1067   :  { %v15149_v57 = vadd.f32 %v7629_v29, %v15140_v24 }
0x1068   :  { %v7631_v15 = vpop.f32.mrf.mxu1 }
0x1069   :  { %v15146_v34 = vadd.f32 %v7631_v15, %v15136_v56 }
0x106a   :  { %v7633_v7 = vpop.f32.mrf.mxu1 }
0x106b   :  { %v7782_v35 = vpack.c.bf16 %v15146_v34, %v15143_v30  ;;  %v15154_v33 = vadd.f32 %v7633_v7, %v15140_v24 }
0x106c   :  { %v7637_v22 = vpop.f32.mrf.mxu1 }
0x106d   :  { %v7789_v61 = vpack.c.bf16 %v15154_v33, %v15149_v57  ;;  %v15159_v50 = vadd.f32 %v7637_v22, %v15136_v56  ;;  %v7804_v57 = vld [vmem:[#allocation13 + $0x8] sm:$0xff] }
0x106e   :  { %v7639_v48 = vpop.f32.mrf.mxu1 }
0x106f   :  { %v15165_v37 = vadd.f32 %v7639_v48, %v15140_v24 }
0x1070   :  { %v7641_v18 = vpop.f32.mrf.mxu1 }
0x1071   :  { %v15162_v19 = vadd.f32 %v7641_v18, %v15136_v56 }
0x1072   :  { %v7643_v58 = vpop.f32.mrf.mxu1 }
0x1073   :  { %v7783_v13 = vpack.c.bf16 %v15162_v19, %v15159_v50  ;;  %v15170_v42 = vadd.f32 %v7643_v58, %v15140_v24 }
0x1074   :  { %v7647_v0 = vpop.f32.mrf.mxu1 }
0x1075   :  { %v7790_v63 = vpack.c.bf16 %v15170_v42, %v15165_v37  ;;  %v15177_v17 = vadd.f32 %v7647_v0, %v15136_v56 }
0x1076   :  { %v15174_v8 = vpop.f32.mrf.mxu1 }
0x1078   :  { %v7651_v26 = vpop.f32.mrf.mxu1 }
0x1079   :  { %v15180_v14 = vadd.f32 %v7651_v26, %v15136_v56 }
0x107a   :  { %v15182_v28 = vpop.f32.mrf.mxu1 }
0x107b   :  { %v7784_v46 = vpack.c.bf16 %v15180_v14, %v15177_v17  ;;  %v7654_v41 = vadd.f32 %v15182_v28, %v15140_v24 }
0x107c   :  { %v7657_v5 = vpop.f32.mrf.mxu1 }
0x107d   :  { %v15187_v62 = vadd.f32 %v7657_v5, %v15136_v56 }
0x107e   :  { %v7659_v44 = vpop.f32.mrf.mxu1 }
0x107f   :  { %v7660_v26 = vadd.f32 %v7659_v44, %v15140_v24 }
0x1080   :  { %v7661_v52 = vpop.f32.mrf.mxu1 }
0x1081   :  { %v15190_v3 = vadd.f32 %v7661_v52, %v15136_v56  ;;  %v7650_v52 = vadd.f32 %v15174_v8, %v15140_v24 }
0x1082   :  { %v7663_v23 = vpop.f32.mrf.mxu1 }
0x1083   :  { %v7785_v20 = vpack.c.bf16 %v15190_v3, %v15187_v62  ;;  %v7664_v54 = vadd.f32 %v7663_v23, %v15140_v24  ;;  %v7791_v45 = vpack.c.bf16 %v7654_v41, %v7650_v52  ;;  %v15960_v41 = vld [vmem:[#allocation96_spill] sm:$0xff] }
0x1084   :  { %v7667_v27 = vpop.f32.mrf.mxu1  ;;  %v15961_v52 = vsub.s32 2, %v15960_v41 }
0x1085   :  { %v15196_v60 = vadd.f32 %v7667_v27, %v15136_v56  ;;  %v7792_v5 = vpack.c.bf16 %v7664_v54, %v7660_v26 }
0x1086   :  { %v7669_v53 = vpop.f32.mrf.mxu1 }
0x1087   :  { %v7670_v58 = vadd.f32 %v7669_v53, %v15140_v24 }
0x1088   :  { %v7671_v43 = vpop.f32.mrf.mxu1 }
0x1089   :  { %v15199_v25 = vadd.f32 %v7671_v43, %v15136_v56 }
0x108a   :  { %v7673_v55 = vpop.f32.mrf.mxu1 }
0x108b   :  { %v7786_v9 = vpack.c.bf16 %v15199_v25, %v15196_v60  ;;  %v7674_v51 = vadd.f32 %v7673_v55, %v15140_v24 }
0x108c   :  { %v7677_v47 = vpop.f32.mrf.mxu1 }
0x108d   :  { %v7678_v59 = vadd.f32 %v7677_v47, %v15136_v56  ;;  %v7793_v0 = vpack.c.bf16 %v7674_v51, %v7670_v58  ;;  %v7810_v47 = vld [vmem:[#allocation13 + $0x38] sm:$0xff]  ;;  %v7728_v51 = vpop.f32.mrf.mxu0 }
0x108e   :  { %v7679_v1 = vpop.f32.mrf.mxu1 }
0x108f   :  { %v7680_v48 = vadd.f32 %v7679_v1, %v15140_v24  ;;  %v9816_v54 = vpop.f32.mrf.mxu0 }
0x1090   :  { %v7681_v12 = vpop.f32.mrf.mxu1 }
0x1091   :  { %v7682_v21 = vadd.f32 %v7681_v12, %v15136_v56 }
0x1092   :  { %v7683_v4 = vpop.f32.mrf.mxu1 }
0x1093   :  { %v7787_v32 = vpack.c.bf16 %v7682_v21, %v7678_v59  ;;  %v7684_v49 = vadd.f32 %v7683_v4, %v15140_v24  ;;  %v7811_v21 = vld [vmem:[#allocation13 + $0x40] sm:$0xff] }
0x1094   :  { %v7687_v10 = vpop.f32.mrf.mxu1 }
0x1095   :  { %v7794_v18 = vpack.c.bf16 %v7684_v49, %v7680_v48  ;;  %v7688_v16 = vadd.f32 %v7687_v10, %v15136_v56  ;;  %v7805_v56 = vld [vmem:[#allocation13 + $0x10] sm:$0xff] }
0x1096   :  { %v7689_v29 = vpop.f32.mrf.mxu1  ;;  %v7813_v48 = vld [vmem:[#allocation13 + $0x50] sm:$0xff] }
0x1097   :  { %v7690_v6 = vadd.f32 %v7689_v29, %v15140_v24  ;;  %v7788_v39 = vpack.c.bf16 %v7688_v16, %v7688_v16 }
0x1098   :  { %v7691_v15 = vpop.f32.mrf.mxu1 }
0x1099   :  { %v7795_v7 = vpack.c.bf16 %v7690_v6, %v7690_v6  ;;  %v7812_v6 = vld [vmem:[#allocation13 + $0x48] sm:$0xff] }
0x109a   :  { %v7692_v22 = vpop.f32.mrf.mxu1 }
0x109b   :  { %9843 = vmatpush3.bf16.xpose.msra.mxu1 %v7795_v7 }
0x109c   :  { %9844 = vmatprep.subr.bf16.mxu1 %v15920_v11 }
0x10a3   :  { %9845 = vmatpush3.bf16.xpose.msra.mxu1 %v7794_v18 }
0x10a4   :  { %9846 = vmatprep.subr.bf16.mxu1 %v15920_v11 }
0x10ab   :  { %9847 = vmatpush3.bf16.xpose.msra.mxu1 %v7793_v0 }
0x10ac   :  { %9848 = vmatprep.subr.bf16.mxu1 %v15920_v11 }
0x10b3   :  { %9849 = vmatpush3.bf16.xpose.msra.mxu1 %v7792_v5  ;;  %v7814_v5 = vld [vmem:[#allocation13 + $0x58] sm:$0xff] }
0x10b4   :  { %9850 = vmatprep.subr.bf16.mxu1 %v15920_v11 }
0x10bb   :  { %9851 = vmatpush3.bf16.xpose.msra.mxu1 %v7791_v45  ;;  %v15335_v45 = vrot.slane %v15132_v38, %v15961_v52 }
0x10bc   :  { %9852 = vmatprep.subr.bf16.mxu1 %v15920_v11 }
0x10c3   :  { %9853 = vmatpush3.bf16.xpose.msra.mxu1 %v7790_v63  ;;  %v7806_v63 = vld [vmem:[#allocation13 + $0x18] sm:$0xff] }
0x10c4   :  { %9854 = vmatprep.subr.bf16.mxu1 %v15920_v11 }
0x10cb   :  { %9855 = vmatpush3.bf16.xpose.msra.mxu1 %v7789_v61 }
0x10cc   :  { %9926 = vmatprep.subr.bf16.mxu1 %v15920_v11 }
0x10d2   :  { %9857 = vmatmul.mubr.bf16.vlgmr.msra.gmra.mxu1 %v7782_v35 }
0x10d3   :  { %9860 = vmatprep.mubr.msk.bf16.mxu1 %vm10892_vm1, %v15920_v11 }
0x10da   :  { %9861 = vmatmul.mubr.bf16.gmra.mxu1 %v7783_v13 }
0x10db   :  { %9864 = vmatprep.mubr.msk.bf16.mxu1 %vm10892_vm1, %v15920_v11 }
0x10e2   :  { %9865 = vmatmul.mubr.bf16.gmra.mxu1 %v7784_v46  ;;  %v7807_v46 = vld [vmem:[#allocation13 + $0x20] sm:$0xff] }
0x10e3   :  { %9868 = vmatprep.mubr.msk.bf16.mxu1 %vm10892_vm1, %v15920_v11 }
0x10ea   :  { %9869 = vmatmul.mubr.bf16.gmra.mxu1 %v7785_v20  ;;  %v7808_v20 = vld [vmem:[#allocation13 + $0x28] sm:$0xff] }
0x10eb   :  { %9872 = vmatprep.mubr.msk.bf16.mxu1 %vm10892_vm1, %v15920_v11 }
0x10f2   :  { %9873 = vmatmul.mubr.bf16.gmra.mxu1 %v7786_v9 }
0x10f3   :  { %9876 = vmatprep.mubr.msk.bf16.mxu1 %vm10892_vm1, %v15920_v11 }
0x10fa   :  { %9877 = vmatmul.mubr.bf16.gmra.mxu1 %v7787_v32 }
0x10fb   :  { %9880 = vmatprep.mubr.msk.bf16.mxu1 %vm10892_vm1, %v15920_v11 }
0x1102   :  { %9881 = vmatmul.mubr.bf16.gmra.mxu1 %v7788_v39  ;;  %v7731_v39 = vpop.f32.mrf.mxu0 }
0x1103   :  { %9940 = vmatprep.mubr.msk.bf16.mxu1 %vm10892_vm1, %v15920_v11 }
0x1192   :  { %v7850_v24 = vpop.f32.mrf.mxu1 }
0x1193   :  { %v15290_v30 = vadd.f32 %v7850_v24, %v7803_v2  ;;  %v15340_v24 = vadd.f32 %v7728_v51, %v15335_v45 }
0x1194   :  { %v9858_v34 = vpop.f32.mrf.mxu1 }
0x1195   :  { %v7904_v35 = vsel %vm2685_vm2, %v15290_v30, -inf }
0x1196   :  { %7905 = vmax.xlane.f32.xlu0 %v7904_v35  ;;  %v7853_v33 = vpop.f32.mrf.mxu1 }
0x1197   :  { %v15294_v61 = vadd.f32 %v7853_v33, %v7804_v57  ;;  %v9817_v57 = vpop.f32.mrf.mxu0  ;;  %v7815_v33 = vld [vmem:[#allocation13 + $0x60] sm:$0xf] }
0x1198   :  { %v9859_v50 = vpop.f32.mrf.mxu1 }
0x1199   :  { %v7907_v19 = vsel %vm2685_vm2, %v15294_v61, -inf  ;;  %v15345_v50 = vadd.f32 %v7731_v39, %v15335_v45 }
0x119a   :  { %7908 = vmax.xlane.f32.xlu0 %v7907_v19  ;;  %v7858_v37 = vpop.f32.mrf.mxu1 }
0x119b   :  { %v15298_v13 = vadd.f32 %v7858_v37, %v7805_v56  ;;  %v7736_v56 = vpop.f32.mrf.mxu0  ;;  %v7796_v37 = vpack.c.bf16 %v15345_v50, %v15340_v24 }
0x119c   :  { %v9862_v42 = vpop.f32.mrf.mxu1  ;;  %v7737_v57 = vadd.f32 %v7736_v56, %v15335_v45 }
0x119d   :  { %v7910_v8 = vsel %vm2685_vm2, %v15298_v13, -inf }
0x119e   :  { %7911 = vmax.xlane.f32.xlu1 %v7910_v8  ;;  %v7861_v17 = vpop.f32.mrf.mxu1 }
0x119f   :  { %v15302_v14 = vadd.f32 %v7861_v17, %v7806_v63  ;;  %v9820_v63 = vpop.f32.mrf.mxu0 }
0x11a0   :  { %v9863_v28 = vpop.f32.mrf.mxu1 }
0x11a1   :  { %v7913_v44 = vsel %vm2685_vm2, %v15302_v14, -inf  ;;  %v7739_v28 = vpop.f32.mrf.mxu0 }
0x11a2   :  { %7914 = vmax.xlane.f32.xlu1 %v7913_v44  ;;  %v7866_v62 = vpop.f32.mrf.mxu1 }
0x11a3   :  { %v15306_v3 = vadd.f32 %v7866_v62, %v7807_v46  ;;  %v9821_v44 = vpop.f32.mrf.mxu0 }
0x11a4   :  { %v9866_v23 = vpop.f32.mrf.mxu1 }
0x11a5   :  { %v7916_v27 = vsel %vm2685_vm2, %v15306_v3, -inf  ;;  %v7744_v23 = vpop.f32.mrf.mxu0 }
0x11a6   :  { %7917 = vmax.xlane.f32.xlu0 %v7916_v27  ;;  %v7869_v40 = vpop.f32.mrf.mxu1  ;;  %v7745_v39 = vadd.f32 %v7744_v23, %v15335_v45 }
0x11a7   :  { %v15310_v53 = vadd.f32 %v7869_v40, %v7808_v20  ;;  %v9824_v20 = vpop.f32.mrf.mxu0 }
0x11a8   :  { %v9867_v43 = vpop.f32.mrf.mxu1 }
0x11a9   :  { %v7919_v60 = vsel %vm2685_vm2, %v15310_v53, -inf  ;;  %v7747_v27 = vpop.f32.mrf.mxu0 }
0x11aa   :  { %7920 = vmax.xlane.f32.xlu1 %v7919_v60  ;;  %v7874_v25 = vpop.f32.mrf.mxu1 }
0x11ab   :  { %v15314_v55 = vadd.f32 %v7874_v25, %v7809_v31  ;;  %v9825_v40 = vpop.f32.mrf.mxu0 }
0x11ac   :  { %v9870_v9 = vpop.f32.mrf.mxu1 }
0x11ad   :  { %v7922_v36 = vsel %vm2685_vm2, %v15314_v55, -inf  ;;  %v7752_v43 = vpop.f32.mrf.mxu0 }
0x11ae   :  { %7923 = vmax.xlane.f32.xlu0 %v7922_v36  ;;  %v7877_v1 = vpop.f32.mrf.mxu1  ;;  %v7753_v41 = vadd.f32 %v7752_v43, %v15335_v45 }
0x11af   :  { %v15318_v12 = vadd.f32 %v7877_v1, %v7810_v47  ;;  %v9828_v31 = vpop.f32.mrf.mxu0 }
0x11b0   :  { %v9871_v59 = vpop.f32.mrf.mxu1 }
0x11b1   :  { %v7925_v4 = vsel %vm2685_vm2, %v15318_v12, -inf  ;;  %v7755_v60 = vpop.f32.mrf.mxu0 }
0x11b2   :  { %7926 = vmax.xlane.f32.xlu1 %v7925_v4  ;;  %v7882_v32 = vpop.f32.mrf.mxu1  ;;  %v7756_v52 = vadd.f32 %v7755_v60, %v15335_v45 }
0x11b3   :  { %v15322_v10 = vadd.f32 %v7882_v32, %v7811_v21  ;;  %v9829_v25 = vpop.f32.mrf.mxu0 }
0x11b4   :  { %v9874_v29 = vpop.f32.mrf.mxu1  ;;  %v7799_v24 = vpack.c.bf16 %v7756_v52, %v7753_v41 }
0x11b5   :  { %v7928_v15 = vsel %vm2685_vm2, %v15322_v10, -inf  ;;  %v7760_v9 = vpop.f32.mrf.mxu0 }
0x11b6   :  { %7929 = vmax.xlane.f32.xlu0 %v7928_v15  ;;  %v7885_v7 = vpop.f32.mrf.mxu1 }
0x11b7   :  { %v15326_v22 = vadd.f32 %v7885_v7, %v7812_v6  ;;  %v9832_v47 = vpop.f32.mrf.mxu0 }
0x11b8   :  { %v9875_v49 = vpop.f32.mrf.mxu1 }
0x11b9   :  { %v7931_v18 = vsel %vm2685_vm2, %v15326_v22, -inf  ;;  %v7763_v36 = vpop.f32.mrf.mxu0 }
0x11ba   :  { %7932 = vmax.xlane.f32.xlu1 %v7931_v18  ;;  %v7890_v58 = vpop.f32.mrf.mxu1  ;;  %v7764_v54 = vadd.f32 %v7763_v36, %v15335_v45 }
0x11bb   :  { %v15330_v0 = vadd.f32 %v7890_v58, %v7813_v48  ;;  %v9833_v1 = vpop.f32.mrf.mxu0  ;;  %v7761_v58 = vadd.f32 %v7760_v9, %v15335_v45 }
0x11bc   :  { %v9878_v26 = vpop.f32.mrf.mxu1 }
0x11bd   :  { %v7934_v16 = vsel %vm2685_vm2, %v15330_v0, -inf  ;;  %v7768_v59 = vpop.f32.mrf.mxu0 }
0x11be   :  { %7935 = vmax.xlane.f32.xlu0 %v7934_v16  ;;  %v7893_v2 = vpop.f32.mrf.mxu1  ;;  %v7769_v15 = vadd.f32 %v7768_v59, %v15335_v45  ;;  %v7800_v16 = vpack.c.bf16 %v7764_v54, %v7761_v58 }
0x11bf   :  { %v15342_v34 = vadd.f32 %v7893_v2, %v7814_v5  ;;  %v9836_v21 = vpop.f32.mrf.mxu0  ;;  %v7748_v2 = vadd.f32 %v7747_v27, %v15335_v45 }
0x11c0   :  { %v9879_v35 = vpop.f32.mrf.mxu1 }
0x11c1   :  { %v7937_v38 = vsel %vm2685_vm2, %v15342_v34, -inf  ;;  %v7771_v4 = vpop.f32.mrf.mxu0  ;;  %v7740_v35 = vadd.f32 %v7739_v28, %v15335_v45 }
0x11c2   :  { %7938 = vmax.xlane.f32.xlu1 %v7937_v38  ;;  %v7898_v19 = vpop.f32.mrf.mxu1  ;;  %v7772_v7 = vadd.f32 %v7771_v4, %v15335_v45 }
0x11c3   :  { %v15351_v42 = vadd.f32 %v7898_v19, %v7815_v33  ;;  %v9837_v32 = vpop.f32.mrf.mxu0  ;;  %v7798_v33 = vpack.c.bf16 %v7748_v2, %v7745_v39  ;;  %v7797_v50 = vpack.c.bf16 %v7740_v35, %v7737_v57 }
0x11c4   :  { %v9882_v8 = vpop.f32.mrf.mxu1  ;;  %v7801_v26 = vpack.c.bf16 %v7772_v7, %v7769_v15 }
0x11c5   :  { %v7941_v17 = vsel %vm7940_vm5, %v15351_v42, -inf  ;;  %v7776_v29 = vpop.f32.mrf.mxu0 }
0x11c6   :  { %7942 = vmax.xlane.f32.xlu0 %v7941_v17  ;;  %v7901_v46 = vpop.f32.mrf.mxu1  ;;  %v7777_v6 = vadd.f32 %v7776_v29, %v15335_v45 }
0x11c7   :  { %v9840_v49 = vpop.f32.mrf.mxu0 }
0x11c8   :  { %v9883_v62 = vpop.f32.mrf.mxu1  ;;  %v7802_v48 = vpack.c.bf16 %v7777_v6, %v7777_v6 }
0x11c9   :  { %v7779_v18 = vpop.f32.mrf.mxu0 }
0x11ca   :  { %v8078_v51 = vsel %vm8076_vm6, %v7802_v48, 0 }
0x11cb   :  { %9885 = vmatpush3.bf16.msra.mxu0 %v8078_v51  ;;  %v9841_v5 = vpop.f32.mrf.mxu0 }
0x11cc   :  { %9886 = vmatprep.subr.bf16.mxu0 %v15920_v11 }
0x11cf   :  { %9887 = vmatpush3.bf16.msra.mxu0 %v7801_v26 }
0x11d0   :  { %9888 = vmatprep.subr.bf16.mxu0 %v15920_v11 }
0x11d3   :  { %9889 = vmatpush3.bf16.msra.mxu0 %v7800_v16 }
0x11d4   :  { %9890 = vmatprep.subr.bf16.mxu0 %v15920_v11 }
0x11d7   :  { %9891 = vmatpush3.bf16.msra.mxu0 %v7799_v24 }
0x11d8   :  { %9892 = vmatprep.subr.bf16.mxu0 %v15920_v11 }
0x11db   :  { %9893 = vmatpush3.bf16.msra.mxu0 %v7798_v33 }
0x11dc   :  { %9894 = vmatprep.subr.bf16.mxu0 %v15920_v11 }
0x11df   :  { %9895 = vmatpush3.bf16.msra.mxu0 %v7797_v50 }
0x11e0   :  { %9896 = vmatprep.subr.bf16.mxu0 %v15920_v11 }
0x11e3   :  { %9897 = vmatpush3.bf16.msra.mxu0 %v7796_v37 }
0x121f   :  { %v7906_v38 = vpop.xlane.xlu0 %7905 }
0x1220   :  { %v7944_v19 = vsub.f32 %v15290_v30, %v7906_v38 }
0x1222   :  { %v7957_v63 = vmul.f32 1.442695, %v7944_v19 }
0x1223   :  { %v7909_v8 = vpop.xlane.xlu0 %7908 }
0x1224   :  { %10686 = vpow2.f32 %v7957_v63  ;;  %v7945_v45 = vsub.f32 %v15294_v61, %v7909_v8 }
0x1226   :  { %v7959_v56 = vmul.f32 1.442695, %v7945_v45 }
0x1227   :  { %v7912_v17 = vpop.xlane.xlu1 %7911 }
0x1228   :  { %10688 = vpow2.f32 %v7959_v56  ;;  %v7946_v28 = vsub.f32 %v15298_v13, %v7912_v17 }
0x122a   :  { %v7961_v46 = vmul.f32 1.442695, %v7946_v28 }
0x122b   :  { %v7915_v44 = vpop.xlane.xlu1 %7914 }
0x122c   :  { %10690 = vpow2.f32 %v7961_v46  ;;  %v7947_v62 = vsub.f32 %v15302_v14, %v7915_v44 }
0x122e   :  { %v7963_v23 = vmul.f32 1.442695, %v7947_v62 }
0x122f   :  { %v7918_v37 = vpop.xlane.xlu0 %7917 }
0x1230   :  { %10692 = vpow2.f32 %v7963_v23  ;;  %v7948_v30 = vsub.f32 %v15306_v3, %v7918_v37 }
0x1231   :  { %v15378_v20 = vpop.eup %10686 }
0x1232   :  { %v7965_v27 = vmul.f32 1.442695, %v7948_v30  ;;  %v7983_v61 = vsel %vm2685_vm2, %v15378_v20, 0.0 }
0x1233   :  { %v7921_v40 = vpop.xlane.xlu1 %7920  ;;  %7984 = vadd.xlane.f32.xlu1 %v7983_v61 }
0x1234   :  { %10694 = vpow2.f32 %v7965_v27  ;;  %v7949_v13 = vsub.f32 %v15310_v53, %v7921_v40 }
0x1235   :  { %v15383_v43 = vpop.eup %10688 }
0x1236   :  { %v7967_v31 = vmul.f32 1.442695, %v7949_v13  ;;  %v7986_v14 = vsel %vm2685_vm2, %v15383_v43, 0.0 }
0x1237   :  { %v7924_v60 = vpop.xlane.xlu0 %7923  ;;  %7987 = vadd.xlane.f32.xlu0 %v7986_v14 }
0x1238   :  { %10696 = vpow2.f32 %v7967_v31  ;;  %v7950_v3 = vsub.f32 %v15314_v55, %v7924_v60 }
0x1239   :  { %v15388_v25 = vpop.eup %10690 }
0x123a   :  { %v7969_v9 = vmul.f32 1.442695, %v7950_v3  ;;  %v7989_v47 = vsel %vm2685_vm2, %v15388_v25, 0.0 }
0x123b   :  { %v7927_v36 = vpop.xlane.xlu1 %7926  ;;  %7990 = vadd.xlane.f32.xlu1 %v7989_v47 }
0x123c   :  { %10698 = vpow2.f32 %v7969_v9  ;;  %v7951_v53 = vsub.f32 %v15318_v12, %v7927_v36 }
0x123d   :  { %v15393_v1 = vpop.eup %10692 }
0x123e   :  { %v7971_v59 = vmul.f32 1.442695, %v7951_v53  ;;  %v7992_v21 = vsel %vm2685_vm2, %v15393_v1, 0.0 }
0x123f   :  { %v7930_v4 = vpop.xlane.xlu0 %7929  ;;  %7993 = vadd.xlane.f32.xlu0 %v7992_v21 }
0x1240   :  { %10700 = vpow2.f32 %v7971_v59  ;;  %v7952_v55 = vsub.f32 %v15322_v10, %v7930_v4 }
0x1241   :  { %v15398_v32 = vpop.eup %10694 }
0x1242   :  { %v7973_v29 = vmul.f32 1.442695, %v7952_v55  ;;  %v7995_v6 = vsel %vm2685_vm2, %v15398_v32, 0.0 }
0x1243   :  { %v7933_v15 = vpop.xlane.xlu1 %7932  ;;  %7996 = vadd.xlane.f32.xlu1 %v7995_v6 }
0x1244   :  { %10702 = vpow2.f32 %v7973_v29  ;;  %v7953_v12 = vsub.f32 %v15326_v22, %v7933_v15 }
0x1245   :  { %v15403_v7 = vpop.eup %10696 }
0x1246   :  { %v7975_v49 = vmul.f32 1.442695, %v7953_v12  ;;  %v7998_v48 = vsel %vm2685_vm2, %v15403_v7, 0.0 }
0x1247   :  { %v7936_v18 = vpop.xlane.xlu0 %7935  ;;  %7999 = vadd.xlane.f32.xlu0 %v7998_v48 }
0x1248   :  { %10704 = vpow2.f32 %v7975_v49  ;;  %v7954_v10 = vsub.f32 %v15330_v0, %v7936_v18 }
0x1249   :  { %v15408_v51 = vpop.eup %10698 }
0x124a   :  { %v7977_v58 = vmul.f32 1.442695, %v7954_v10  ;;  %v8001_v54 = vsel %vm2685_vm2, %v15408_v51, 0.0 }
0x124b   :  { %8002 = vadd.xlane.f32.xlu1 %v8001_v54  ;;  %v7939_v26 = vpop.xlane.xlu1 %7938 }
0x124c   :  { %10706 = vpow2.f32 %v7977_v58  ;;  %v7955_v22 = vsub.f32 %v15342_v34, %v7939_v26 }
0x124d   :  { %v15413_v5 = vpop.eup %10700 }
0x124e   :  { %v7979_v41 = vmul.f32 1.442695, %v7955_v22  ;;  %v8004_v52 = vsel %vm2685_vm2, %v15413_v5, 0.0 }
0x124f   :  { %8005 = vadd.xlane.f32.xlu0 %v8004_v52  ;;  %v7943_v16 = vpop.xlane.xlu0 %7942 }
0x1250   :  { %10708 = vpow2.f32 %v7979_v41  ;;  %v7956_v0 = vsub.f32 %v15351_v42, %v7943_v16 }
0x1251   :  { %v15418_v39 = vpop.eup %10702 }
0x1252   :  { %v7981_v2 = vmul.f32 1.442695, %v7956_v0  ;;  %v8007_v24 = vsel %vm2685_vm2, %v15418_v39, 0.0 }
0x1253   :  { %8008 = vadd.xlane.f32.xlu1 %v8007_v24 }
0x1254   :  { %10710 = vpow2.f32 %v7981_v2 }
0x1255   :  { %v15422_v34 = vpop.eup %10704 }
0x1256   :  { %v8010_v57 = vsel %vm2685_vm2, %v15422_v34, 0.0 }
0x1257   :  { %8011 = vadd.xlane.f32.xlu0 %v8010_v57 }
0x1259   :  { %v15426_v35 = vpop.eup %10706 }
0x125a   :  { %v8013_v33 = vsel %vm2685_vm2, %v15426_v35, 0.0 }
0x125b   :  { %8014 = vadd.xlane.f32.xlu1 %v8013_v33 }
0x125d   :  { %v15430_v42 = vpop.eup %10708 }
0x125e   :  { %v8016_v50 = vsel %vm2685_vm2, %v15430_v42, 0.0 }
0x125f   :  { %8017 = vadd.xlane.f32.xlu0 %v8016_v50 }
0x1261   :  { %v15434_v38 = vpop.eup %10710 }
0x1262   :  { %v8019_v19 = vsel %vm7940_vm5, %v15434_v38, 0.0 }
0x1263   :  { %8020 = vadd.xlane.f32.xlu1 %v8019_v19 }
0x12bc   :  { %v7985_v63 = vpop.xlane.xlu1 %7984 }
0x12bd   :  { %10712 = vrcp.f32 %v7985_v63 }
0x12c0   :  { %v7988_v8 = vpop.xlane.xlu0 %7987 }
0x12c1   :  { %10714 = vrcp.f32 %v7988_v8 }
0x12c4   :  { %v7991_v45 = vpop.xlane.xlu1 %7990 }
0x12c5   :  { %10716 = vrcp.f32 %v7991_v45 }
0x12c8   :  { %v7994_v56 = vpop.xlane.xlu0 %7993 }
0x12c9   :  { %10718 = vrcp.f32 %v7994_v56 }
0x12ca   :  { %v10713_v17 = vpop.eup %10712 }
0x12cb   :  { %v8035_v44 = vmul.f32 %v10713_v17, %v15378_v20 }
0x12cc   :  { %v7997_v28 = vpop.xlane.xlu1 %7996 }
0x12cd   :  { %10720 = vrcp.f32 %v7997_v28 }
0x12ce   :  { %v10715_v46 = vpop.eup %10714 }
0x12cf   :  { %v8036_v62 = vmul.f32 %v10715_v46, %v15383_v43 }
0x12d0   :  { %v8000_v23 = vpop.xlane.xlu0 %7999 }
0x12d1   :  { %10722 = vrcp.f32 %v8000_v23  ;;  %v8048_v37 = vpack.c.bf16 %v8036_v62, %v8035_v44 }
0x12d2   :  { %v10717_v30 = vpop.eup %10716 }
0x12d3   :  { %9899 = vmatmul.mubr.msk.bf16.vlgmr.msra.gmra.mxu0 %vm2685_vm2, %v8048_v37  ;;  %v8037_v40 = vmul.f32 %v10717_v30, %v15388_v25 }
0x12d4   :  { %v8003_v27 = vpop.xlane.xlu1 %8002  ;;  %9902 = vmatprep.mubr.msk.bf16.mxu0 %vm10892_vm1, %v15920_v11 }
0x12d5   :  { %10724 = vrcp.f32 %v8003_v27 }
0x12d6   :  { %v10719_v61 = vpop.eup %10718 }
0x12d7   :  { %v8038_v13 = vmul.f32 %v10719_v61, %v15393_v1 }
0x12d8   :  { %v8006_v31 = vpop.xlane.xlu0 %8005 }
0x12d9   :  { %10726 = vrcp.f32 %v8006_v31  ;;  %v8049_v20 = vpack.c.bf16 %v8038_v13, %v8037_v40 }
0x12da   :  { %v10721_v43 = vpop.eup %10720 }
0x12db   :  { %9903 = vmatmul.mubr.msk.bf16.gmra.mxu0 %vm2685_vm2, %v8049_v20  ;;  %v8039_v3 = vmul.f32 %v10721_v43, %v15398_v32 }
0x12dc   :  { %v8009_v14 = vpop.xlane.xlu1 %8008  ;;  %9906 = vmatprep.mubr.msk.bf16.mxu0 %vm10892_vm1, %v15920_v11 }
0x12dd   :  { %10728 = vrcp.f32 %v8009_v14  ;;  %v8168_v14 = vld [vmem:[%s15515_s18] sm:$0x1] }
0x12de   :  { %v10723_v60 = vpop.eup %10722 }
0x12df   :  { %v8040_v9 = vmul.f32 %v10723_v60, %v15403_v7 }
0x12e0   :  { %v8012_v47 = vpop.xlane.xlu0 %8011 }
0x12e1   :  { %10730 = vrcp.f32 %v8012_v47  ;;  %v8050_v25 = vpack.c.bf16 %v8040_v9, %v8039_v3 }
0x12e2   :  { %v10725_v36 = vpop.eup %10724 }
0x12e3   :  { %9907 = vmatmul.mubr.msk.bf16.gmra.mxu0 %vm2685_vm2, %v8050_v25  ;;  %v8041_v59 = vmul.f32 %v10725_v36, %v15408_v51 }
0x12e4   :  { %v8015_v53 = vpop.xlane.xlu1 %8014  ;;  %9910 = vmatprep.mubr.msk.bf16.mxu0 %vm10892_vm1, %v15920_v11 }
0x12e5   :  { %10732 = vrcp.f32 %v8015_v53 }
0x12e6   :  { %v10727_v1 = vpop.eup %10726 }
0x12e7   :  { %v8042_v21 = vmul.f32 %v10727_v1, %v15413_v5 }
0x12e8   :  { %v8018_v4 = vpop.xlane.xlu0 %8017 }
0x12e9   :  { %10734 = vrcp.f32 %v8018_v4  ;;  %v8051_v55 = vpack.c.bf16 %v8042_v21, %v8041_v59 }
0x12ea   :  { %v10729_v32 = vpop.eup %10728 }
0x12eb   :  { %9911 = vmatmul.mubr.msk.bf16.gmra.mxu0 %vm2685_vm2, %v8051_v55  ;;  %v8043_v15 = vmul.f32 %v10729_v32, %v15418_v39 }
0x12ec   :  { %v8021_v29 = vpop.xlane.xlu1 %8020  ;;  %9914 = vmatprep.mubr.msk.bf16.mxu0 %vm10892_vm1, %v15920_v11 }
0x12ed   :  { %10736 = vrcp.f32 %v8021_v29 }
0x12ee   :  { %v10731_v6 = vpop.eup %10730 }
0x12ef   :  { %v8044_v12 = vmul.f32 %v10731_v6, %v15422_v34 }
0x12f1   :  { %v8052_v7 = vpack.c.bf16 %v8044_v12, %v8043_v15 }
0x12f2   :  { %v10733_v49 = vpop.eup %10732 }
0x12f3   :  { %9915 = vmatmul.mubr.msk.bf16.gmra.mxu0 %vm2685_vm2, %v8052_v7  ;;  %v8045_v18 = vmul.f32 %v10733_v49, %v15426_v35 }
0x12f4   :  { %9918 = vmatprep.mubr.msk.bf16.mxu0 %vm10892_vm1, %v15920_v11 }
0x12f6   :  { %v10735_v48 = vpop.eup %10734 }
0x12f7   :  { %v8046_v10 = vmul.f32 %v10735_v48, %v15430_v42 }
0x12f9   :  { %v8053_v51 = vpack.c.bf16 %v8046_v10, %v8045_v18 }
0x12fa   :  { %v10737_v58 = vpop.eup %10736 }
0x12fb   :  { %9919 = vmatmul.mubr.msk.bf16.gmra.mxu0 %vm2685_vm2, %v8053_v51  ;;  %v8047_v54 = vmul.f32 %v10737_v58, %v15434_v38 }
0x12fc   :  { %9922 = vmatprep.mubr.msk.bf16.mxu0 %vm10892_vm1, %v15920_v11 }
0x12fd   :  { %v8054_v26 = vpack.c.bf16 %v8047_v54, %v8047_v54 }
0x1303   :  { %9923 = vmatmul.mubr.msk.bf16.gmra.mxu0 %vm2685_vm2, %v8054_v26 }
0x1393   :  { %v8114_v22 = vpop.f32.mrf.mxu0 }
0x1395   :  { %v9900_v5 = vpop.f32.mrf.mxu0 }
0x1397   :  { %v8117_v41 = vpop.f32.mrf.mxu0 }
0x1398   :  { %v8169_v52 = vpack.c.bf16 %v8117_v41, %v8114_v22 }
0x1399   :  { %v9901_v16 = vpop.f32.mrf.mxu0 }
0x139b   :  { %v8122_v0 = vpop.f32.mrf.mxu0 }
0x139d   :  { %v9904_v39 = vpop.f32.mrf.mxu0 }
0x139f   :  { %v8125_v2 = vpop.f32.mrf.mxu0 }
0x13a0   :  { %v8170_v43 = vpack.c.bf16 %v8125_v2, %v8122_v0 }
0x13a1   :  { %v9905_v24 = vpop.f32.mrf.mxu0 }
0x13a3   :  { %v8130_v34 = vpop.f32.mrf.mxu0 }
0x13a5   :  { %v9908_v57 = vpop.f32.mrf.mxu0 }
0x13a7   :  { %v8133_v35 = vpop.f32.mrf.mxu0 }
0x13a8   :  { %v8171_v20 = vpack.c.bf16 %v8133_v35, %v8130_v34 }
0x13a9   :  { %v9909_v33 = vpop.f32.mrf.mxu0 }
0x13ab   :  { %v8138_v42 = vpop.f32.mrf.mxu0 }
0x13ad   :  { %v9912_v50 = vpop.f32.mrf.mxu0 }
0x13af   :  { %v8141_v19 = vpop.f32.mrf.mxu0 }
0x13b0   :  { %v8172_v31 = vpack.c.bf16 %v8141_v19, %v8138_v42 }
0x13b1   :  { %v9913_v38 = vpop.f32.mrf.mxu0 }
0x13b3   :  { %v8146_v63 = vpop.f32.mrf.mxu0 }
0x13b5   :  { %v9916_v8 = vpop.f32.mrf.mxu0 }
0x13b7   :  { %v8149_v45 = vpop.f32.mrf.mxu0 }
0x13b8   :  { %v8173_v13 = vpack.c.bf16 %v8149_v45, %v8146_v63 }
0x13b9   :  { %v9917_v56 = vpop.f32.mrf.mxu0 }
0x13bb   :  { %v8154_v17 = vpop.f32.mrf.mxu0 }
0x13bd   :  { %v9920_v28 = vpop.f32.mrf.mxu0 }
0x13bf   :  { %v8157_v46 = vpop.f32.mrf.mxu0 }
0x13c0   :  { %v8174_v61 = vpack.c.bf16 %v8157_v46, %v8154_v17 }
0x13c1   :  { %v9921_v44 = vpop.f32.mrf.mxu0 }
0x13c3   :  { %v8162_v62 = vpop.f32.mrf.mxu0 }
0x13c4   :  { %v8175_v23 = vpack.c.bf16 %v8162_v62, %v8162_v62 }
0x13c5   :  { %v9924_v37 = vpop.f32.mrf.mxu0 }
0x13c6   :  { %v8180_v30 = vsel %vm8076_vm6, %v8175_v23, 0 }
0x13c7   :  { %v8165_v27 = vpop.f32.mrf.mxu0  ;;  %9927 = vmatpush3.bf16.msra.mxu1 %v8180_v30 }
0x13c8   :  { %9928 = vmatprep.subr.bf16.mxu1 %v15920_v11 }
0x13c9   :  { %v9925_v40 = vpop.f32.mrf.mxu0 }
0x13cb   :  { %9929 = vmatpush3.bf16.msra.mxu1 %v8174_v61 }
0x13cc   :  { %9930 = vmatprep.subr.bf16.mxu1 %v15920_v11 }
0x13cf   :  { %9931 = vmatpush3.bf16.msra.mxu1 %v8173_v13 }
0x13d0   :  { %9932 = vmatprep.subr.bf16.mxu1 %v15920_v11 }
0x13d3   :  { %9933 = vmatpush3.bf16.msra.mxu1 %v8172_v31 }
0x13d4   :  { %9934 = vmatprep.subr.bf16.mxu1 %v15920_v11 }
0x13d7   :  { %9935 = vmatpush3.bf16.msra.mxu1 %v8171_v20 }
0x13d8   :  { %9936 = vmatprep.subr.bf16.mxu1 %v15920_v11 }
0x13db   :  { %9937 = vmatpush3.bf16.msra.mxu1 %v8170_v43 }
0x13dc   :  { %9938 = vmatprep.subr.bf16.mxu1 %v15920_v11 }
0x13df   :  { %9939 = vmatpush3.bf16.msra.mxu1 %v8169_v52 }
0x13e2   :  { %9941 = vmatmul.mubr.msk.bf16.vlgmr.msra.gmra.mxu1 %vm2685_vm2, %v8168_v14 }
0x14a2   :  { %v8216_v60 = vpop.f32.mrf.mxu1 }
0x14a3   :  { %v8222_v3 = vmul.f32 0.02, %v8216_v60 }
0x14a4   :  { %v9942_v9 = vpop.f32.mrf.mxu1 }
0x14a6   :  { %v8219_v47 = vpop.f32.mrf.mxu1 }
0x14a8   :  { %v9943_v25 = vpop.f32.mrf.mxu1 }
0x14a9   :  { %10880 = dma.done.wait [#allocation7 + $0x4], 1024 }
0x14aa   :  { %10881 = vsyncadd [#allocation7 + $0x4], 4294966272  ;;  %9944 = vmatprep.subr.bf16.mxu0 %v15920_v11  ;;  %9960 = vmatprep.mubr.msk.bf16.mxu0 %vm10892_vm1, %v15920_v11  ;;  %v10738_v36 = vld [vmem:[#allocation6 + $0x38] sm:$0xff]   ;;  %v10739_v53 = vld [vmem:[#allocation6 + $0x30] sm:$0xff]   ;;  %v8225_v29 = vpack.c.bf16 %v8222_v3, %v8222_v3  ;;  %s10896_s7 = smov [#allocation14]  }
0x14ab   :  { %9945 = vmatpush3.bf16.msra.mxu0 %v10738_v36  ;;  %v10740_v1 = vld [vmem:[#allocation6 + $0x28] sm:$0xff]   ;;  %v10741_v59 = vld [vmem:[#allocation6 + $0x20] sm:$0xff]   ;;  %v10742_v21 = vld [vmem:[#allocation6 + $0x18] sm:$0xff]   ;;  %s8353_s3 = sshll.u32 %s10896_s7, 4  ;;  %s8354_s3 = int_to_ptr.vmem [resolvable:$true] %s8353_s3 }
0x14ac   :  { %9946 = vmatprep.subr.bf16.mxu0 %v15920_v11  ;;  %v10743_v4 = vld [vmem:[#allocation6 + $0x10] sm:$0xff]   ;;  %v10744_v55 = vld [vmem:[#allocation6 + $0x8] sm:$0xff]   ;;  %v10745_v32 = vld [vmem:[#allocation6] sm:$0xff]   ;;  %p10853_p12 = scmp.lt.s32.totalorder %s8354_s3, %s8354_s3 }
0x14ad   :  { %v8891_v6 = vld [vmem:[%s15512_s15] ss:$0 sm:$0xff]  ;;  %s10848_s15 = scalar_lea.vmem %s8354_s3, 32 }
0x14ae   :  { %p10849_p11 = scmp.ne.s32.totalorder %s8354_s3, %s10848_s15  ;;  %p10854_p13 = scmp.lt.s32.totalorder %s10848_s15, %s10848_s15 }
0x14af   :  { %9947 = vmatpush3.bf16.msra.mxu0 %v10739_v53 }
0x14b0   :  { %9948 = vmatprep.subr.bf16.mxu0 %v15920_v11  ;;  %p10855_p0 = por %p10854_p13, %p10853_p12 }
0x14b2   :  { %p10856_p1 = pnand %p10855_p0, %p10849_p11 }
0x14b3   :  { %9949 = vmatpush3.bf16.msra.mxu0 %v10740_v1 }
0x14b4   :  { %9950 = vmatprep.subr.bf16.mxu0 %v15920_v11 }
0x14b7   :  { %9951 = vmatpush3.bf16.msra.mxu0 %v10741_v59 }
0x14b8   :  { %9952 = vmatprep.subr.bf16.mxu0 %v15920_v11 }
0x14bb   :  { %9953 = vmatpush3.bf16.msra.mxu0 %v10742_v21 }
0x14bc   :  { %9954 = vmatprep.subr.bf16.mxu0 %v15920_v11 }
0x14bf   :  { %9955 = vmatpush3.bf16.msra.mxu0 %v10743_v4 }
0x14c0   :  { %9956 = vmatprep.subr.bf16.mxu0 %v15920_v11 }
0x14c3   :  { %9957 = vmatpush3.bf16.msra.mxu0 %v10744_v55 }
0x14c4   :  { %9958 = vmatprep.subr.bf16.mxu0 %v15920_v11 }
0x14c7   :  { %9959 = vmatpush3.bf16.msra.mxu0 %v10745_v32 }
0x14ca   :  { %9961 = vmatmul.mubr.bf16.vlgmr.msra.gmra.mxu0 %v8225_v29 }
0x158a   :  { %v8331_v15 = vpop.f32.mrf.mxu0 }
0x158b   :  { %v8332_v12 = vadd.f32 %v8891_v6, %v8331_v15 }
0x158c   :  { %v9962_v7 = vpop.f32.mrf.mxu0 }
0x158d   :  { %v8337_v49 = vmul.f32 %v8332_v12, %v8332_v12 }
0x158e   :  { %v8334_v48 = vpop.f32.mrf.mxu0 }
0x158f   :  { %v8338_v18 = vmul.f32 %v8337_v49, %v8332_v12 }
0x1590   :  { %v9963_v10 = vpop.f32.mrf.mxu0 }
0x1591   :  { %v8339_v51 = vmul.f32 0.044715, %v8338_v18 }
0x1593   :  { %v8340_v58 = vadd.f32 %v8339_v51, %v8332_v12 }
0x1595   :  { %v8341_v54 = vmul.f32 0.7978846, %v8340_v58 }
0x1597   :  { %10746 = vtanh.f32 %v8341_v54 }
0x15a4   :  { %v10747_v26 = vpop.eup %10746 }
0x15a5   :  { %v8343_v11 = vadd.f32 1.0, %v10747_v26 }
0x15a7   :  { %v8344_v22 = vmul.f32 0.5, %v8343_v11 }
0x15a9   :  { %v8345_v5 = vmul.f32 %v8344_v22, %v8332_v12 }
0x15ab   :  { %8346 = vst [vmem:[#allocation14] sm:$0x3] %v8345_v5 }
0x15ac   :  { %10859 = shalt.err (!%p10856_p1)
}
0x15ad   :  { %8356 = dma.vmem_to_hbm [thread:$0]  %s8354_s3, 32, %s15521_s24, [#allocation10]  }
0x15ae   :  { %10882 = dma.done.wait [#allocation10], 32  }
0x15af   :  { %10883 = vsyncadd [#allocation10], 4294967264 }
0x15b0   :  { %8360 = vsyncpa [#allocation9], 1 }
0x15b1   :  { %8361 = vsyncpa [#allocation12], 1 }
0x15b2   :  { %8362 = vsyncpa [#allocation10], 1 }
0x15b3   :  { %8363 = vsyncmov [#allocation7] }
0x15b6   :  { %s8364_s30 = vpop.sfrf %8363 }
0x15b7   :  { %p8900_p2 = scmp.ne.s32.totalorder %s8364_s30, 0 }
0x15b9   :  { %8368 = shalt.err (%p8900_p2)  }
0x15ba   :  { %8370 = vsyncmov [#allocation7 + $0x1] }
0x15bd   :  { %s8371_s17 = vpop.sfrf %8370 }
0x15be   :  { %p8901_p3 = scmp.ne.s32.totalorder %s8371_s17, 0 }
0x15c0   :  { %8375 = shalt.err (%p8901_p3)  }
0x15c1   :  { %8377 = vsyncmov [#allocation7 + $0x2] }
0x15c4   :  { %s8378_s29 = vpop.sfrf %8377 }
0x15c5   :  { %p8902_p4 = scmp.ne.s32.totalorder %s8378_s29, 0 }
0x15c7   :  { %8382 = shalt.err (%p8902_p4)  }
0x15c8   :  { %8384 = vsyncmov [#allocation7 + $0x3] }
0x15cb   :  { %s8385_s28 = vpop.sfrf %8384 }
0x15cc   :  { %p8903_p5 = scmp.ne.s32.totalorder %s8385_s28, 0 }
0x15ce   :  { %8389 = shalt.err (%p8903_p5)  }
0x15cf   :  { %8391 = vsyncmov [#allocation7 + $0x4] }
0x15d2   :  { %s8392_s24 = vpop.sfrf %8391 }
0x15d3   :  { %p8904_p6 = scmp.ne.s32.totalorder %s8392_s24, 0 }
0x15d5   :  { %8396 = shalt.err (%p8904_p6)  }

</bundles_post_ra>
